<compile_context>
chip_gen: v5e
topology: v5e:2x2
jax: 0.10.0
libtpu: 0.0.40
codegen_flags: <defaults>
</compile_context>

<pallas_src>
import functools

import numpy as np

import jax
import jax.numpy as jnp
from jax.experimental import pallas as pl
from jax.experimental.pallas import tpu as pltpu


# ------------------------------ Pallas kernels ------------------------------

def _conv1_pool_kernel(pm_ref, w_ref, bgb_ref, o_ref,
                       s1_ref, s2_ref, ymax_ref, ymin_ref,
                       *, n, bh, bw, cout, p_chunk):
    """Fused conv1 + bias + LeakyReLU(0.2) + BatchNorm2d(train, eps=0.8)
    + MaxPool2d(8, 4).

    pm_ref  : (p_chunk, M, K) im2col patches for p_chunk of the 16 positions
              inside a 4x4 block of conv outputs; M = N*BH*BW rows ordered
              (n, block_row, block_col), K = 8*8*Cin.
    w_ref   : (K, cout) conv weight as a matmul matrix.
    bgb_ref : (3, cout) rows = conv bias, BN gamma, BN beta.
    o_ref   : (n, bh-1, bw-1, cout) pooled output (written on the last step).
    scratch : s1/s2 (1, cout) running sum / sum-of-squares,
              ymax/ymin (M, cout) running per-(block, channel) extrema.
    """
    step = pl.program_id(0)
    m_blocks = n * bh * bw
    m_total = 16 * m_blocks                       # = N * Ho * Wo conv outputs

    @pl.when(step == 0)
    def _():
        s1_ref[...] = jnp.zeros_like(s1_ref)
        s2_ref[...] = jnp.zeros_like(s2_ref)
        ymax_ref[...] = jnp.full(ymax_ref.shape, -jnp.inf, jnp.float32)
        ymin_ref[...] = jnp.full(ymin_ref.shape, jnp.inf, jnp.float32)

    w = w_ref[...]
    bias = bgb_ref[0:1, :]
    for q in range(p_chunk):                      # unrolled: (M, K) @ (K, cout)
        yp = jnp.dot(pm_ref[q], w, preferred_element_type=jnp.float32) + bias
        yp = jnp.where(yp > 0, yp, 0.2 * yp)      # LeakyReLU(0.2)
        s1_ref[...] += jnp.sum(yp, axis=0, keepdims=True)
        s2_ref[...] += jnp.sum(yp * yp, axis=0, keepdims=True)
        ymax_ref[...] = jnp.maximum(ymax_ref[...], yp)
        ymin_ref[...] = jnp.minimum(ymin_ref[...], yp)

    @pl.when(step == pl.num_programs(0) - 1)
    def _():
        mean = s1_ref[...] / m_total              # stats over N*Ho*Wo
        var = s2_ref[...] / m_total - mean * mean   # one-pass var (eps=0.8 >> cancellation)
        scale = bgb_ref[1:2, :] * jax.lax.rsqrt(var + 0.8)
        shift = bgb_ref[2:3, :] - mean * scale
        # max over the 16 in-block positions of (y*scale + shift): per channel
        # take the max or min of y depending on sign(scale) -> exact BN-then-pool.
        blk = jnp.where(scale >= 0, ymax_ref[...], ymin_ref[...]) * scale + shift
        # 8x8 / stride-4 maxpool == max over a 2x2 neighbourhood of 4x4 block maxima.
        for nn in range(n):
            for ph in range(bh - 1):
                base = (nn * bh + ph) * bw
                r01 = jnp.maximum(blk[base:base + bw, :],
                                  blk[base + bw:base + 2 * bw, :])
                o_ref[nn, ph, :, :] = jnp.maximum(r01[0:bw - 1, :], r01[1:bw, :])


def _tail_kernel(pm2_ref, w2_ref, wsm_ref, bv_ref, fc2_ref, o_ref, *, n):
    """conv2+LReLU+BN2+MaxPool(4,2) -> conv3+LReLU+BN3 -> ReLU -> fc1 -> ReLU
    -> fc2 -> softmax(dim=1), fully fused.

    pm2_ref: (N*4*6, 512) conv2 im2col patches, rows in (n, h, w) raster order.
    w2_ref : (512, 64) conv2 weight as matmul matrix.
    wsm_ref: (5, 64, 64) = [conv3 taps kw=0..2 at kh=1, fc1 split w=0, fc1 split w=1].
    bv_ref : (7, 64)    = [conv2 b, bn2 g, bn2 b, conv3 b, bn3 g, bn3 b, fc1 b].
    fc2_ref: (65, A)    = [fc2 weight (64, A); fc2 bias (1, A)].
    o_ref  : (N, A) action probabilities.
    """
    # ---- conv2 (4x4, s2, p1) + bias + LeakyReLU + BatchNorm(train) ----------
    y2 = jnp.dot(pm2_ref[...], w2_ref[...], preferred_element_type=jnp.float32)
    y2 = y2 + bv_ref[0:1, :]
    y2 = jnp.where(y2 > 0, y2, 0.2 * y2)
    m2 = jnp.mean(y2, axis=0, keepdims=True)
    v2 = jnp.mean(y2 * y2, axis=0, keepdims=True) - m2 * m2
    y2 = (y2 - m2) * (bv_ref[1:2, :] * jax.lax.rsqrt(v2 + 0.8)) + bv_ref[2:3, :]

    # ---- MaxPool2d(4, 2): the conv2 map is (4, 6) per image -> 2 pooled pixels.
    p0_rows, p1_rows = [], []
    for nn in range(n):
        slab = y2[nn * 24:(nn + 1) * 24, :]           # (24, 64), (h, w) raster
        w0 = slab[0:4, :]                             # cols 0..3 at h = 0
        w1 = slab[2:6, :]                             # cols 2..5 at h = 0
        for h in range(1, 4):
            w0 = jnp.maximum(w0, slab[6 * h:6 * h + 4, :])
            w1 = jnp.maximum(w1, slab[6 * h + 2:6 * h + 6, :])
        p0_rows.append(jnp.max(w0, axis=0, keepdims=True))
        p1_rows.append(jnp.max(w1, axis=0, keepdims=True))
    p0 = jnp.concatenate(p0_rows, axis=0)             # (N, 64) pooled (h=0, w=0)
    p1 = jnp.concatenate(p1_rows, axis=0)             # (N, 64) pooled (h=0, w=1)

    # ---- conv3 (3x3, s1, p1) on the (N, 1, 2, 64) pooled map: only kernel
    #      row kh=1 ever sees real data; the kw taps are shifted / zero-padded
    #      columns.  Rows of y3 are ordered (w_out, n).
    z = jnp.zeros_like(p0)
    x_l = jnp.concatenate([z, p0], axis=0)            # input column w_out - 1
    x_c = jnp.concatenate([p0, p1], axis=0)           # input column w_out
    x_r = jnp.concatenate([p1, z], axis=0)            # input column w_out + 1
    y3 = (jnp.dot(x_l, wsm_ref[0], preferred_element_type=jnp.float32)
          + jnp.dot(x_c, wsm_ref[1], preferred_element_type=jnp.float32)
          + jnp.dot(x_r, wsm_ref[2], preferred_element_type=jnp.float32))
    y3 = y3 + bv_ref[3:4, :]
    y3 = jnp.where(y3 > 0, y3, 0.2 * y3)
    m3 = jnp.mean(y3, axis=0, keepdims=True)
    v3 = jnp.mean(y3 * y3, axis=0, keepdims=True) - m3 * m3
    y3 = (y3 - m3) * (bv_ref[4:5, :] * jax.lax.rsqrt(v3 + 0.8)) + bv_ref[5:6, :]

    # ---- head: ReLU -> fc1 -> ReLU -> fc2 -> softmax(dim=1).  The PyTorch
    #      NCHW flatten (idx = 2*c + w) is absorbed into the w-major split of
    #      the fc1 weight, so no in-kernel transpose is needed.
    y3 = jnp.maximum(y3, 0.0)
    h = (jnp.dot(y3[0:n, :], wsm_ref[3], preferred_element_type=jnp.float32)
         + jnp.dot(y3[n:2 * n, :], wsm_ref[4], preferred_element_type=jnp.float32)
         + bv_ref[6:7, :])
    h = jnp.maximum(h, 0.0)
    logits = (jnp.dot(h, fc2_ref[0:64, :], preferred_element_type=jnp.float32)
              + fc2_ref[64:65, :])
    mx = jnp.max(logits, axis=1, keepdims=True)
    e = jnp.exp(logits - mx)
    o_ref[...] = e / jnp.sum(e, axis=1, keepdims=True)


# ------------------------------- JAX glue ------------------------------------

def _im2col(x, k, stride, pad):
    """x: (N, H, W, C) -> (N, Ho, Wo, k*k*C) patches, columns ordered (ki, kj, ci)."""
    n, h, w, c = x.shape
    if pad:
        x = jnp.pad(x, ((0, 0), (pad, pad), (pad, pad), (0, 0)))
    ho = (h + 2 * pad - k) // stride + 1
    wo = (w + 2 * pad - k) // stride + 1
    cols = []
    for ki in range(k):
        for kj in range(k):
            cols.append(x[:, ki:ki + stride * ho:stride, kj:kj + stride * wo:stride, :])
    return jnp.stack(cols, axis=3).reshape(n, ho, wo, k * k * c), ho, wo


def _conv1_block(x_nhwc, p):
    """conv1 + LeakyReLU + BN + MaxPool(8, 4) via one fused Pallas kernel."""
    n = x_nhwc.shape[0]
    cout = p['conv1_w'].shape[0]
    pm, ho, wo = _im2col(x_nhwc, 8, 4, 1)                 # (N, 36, 52, 256)
    k1 = pm.shape[-1]
    bh, bw = ho // 4, wo // 4                             # 4x4 blocks of conv outputs
    assert ho == 4 * bh and wo == 4 * bw, (ho, wo)
    # rows -> (position-in-block, n*bh*bw) so the stride-4 pool needs no strided
    # access inside the kernel.
    pm = pm.reshape(n, bh, 4, bw, 4, k1).transpose(2, 4, 0, 1, 3, 5)
    pm = pm.reshape(16, n * bh * bw, k1)
    wm = jnp.transpose(p['conv1_w'], (2, 3, 1, 0)).reshape(k1, cout)
    bgb = jnp.stack([p['conv1_b'], p['bn1_g'], p['bn1_b']], axis=0)

    p_chunk = 4
    m_blocks = n * bh * bw
    kern = functools.partial(_conv1_pool_kernel, n=n, bh=bh, bw=bw,
                             cout=cout, p_chunk=p_chunk)
    return pl.pallas_call(
        kern,
        out_shape=jax.ShapeDtypeStruct((n, bh - 1, bw - 1, cout), jnp.float32),
        grid=(16 // p_chunk,),
        in_specs=[
            pl.BlockSpec((p_chunk, m_blocks, k1), lambda i: (i, 0, 0)),
            pl.BlockSpec((k1, cout), lambda i: (0, 0)),
            pl.BlockSpec((3, cout), lambda i: (0, 0)),
        ],
        out_specs=pl.BlockSpec((n, bh - 1, bw - 1, cout), lambda i: (0, 0, 0, 0)),
        scratch_shapes=[
            pltpu.VMEM((1, cout), jnp.float32),
            pltpu.VMEM((1, cout), jnp.float32),
            pltpu.VMEM((m_blocks, cout), jnp.float32),
            pltpu.VMEM((m_blocks, cout), jnp.float32),
        ],
        compiler_params=pltpu.CompilerParams(dimension_semantics=("arbitrary",)),
    )(pm, wm, bgb)


def _tail(y1, p):
    """conv2 block + conv3 block + fc head, fused in a single Pallas kernel."""
    n = y1.shape[0]
    pm2, ho2, wo2 = _im2col(y1, 4, 2, 1)                  # (N, 4, 6, 512)
    assert (ho2, wo2) == (4, 6), (ho2, wo2)               # MaxPool(4,2) -> (1, 2)
    k2 = pm2.shape[-1]
    pm2 = pm2.reshape(n * ho2 * wo2, k2)
    w2m = jnp.transpose(p['conv2_w'], (2, 3, 1, 0)).reshape(k2, 64)
    # conv3 is 3x3 / pad 1 on a 1x2 map: only kernel row kh=1 ever touches data.
    w3taps = jnp.transpose(p['conv3_w'][:, :, 1, :], (2, 1, 0))       # (3, 64, 64)
    # PyTorch NCHW flatten (idx = 2*c + w) folded into a w-major fc1 split.
    wsm = jnp.concatenate([w3taps,
                           p['fc1_w'][0::2][None, :, :],
                           p['fc1_w'][1::2][None, :, :]], axis=0)     # (5, 64, 64)
    bv = jnp.stack([p['conv2_b'], p['bn2_g'], p['bn2_b'],
                    p['conv3_b'], p['bn3_g'], p['bn3_b'], p['fc1_b']], axis=0)
    fc2p = jnp.concatenate([p['fc2_w'], p['fc2_b'][None, :]], axis=0)  # (65, A)
    a = fc2p.shape[1]

    def _fs(shape):
        return pl.BlockSpec(shape, lambda i: (0,) * len(shape))

    return pl.pallas_call(
        functools.partial(_tail_kernel, n=n),
        out_shape=jax.ShapeDtypeStruct((n, a), jnp.float32),
        grid=(1,),
        in_specs=[_fs(pm2.shape), _fs(w2m.shape), _fs(wsm.shape),
                  _fs(bv.shape), _fs(fc2p.shape)],
        out_specs=_fs((n, a)),
    )(pm2, w2m, wsm, bv, fc2p)


def policy_net_forward(x_nchw, p):
    x = jnp.transpose(x_nchw, (0, 2, 3, 1)).astype(jnp.float32)   # NCHW -> NHWC
    y1 = _conv1_block(x, p)                                       # (N, 8, 12, 32)
    return _tail(y1, p)                                           # (N, action_num)


# ------------------------------ parameters -----------------------------------

def init_params(key, state_dim, action_num):
    ks = jax.random.split(key, 16)

    def _w(k, shape, fan_in):
        return jax.random.normal(k, shape, jnp.float32) / jnp.sqrt(float(fan_in))

    return {
        'conv1_w': _w(ks[0], (32, state_dim, 8, 8), state_dim * 64),
        'conv1_b': 0.05 * jax.random.normal(ks[1], (32,), jnp.float32),
        'bn1_g': 1.0 + 0.1 * jax.random.normal(ks[2], (32,), jnp.float32),
        'bn1_b': 0.1 * jax.random.normal(ks[3], (32,), jnp.float32),
        'conv2_w': _w(ks[4], (64, 32, 4, 4), 32 * 16),
        'conv2_b': 0.05 * jax.random.normal(ks[5], (64,), jnp.float32),
        'bn2_g': 1.0 + 0.1 * jax.random.normal(ks[6], (64,), jnp.float32),
        'bn2_b': 0.1 * jax.random.normal(ks[7], (64,), jnp.float32),
        'conv3_w': _w(ks[8], (64, 64, 3, 3), 64 * 9),
        'conv3_b': 0.05 * jax.random.normal(ks[9], (64,), jnp.float32),
        'bn3_g': 1.0 + 0.1 * jax.random.normal(ks[10], (64,), jnp.float32),
        'bn3_b': 0.1 * jax.random.normal(ks[11], (64,), jnp.float32),
        'fc1_w': _w(ks[12], (64 * 1 * 2, 64), 128),       # (in, out)
        'fc1_b': 0.05 * jax.random.normal(ks[13], (64,), jnp.float32),
        'fc2_w': _w(ks[14], (64, action_num), 64),        # (in, out)
        'fc2_b': 0.05 * jax.random.normal(ks[15], (action_num,), jnp.float32),
    }


# ---------------------------- pure-JAX reference -----------------------------

def _reference_forward(x_nchw, p):
    hi = jax.lax.Precision.HIGHEST
    dn = ('NCHW', 'OIHW', 'NCHW')

    def block(x, w, b, g, beta, stride, pad, pk=None, ps=None):
        y = jax.lax.conv_general_dilated(x, w, (stride, stride),
                                         [(pad, pad), (pad, pad)],
                                         dimension_numbers=dn, precision=hi)
        y = y + b.reshape(1, -1, 1, 1)
        y = jnp.where(y > 0, y, 0.2 * y)
        mean = jnp.mean(y, axis=(0, 2, 3), keepdims=True)
        var = jnp.mean(jnp.square(y - mean), axis=(0, 2, 3), keepdims=True)
        y = (y - mean) * jax.lax.rsqrt(var + 0.8)
        y = y * g.reshape(1, -1, 1, 1) + beta.reshape(1, -1, 1, 1)
        if pk is not None:
            y = jax.lax.reduce_window(y, -jnp.inf, jax.lax.max,
                                      (1, 1, pk, pk), (1, 1, ps, ps), 'VALID')
        return y

    y = block(x_nchw, p['conv1_w'], p['conv1_b'], p['bn1_g'], p['bn1_b'], 4, 1, 8, 4)
    y = block(y, p['conv2_w'], p['conv2_b'], p['bn2_g'], p['bn2_b'], 2, 1, 4, 2)
    y = block(y, p['conv3_w'], p['conv3_b'], p['bn3_g'], p['bn3_b'], 1, 1)
    y = jnp.maximum(y, 0.0)
    flat = y.reshape(y.shape[0], -1)
    h = jnp.maximum(jnp.dot(flat, p['fc1_w'], precision=hi) + p['fc1_b'], 0.0)
    logits = jnp.dot(h, p['fc2_w'], precision=hi) + p['fc2_b']
    return jax.nn.softmax(logits, axis=1)


# ----------------------------------- main -------------------------------------

if __name__ == "__main__":
    state_dim, action_num = 4, 6
    # Spatial size whose conv/pool pyramid yields the 64*1*2 fc1 input.
    N, H, W = 2, 146, 210

    key = jax.random.PRNGKey(0)
    params = init_params(key, state_dim, action_num)
    x = jax.random.normal(jax.random.fold_in(key, 123),
                          (N, state_dim, H, W), jnp.float32)

    # TODO(synk): BatchNorm running-stat (momentum) buffer updates are a
    # training-time side effect and are not reproduced; they do not affect the
    # returned action probabilities.

    fwd = jax.jit(policy_net_forward)
    probs = jax.block_until_ready(fwd(x, params))
    assert probs.shape == (N, action_num)

    ref = jax.block_until_ready(_reference_forward(x, params))
    max_err = float(np.max(np.abs(np.asarray(probs) - np.asarray(ref))))
    assert np.allclose(np.asarray(probs), np.asarray(ref), atol=1e-2), max_err
    assert np.allclose(np.asarray(probs).sum(axis=1), 1.0, atol=1e-4)

    print("KERNEL_OK")
</pallas_src>

<mosaic_0001>
module attributes {stable_mosaic.version = 11 : i64} {
  func.func @_conv1_pool_kernel(%arg0: i32, %arg1: memref<4x234x256xf32, #tpu.memory_space<vmem>>, %arg2: memref<256x32xf32, #tpu.memory_space<vmem>>, %arg3: memref<3x32xf32, #tpu.memory_space<vmem>>, %arg4: memref<2x8x12x32xf32, #tpu.memory_space<vmem>>, %arg5: memref<1x32xf32, #tpu.memory_space<vmem>>, %arg6: memref<1x32xf32, #tpu.memory_space<vmem>>, %arg7: memref<234x32xf32, #tpu.memory_space<vmem>>, %arg8: memref<234x32xf32, #tpu.memory_space<vmem>>) attributes {dimension_semantics = [#tpu.dimension_semantics<arbitrary>], iteration_bounds = array<i64: 4>, scalar_prefetch = 0 : i64, scratch_operands = 4 : i64, tpu.core_type = #tpu.core_type<tc>, window_params = [{transform_indices = @transform_0, window_bounds = array<i64: 4, 234, 256>}, {pipeline_mode = #tpu.pipeline_mode<synchronous>, transform_indices = @transform_1, window_bounds = array<i64: 256, 32>}, {pipeline_mode = #tpu.pipeline_mode<synchronous>, transform_indices = @transform_2, window_bounds = array<i64: 3, 32>}, {pipeline_mode = #tpu.pipeline_mode<synchronous>, transform_indices = @transform_3, window_bounds = array<i64: 2, 8, 12, 32>}]} {
    %c0_i32 = arith.constant 0 : i32
    %0 = arith.cmpi eq, %arg0, %c0_i32 : i32
    %1 = arith.extui %0 : i1 to i32
    %c0_i32_0 = arith.constant 0 : i32
    %2 = arith.cmpi ne, %1, %c0_i32_0 : i32
    scf.if %2 {
      %cst_97 = arith.constant 0.000000e+00 : f32
      %116 = vector.broadcast %cst_97 : f32 to vector<1x32xf32>
      %c0_98 = arith.constant 0 : index
      %c0_99 = arith.constant 0 : index
      %117 = vector.load %arg5[%c0_98, %c0_99] : memref<1x32xf32, #tpu.memory_space<vmem>>, vector<1x32xf32>
      tpu.vector_store %arg5[%c0_98, %c0_99], %116 {strides = array<i32>} : memref<1x32xf32, #tpu.memory_space<vmem>>, vector<1x32xf32>,
      %cst_100 = arith.constant 0.000000e+00 : f32
      %118 = vector.broadcast %cst_100 : f32 to vector<1x32xf32>
      %c0_101 = arith.constant 0 : index
      %c0_102 = arith.constant 0 : index
      %119 = vector.load %arg6[%c0_101, %c0_102] : memref<1x32xf32, #tpu.memory_space<vmem>>, vector<1x32xf32>
      tpu.vector_store %arg6[%c0_101, %c0_102], %118 {strides = array<i32>} : memref<1x32xf32, #tpu.memory_space<vmem>>, vector<1x32xf32>,
      %cst_103 = arith.constant 0xFF800000 : f32
      %120 = vector.broadcast %cst_103 : f32 to vector<234x32xf32>
      %c0_104 = arith.constant 0 : index
      %c0_105 = arith.constant 0 : index
      %121 = vector.load %arg7[%c0_104, %c0_105] : memref<234x32xf32, #tpu.memory_space<vmem>>, vector<234x32xf32>
      tpu.vector_store %arg7[%c0_104, %c0_105], %120 {strides = array<i32>} : memref<234x32xf32, #tpu.memory_space<vmem>>, vector<234x32xf32>,
      %cst_106 = arith.constant 0x7F800000 : f32
      %122 = vector.broadcast %cst_106 : f32 to vector<234x32xf32>
      %c0_107 = arith.constant 0 : index
      %c0_108 = arith.constant 0 : index
      %123 = vector.load %arg8[%c0_107, %c0_108] : memref<234x32xf32, #tpu.memory_space<vmem>>, vector<234x32xf32>
      tpu.vector_store %arg8[%c0_107, %c0_108], %122 {strides = array<i32>} : memref<234x32xf32, #tpu.memory_space<vmem>>, vector<234x32xf32>,
    } else {
    }
    %c0 = arith.constant 0 : index
    %c0_1 = arith.constant 0 : index
    %3 = vector.load %arg2[%c0, %c0_1] : memref<256x32xf32, #tpu.memory_space<vmem>>, vector<256x32xf32>
    %c0_2 = arith.constant 0 : index
    %c0_3 = arith.constant 0 : index
    %4 = vector.load %arg3[%c0_2, %c0_3] : memref<3x32xf32, #tpu.memory_space<vmem>>, vector<1x32xf32>
    %c0_4 = arith.constant 0 : index
    %c0_5 = arith.constant 0 : index
    %c0_6 = arith.constant 0 : index
    %5 = vector.load %arg1[%c0_4, %c0_5, %c0_6] : memref<4x234x256xf32, #tpu.memory_space<vmem>>, vector<1x234x256xf32>
    %6 = vector.shape_cast %5 : vector<1x234x256xf32> to vector<234x256xf32>
    %cst = arith.constant dense<0.000000e+00> : vector<234x32xf32>
    %7 = tpu.matmul %6, %3, %cst {dimension_numbers = #tpu.dot_dimension_numbers<[1], [0], [0], [1], [0, 0, 1, 1], [], []>} : vector<234x256xf32>, vector<256x32xf32>, vector<234x32xf32> -> vector<234x32xf32>
    %8 = vector.broadcast %4 : vector<1x32xf32> to vector<234x32xf32>
    %9 = arith.addf %7, %8 : vector<234x32xf32>
    %cst_7 = arith.constant 0.000000e+00 : f32
    %10 = vector.broadcast %cst_7 : f32 to vector<234x32xf32>
    %11 = arith.cmpf ogt, %9, %10 : vector<234x32xf32>
    %cst_8 = arith.constant 2.000000e-01 : f32
    %12 = vector.broadcast %cst_8 : f32 to vector<234x32xf32>
    %13 = arith.mulf %12, %9 : vector<234x32xf32>
    %14 = arith.select %11, %9, %13 : vector<234x32xi1>, vector<234x32xf32>
    %c0_9 = arith.constant 0 : index
    %c0_10 = arith.constant 0 : index
    %15 = vector.load %arg5[%c0_9, %c0_10] : memref<1x32xf32, #tpu.memory_space<vmem>>, vector<1x32xf32>
    %cst_11 = arith.constant dense<0.000000e+00> : vector<32xf32>
    %16 = vector.multi_reduction <add>, %14, %cst_11 [0] : vector<234x32xf32> to vector<32xf32>
    %17 = vector.shape_cast %16 : vector<32xf32> to vector<1x32xf32>
    %18 = arith.addf %15, %17 : vector<1x32xf32>
    %c0_12 = arith.constant 0 : index
    %c0_13 = arith.constant 0 : index
    %19 = vector.load %arg5[%c0_12, %c0_13] : memref<1x32xf32, #tpu.memory_space<vmem>>, vector<1x32xf32>
    tpu.vector_store %arg5[%c0_12, %c0_13], %18 {strides = array<i32>} : memref<1x32xf32, #tpu.memory_space<vmem>>, vector<1x32xf32>,
    %c0_14 = arith.constant 0 : index
    %c0_15 = arith.constant 0 : index
    %20 = vector.load %arg6[%c0_14, %c0_15] : memref<1x32xf32, #tpu.memory_space<vmem>>, vector<1x32xf32>
    %21 = arith.mulf %14, %14 : vector<234x32xf32>
    %cst_16 = arith.constant dense<0.000000e+00> : vector<32xf32>
    %22 = vector.multi_reduction <add>, %21, %cst_16 [0] : vector<234x32xf32> to vector<32xf32>
    %23 = vector.shape_cast %22 : vector<32xf32> to vector<1x32xf32>
    %24 = arith.addf %20, %23 : vector<1x32xf32>
    %c0_17 = arith.constant 0 : index
    %c0_18 = arith.constant 0 : index
    %25 = vector.load %arg6[%c0_17, %c0_18] : memref<1x32xf32, #tpu.memory_space<vmem>>, vector<1x32xf32>
    tpu.vector_store %arg6[%c0_17, %c0_18], %24 {strides = array<i32>} : memref<1x32xf32, #tpu.memory_space<vmem>>, vector<1x32xf32>,
    %c0_19 = arith.constant 0 : index
    %c0_20 = arith.constant 0 : index
    %26 = vector.load %arg7[%c0_19, %c0_20] : memref<234x32xf32, #tpu.memory_space<vmem>>, vector<234x32xf32>
    %27 = arith.maximumf %26, %14 : vector<234x32xf32>
    %c0_21 = arith.constant 0 : index
    %c0_22 = arith.constant 0 : index
    %28 = vector.load %arg7[%c0_21, %c0_22] : memref<234x32xf32, #tpu.memory_space<vmem>>, vector<234x32xf32>
    tpu.vector_store %arg7[%c0_21, %c0_22], %27 {strides = array<i32>} : memref<234x32xf32, #tpu.memory_space<vmem>>, vector<234x32xf32>,
    %c0_23 = arith.constant 0 : index
    %c0_24 = arith.constant 0 : index
    %29 = vector.load %arg8[%c0_23, %c0_24] : memref<234x32xf32, #tpu.memory_space<vmem>>, vector<234x32xf32>
    %30 = arith.minimumf %29, %14 : vector<234x32xf32>
    %c0_25 = arith.constant 0 : index
    %c0_26 = arith.constant 0 : index
    %31 = vector.load %arg8[%c0_25, %c0_26] : memref<234x32xf32, #tpu.memory_space<vmem>>, vector<234x32xf32>
    tpu.vector_store %arg8[%c0_25, %c0_26], %30 {strides = array<i32>} : memref<234x32xf32, #tpu.memory_space<vmem>>, vector<234x32xf32>,
    %c1 = arith.constant 1 : index
    %c0_27 = arith.constant 0 : index
    %c0_28 = arith.constant 0 : index
    %32 = vector.load %arg1[%c1, %c0_27, %c0_28] : memref<4x234x256xf32, #tpu.memory_space<vmem>>, vector<1x234x256xf32>
    %33 = vector.shape_cast %32 : vector<1x234x256xf32> to vector<234x256xf32>
    %cst_29 = arith.constant dense<0.000000e+00> : vector<234x32xf32>
    %34 = tpu.matmul %33, %3, %cst_29 {dimension_numbers = #tpu.dot_dimension_numbers<[1], [0], [0], [1], [0, 0, 1, 1], [], []>} : vector<234x256xf32>, vector<256x32xf32>, vector<234x32xf32> -> vector<234x32xf32>
    %35 = vector.broadcast %4 : vector<1x32xf32> to vector<234x32xf32>
    %36 = arith.addf %34, %35 : vector<234x32xf32>
    %cst_30 = arith.constant 0.000000e+00 : f32
    %37 = vector.broadcast %cst_30 : f32 to vector<234x32xf32>
    %38 = arith.cmpf ogt, %36, %37 : vector<234x32xf32>
    %cst_31 = arith.constant 2.000000e-01 : f32
    %39 = vector.broadcast %cst_31 : f32 to vector<234x32xf32>
    %40 = arith.mulf %39, %36 : vector<234x32xf32>
    %41 = arith.select %38, %36, %40 : vector<234x32xi1>, vector<234x32xf32>
    %c0_32 = arith.constant 0 : index
    %c0_33 = arith.constant 0 : index
    %42 = vector.load %arg5[%c0_32, %c0_33] : memref<1x32xf32, #tpu.memory_space<vmem>>, vector<1x32xf32>
    %cst_34 = arith.constant dense<0.000000e+00> : vector<32xf32>
    %43 = vector.multi_reduction <add>, %41, %cst_34 [0] : vector<234x32xf32> to vector<32xf32>
    %44 = vector.shape_cast %43 : vector<32xf32> to vector<1x32xf32>
    %45 = arith.addf %42, %44 : vector<1x32xf32>
    %c0_35 = arith.constant 0 : index
    %c0_36 = arith.constant 0 : index
    %46 = vector.load %arg5[%c0_35, %c0_36] : memref<1x32xf32, #tpu.memory_space<vmem>>, vector<1x32xf32>
    tpu.vector_store %arg5[%c0_35, %c0_36], %45 {strides = array<i32>} : memref<1x32xf32, #tpu.memory_space<vmem>>, vector<1x32xf32>,
    %c0_37 = arith.constant 0 : index
    %c0_38 = arith.constant 0 : index
    %47 = vector.load %arg6[%c0_37, %c0_38] : memref<1x32xf32, #tpu.memory_space<vmem>>, vector<1x32xf32>
    %48 = arith.mulf %41, %41 : vector<234x32xf32>
    %cst_39 = arith.constant dense<0.000000e+00> : vector<32xf32>
    %49 = vector.multi_reduction <add>, %48, %cst_39 [0] : vector<234x32xf32> to vector<32xf32>
    %50 = vector.shape_cast %49 : vector<32xf32> to vector<1x32xf32>
    %51 = arith.addf %47, %50 : vector<1x32xf32>
    %c0_40 = arith.constant 0 : index
    %c0_41 = arith.constant 0 : index
    %52 = vector.load %arg6[%c0_40, %c0_41] : memref<1x32xf32, #tpu.memory_space<vmem>>, vector<1x32xf32>
    tpu.vector_store %arg6[%c0_40, %c0_41], %51 {strides = array<i32>} : memref<1x32xf32, #tpu.memory_space<vmem>>, vector<1x32xf32>,
    %c0_42 = arith.constant 0 : index
    %c0_43 = arith.constant 0 : index
    %53 = vector.load %arg7[%c0_42, %c0_43] : memref<234x32xf32, #tpu.memory_space<vmem>>, vector<234x32xf32>
    %54 = arith.maximumf %53, %41 : vector<234x32xf32>
    %c0_44 = arith.constant 0 : index
    %c0_45 = arith.constant 0 : index
    %55 = vector.load %arg7[%c0_44, %c0_45] : memref<234x32xf32, #tpu.memory_space<vmem>>, vector<234x32xf32>
    tpu.vector_store %arg7[%c0_44, %c0_45], %54 {strides = array<i32>} : memref<234x32xf32, #tpu.memory_space<vmem>>, vector<234x32xf32>,
    %c0_46 = arith.constant 0 : index
    %c0_47 = arith.constant 0 : index
    %56 = vector.load %arg8[%c0_46, %c0_47] : memref<234x32xf32, #tpu.memory_space<vmem>>, vector<234x32xf32>
    %57 = arith.minimumf %56, %41 : vector<234x32xf32>
    %c0_48 = arith.constant 0 : index
    %c0_49 = arith.constant 0 : index
    %58 = vector.load %arg8[%c0_48, %c0_49] : memref<234x32xf32, #tpu.memory_space<vmem>>, vector<234x32xf32>
    tpu.vector_store %arg8[%c0_48, %c0_49], %57 {strides = array<i32>} : memref<234x32xf32, #tpu.memory_space<vmem>>, vector<234x32xf32>,
    %c2 = arith.constant 2 : index
    %c0_50 = arith.constant 0 : index
    %c0_51 = arith.constant 0 : index
    %59 = vector.load %arg1[%c2, %c0_50, %c0_51] : memref<4x234x256xf32, #tpu.memory_space<vmem>>, vector<1x234x256xf32>
    %60 = vector.shape_cast %59 : vector<1x234x256xf32> to vector<234x256xf32>
    %cst_52 = arith.constant dense<0.000000e+00> : vector<234x32xf32>
    %61 = tpu.matmul %60, %3, %cst_52 {dimension_numbers = #tpu.dot_dimension_numbers<[1], [0], [0], [1], [0, 0, 1, 1], [], []>} : vector<234x256xf32>, vector<256x32xf32>, vector<234x32xf32> -> vector<234x32xf32>
    %62 = vector.broadcast %4 : vector<1x32xf32> to vector<234x32xf32>
    %63 = arith.addf %61, %62 : vector<234x32xf32>
    %cst_53 = arith.constant 0.000000e+00 : f32
    %64 = vector.broadcast %cst_53 : f32 to vector<234x32xf32>
    %65 = arith.cmpf ogt, %63, %64 : vector<234x32xf32>
    %cst_54 = arith.constant 2.000000e-01 : f32
    %66 = vector.broadcast %cst_54 : f32 to vector<234x32xf32>
    %67 = arith.mulf %66, %63 : vector<234x32xf32>
    %68 = arith.select %65, %63, %67 : vector<234x32xi1>, vector<234x32xf32>
    %c0_55 = arith.constant 0 : index
    %c0_56 = arith.constant 0 : index
    %69 = vector.load %arg5[%c0_55, %c0_56] : memref<1x32xf32, #tpu.memory_space<vmem>>, vector<1x32xf32>
    %cst_57 = arith.constant dense<0.000000e+00> : vector<32xf32>
    %70 = vector.multi_reduction <add>, %68, %cst_57 [0] : vector<234x32xf32> to vector<32xf32>
    %71 = vector.shape_cast %70 : vector<32xf32> to vector<1x32xf32>
    %72 = arith.addf %69, %71 : vector<1x32xf32>
    %c0_58 = arith.constant 0 : index
    %c0_59 = arith.constant 0 : index
    %73 = vector.load %arg5[%c0_58, %c0_59] : memref<1x32xf32, #tpu.memory_space<vmem>>, vector<1x32xf32>
    tpu.vector_store %arg5[%c0_58, %c0_59], %72 {strides = array<i32>} : memref<1x32xf32, #tpu.memory_space<vmem>>, vector<1x32xf32>,
    %c0_60 = arith.constant 0 : index
    %c0_61 = arith.constant 0 : index
    %74 = vector.load %arg6[%c0_60, %c0_61] : memref<1x32xf32, #tpu.memory_space<vmem>>, vector<1x32xf32>
    %75 = arith.mulf %68, %68 : vector<234x32xf32>
    %cst_62 = arith.constant dense<0.000000e+00> : vector<32xf32>
    %76 = vector.multi_reduction <add>, %75, %cst_62 [0] : vector<234x32xf32> to vector<32xf32>
    %77 = vector.shape_cast %76 : vector<32xf32> to vector<1x32xf32>
    %78 = arith.addf %74, %77 : vector<1x32xf32>
    %c0_63 = arith.constant 0 : index
    %c0_64 = arith.constant 0 : index
    %79 = vector.load %arg6[%c0_63, %c0_64] : memref<1x32xf32, #tpu.memory_space<vmem>>, vector<1x32xf32>
    tpu.vector_store %arg6[%c0_63, %c0_64], %78 {strides = array<i32>} : memref<1x32xf32, #tpu.memory_space<vmem>>, vector<1x32xf32>,
    %c0_65 = arith.constant 0 : index
    %c0_66 = arith.constant 0 : index
    %80 = vector.load %arg7[%c0_65, %c0_66] : memref<234x32xf32, #tpu.memory_space<vmem>>, vector<234x32xf32>
    %81 = arith.maximumf %80, %68 : vector<234x32xf32>
    %c0_67 = arith.constant 0 : index
    %c0_68 = arith.constant 0 : index
    %82 = vector.load %arg7[%c0_67, %c0_68] : memref<234x32xf32, #tpu.memory_space<vmem>>, vector<234x32xf32>
    tpu.vector_store %arg7[%c0_67, %c0_68], %81 {strides = array<i32>} : memref<234x32xf32, #tpu.memory_space<vmem>>, vector<234x32xf32>,
    %c0_69 = arith.constant 0 : index
    %c0_70 = arith.constant 0 : index
    %83 = vector.load %arg8[%c0_69, %c0_70] : memref<234x32xf32, #tpu.memory_space<vmem>>, vector<234x32xf32>
    %84 = arith.minimumf %83, %68 : vector<234x32xf32>
    %c0_71 = arith.constant 0 : index
    %c0_72 = arith.constant 0 : index
    %85 = vector.load %arg8[%c0_71, %c0_72] : memref<234x32xf32, #tpu.memory_space<vmem>>, vector<234x32xf32>
    tpu.vector_store %arg8[%c0_71, %c0_72], %84 {strides = array<i32>} : memref<234x32xf32, #tpu.memory_space<vmem>>, vector<234x32xf32>,
    %c3 = arith.constant 3 : index
    %c0_73 = arith.constant 0 : index
    %c0_74 = arith.constant 0 : index
    %86 = vector.load %arg1[%c3, %c0_73, %c0_74] : memref<4x234x256xf32, #tpu.memory_space<vmem>>, vector<1x234x256xf32>
    %87 = vector.shape_cast %86 : vector<1x234x256xf32> to vector<234x256xf32>
    %cst_75 = arith.constant dense<0.000000e+00> : vector<234x32xf32>
    %88 = tpu.matmul %87, %3, %cst_75 {dimension_numbers = #tpu.dot_dimension_numbers<[1], [0], [0], [1], [0, 0, 1, 1], [], []>} : vector<234x256xf32>, vector<256x32xf32>, vector<234x32xf32> -> vector<234x32xf32>
    %89 = vector.broadcast %4 : vector<1x32xf32> to vector<234x32xf32>
    %90 = arith.addf %88, %89 : vector<234x32xf32>
    %cst_76 = arith.constant 0.000000e+00 : f32
    %91 = vector.broadcast %cst_76 : f32 to vector<234x32xf32>
    %92 = arith.cmpf ogt, %90, %91 : vector<234x32xf32>
    %cst_77 = arith.constant 2.000000e-01 : f32
    %93 = vector.broadcast %cst_77 : f32 to vector<234x32xf32>
    %94 = arith.mulf %93, %90 : vector<234x32xf32>
    %95 = arith.select %92, %90, %94 : vector<234x32xi1>, vector<234x32xf32>
    %c0_78 = arith.constant 0 : index
    %c0_79 = arith.constant 0 : index
    %96 = vector.load %arg5[%c0_78, %c0_79] : memref<1x32xf32, #tpu.memory_space<vmem>>, vector<1x32xf32>
    %cst_80 = arith.constant dense<0.000000e+00> : vector<32xf32>
    %97 = vector.multi_reduction <add>, %95, %cst_80 [0] : vector<234x32xf32> to vector<32xf32>
    %98 = vector.shape_cast %97 : vector<32xf32> to vector<1x32xf32>
    %99 = arith.addf %96, %98 : vector<1x32xf32>
    %c0_81 = arith.constant 0 : index
    %c0_82 = arith.constant 0 : index
    %100 = vector.load %arg5[%c0_81, %c0_82] : memref<1x32xf32, #tpu.memory_space<vmem>>, vector<1x32xf32>
    tpu.vector_store %arg5[%c0_81, %c0_82], %99 {strides = array<i32>} : memref<1x32xf32, #tpu.memory_space<vmem>>, vector<1x32xf32>,
    %c0_83 = arith.constant 0 : index
    %c0_84 = arith.constant 0 : index
    %101 = vector.load %arg6[%c0_83, %c0_84] : memref<1x32xf32, #tpu.memory_space<vmem>>, vector<1x32xf32>
    %102 = arith.mulf %95, %95 : vector<234x32xf32>
    %cst_85 = arith.constant dense<0.000000e+00> : vector<32xf32>
    %103 = vector.multi_reduction <add>, %102, %cst_85 [0] : vector<234x32xf32> to vector<32xf32>
    %104 = vector.shape_cast %103 : vector<32xf32> to vector<1x32xf32>
    %105 = arith.addf %101, %104 : vector<1x32xf32>
    %c0_86 = arith.constant 0 : index
    %c0_87 = arith.constant 0 : index
    %106 = vector.load %arg6[%c0_86, %c0_87] : memref<1x32xf32, #tpu.memory_space<vmem>>, vector<1x32xf32>
    tpu.vector_store %arg6[%c0_86, %c0_87], %105 {strides = array<i32>} : memref<1x32xf32, #tpu.memory_space<vmem>>, vector<1x32xf32>,
    %c0_88 = arith.constant 0 : index
    %c0_89 = arith.constant 0 : index
    %107 = vector.load %arg7[%c0_88, %c0_89] : memref<234x32xf32, #tpu.memory_space<vmem>>, vector<234x32xf32>
    %108 = arith.maximumf %107, %95 : vector<234x32xf32>
    %c0_90 = arith.constant 0 : index
    %c0_91 = arith.constant 0 : index
    %109 = vector.load %arg7[%c0_90, %c0_91] : memref<234x32xf32, #tpu.memory_space<vmem>>, vector<234x32xf32>
    tpu.vector_store %arg7[%c0_90, %c0_91], %108 {strides = array<i32>} : memref<234x32xf32, #tpu.memory_space<vmem>>, vector<234x32xf32>,
    %c0_92 = arith.constant 0 : index
    %c0_93 = arith.constant 0 : index
    %110 = vector.load %arg8[%c0_92, %c0_93] : memref<234x32xf32, #tpu.memory_space<vmem>>, vector<234x32xf32>
    %111 = arith.minimumf %110, %95 : vector<234x32xf32>
    %c0_94 = arith.constant 0 : index
    %c0_95 = arith.constant 0 : index
    %112 = vector.load %arg8[%c0_94, %c0_95] : memref<234x32xf32, #tpu.memory_space<vmem>>, vector<234x32xf32>
    tpu.vector_store %arg8[%c0_94, %c0_95], %111 {strides = array<i32>} : memref<234x32xf32, #tpu.memory_space<vmem>>, vector<234x32xf32>,
    %c3_i32 = arith.constant 3 : i32
    %113 = arith.cmpi eq, %arg0, %c3_i32 : i32
    %114 = arith.extui %113 : i1 to i32
    %c0_i32_96 = arith.constant 0 : i32
    %115 = arith.cmpi ne, %114, %c0_i32_96 : i32
    scf.if %115 {
      %c0_97 = arith.constant 0 : index
      %c0_98 = arith.constant 0 : index
      %116 = vector.load %arg5[%c0_97, %c0_98] : memref<1x32xf32, #tpu.memory_space<vmem>>, vector<1x32xf32>
      %cst_99 = arith.constant 3.744000e+03 : f32
      %117 = vector.broadcast %cst_99 : f32 to vector<1x32xf32>
      %118 = arith.divf %116, %117 : vector<1x32xf32>
      %c0_100 = arith.constant 0 : index
      %c0_101 = arith.constant 0 : index
      %119 = vector.load %arg6[%c0_100, %c0_101] : memref<1x32xf32, #tpu.memory_space<vmem>>, vector<1x32xf32>
      %cst_102 = arith.constant 3.744000e+03 : f32
      %120 = vector.broadcast %cst_102 : f32 to vector<1x32xf32>
      %121 = arith.divf %119, %120 : vector<1x32xf32>
      %122 = arith.mulf %118, %118 : vector<1x32xf32>
      %123 = arith.subf %121, %122 : vector<1x32xf32>
      %c1_103 = arith.constant 1 : index
      %c0_104 = arith.constant 0 : index
      %124 = vector.load %arg3[%c1_103, %c0_104] : memref<3x32xf32, #tpu.memory_space<vmem>>, vector<1x32xf32>
      %cst_105 = arith.constant 8.000000e-01 : f32
      %125 = vector.broadcast %cst_105 : f32 to vector<1x32xf32>
      %126 = arith.addf %123, %125 : vector<1x32xf32>
      %127 = math.rsqrt %126 : vector<1x32xf32>
      %128 = arith.mulf %124, %127 : vector<1x32xf32>
      %c2_106 = arith.constant 2 : index
      %c0_107 = arith.constant 0 : index
      %129 = vector.load %arg3[%c2_106, %c0_107] : memref<3x32xf32, #tpu.memory_space<vmem>>, vector<1x32xf32>
      %130 = arith.mulf %118, %128 : vector<1x32xf32>
      %131 = arith.subf %129, %130 : vector<1x32xf32>
      %cst_108 = arith.constant 0.000000e+00 : f32
      %132 = vector.broadcast %cst_108 : f32 to vector<1x32xf32>
      %133 = arith.cmpf oge, %128, %132 : vector<1x32xf32>
      %c0_109 = arith.constant 0 : index
      %c0_110 = arith.constant 0 : index
      %134 = vector.load %arg7[%c0_109, %c0_110] : memref<234x32xf32, #tpu.memory_space<vmem>>, vector<234x32xf32>
      %c0_111 = arith.constant 0 : index
      %c0_112 = arith.constant 0 : index
      %135 = vector.load %arg8[%c0_111, %c0_112] : memref<234x32xf32, #tpu.memory_space<vmem>>, vector<234x32xf32>
      %136 = vector.shape_cast %133 : vector<1x32xi1> to vector<1x32xi1>
      %137 = vector.broadcast %136 : vector<1x32xi1> to vector<234x32xi1>
      %138 = arith.select %137, %134, %135 : vector<234x32xi1>, vector<234x32xf32>
      %139 = vector.broadcast %128 : vector<1x32xf32> to vector<234x32xf32>
      %140 = arith.mulf %138, %139 : vector<234x32xf32>
      %141 = vector.broadcast %131 : vector<1x32xf32> to vector<234x32xf32>
      %142 = arith.addf %140, %141 : vector<234x32xf32>
      %143 = vector.extract_strided_slice %142 {offsets = [0, 0], sizes = [13, 32], strides = [1, 1]} : vector<234x32xf32> to vector<13x32xf32>
      %144 = vector.extract_strided_slice %142 {offsets = [13, 0], sizes = [13, 32], strides = [1, 1]} : vector<234x32xf32> to vector<13x32xf32>
      %145 = arith.maximumf %143, %144 : vector<13x32xf32>
      %146 = vector.extract_strided_slice %145 {offsets = [0, 0], sizes = [12, 32], strides = [1, 1]} : vector<13x32xf32> to vector<12x32xf32>
      %147 = vector.extract_strided_slice %145 {offsets = [1, 0], sizes = [12, 32], strides = [1, 1]} : vector<13x32xf32> to vector<12x32xf32>
      %148 = arith.maximumf %146, %147 : vector<12x32xf32>
      %c0_113 = arith.constant 0 : index
      %c0_114 = arith.constant 0 : index
      %c0_115 = arith.constant 0 : index
      %c0_116 = arith.constant 0 : index
      %149 = vector.load %arg4[%c0_113, %c0_114, %c0_115, %c0_116] : memref<2x8x12x32xf32, #tpu.memory_space<vmem>>, vector<1x1x12x32xf32>
      %150 = vector.shape_cast %149 : vector<1x1x12x32xf32> to vector<12x32xf32>
      %151 = vector.shape_cast %148 : vector<12x32xf32> to vector<1x1x12x32xf32>
      tpu.vector_store %arg4[%c0_113, %c0_114, %c0_115, %c0_116], %151 {strides = array<i32>} : memref<2x8x12x32xf32, #tpu.memory_space<vmem>>, vector<1x1x12x32xf32>,
      %152 = vector.extract_strided_slice %142 {offsets = [13, 0], sizes = [13, 32], strides = [1, 1]} : vector<234x32xf32> to vector<13x32xf32>
      %153 = vector.extract_strided_slice %142 {offsets = [26, 0], sizes = [13, 32], strides = [1, 1]} : vector<234x32xf32> to vector<13x32xf32>
      %154 = arith.maximumf %152, %153 : vector<13x32xf32>
      %155 = vector.extract_strided_slice %154 {offsets = [0, 0], sizes = [12, 32], strides = [1, 1]} : vector<13x32xf32> to vector<12x32xf32>
      %156 = vector.extract_strided_slice %154 {offsets = [1, 0], sizes = [12, 32], strides = [1, 1]} : vector<13x32xf32> to vector<12x32xf32>
      %157 = arith.maximumf %155, %156 : vector<12x32xf32>
      %c0_117 = arith.constant 0 : index
      %c1_118 = arith.constant 1 : index
      %c0_119 = arith.constant 0 : index
      %c0_120 = arith.constant 0 : index
      %158 = vector.load %arg4[%c0_117, %c1_118, %c0_119, %c0_120] : memref<2x8x12x32xf32, #tpu.memory_space<vmem>>, vector<1x1x12x32xf32>
      %159 = vector.shape_cast %158 : vector<1x1x12x32xf32> to vector<12x32xf32>
      %160 = vector.shape_cast %157 : vector<12x32xf32> to vector<1x1x12x32xf32>
      tpu.vector_store %arg4[%c0_117, %c1_118, %c0_119, %c0_120], %160 {strides = array<i32>} : memref<2x8x12x32xf32, #tpu.memory_space<vmem>>, vector<1x1x12x32xf32>,
      %161 = vector.extract_strided_slice %142 {offsets = [26, 0], sizes = [13, 32], strides = [1, 1]} : vector<234x32xf32> to vector<13x32xf32>
      %162 = vector.extract_strided_slice %142 {offsets = [39, 0], sizes = [13, 32], strides = [1, 1]} : vector<234x32xf32> to vector<13x32xf32>
      %163 = arith.maximumf %161, %162 : vector<13x32xf32>
      %164 = vector.extract_strided_slice %163 {offsets = [0, 0], sizes = [12, 32], strides = [1, 1]} : vector<13x32xf32> to vector<12x32xf32>
      %165 = vector.extract_strided_slice %163 {offsets = [1, 0], sizes = [12, 32], strides = [1, 1]} : vector<13x32xf32> to vector<12x32xf32>
      %166 = arith.maximumf %164, %165 : vector<12x32xf32>
      %c0_121 = arith.constant 0 : index
      %c2_122 = arith.constant 2 : index
      %c0_123 = arith.constant 0 : index
      %c0_124 = arith.constant 0 : index
      %167 = vector.load %arg4[%c0_121, %c2_122, %c0_123, %c0_124] : memref<2x8x12x32xf32, #tpu.memory_space<vmem>>, vector<1x1x12x32xf32>
      %168 = vector.shape_cast %167 : vector<1x1x12x32xf32> to vector<12x32xf32>
      %169 = vector.shape_cast %166 : vector<12x32xf32> to vector<1x1x12x32xf32>
      tpu.vector_store %arg4[%c0_121, %c2_122, %c0_123, %c0_124], %169 {strides = array<i32>} : memref<2x8x12x32xf32, #tpu.memory_space<vmem>>, vector<1x1x12x32xf32>,
      %170 = vector.extract_strided_slice %142 {offsets = [39, 0], sizes = [13, 32], strides = [1, 1]} : vector<234x32xf32> to vector<13x32xf32>
      %171 = vector.extract_strided_slice %142 {offsets = [52, 0], sizes = [13, 32], strides = [1, 1]} : vector<234x32xf32> to vector<13x32xf32>
      %172 = arith.maximumf %170, %171 : vector<13x32xf32>
      %173 = vector.extract_strided_slice %172 {offsets = [0, 0], sizes = [12, 32], strides = [1, 1]} : vector<13x32xf32> to vector<12x32xf32>
      %174 = vector.extract_strided_slice %172 {offsets = [1, 0], sizes = [12, 32], strides = [1, 1]} : vector<13x32xf32> to vector<12x32xf32>
      %175 = arith.maximumf %173, %174 : vector<12x32xf32>
      %c0_125 = arith.constant 0 : index
      %c3_126 = arith.constant 3 : index
      %c0_127 = arith.constant 0 : index
      %c0_128 = arith.constant 0 : index
      %176 = vector.load %arg4[%c0_125, %c3_126, %c0_127, %c0_128] : memref<2x8x12x32xf32, #tpu.memory_space<vmem>>, vector<1x1x12x32xf32>
      %177 = vector.shape_cast %176 : vector<1x1x12x32xf32> to vector<12x32xf32>
      %178 = vector.shape_cast %175 : vector<12x32xf32> to vector<1x1x12x32xf32>
      tpu.vector_store %arg4[%c0_125, %c3_126, %c0_127, %c0_128], %178 {strides = array<i32>} : memref<2x8x12x32xf32, #tpu.memory_space<vmem>>, vector<1x1x12x32xf32>,
      %179 = vector.extract_strided_slice %142 {offsets = [52, 0], sizes = [13, 32], strides = [1, 1]} : vector<234x32xf32> to vector<13x32xf32>
      %180 = vector.extract_strided_slice %142 {offsets = [65, 0], sizes = [13, 32], strides = [1, 1]} : vector<234x32xf32> to vector<13x32xf32>
      %181 = arith.maximumf %179, %180 : vector<13x32xf32>
      %182 = vector.extract_strided_slice %181 {offsets = [0, 0], sizes = [12, 32], strides = [1, 1]} : vector<13x32xf32> to vector<12x32xf32>
      %183 = vector.extract_strided_slice %181 {offsets = [1, 0], sizes = [12, 32], strides = [1, 1]} : vector<13x32xf32> to vector<12x32xf32>
      %184 = arith.maximumf %182, %183 : vector<12x32xf32>
      %c0_129 = arith.constant 0 : index
      %c4 = arith.constant 4 : index
      %c0_130 = arith.constant 0 : index
      %c0_131 = arith.constant 0 : index
      %185 = vector.load %arg4[%c0_129, %c4, %c0_130, %c0_131] : memref<2x8x12x32xf32, #tpu.memory_space<vmem>>, vector<1x1x12x32xf32>
      %186 = vector.shape_cast %185 : vector<1x1x12x32xf32> to vector<12x32xf32>
      %187 = vector.shape_cast %184 : vector<12x32xf32> to vector<1x1x12x32xf32>
      tpu.vector_store %arg4[%c0_129, %c4, %c0_130, %c0_131], %187 {strides = array<i32>} : memref<2x8x12x32xf32, #tpu.memory_space<vmem>>, vector<1x1x12x32xf32>,
      %188 = vector.extract_strided_slice %142 {offsets = [65, 0], sizes = [13, 32], strides = [1, 1]} : vector<234x32xf32> to vector<13x32xf32>
      %189 = vector.extract_strided_slice %142 {offsets = [78, 0], sizes = [13, 32], strides = [1, 1]} : vector<234x32xf32> to vector<13x32xf32>
      %190 = arith.maximumf %188, %189 : vector<13x32xf32>
      %191 = vector.extract_strided_slice %190 {offsets = [0, 0], sizes = [12, 32], strides = [1, 1]} : vector<13x32xf32> to vector<12x32xf32>
      %192 = vector.extract_strided_slice %190 {offsets = [1, 0], sizes = [12, 32], strides = [1, 1]} : vector<13x32xf32> to vector<12x32xf32>
      %193 = arith.maximumf %191, %192 : vector<12x32xf32>
      %c0_132 = arith.constant 0 : index
      %c5 = arith.constant 5 : index
      %c0_133 = arith.constant 0 : index
      %c0_134 = arith.constant 0 : index
      %194 = vector.load %arg4[%c0_132, %c5, %c0_133, %c0_134] : memref<2x8x12x32xf32, #tpu.memory_space<vmem>>, vector<1x1x12x32xf32>
      %195 = vector.shape_cast %194 : vector<1x1x12x32xf32> to vector<12x32xf32>
      %196 = vector.shape_cast %193 : vector<12x32xf32> to vector<1x1x12x32xf32>
      tpu.vector_store %arg4[%c0_132, %c5, %c0_133, %c0_134], %196 {strides = array<i32>} : memref<2x8x12x32xf32, #tpu.memory_space<vmem>>, vector<1x1x12x32xf32>,
      %197 = vector.extract_strided_slice %142 {offsets = [78, 0], sizes = [13, 32], strides = [1, 1]} : vector<234x32xf32> to vector<13x32xf32>
      %198 = vector.extract_strided_slice %142 {offsets = [91, 0], sizes = [13, 32], strides = [1, 1]} : vector<234x32xf32> to vector<13x32xf32>
      %199 = arith.maximumf %197, %198 : vector<13x32xf32>
      %200 = vector.extract_strided_slice %199 {offsets = [0, 0], sizes = [12, 32], strides = [1, 1]} : vector<13x32xf32> to vector<12x32xf32>
      %201 = vector.extract_strided_slice %199 {offsets = [1, 0], sizes = [12, 32], strides = [1, 1]} : vector<13x32xf32> to vector<12x32xf32>
      %202 = arith.maximumf %200, %201 : vector<12x32xf32>
      %c0_135 = arith.constant 0 : index
      %c6 = arith.constant 6 : index
      %c0_136 = arith.constant 0 : index
      %c0_137 = arith.constant 0 : index
      %203 = vector.load %arg4[%c0_135, %c6, %c0_136, %c0_137] : memref<2x8x12x32xf32, #tpu.memory_space<vmem>>, vector<1x1x12x32xf32>
      %204 = vector.shape_cast %203 : vector<1x1x12x32xf32> to vector<12x32xf32>
      %205 = vector.shape_cast %202 : vector<12x32xf32> to vector<1x1x12x32xf32>
      tpu.vector_store %arg4[%c0_135, %c6, %c0_136, %c0_137], %205 {strides = array<i32>} : memref<2x8x12x32xf32, #tpu.memory_space<vmem>>, vector<1x1x12x32xf32>,
      %206 = vector.extract_strided_slice %142 {offsets = [91, 0], sizes = [13, 32], strides = [1, 1]} : vector<234x32xf32> to vector<13x32xf32>
      %207 = vector.extract_strided_slice %142 {offsets = [104, 0], sizes = [13, 32], strides = [1, 1]} : vector<234x32xf32> to vector<13x32xf32>
      %208 = arith.maximumf %206, %207 : vector<13x32xf32>
      %209 = vector.extract_strided_slice %208 {offsets = [0, 0], sizes = [12, 32], strides = [1, 1]} : vector<13x32xf32> to vector<12x32xf32>
      %210 = vector.extract_strided_slice %208 {offsets = [1, 0], sizes = [12, 32], strides = [1, 1]} : vector<13x32xf32> to vector<12x32xf32>
      %211 = arith.maximumf %209, %210 : vector<12x32xf32>
      %c0_138 = arith.constant 0 : index
      %c7 = arith.constant 7 : index
      %c0_139 = arith.constant 0 : index
      %c0_140 = arith.constant 0 : index
      %212 = vector.load %arg4[%c0_138, %c7, %c0_139, %c0_140] : memref<2x8x12x32xf32, #tpu.memory_space<vmem>>, vector<1x1x12x32xf32>
      %213 = vector.shape_cast %212 : vector<1x1x12x32xf32> to vector<12x32xf32>
      %214 = vector.shape_cast %211 : vector<12x32xf32> to vector<1x1x12x32xf32>
      tpu.vector_store %arg4[%c0_138, %c7, %c0_139, %c0_140], %214 {strides = array<i32>} : memref<2x8x12x32xf32, #tpu.memory_space<vmem>>, vector<1x1x12x32xf32>,
      %215 = vector.extract_strided_slice %142 {offsets = [117, 0], sizes = [13, 32], strides = [1, 1]} : vector<234x32xf32> to vector<13x32xf32>
      %216 = vector.extract_strided_slice %142 {offsets = [130, 0], sizes = [13, 32], strides = [1, 1]} : vector<234x32xf32> to vector<13x32xf32>
      %217 = arith.maximumf %215, %216 : vector<13x32xf32>
      %218 = vector.extract_strided_slice %217 {offsets = [0, 0], sizes = [12, 32], strides = [1, 1]} : vector<13x32xf32> to vector<12x32xf32>
      %219 = vector.extract_strided_slice %217 {offsets = [1, 0], sizes = [12, 32], strides = [1, 1]} : vector<13x32xf32> to vector<12x32xf32>
      %220 = arith.maximumf %218, %219 : vector<12x32xf32>
      %c1_141 = arith.constant 1 : index
      %c0_142 = arith.constant 0 : index
      %c0_143 = arith.constant 0 : index
      %c0_144 = arith.constant 0 : index
      %221 = vector.load %arg4[%c1_141, %c0_142, %c0_143, %c0_144] : memref<2x8x12x32xf32, #tpu.memory_space<vmem>>, vector<1x1x12x32xf32>
      %222 = vector.shape_cast %221 : vector<1x1x12x32xf32> to vector<12x32xf32>
      %223 = vector.shape_cast %220 : vector<12x32xf32> to vector<1x1x12x32xf32>
      tpu.vector_store %arg4[%c1_141, %c0_142, %c0_143, %c0_144], %223 {strides = array<i32>} : memref<2x8x12x32xf32, #tpu.memory_space<vmem>>, vector<1x1x12x32xf32>,
      %224 = vector.extract_strided_slice %142 {offsets = [130, 0], sizes = [13, 32], strides = [1, 1]} : vector<234x32xf32> to vector<13x32xf32>
      %225 = vector.extract_strided_slice %142 {offsets = [143, 0], sizes = [13, 32], strides = [1, 1]} : vector<234x32xf32> to vector<13x32xf32>
      %226 = arith.maximumf %224, %225 : vector<13x32xf32>
      %227 = vector.extract_strided_slice %226 {offsets = [0, 0], sizes = [12, 32], strides = [1, 1]} : vector<13x32xf32> to vector<12x32xf32>
      %228 = vector.extract_strided_slice %226 {offsets = [1, 0], sizes = [12, 32], strides = [1, 1]} : vector<13x32xf32> to vector<12x32xf32>
      %229 = arith.maximumf %227, %228 : vector<12x32xf32>
      %c1_145 = arith.constant 1 : index
      %c1_146 = arith.constant 1 : index
      %c0_147 = arith.constant 0 : index
      %c0_148 = arith.constant 0 : index
      %230 = vector.load %arg4[%c1_145, %c1_146, %c0_147, %c0_148] : memref<2x8x12x32xf32, #tpu.memory_space<vmem>>, vector<1x1x12x32xf32>
      %231 = vector.shape_cast %230 : vector<1x1x12x32xf32> to vector<12x32xf32>
      %232 = vector.shape_cast %229 : vector<12x32xf32> to vector<1x1x12x32xf32>
      tpu.vector_store %arg4[%c1_145, %c1_146, %c0_147, %c0_148], %232 {strides = array<i32>} : memref<2x8x12x32xf32, #tpu.memory_space<vmem>>, vector<1x1x12x32xf32>,
      %233 = vector.extract_strided_slice %142 {offsets = [143, 0], sizes = [13, 32], strides = [1, 1]} : vector<234x32xf32> to vector<13x32xf32>
      %234 = vector.extract_strided_slice %142 {offsets = [156, 0], sizes = [13, 32], strides = [1, 1]} : vector<234x32xf32> to vector<13x32xf32>
      %235 = arith.maximumf %233, %234 : vector<13x32xf32>
      %236 = vector.extract_strided_slice %235 {offsets = [0, 0], sizes = [12, 32], strides = [1, 1]} : vector<13x32xf32> to vector<12x32xf32>
      %237 = vector.extract_strided_slice %235 {offsets = [1, 0], sizes = [12, 32], strides = [1, 1]} : vector<13x32xf32> to vector<12x32xf32>
      %238 = arith.maximumf %236, %237 : vector<12x32xf32>
      %c1_149 = arith.constant 1 : index
      %c2_150 = arith.constant 2 : index
      %c0_151 = arith.constant 0 : index
      %c0_152 = arith.constant 0 : index
      %239 = vector.load %arg4[%c1_149, %c2_150, %c0_151, %c0_152] : memref<2x8x12x32xf32, #tpu.memory_space<vmem>>, vector<1x1x12x32xf32>
      %240 = vector.shape_cast %239 : vector<1x1x12x32xf32> to vector<12x32xf32>
      %241 = vector.shape_cast %238 : vector<12x32xf32> to vector<1x1x12x32xf32>
      tpu.vector_store %arg4[%c1_149, %c2_150, %c0_151, %c0_152], %241 {strides = array<i32>} : memref<2x8x12x32xf32, #tpu.memory_space<vmem>>, vector<1x1x12x32xf32>,
      %242 = vector.extract_strided_slice %142 {offsets = [156, 0], sizes = [13, 32], strides = [1, 1]} : vector<234x32xf32> to vector<13x32xf32>
      %243 = vector.extract_strided_slice %142 {offsets = [169, 0], sizes = [13, 32], strides = [1, 1]} : vector<234x32xf32> to vector<13x32xf32>
      %244 = arith.maximumf %242, %243 : vector<13x32xf32>
      %245 = vector.extract_strided_slice %244 {offsets = [0, 0], sizes = [12, 32], strides = [1, 1]} : vector<13x32xf32> to vector<12x32xf32>
      %246 = vector.extract_strided_slice %244 {offsets = [1, 0], sizes = [12, 32], strides = [1, 1]} : vector<13x32xf32> to vector<12x32xf32>
      %247 = arith.maximumf %245, %246 : vector<12x32xf32>
      %c1_153 = arith.constant 1 : index
      %c3_154 = arith.constant 3 : index
      %c0_155 = arith.constant 0 : index
      %c0_156 = arith.constant 0 : index
      %248 = vector.load %arg4[%c1_153, %c3_154, %c0_155, %c0_156] : memref<2x8x12x32xf32, #tpu.memory_space<vmem>>, vector<1x1x12x32xf32>
      %249 = vector.shape_cast %248 : vector<1x1x12x32xf32> to vector<12x32xf32>
      %250 = vector.shape_cast %247 : vector<12x32xf32> to vector<1x1x12x32xf32>
      tpu.vector_store %arg4[%c1_153, %c3_154, %c0_155, %c0_156], %250 {strides = array<i32>} : memref<2x8x12x32xf32, #tpu.memory_space<vmem>>, vector<1x1x12x32xf32>,
      %251 = vector.extract_strided_slice %142 {offsets = [169, 0], sizes = [13, 32], strides = [1, 1]} : vector<234x32xf32> to vector<13x32xf32>
      %252 = vector.extract_strided_slice %142 {offsets = [182, 0], sizes = [13, 32], strides = [1, 1]} : vector<234x32xf32> to vector<13x32xf32>
      %253 = arith.maximumf %251, %252 : vector<13x32xf32>
      %254 = vector.extract_strided_slice %253 {offsets = [0, 0], sizes = [12, 32], strides = [1, 1]} : vector<13x32xf32> to vector<12x32xf32>
      %255 = vector.extract_strided_slice %253 {offsets = [1, 0], sizes = [12, 32], strides = [1, 1]} : vector<13x32xf32> to vector<12x32xf32>
      %256 = arith.maximumf %254, %255 : vector<12x32xf32>
      %c1_157 = arith.constant 1 : index
      %c4_158 = arith.constant 4 : index
      %c0_159 = arith.constant 0 : index
      %c0_160 = arith.constant 0 : index
      %257 = vector.load %arg4[%c1_157, %c4_158, %c0_159, %c0_160] : memref<2x8x12x32xf32, #tpu.memory_space<vmem>>, vector<1x1x12x32xf32>
      %258 = vector.shape_cast %257 : vector<1x1x12x32xf32> to vector<12x32xf32>
      %259 = vector.shape_cast %256 : vector<12x32xf32> to vector<1x1x12x32xf32>
      tpu.vector_store %arg4[%c1_157, %c4_158, %c0_159, %c0_160], %259 {strides = array<i32>} : memref<2x8x12x32xf32, #tpu.memory_space<vmem>>, vector<1x1x12x32xf32>,
      %260 = vector.extract_strided_slice %142 {offsets = [182, 0], sizes = [13, 32], strides = [1, 1]} : vector<234x32xf32> to vector<13x32xf32>
      %261 = vector.extract_strided_slice %142 {offsets = [195, 0], sizes = [13, 32], strides = [1, 1]} : vector<234x32xf32> to vector<13x32xf32>
      %262 = arith.maximumf %260, %261 : vector<13x32xf32>
      %263 = vector.extract_strided_slice %262 {offsets = [0, 0], sizes = [12, 32], strides = [1, 1]} : vector<13x32xf32> to vector<12x32xf32>
      %264 = vector.extract_strided_slice %262 {offsets = [1, 0], sizes = [12, 32], strides = [1, 1]} : vector<13x32xf32> to vector<12x32xf32>
      %265 = arith.maximumf %263, %264 : vector<12x32xf32>
      %c1_161 = arith.constant 1 : index
      %c5_162 = arith.constant 5 : index
      %c0_163 = arith.constant 0 : index
      %c0_164 = arith.constant 0 : index
      %266 = vector.load %arg4[%c1_161, %c5_162, %c0_163, %c0_164] : memref<2x8x12x32xf32, #tpu.memory_space<vmem>>, vector<1x1x12x32xf32>
      %267 = vector.shape_cast %266 : vector<1x1x12x32xf32> to vector<12x32xf32>
      %268 = vector.shape_cast %265 : vector<12x32xf32> to vector<1x1x12x32xf32>
      tpu.vector_store %arg4[%c1_161, %c5_162, %c0_163, %c0_164], %268 {strides = array<i32>} : memref<2x8x12x32xf32, #tpu.memory_space<vmem>>, vector<1x1x12x32xf32>,
      %269 = vector.extract_strided_slice %142 {offsets = [195, 0], sizes = [13, 32], strides = [1, 1]} : vector<234x32xf32> to vector<13x32xf32>
      %270 = vector.extract_strided_slice %142 {offsets = [208, 0], sizes = [13, 32], strides = [1, 1]} : vector<234x32xf32> to vector<13x32xf32>
      %271 = arith.maximumf %269, %270 : vector<13x32xf32>
      %272 = vector.extract_strided_slice %271 {offsets = [0, 0], sizes = [12, 32], strides = [1, 1]} : vector<13x32xf32> to vector<12x32xf32>
      %273 = vector.extract_strided_slice %271 {offsets = [1, 0], sizes = [12, 32], strides = [1, 1]} : vector<13x32xf32> to vector<12x32xf32>
      %274 = arith.maximumf %272, %273 : vector<12x32xf32>
      %c1_165 = arith.constant 1 : index
      %c6_166 = arith.constant 6 : index
      %c0_167 = arith.constant 0 : index
      %c0_168 = arith.constant 0 : index
      %275 = vector.load %arg4[%c1_165, %c6_166, %c0_167, %c0_168] : memref<2x8x12x32xf32, #tpu.memory_space<vmem>>, vector<1x1x12x32xf32>
      %276 = vector.shape_cast %275 : vector<1x1x12x32xf32> to vector<12x32xf32>
      %277 = vector.shape_cast %274 : vector<12x32xf32> to vector<1x1x12x32xf32>
      tpu.vector_store %arg4[%c1_165, %c6_166, %c0_167, %c0_168], %277 {strides = array<i32>} : memref<2x8x12x32xf32, #tpu.memory_space<vmem>>, vector<1x1x12x32xf32>,
      %278 = vector.extract_strided_slice %142 {offsets = [208, 0], sizes = [13, 32], strides = [1, 1]} : vector<234x32xf32> to vector<13x32xf32>
      %279 = vector.extract_strided_slice %142 {offsets = [221, 0], sizes = [13, 32], strides = [1, 1]} : vector<234x32xf32> to vector<13x32xf32>
      %280 = arith.maximumf %278, %279 : vector<13x32xf32>
      %281 = vector.extract_strided_slice %280 {offsets = [0, 0], sizes = [12, 32], strides = [1, 1]} : vector<13x32xf32> to vector<12x32xf32>
      %282 = vector.extract_strided_slice %280 {offsets = [1, 0], sizes = [12, 32], strides = [1, 1]} : vector<13x32xf32> to vector<12x32xf32>
      %283 = arith.maximumf %281, %282 : vector<12x32xf32>
      %c1_169 = arith.constant 1 : index
      %c7_170 = arith.constant 7 : index
      %c0_171 = arith.constant 0 : index
      %c0_172 = arith.constant 0 : index
      %284 = vector.load %arg4[%c1_169, %c7_170, %c0_171, %c0_172] : memref<2x8x12x32xf32, #tpu.memory_space<vmem>>, vector<1x1x12x32xf32>
      %285 = vector.shape_cast %284 : vector<1x1x12x32xf32> to vector<12x32xf32>
      %286 = vector.shape_cast %283 : vector<12x32xf32> to vector<1x1x12x32xf32>
      tpu.vector_store %arg4[%c1_169, %c7_170, %c0_171, %c0_172], %286 {strides = array<i32>} : memref<2x8x12x32xf32, #tpu.memory_space<vmem>>, vector<1x1x12x32xf32>,
    } else {
    }
    return
  }
  func.func @transform_0(%arg0: i32) -> (i32, i32, i32) {
    %c0_i32 = arith.constant 0 : i32
    %c0_i32_0 = arith.constant 0 : i32
    %c0_i32_1 = arith.constant 0 : i32
    return %arg0, %c0_i32, %c0_i32_0 : i32, i32, i32
  }
  func.func @transform_1(%arg0: i32) -> (i32, i32) {
    %c0_i32 = arith.constant 0 : i32
    %c0_i32_0 = arith.constant 0 : i32
    %c0_i32_1 = arith.constant 0 : i32
    return %c0_i32, %c0_i32_0 : i32, i32
  }
  func.func @transform_2(%arg0: i32) -> (i32, i32) {
    %c0_i32 = arith.constant 0 : i32
    %c0_i32_0 = arith.constant 0 : i32
    %c0_i32_1 = arith.constant 0 : i32
    return %c0_i32, %c0_i32_0 : i32, i32
  }
  func.func @transform_3(%arg0: i32) -> (i32, i32, i32, i32) {
    %c0_i32 = arith.constant 0 : i32
    %c0_i32_0 = arith.constant 0 : i32
    %c0_i32_1 = arith.constant 0 : i32
    %c0_i32_2 = arith.constant 0 : i32
    %c0_i32_3 = arith.constant 0 : i32
    return %c0_i32, %c0_i32_0, %c0_i32_1, %c0_i32_2 : i32, i32, i32, i32
  }
}

module attributes {stable_mosaic.version = 11 : i64} {
  func.func @_tail_kernel(%arg0: i32, %arg1: memref<48x512xf32, #tpu.memory_space<vmem>>, %arg2: memref<512x64xf32, #tpu.memory_space<vmem>>, %arg3: memref<5x64x64xf32, #tpu.memory_space<vmem>>, %arg4: memref<7x64xf32, #tpu.memory_space<vmem>>, %arg5: memref<65x6xf32, #tpu.memory_space<vmem>>, %arg6: memref<2x6xf32, #tpu.memory_space<vmem>>) attributes {dimension_semantics = [#tpu.dimension_semantics<arbitrary>], iteration_bounds = array<i64: 1>, scalar_prefetch = 0 : i64, scratch_operands = 0 : i64, tpu.core_type = #tpu.core_type<tc>, window_params = [{pipeline_mode = #tpu.pipeline_mode<synchronous>, transform_indices = @transform_0, window_bounds = array<i64: 48, 512>}, {pipeline_mode = #tpu.pipeline_mode<synchronous>, transform_indices = @transform_1, window_bounds = array<i64: 512, 64>}, {pipeline_mode = #tpu.pipeline_mode<synchronous>, transform_indices = @transform_2, window_bounds = array<i64: 5, 64, 64>}, {pipeline_mode = #tpu.pipeline_mode<synchronous>, transform_indices = @transform_3, window_bounds = array<i64: 7, 64>}, {pipeline_mode = #tpu.pipeline_mode<synchronous>, transform_indices = @transform_4, window_bounds = array<i64: 65, 6>}, {pipeline_mode = #tpu.pipeline_mode<synchronous>, transform_indices = @transform_5, window_bounds = array<i64: 2, 6>}]} {
    %c0 = arith.constant 0 : index
    %c0_0 = arith.constant 0 : index
    %0 = vector.load %arg1[%c0, %c0_0] : memref<48x512xf32, #tpu.memory_space<vmem>>, vector<48x512xf32>
    %c0_1 = arith.constant 0 : index
    %c0_2 = arith.constant 0 : index
    %1 = vector.load %arg2[%c0_1, %c0_2] : memref<512x64xf32, #tpu.memory_space<vmem>>, vector<512x64xf32>
    %cst = arith.constant dense<0.000000e+00> : vector<48x64xf32>
    %2 = tpu.matmul %0, %1, %cst {dimension_numbers = #tpu.dot_dimension_numbers<[1], [0], [0], [1], [0, 0, 1, 1], [], []>} : vector<48x512xf32>, vector<512x64xf32>, vector<48x64xf32> -> vector<48x64xf32>
    %c0_3 = arith.constant 0 : index
    %c0_4 = arith.constant 0 : index
    %3 = vector.load %arg4[%c0_3, %c0_4] : memref<7x64xf32, #tpu.memory_space<vmem>>, vector<1x64xf32>
    %4 = vector.broadcast %3 : vector<1x64xf32> to vector<48x64xf32>
    %5 = arith.addf %2, %4 : vector<48x64xf32>
    %cst_5 = arith.constant 0.000000e+00 : f32
    %6 = vector.broadcast %cst_5 : f32 to vector<48x64xf32>
    %7 = arith.cmpf ogt, %5, %6 : vector<48x64xf32>
    %cst_6 = arith.constant 2.000000e-01 : f32
    %8 = vector.broadcast %cst_6 : f32 to vector<48x64xf32>
    %9 = arith.mulf %8, %5 : vector<48x64xf32>
    %10 = arith.select %7, %5, %9 : vector<48x64xi1>, vector<48x64xf32>
    %cst_7 = arith.constant dense<0.000000e+00> : vector<64xf32>
    %11 = vector.multi_reduction <add>, %10, %cst_7 [0] : vector<48x64xf32> to vector<64xf32>
    %12 = vector.shape_cast %11 : vector<64xf32> to vector<1x64xf32>
    %cst_8 = arith.constant 4.800000e+01 : f32
    %13 = vector.broadcast %cst_8 : f32 to vector<1x64xf32>
    %14 = arith.divf %12, %13 : vector<1x64xf32>
    %15 = arith.mulf %10, %10 : vector<48x64xf32>
    %cst_9 = arith.constant dense<0.000000e+00> : vector<64xf32>
    %16 = vector.multi_reduction <add>, %15, %cst_9 [0] : vector<48x64xf32> to vector<64xf32>
    %17 = vector.shape_cast %16 : vector<64xf32> to vector<1x64xf32>
    %cst_10 = arith.constant 4.800000e+01 : f32
    %18 = vector.broadcast %cst_10 : f32 to vector<1x64xf32>
    %19 = arith.divf %17, %18 : vector<1x64xf32>
    %20 = arith.mulf %14, %14 : vector<1x64xf32>
    %21 = arith.subf %19, %20 : vector<1x64xf32>
    %22 = vector.broadcast %14 : vector<1x64xf32> to vector<48x64xf32>
    %23 = arith.subf %10, %22 : vector<48x64xf32>
    %c1 = arith.constant 1 : index
    %c0_11 = arith.constant 0 : index
    %24 = vector.load %arg4[%c1, %c0_11] : memref<7x64xf32, #tpu.memory_space<vmem>>, vector<1x64xf32>
    %cst_12 = arith.constant 8.000000e-01 : f32
    %25 = vector.broadcast %cst_12 : f32 to vector<1x64xf32>
    %26 = arith.addf %21, %25 : vector<1x64xf32>
    %27 = math.rsqrt %26 : vector<1x64xf32>
    %28 = arith.mulf %24, %27 : vector<1x64xf32>
    %29 = vector.broadcast %28 : vector<1x64xf32> to vector<48x64xf32>
    %30 = arith.mulf %23, %29 : vector<48x64xf32>
    %c2 = arith.constant 2 : index
    %c0_13 = arith.constant 0 : index
    %31 = vector.load %arg4[%c2, %c0_13] : memref<7x64xf32, #tpu.memory_space<vmem>>, vector<1x64xf32>
    %32 = vector.broadcast %31 : vector<1x64xf32> to vector<48x64xf32>
    %33 = arith.addf %30, %32 : vector<48x64xf32>
    %34 = vector.extract_strided_slice %33 {offsets = [0, 0], sizes = [24, 64], strides = [1, 1]} : vector<48x64xf32> to vector<24x64xf32>
    %35 = vector.extract_strided_slice %34 {offsets = [0, 0], sizes = [4, 64], strides = [1, 1]} : vector<24x64xf32> to vector<4x64xf32>
    %36 = vector.extract_strided_slice %34 {offsets = [2, 0], sizes = [4, 64], strides = [1, 1]} : vector<24x64xf32> to vector<4x64xf32>
    %37 = vector.extract_strided_slice %34 {offsets = [6, 0], sizes = [4, 64], strides = [1, 1]} : vector<24x64xf32> to vector<4x64xf32>
    %38 = arith.maximumf %35, %37 : vector<4x64xf32>
    %39 = vector.extract_strided_slice %34 {offsets = [8, 0], sizes = [4, 64], strides = [1, 1]} : vector<24x64xf32> to vector<4x64xf32>
    %40 = arith.maximumf %36, %39 : vector<4x64xf32>
    %41 = vector.extract_strided_slice %34 {offsets = [12, 0], sizes = [4, 64], strides = [1, 1]} : vector<24x64xf32> to vector<4x64xf32>
    %42 = arith.maximumf %38, %41 : vector<4x64xf32>
    %43 = vector.extract_strided_slice %34 {offsets = [14, 0], sizes = [4, 64], strides = [1, 1]} : vector<24x64xf32> to vector<4x64xf32>
    %44 = arith.maximumf %40, %43 : vector<4x64xf32>
    %45 = vector.extract_strided_slice %34 {offsets = [18, 0], sizes = [4, 64], strides = [1, 1]} : vector<24x64xf32> to vector<4x64xf32>
    %46 = arith.maximumf %42, %45 : vector<4x64xf32>
    %47 = vector.extract_strided_slice %34 {offsets = [20, 0], sizes = [4, 64], strides = [1, 1]} : vector<24x64xf32> to vector<4x64xf32>
    %48 = arith.maximumf %44, %47 : vector<4x64xf32>
    %cst_14 = arith.constant dense<0xFF800000> : vector<64xf32>
    %49 = vector.multi_reduction <maximumf>, %46, %cst_14 [0] : vector<4x64xf32> to vector<64xf32>
    %50 = vector.shape_cast %49 : vector<64xf32> to vector<1x64xf32>
    %cst_15 = arith.constant dense<0xFF800000> : vector<64xf32>
    %51 = vector.multi_reduction <maximumf>, %48, %cst_15 [0] : vector<4x64xf32> to vector<64xf32>
    %52 = vector.shape_cast %51 : vector<64xf32> to vector<1x64xf32>
    %53 = vector.extract_strided_slice %33 {offsets = [24, 0], sizes = [24, 64], strides = [1, 1]} : vector<48x64xf32> to vector<24x64xf32>
    %54 = vector.extract_strided_slice %53 {offsets = [0, 0], sizes = [4, 64], strides = [1, 1]} : vector<24x64xf32> to vector<4x64xf32>
    %55 = vector.extract_strided_slice %53 {offsets = [2, 0], sizes = [4, 64], strides = [1, 1]} : vector<24x64xf32> to vector<4x64xf32>
    %56 = vector.extract_strided_slice %53 {offsets = [6, 0], sizes = [4, 64], strides = [1, 1]} : vector<24x64xf32> to vector<4x64xf32>
    %57 = arith.maximumf %54, %56 : vector<4x64xf32>
    %58 = vector.extract_strided_slice %53 {offsets = [8, 0], sizes = [4, 64], strides = [1, 1]} : vector<24x64xf32> to vector<4x64xf32>
    %59 = arith.maximumf %55, %58 : vector<4x64xf32>
    %60 = vector.extract_strided_slice %53 {offsets = [12, 0], sizes = [4, 64], strides = [1, 1]} : vector<24x64xf32> to vector<4x64xf32>
    %61 = arith.maximumf %57, %60 : vector<4x64xf32>
    %62 = vector.extract_strided_slice %53 {offsets = [14, 0], sizes = [4, 64], strides = [1, 1]} : vector<24x64xf32> to vector<4x64xf32>
    %63 = arith.maximumf %59, %62 : vector<4x64xf32>
    %64 = vector.extract_strided_slice %53 {offsets = [18, 0], sizes = [4, 64], strides = [1, 1]} : vector<24x64xf32> to vector<4x64xf32>
    %65 = arith.maximumf %61, %64 : vector<4x64xf32>
    %66 = vector.extract_strided_slice %53 {offsets = [20, 0], sizes = [4, 64], strides = [1, 1]} : vector<24x64xf32> to vector<4x64xf32>
    %67 = arith.maximumf %63, %66 : vector<4x64xf32>
    %cst_16 = arith.constant dense<0xFF800000> : vector<64xf32>
    %68 = vector.multi_reduction <maximumf>, %65, %cst_16 [0] : vector<4x64xf32> to vector<64xf32>
    %69 = vector.shape_cast %68 : vector<64xf32> to vector<1x64xf32>
    %cst_17 = arith.constant dense<0xFF800000> : vector<64xf32>
    %70 = vector.multi_reduction <maximumf>, %67, %cst_17 [0] : vector<4x64xf32> to vector<64xf32>
    %71 = vector.shape_cast %70 : vector<64xf32> to vector<1x64xf32>
    %72 = tpu.concatenate %50, %69 in 0 : vector<1x64xf32>, vector<1x64xf32> -> vector<2x64xf32>
    %73 = tpu.concatenate %52, %71 in 0 : vector<1x64xf32>, vector<1x64xf32> -> vector<2x64xf32>
    %cst_18 = arith.constant 0.000000e+00 : f32
    %74 = vector.broadcast %cst_18 : f32 to vector<2x64xf32>
    %75 = tpu.concatenate %74, %72 in 0 : vector<2x64xf32>, vector<2x64xf32> -> vector<4x64xf32>
    %76 = tpu.concatenate %72, %73 in 0 : vector<2x64xf32>, vector<2x64xf32> -> vector<4x64xf32>
    %77 = tpu.concatenate %73, %74 in 0 : vector<2x64xf32>, vector<2x64xf32> -> vector<4x64xf32>
    %c0_19 = arith.constant 0 : index
    %c0_20 = arith.constant 0 : index
    %c0_21 = arith.constant 0 : index
    %78 = vector.load %arg3[%c0_19, %c0_20, %c0_21] : memref<5x64x64xf32, #tpu.memory_space<vmem>>, vector<1x64x64xf32>
    %79 = vector.shape_cast %78 : vector<1x64x64xf32> to vector<64x64xf32>
    %cst_22 = arith.constant dense<0.000000e+00> : vector<4x64xf32>
    %80 = tpu.matmul %75, %79, %cst_22 {dimension_numbers = #tpu.dot_dimension_numbers<[1], [0], [0], [1], [0, 0, 1, 1], [], []>} : vector<4x64xf32>, vector<64x64xf32>, vector<4x64xf32> -> vector<4x64xf32>
    %c1_23 = arith.constant 1 : index
    %c0_24 = arith.constant 0 : index
    %c0_25 = arith.constant 0 : index
    %81 = vector.load %arg3[%c1_23, %c0_24, %c0_25] : memref<5x64x64xf32, #tpu.memory_space<vmem>>, vector<1x64x64xf32>
    %82 = vector.shape_cast %81 : vector<1x64x64xf32> to vector<64x64xf32>
    %cst_26 = arith.constant dense<0.000000e+00> : vector<4x64xf32>
    %83 = tpu.matmul %76, %82, %cst_26 {dimension_numbers = #tpu.dot_dimension_numbers<[1], [0], [0], [1], [0, 0, 1, 1], [], []>} : vector<4x64xf32>, vector<64x64xf32>, vector<4x64xf32> -> vector<4x64xf32>
    %84 = arith.addf %80, %83 : vector<4x64xf32>
    %c2_27 = arith.constant 2 : index
    %c0_28 = arith.constant 0 : index
    %c0_29 = arith.constant 0 : index
    %85 = vector.load %arg3[%c2_27, %c0_28, %c0_29] : memref<5x64x64xf32, #tpu.memory_space<vmem>>, vector<1x64x64xf32>
    %86 = vector.shape_cast %85 : vector<1x64x64xf32> to vector<64x64xf32>
    %cst_30 = arith.constant dense<0.000000e+00> : vector<4x64xf32>
    %87 = tpu.matmul %77, %86, %cst_30 {dimension_numbers = #tpu.dot_dimension_numbers<[1], [0], [0], [1], [0, 0, 1, 1], [], []>} : vector<4x64xf32>, vector<64x64xf32>, vector<4x64xf32> -> vector<4x64xf32>
    %88 = arith.addf %84, %87 : vector<4x64xf32>
    %c3 = arith.constant 3 : index
    %c0_31 = arith.constant 0 : index
    %89 = vector.load %arg4[%c3, %c0_31] : memref<7x64xf32, #tpu.memory_space<vmem>>, vector<1x64xf32>
    %90 = vector.broadcast %89 : vector<1x64xf32> to vector<4x64xf32>
    %91 = arith.addf %88, %90 : vector<4x64xf32>
    %cst_32 = arith.constant 0.000000e+00 : f32
    %92 = vector.broadcast %cst_32 : f32 to vector<4x64xf32>
    %93 = arith.cmpf ogt, %91, %92 : vector<4x64xf32>
    %cst_33 = arith.constant 2.000000e-01 : f32
    %94 = vector.broadcast %cst_33 : f32 to vector<4x64xf32>
    %95 = arith.mulf %94, %91 : vector<4x64xf32>
    %96 = arith.select %93, %91, %95 : vector<4x64xi1>, vector<4x64xf32>
    %cst_34 = arith.constant dense<0.000000e+00> : vector<64xf32>
    %97 = vector.multi_reduction <add>, %96, %cst_34 [0] : vector<4x64xf32> to vector<64xf32>
    %98 = vector.shape_cast %97 : vector<64xf32> to vector<1x64xf32>
    %cst_35 = arith.constant 4.000000e+00 : f32
    %99 = vector.broadcast %cst_35 : f32 to vector<1x64xf32>
    %100 = arith.divf %98, %99 : vector<1x64xf32>
    %101 = arith.mulf %96, %96 : vector<4x64xf32>
    %cst_36 = arith.constant dense<0.000000e+00> : vector<64xf32>
    %102 = vector.multi_reduction <add>, %101, %cst_36 [0] : vector<4x64xf32> to vector<64xf32>
    %103 = vector.shape_cast %102 : vector<64xf32> to vector<1x64xf32>
    %cst_37 = arith.constant 4.000000e+00 : f32
    %104 = vector.broadcast %cst_37 : f32 to vector<1x64xf32>
    %105 = arith.divf %103, %104 : vector<1x64xf32>
    %106 = arith.mulf %100, %100 : vector<1x64xf32>
    %107 = arith.subf %105, %106 : vector<1x64xf32>
    %108 = vector.broadcast %100 : vector<1x64xf32> to vector<4x64xf32>
    %109 = arith.subf %96, %108 : vector<4x64xf32>
    %c4 = arith.constant 4 : index
    %c0_38 = arith.constant 0 : index
    %110 = vector.load %arg4[%c4, %c0_38] : memref<7x64xf32, #tpu.memory_space<vmem>>, vector<1x64xf32>
    %cst_39 = arith.constant 8.000000e-01 : f32
    %111 = vector.broadcast %cst_39 : f32 to vector<1x64xf32>
    %112 = arith.addf %107, %111 : vector<1x64xf32>
    %113 = math.rsqrt %112 : vector<1x64xf32>
    %114 = arith.mulf %110, %113 : vector<1x64xf32>
    %115 = vector.broadcast %114 : vector<1x64xf32> to vector<4x64xf32>
    %116 = arith.mulf %109, %115 : vector<4x64xf32>
    %c5 = arith.constant 5 : index
    %c0_40 = arith.constant 0 : index
    %117 = vector.load %arg4[%c5, %c0_40] : memref<7x64xf32, #tpu.memory_space<vmem>>, vector<1x64xf32>
    %118 = vector.broadcast %117 : vector<1x64xf32> to vector<4x64xf32>
    %119 = arith.addf %116, %118 : vector<4x64xf32>
    %cst_41 = arith.constant 0.000000e+00 : f32
    %120 = vector.broadcast %cst_41 : f32 to vector<4x64xf32>
    %121 = arith.maximumf %119, %120 : vector<4x64xf32>
    %122 = vector.extract_strided_slice %121 {offsets = [0, 0], sizes = [2, 64], strides = [1, 1]} : vector<4x64xf32> to vector<2x64xf32>
    %c3_42 = arith.constant 3 : index
    %c0_43 = arith.constant 0 : index
    %c0_44 = arith.constant 0 : index
    %123 = vector.load %arg3[%c3_42, %c0_43, %c0_44] : memref<5x64x64xf32, #tpu.memory_space<vmem>>, vector<1x64x64xf32>
    %124 = vector.shape_cast %123 : vector<1x64x64xf32> to vector<64x64xf32>
    %cst_45 = arith.constant dense<0.000000e+00> : vector<2x64xf32>
    %125 = tpu.matmul %122, %124, %cst_45 {dimension_numbers = #tpu.dot_dimension_numbers<[1], [0], [0], [1], [0, 0, 1, 1], [], []>} : vector<2x64xf32>, vector<64x64xf32>, vector<2x64xf32> -> vector<2x64xf32>
    %126 = vector.extract_strided_slice %121 {offsets = [2, 0], sizes = [2, 64], strides = [1, 1]} : vector<4x64xf32> to vector<2x64xf32>
    %c4_46 = arith.constant 4 : index
    %c0_47 = arith.constant 0 : index
    %c0_48 = arith.constant 0 : index
    %127 = vector.load %arg3[%c4_46, %c0_47, %c0_48] : memref<5x64x64xf32, #tpu.memory_space<vmem>>, vector<1x64x64xf32>
    %128 = vector.shape_cast %127 : vector<1x64x64xf32> to vector<64x64xf32>
    %cst_49 = arith.constant dense<0.000000e+00> : vector<2x64xf32>
    %129 = tpu.matmul %126, %128, %cst_49 {dimension_numbers = #tpu.dot_dimension_numbers<[1], [0], [0], [1], [0, 0, 1, 1], [], []>} : vector<2x64xf32>, vector<64x64xf32>, vector<2x64xf32> -> vector<2x64xf32>
    %130 = arith.addf %125, %129 : vector<2x64xf32>
    %c6 = arith.constant 6 : index
    %c0_50 = arith.constant 0 : index
    %131 = vector.load %arg4[%c6, %c0_50] : memref<7x64xf32, #tpu.memory_space<vmem>>, vector<1x64xf32>
    %132 = vector.broadcast %131 : vector<1x64xf32> to vector<2x64xf32>
    %133 = arith.addf %130, %132 : vector<2x64xf32>
    %cst_51 = arith.constant 0.000000e+00 : f32
    %134 = vector.broadcast %cst_51 : f32 to vector<2x64xf32>
    %135 = arith.maximumf %133, %134 : vector<2x64xf32>
    %c0_52 = arith.constant 0 : index
    %c0_53 = arith.constant 0 : index
    %136 = vector.load %arg5[%c0_52, %c0_53] : memref<65x6xf32, #tpu.memory_space<vmem>>, vector<64x6xf32>
    %cst_54 = arith.constant dense<0.000000e+00> : vector<2x6xf32>
    %137 = tpu.matmul %135, %136, %cst_54 {dimension_numbers = #tpu.dot_dimension_numbers<[1], [0], [0], [1], [0, 0, 1, 1], [], []>} : vector<2x64xf32>, vector<64x6xf32>, vector<2x6xf32> -> vector<2x6xf32>
    %c64 = arith.constant 64 : index
    %c0_55 = arith.constant 0 : index
    %138 = vector.load %arg5[%c64, %c0_55] : memref<65x6xf32, #tpu.memory_space<vmem>>, vector<1x6xf32>
    %139 = vector.broadcast %138 : vector<1x6xf32> to vector<2x6xf32>
    %140 = arith.addf %137, %139 : vector<2x6xf32>
    %cst_56 = arith.constant dense<0xFF800000> : vector<2xf32>
    %141 = vector.multi_reduction <maximumf>, %140, %cst_56 [1] : vector<2x6xf32> to vector<2xf32>
    %142 = vector.shape_cast %141 : vector<2xf32> to vector<2x1xf32>
    %143 = vector.broadcast %142 : vector<2x1xf32> to vector<2x6xf32>
    %144 = arith.subf %140, %143 : vector<2x6xf32>
    %145 = math.exp %144 : vector<2x6xf32>
    %cst_57 = arith.constant dense<0.000000e+00> : vector<2xf32>
    %146 = vector.multi_reduction <add>, %145, %cst_57 [1] : vector<2x6xf32> to vector<2xf32>
    %147 = vector.shape_cast %146 : vector<2xf32> to vector<2x1xf32>
    %148 = vector.broadcast %147 : vector<2x1xf32> to vector<2x6xf32>
    %149 = arith.divf %145, %148 : vector<2x6xf32>
    %c0_58 = arith.constant 0 : index
    %c0_59 = arith.constant 0 : index
    %150 = vector.load %arg6[%c0_58, %c0_59] : memref<2x6xf32, #tpu.memory_space<vmem>>, vector<2x6xf32>
    tpu.vector_store %arg6[%c0_58, %c0_59], %149 {strides = array<i32>} : memref<2x6xf32, #tpu.memory_space<vmem>>, vector<2x6xf32>,
    return
  }
  func.func @transform_0(%arg0: i32) -> (i32, i32) {
    %c0_i32 = arith.constant 0 : i32
    %c0_i32_0 = arith.constant 0 : i32
    %c0_i32_1 = arith.constant 0 : i32
    return %c0_i32, %c0_i32_0 : i32, i32
  }
  func.func @transform_1(%arg0: i32) -> (i32, i32) {
    %c0_i32 = arith.constant 0 : i32
    %c0_i32_0 = arith.constant 0 : i32
    %c0_i32_1 = arith.constant 0 : i32
    return %c0_i32, %c0_i32_0 : i32, i32
  }
  func.func @transform_2(%arg0: i32) -> (i32, i32, i32) {
    %c0_i32 = arith.constant 0 : i32
    %c0_i32_0 = arith.constant 0 : i32
    %c0_i32_1 = arith.constant 0 : i32
    %c0_i32_2 = arith.constant 0 : i32
    return %c0_i32, %c0_i32_0, %c0_i32_1 : i32, i32, i32
  }
  func.func @transform_3(%arg0: i32) -> (i32, i32) {
    %c0_i32 = arith.constant 0 : i32
    %c0_i32_0 = arith.constant 0 : i32
    %c0_i32_1 = arith.constant 0 : i32
    return %c0_i32, %c0_i32_0 : i32, i32
  }
  func.func @transform_4(%arg0: i32) -> (i32, i32) {
    %c0_i32 = arith.constant 0 : i32
    %c0_i32_0 = arith.constant 0 : i32
    %c0_i32_1 = arith.constant 0 : i32
    return %c0_i32, %c0_i32_0 : i32, i32
  }
  func.func @transform_5(%arg0: i32) -> (i32, i32) {
    %c0_i32 = arith.constant 0 : i32
    %c0_i32_0 = arith.constant 0 : i32
    %c0_i32_1 = arith.constant 0 : i32
    return %c0_i32, %c0_i32_0 : i32, i32
  }
}

</mosaic_0001>

<bundles_post_ra>
// kernel: policy_net_forward.2
= control target key start
LH: loop header
LB: loop body
LE: loop exit
PB: predicated region body
PF: predicated region fallthrough
CT: control target
= control target key end

     0   :  { %s4010_s12 = smov 0   ;;  %s5871_s0 = inlined_call_operand.vmem [shape: f32[16,234,256], index: 0, kind: input, shape index: {}]   ;;  %s5872_s1 = inlined_call_operand.vmem [shape: f32[256,32], index: 1, kind: input, shape index: {}]   ;;  %s5873_s2 = inlined_call_operand.vmem [shape: f32[3,32], index: 2, kind: input, shape index: {}]   ;;  %s5874_s3 = inlined_call_operand.vmem [shape: f32[2,8,12,32], index: 3, kind: output, shape index: {}]  }
   0x1 LB: > { %s4016_s13 = sadd.s32 4294967295, %s3983_s12   ;;  %p3731_p0 = scmp.ge.s32.totalorder %s3983_s12, 1  ;;  %s3983_s12 = sphi %s4010_s12, %s13_s12  }
   0x2   : > { %p134_p1 = scmp.lt.s32.totalorder %s3983_s12, 5 }
   0x4   : > { %p135_p2 = pnand %p3731_p0, %p134_p1 }
   0x5   : > { %s3732_s14 = sshll.u32 (!%p135_p2), %s4016_s13, 2  ;;  %p3734_p4 = scmp.ne.s32.totalorder (!%p135_p2), %s4016_s13, 0 }
   0x6   : > { %138 = sbr.rel (%p135_p2) target bundleno = 874 (0x36a), region = 32  ;;  %p155_p3 = scmp.lt.s32.totalorder (!%p135_p2), %s3732_s14, 15 }
   0xb   : > { %s5882_s14 = smov (!%p155_p3, %s3732_s14), 15  ;;  %164 = sbr.rel (%p3734_p4) target bundleno = 79 (0x4f), region = 36 }
   0xc   : > { %s3954_s15 = smul.u32 480, %s5882_s14 }
   0xe   : > { %s4024_s18 = scalar_lea.vmem %s5871_s0, %s3954_s15 }
  0x10   : > { %vm165_vm0 = vcmask 253952   ;;  %vm168_vm1 = vcmask 261120   ;;  %v3985_v0 = vmov 0.0   ;;  %v3986_v1 = vmov -inf  }
  0x11   : > { %166 = vst.msk [vmem:[#allocation2] sm:$0x1] %vm165_vm0, %v3985_v0  ;;  %vm198_vm2 = vcmask 254976   ;;  %v3987_v2 = vmov inf  }
  0x12   : > { %167 = vst.msk [vmem:[#allocation3] sm:$0x1] %vm165_vm0, %v3985_v0 }
  0x13   : > { %169 = vst.msk [vmem:[#allocation4] sm:$0xff] %vm168_vm1, %v3986_v1 }
  0x14   : > { %170 = vst.msk [vmem:[#allocation4 + $0x8] sm:$0xff] %vm168_vm1, %v3986_v1 }
  0x15   : > { %171 = vst.msk [vmem:[#allocation4 + $0x10] sm:$0xff] %vm168_vm1, %v3986_v1 }
  0x16   : > { %172 = vst.msk [vmem:[#allocation4 + $0x18] sm:$0xff] %vm168_vm1, %v3986_v1 }
  0x17   : > { %173 = vst.msk [vmem:[#allocation4 + $0x20] sm:$0xff] %vm168_vm1, %v3986_v1 }
  0x18   : > { %174 = vst.msk [vmem:[#allocation4 + $0x28] sm:$0xff] %vm168_vm1, %v3986_v1 }
  0x19   : > { %175 = vst.msk [vmem:[#allocation4 + $0x30] sm:$0xff] %vm168_vm1, %v3986_v1 }
  0x1a   : > { %176 = vst.msk [vmem:[#allocation4 + $0x38] sm:$0xff] %vm168_vm1, %v3986_v1 }
  0x1b   : > { %177 = vst.msk [vmem:[#allocation4 + $0x40] sm:$0xff] %vm168_vm1, %v3986_v1 }
  0x1c   : > { %178 = vst.msk [vmem:[#allocation4 + $0x48] sm:$0xff] %vm168_vm1, %v3986_v1 }
  0x1d   : > { %179 = vst.msk [vmem:[#allocation4 + $0x50] sm:$0xff] %vm168_vm1, %v3986_v1 }
  0x1e   : > { %180 = vst.msk [vmem:[#allocation4 + $0x58] sm:$0xff] %vm168_vm1, %v3986_v1 }
  0x1f   : > { %181 = vst.msk [vmem:[#allocation4 + $0x60] sm:$0xff] %vm168_vm1, %v3986_v1 }
  0x20   : > { %182 = vst.msk [vmem:[#allocation4 + $0x68] sm:$0xff] %vm168_vm1, %v3986_v1 }
  0x21   : > { %183 = vst.msk [vmem:[#allocation4 + $0x70] sm:$0xff] %vm168_vm1, %v3986_v1 }
  0x22   : > { %184 = vst.msk [vmem:[#allocation4 + $0x78] sm:$0xff] %vm168_vm1, %v3986_v1 }
  0x23   : > { %185 = vst.msk [vmem:[#allocation4 + $0x80] sm:$0xff] %vm168_vm1, %v3986_v1 }
  0x24   : > { %186 = vst.msk [vmem:[#allocation4 + $0x88] sm:$0xff] %vm168_vm1, %v3986_v1 }
  0x25   : > { %187 = vst.msk [vmem:[#allocation4 + $0x90] sm:$0xff] %vm168_vm1, %v3986_v1 }
  0x26   : > { %188 = vst.msk [vmem:[#allocation4 + $0x98] sm:$0xff] %vm168_vm1, %v3986_v1 }
  0x27   : > { %189 = vst.msk [vmem:[#allocation4 + $0xa0] sm:$0xff] %vm168_vm1, %v3986_v1 }
  0x28   : > { %190 = vst.msk [vmem:[#allocation4 + $0xa8] sm:$0xff] %vm168_vm1, %v3986_v1 }
  0x29   : > { %191 = vst.msk [vmem:[#allocation4 + $0xb0] sm:$0xff] %vm168_vm1, %v3986_v1 }
  0x2a   : > { %192 = vst.msk [vmem:[#allocation4 + $0xb8] sm:$0xff] %vm168_vm1, %v3986_v1 }
  0x2b   : > { %193 = vst.msk [vmem:[#allocation4 + $0xc0] sm:$0xff] %vm168_vm1, %v3986_v1 }
  0x2c   : > { %194 = vst.msk [vmem:[#allocation4 + $0xc8] sm:$0xff] %vm168_vm1, %v3986_v1 }
  0x2d   : > { %195 = vst.msk [vmem:[#allocation4 + $0xd0] sm:$0xff] %vm168_vm1, %v3986_v1 }
  0x2e   : > { %196 = vst.msk [vmem:[#allocation4 + $0xd8] sm:$0xff] %vm168_vm1, %v3986_v1 }
  0x2f   : > { %197 = vst.msk [vmem:[#allocation4 + $0xe0] sm:$0xff] %vm168_vm1, %v3986_v1 }
  0x30   : > { %199 = vst.msk [vmem:[#allocation4 + $0xe8] sm:$0x3] %vm198_vm2, %v3986_v1 }
  0x31   : > { %200 = vst.msk [vmem:[#allocation5] sm:$0xff] %vm168_vm1, %v3987_v2 }
  0x32   : > { %201 = vst.msk [vmem:[#allocation5 + $0x8] sm:$0xff] %vm168_vm1, %v3987_v2 }
  0x33   : > { %202 = vst.msk [vmem:[#allocation5 + $0x10] sm:$0xff] %vm168_vm1, %v3987_v2 }
  0x34   : > { %203 = vst.msk [vmem:[#allocation5 + $0x18] sm:$0xff] %vm168_vm1, %v3987_v2 }
  0x35   : > { %204 = vst.msk [vmem:[#allocation5 + $0x20] sm:$0xff] %vm168_vm1, %v3987_v2 }
  0x36   : > { %205 = vst.msk [vmem:[#allocation5 + $0x28] sm:$0xff] %vm168_vm1, %v3987_v2 }
  0x37   : > { %206 = vst.msk [vmem:[#allocation5 + $0x30] sm:$0xff] %vm168_vm1, %v3987_v2 }
  0x38   : > { %207 = vst.msk [vmem:[#allocation5 + $0x38] sm:$0xff] %vm168_vm1, %v3987_v2 }
  0x39   : > { %208 = vst.msk [vmem:[#allocation5 + $0x40] sm:$0xff] %vm168_vm1, %v3987_v2 }
  0x3a   : > { %209 = vst.msk [vmem:[#allocation5 + $0x48] sm:$0xff] %vm168_vm1, %v3987_v2 }
  0x3b   : > { %210 = vst.msk [vmem:[#allocation5 + $0x50] sm:$0xff] %vm168_vm1, %v3987_v2 }
  0x3c   : > { %211 = vst.msk [vmem:[#allocation5 + $0x58] sm:$0xff] %vm168_vm1, %v3987_v2 }
  0x3d   : > { %212 = vst.msk [vmem:[#allocation5 + $0x60] sm:$0xff] %vm168_vm1, %v3987_v2 }
  0x3e   : > { %213 = vst.msk [vmem:[#allocation5 + $0x68] sm:$0xff] %vm168_vm1, %v3987_v2 }
  0x3f   : > { %214 = vst.msk [vmem:[#allocation5 + $0x70] sm:$0xff] %vm168_vm1, %v3987_v2 }
  0x40   : > { %215 = vst.msk [vmem:[#allocation5 + $0x78] sm:$0xff] %vm168_vm1, %v3987_v2 }
  0x41   : > { %216 = vst.msk [vmem:[#allocation5 + $0x80] sm:$0xff] %vm168_vm1, %v3987_v2 }
  0x42   : > { %217 = vst.msk [vmem:[#allocation5 + $0x88] sm:$0xff] %vm168_vm1, %v3987_v2 }
  0x43   : > { %218 = vst.msk [vmem:[#allocation5 + $0x90] sm:$0xff] %vm168_vm1, %v3987_v2 }
  0x44   : > { %219 = vst.msk [vmem:[#allocation5 + $0x98] sm:$0xff] %vm168_vm1, %v3987_v2 }
  0x45   : > { %220 = vst.msk [vmem:[#allocation5 + $0xa0] sm:$0xff] %vm168_vm1, %v3987_v2 }
  0x46   : > { %221 = vst.msk [vmem:[#allocation5 + $0xa8] sm:$0xff] %vm168_vm1, %v3987_v2 }
  0x47   : > { %222 = vst.msk [vmem:[#allocation5 + $0xb0] sm:$0xff] %vm168_vm1, %v3987_v2 }
  0x48   : > { %223 = vst.msk [vmem:[#allocation5 + $0xb8] sm:$0xff] %vm168_vm1, %v3987_v2 }
  0x49   : > { %224 = vst.msk [vmem:[#allocation5 + $0xc0] sm:$0xff] %vm168_vm1, %v3987_v2 }
  0x4a   : > { %225 = vst.msk [vmem:[#allocation5 + $0xc8] sm:$0xff] %vm168_vm1, %v3987_v2 }
  0x4b   : > { %226 = vst.msk [vmem:[#allocation5 + $0xd0] sm:$0xff] %vm168_vm1, %v3987_v2 }
  0x4c   : > { %227 = vst.msk [vmem:[#allocation5 + $0xd8] sm:$0xff] %vm168_vm1, %v3987_v2 }
  0x4d   : > { %228 = vst.msk [vmem:[#allocation5 + $0xe0] sm:$0xff] %vm168_vm1, %v3987_v2 }
  0x4e   : > { %229 = vst.msk [vmem:[#allocation5 + $0xe8] sm:$0x3] %vm198_vm2, %v3987_v2 }
  0x4f PF: > { %v4090_v3 = vld [vmem:[%s5872_s1 + $0x78] sm:$0xff]  ;;  %v4095_v4 = vld [vmem:[%s5872_s1 + $0x70] sm:$0xff]  ;;  %v4114_v7 = vld [vmem:[%s5872_s1 + $0x68] sm:$0xff]  ;;  %vm629_vm4 = vcmask 261120   ;;  %p3915_p5 = scmp.ne.s32.totalorder %s4016_s13, 3 }
  0x50   : > { %v4100_v5 = vld [vmem:[%s5872_s1 + $0xf8] sm:$0xff]  ;;  %324 = vmatpush.msra.mxu0 %v4090_v3  ;;  %1038 = vmatpush.msra.mxu2 %v4090_v3  ;;  %v4107_v6 = vld [vmem:[%s5872_s1 + $0xf0] sm:$0xff]  ;;  %v4121_v8 = vld [vmem:[%s5872_s1 + $0xe8] sm:$0xff] }
  0x51   : > { %431 = vmatpush.msra.mxu1 %v4100_v5  ;;  %1145 = vmatpush.msra.mxu3 %v4100_v5  ;;  %v4128_v9 = vld [vmem:[%s5872_s1 + $0x60] sm:$0xff]  ;;  %v4142_v11 = vld [vmem:[%s5872_s1 + $0x58] sm:$0xff]  ;;  %v4156_v13 = vld [vmem:[%s5872_s1 + $0x50] sm:$0xff] }
  0x52   : > { %325 = vmatpush.msra.mxu0 %v4095_v4  ;;  %1039 = vmatpush.msra.mxu2 %v4095_v4  ;;  %v4135_v10 = vld [vmem:[%s5872_s1 + $0xe0] sm:$0xff]  ;;  %v4149_v12 = vld [vmem:[%s5872_s1 + $0xd8] sm:$0xff]  ;;  %v4163_v14 = vld [vmem:[%s5872_s1 + $0xd0] sm:$0xff] }
  0x53   : > { %432 = vmatpush.msra.mxu1 %v4107_v6  ;;  %1146 = vmatpush.msra.mxu3 %v4107_v6  ;;  %v4170_v15 = vld [vmem:[%s5872_s1 + $0x48] sm:$0xff]  ;;  %v4184_v17 = vld [vmem:[%s5872_s1 + $0x40] sm:$0xff]  ;;  %v4198_v19 = vld [vmem:[%s5872_s1 + $0x38] sm:$0xff] }
  0x54   : > { %326 = vmatpush.msra.mxu0 %v4114_v7  ;;  %1040 = vmatpush.msra.mxu2 %v4114_v7  ;;  %v4177_v16 = vld [vmem:[%s5872_s1 + $0xc8] sm:$0xff]  ;;  %v4191_v18 = vld [vmem:[%s5872_s1 + $0xc0] sm:$0xff]  ;;  %v4205_v20 = vld [vmem:[%s5872_s1 + $0xb8] sm:$0xff] }
  0x55   : > { %433 = vmatpush.msra.mxu1 %v4121_v8  ;;  %1147 = vmatpush.msra.mxu3 %v4121_v8  ;;  %v4212_v21 = vld [vmem:[%s5872_s1 + $0x30] sm:$0xff]  ;;  %v4226_v23 = vld [vmem:[%s5872_s1 + $0x28] sm:$0xff]  ;;  %v4240_v25 = vld [vmem:[%s5872_s1 + $0x20] sm:$0xff] }
  0x56   : > { %327 = vmatpush.msra.mxu0 %v4128_v9  ;;  %1041 = vmatpush.msra.mxu2 %v4128_v9  ;;  %v4219_v22 = vld [vmem:[%s5872_s1 + $0xb0] sm:$0xff]  ;;  %v4233_v24 = vld [vmem:[%s5872_s1 + $0xa8] sm:$0xff]  ;;  %v4247_v26 = vld [vmem:[%s5872_s1 + $0xa0] sm:$0xff] }
  0x57   : > { %434 = vmatpush.msra.mxu1 %v4135_v10  ;;  %1148 = vmatpush.msra.mxu3 %v4135_v10  ;;  %v4254_v27 = vld [vmem:[%s5872_s1 + $0x18] sm:$0xff]  ;;  %v4268_v29 = vld [vmem:[%s5872_s1 + $0x10] sm:$0xff]  ;;  %v4282_v31 = vld [vmem:[%s5872_s1 + $0x8] sm:$0xff] }
  0x58   : > { %328 = vmatpush.msra.mxu0 %v4142_v11  ;;  %1042 = vmatpush.msra.mxu2 %v4142_v11  ;;  %v4261_v28 = vld [vmem:[%s5872_s1 + $0x98] sm:$0xff]  ;;  %v4275_v30 = vld [vmem:[%s5872_s1 + $0x90] sm:$0xff]  ;;  %v4289_v32 = vld [vmem:[%s5872_s1 + $0x88] sm:$0xff] }
  0x59   : > { %435 = vmatpush.msra.mxu1 %v4149_v12  ;;  %1149 = vmatpush.msra.mxu3 %v4149_v12  ;;  %v4296_v33 = vld [vmem:[%s5872_s1] sm:$0xff]  ;;  %v264_v37 = vld [vmem:[%s4024_s18 + $0x8] sm:$0xff]  ;;  %v265_v39 = vld [vmem:[%s4024_s18 + $0x10] sm:$0xff] }
  0x5a   : > { %329 = vmatpush.msra.mxu0 %v4156_v13  ;;  %1043 = vmatpush.msra.mxu2 %v4156_v13  ;;  %v263_v34 = vld [vmem:[%s4024_s18] sm:$0xff]  ;;  %v3736_v38 = vld [vmem:[%s4024_s18 + $0x1e8] sm:$0xff]  ;;  %v3737_v40 = vld [vmem:[%s4024_s18 + $0x1f0] sm:$0xff] }
  0x5b   : > { %436 = vmatpush.msra.mxu1 %v4163_v14  ;;  %1150 = vmatpush.msra.mxu3 %v4163_v14  ;;  %v3735_v35 = vld [vmem:[%s4024_s18 + $0x1e0] sm:$0xff]  ;;  %v266_v41 = vld [vmem:[%s4024_s18 + $0x18] sm:$0xff]  ;;  %v268_v45 = vld [vmem:[%s4024_s18 + $0x28] sm:$0xff] }
  0x5c   : > { %330 = vmatpush.msra.mxu0 %v4170_v15  ;;  %1044 = vmatpush.msra.mxu2 %v4170_v15  ;;  %v4307_v36 = vld [vmem:[%s5872_s1 + $0x80] sm:$0xff]  ;;  %v3738_v42 = vld [vmem:[%s4024_s18 + $0x1f8] sm:$0xff]  ;;  %v3740_v46 = vld [vmem:[%s4024_s18 + $0x208] sm:$0xff] }
  0x5d   : > { %437 = vmatpush.msra.mxu1 %v4177_v16  ;;  %1151 = vmatpush.msra.mxu3 %v4177_v16  ;;  %v267_v43 = vld [vmem:[%s4024_s18 + $0x20] sm:$0xff]  ;;  %v269_v47 = vld [vmem:[%s4024_s18 + $0x30] sm:$0xff]  ;;  %v270_v49 = vld [vmem:[%s4024_s18 + $0x38] sm:$0xff] }
  0x5e   : > { %331 = vmatpush.msra.mxu0 %v4184_v17  ;;  %1045 = vmatpush.msra.mxu2 %v4184_v17  ;;  %v3739_v44 = vld [vmem:[%s4024_s18 + $0x200] sm:$0xff]  ;;  %v3741_v48 = vld [vmem:[%s4024_s18 + $0x210] sm:$0xff]  ;;  %v3742_v50 = vld [vmem:[%s4024_s18 + $0x218] sm:$0xff] }
  0x5f   : > { %438 = vmatpush.msra.mxu1 %v4191_v18  ;;  %1152 = vmatpush.msra.mxu3 %v4191_v18  ;;  %v271_v51 = vld [vmem:[%s4024_s18 + $0x40] sm:$0xff]  ;;  %v272_v53 = vld [vmem:[%s4024_s18 + $0x48] sm:$0xff]  ;;  %v273_v55 = vld [vmem:[%s4024_s18 + $0x50] sm:$0xff] }
  0x60   : > { %332 = vmatpush.msra.mxu0 %v4198_v19  ;;  %1046 = vmatpush.msra.mxu2 %v4198_v19  ;;  %v3743_v52 = vld [vmem:[%s4024_s18 + $0x220] sm:$0xff]  ;;  %v3744_v54 = vld [vmem:[%s4024_s18 + $0x228] sm:$0xff]  ;;  %v3745_v56 = vld [vmem:[%s4024_s18 + $0x230] sm:$0xff] }
  0x61   : > { %439 = vmatpush.msra.mxu1 %v4205_v20  ;;  %1153 = vmatpush.msra.mxu3 %v4205_v20  ;;  %v274_v57 = vld [vmem:[%s4024_s18 + $0x58] sm:$0xff]  ;;  %v275_v59 = vld [vmem:[%s4024_s18 + $0x60] sm:$0xff]  ;;  %v276_v61 = vld [vmem:[%s4024_s18 + $0x68] sm:$0xff] }
  0x62   : > { %333 = vmatpush.msra.mxu0 %v4212_v21  ;;  %1047 = vmatpush.msra.mxu2 %v4212_v21  ;;  %v3746_v58 = vld [vmem:[%s4024_s18 + $0x238] sm:$0xff]  ;;  %v3747_v60 = vld [vmem:[%s4024_s18 + $0x240] sm:$0xff]  ;;  %v3748_v62 = vld [vmem:[%s4024_s18 + $0x248] sm:$0xff] }
  0x63   : > { %440 = vmatpush.msra.mxu1 %v4219_v22  ;;  %1154 = vmatpush.msra.mxu3 %v4219_v22  ;;  %v277_v63 = vld [vmem:[%s4024_s18 + $0x70] sm:$0xff]  ;;  %v278_v1 = vld [vmem:[%s4024_s18 + $0x78] sm:$0xff] }
  0x64   : > { %334 = vmatpush.msra.mxu0 %v4226_v23  ;;  %1048 = vmatpush.msra.mxu2 %v4226_v23  ;;  %v3749_v0 = vld [vmem:[%s4024_s18 + $0x250] sm:$0xff]  ;;  %v3750_v2 = vld [vmem:[%s4024_s18 + $0x258] sm:$0xff] }
  0x65   : > { %441 = vmatpush.msra.mxu1 %v4233_v24  ;;  %1155 = vmatpush.msra.mxu3 %v4233_v24 }
  0x66   : > { %335 = vmatpush.msra.mxu0 %v4240_v25  ;;  %1049 = vmatpush.msra.mxu2 %v4240_v25 }
  0x67   : > { %442 = vmatpush.msra.mxu1 %v4247_v26  ;;  %1156 = vmatpush.msra.mxu3 %v4247_v26 }
  0x68   : > { %336 = vmatpush.msra.mxu0 %v4254_v27  ;;  %1050 = vmatpush.msra.mxu2 %v4254_v27 }
  0x69   : > { %443 = vmatpush.msra.mxu1 %v4261_v28  ;;  %1157 = vmatpush.msra.mxu3 %v4261_v28 }
  0x6a   : > { %337 = vmatpush.msra.mxu0 %v4268_v29  ;;  %1051 = vmatpush.msra.mxu2 %v4268_v29 }
  0x6b   : > { %444 = vmatpush.msra.mxu1 %v4275_v30  ;;  %1158 = vmatpush.msra.mxu3 %v4275_v30 }
  0x6c   : > { %338 = vmatpush.msra.mxu0 %v4282_v31  ;;  %1052 = vmatpush.msra.mxu2 %v4282_v31 }
  0x6d   : > { %445 = vmatpush.msra.mxu1 %v4289_v32  ;;  %1159 = vmatpush.msra.mxu3 %v4289_v32 }
  0x6e   : > { %339 = vmatpush.msra.mxu0 %v4296_v33  ;;  %1053 = vmatpush.msra.mxu2 %v4296_v33 }
  0x6f   : > { %340 = vmatmul.f32.vlgmr.msra.gmra.mxu0 %v263_v34  ;;  %1054 = vmatmul.f32.vlgmr.msra.gmra.mxu2 %v3735_v35  ;;  %v3766_v34 = vld [vmem:[%s4024_s18 + $0x2d8] sm:$0xff]  ;;  %v4442_v35 = vld [vmem:[%s5873_s2] ss:$0 sm:$0xff] }
  0x70   : > { %1749 = vmatpush.msrb.mxu0 %v4090_v3  ;;  %446 = vmatpush.msra.mxu1 %v4307_v36 }
  0x71   : > { %1160 = vmatpush.msra.mxu3 %v4307_v36  ;;  %447 = vmatmul.f32.vlgmr.msra.gmra.mxu1 %v264_v37  ;;  %v295_v37 = vld [vmem:[%s4024_s18 + $0x100] sm:$0xff] }
  0x72   : > { %1161 = vmatmul.f32.vlgmr.msra.gmra.mxu3 %v3736_v38  ;;  %1856 = vmatpush.msrb.mxu1 %v4100_v5  ;;  %v3767_v38 = vld [vmem:[%s4024_s18 + $0x2e0] sm:$0xff] }
  0x73   : > { %2460 = vmatpush.msrb.mxu2 %v4090_v3  ;;  %2567 = vmatpush.msrb.mxu3 %v4100_v5  ;;  %v279_v3 = vld [vmem:[%s4024_s18 + $0x80] sm:$0xff]  ;;  %v280_v5 = vld [vmem:[%s4024_s18 + $0x88] sm:$0xff] }
  0x74   : > { %1750 = vmatpush.msrb.mxu0 %v4095_v4  ;;  %1857 = vmatpush.msrb.mxu1 %v4107_v6 }
  0x75   : > { %2461 = vmatpush.msrb.mxu2 %v4095_v4  ;;  %2568 = vmatpush.msrb.mxu3 %v4107_v6  ;;  %v3751_v4 = vld [vmem:[%s4024_s18 + $0x260] sm:$0xff]  ;;  %v3752_v6 = vld [vmem:[%s4024_s18 + $0x268] sm:$0xff] }
  0x76   : > { %1751 = vmatpush.msrb.mxu0 %v4114_v7  ;;  %1858 = vmatpush.msrb.mxu1 %v4121_v8 }
  0x77   : > { %343 = vmatmul.f32.gmra.mxu0 %v265_v39  ;;  %1057 = vmatmul.f32.gmra.mxu2 %v3737_v40 }
  0x78   : > { %2462 = vmatpush.msrb.mxu2 %v4114_v7  ;;  %2569 = vmatpush.msrb.mxu3 %v4121_v8  ;;  %v281_v7 = vld [vmem:[%s4024_s18 + $0x90] sm:$0xff] }
  0x79   : > { %450 = vmatmul.f32.gmra.mxu1 %v266_v41  ;;  %1752 = vmatpush.msrb.mxu0 %v4128_v9  ;;  %v3753_v8 = vld [vmem:[%s4024_s18 + $0x270] sm:$0xff]  ;;  %v296_v41 = vld [vmem:[%s4024_s18 + $0x108] sm:$0xff] }
  0x7a   : > { %1164 = vmatmul.f32.gmra.mxu3 %v3738_v42  ;;  %1859 = vmatpush.msrb.mxu1 %v4135_v10 }
  0x7b   : > { %2463 = vmatpush.msrb.mxu2 %v4128_v9  ;;  %2570 = vmatpush.msrb.mxu3 %v4135_v10  ;;  %v282_v9 = vld [vmem:[%s4024_s18 + $0x98] sm:$0xff] }
  0x7c   : > { %1753 = vmatpush.msrb.mxu0 %v4142_v11  ;;  %1860 = vmatpush.msrb.mxu1 %v4149_v12  ;;  %v3754_v10 = vld [vmem:[%s4024_s18 + $0x278] sm:$0xff] }
  0x7d   : > { %2464 = vmatpush.msrb.mxu2 %v4142_v11  ;;  %2571 = vmatpush.msrb.mxu3 %v4149_v12  ;;  %v283_v11 = vld [vmem:[%s4024_s18 + $0xa0] sm:$0xff] }
  0x7e   : > { %1754 = vmatpush.msrb.mxu0 %v4156_v13  ;;  %1861 = vmatpush.msrb.mxu1 %v4163_v14  ;;  %v3755_v12 = vld [vmem:[%s4024_s18 + $0x280] sm:$0xff] }
  0x7f   : > { %346 = vmatmul.f32.gmra.mxu0 %v267_v43  ;;  %1060 = vmatmul.f32.gmra.mxu2 %v3739_v44  ;;  %v3768_v43 = vld [vmem:[%s4024_s18 + $0x2e8] sm:$0xff] }
  0x80   : > { %2465 = vmatpush.msrb.mxu2 %v4156_v13  ;;  %2572 = vmatpush.msrb.mxu3 %v4163_v14  ;;  %v284_v13 = vld [vmem:[%s4024_s18 + $0xa8] sm:$0xff] }
  0x81   : > { %453 = vmatmul.f32.gmra.mxu1 %v268_v45  ;;  %1755 = vmatpush.msrb.mxu0 %v4170_v15  ;;  %v3756_v14 = vld [vmem:[%s4024_s18 + $0x288] sm:$0xff] }
  0x82   : > { %1167 = vmatmul.f32.gmra.mxu3 %v3740_v46  ;;  %1862 = vmatpush.msrb.mxu1 %v4177_v16  ;;  %v797_v45 = vld [vmem:[#allocation4] sm:$0xff]  ;;  %v887_v46 = vld [vmem:[#allocation5] sm:$0xff] }
  0x83   : > { %2466 = vmatpush.msrb.mxu2 %v4170_v15  ;;  %2573 = vmatpush.msrb.mxu3 %v4177_v16  ;;  %v285_v15 = vld [vmem:[%s4024_s18 + $0xb0] sm:$0xff] }
  0x84   : > { %1756 = vmatpush.msrb.mxu0 %v4184_v17  ;;  %1863 = vmatpush.msrb.mxu1 %v4191_v18  ;;  %v3757_v16 = vld [vmem:[%s4024_s18 + $0x290] sm:$0xff] }
  0x85   : > { %2467 = vmatpush.msrb.mxu2 %v4184_v17  ;;  %2574 = vmatpush.msrb.mxu3 %v4191_v18  ;;  %v286_v17 = vld [vmem:[%s4024_s18 + $0xb8] sm:$0xff] }
  0x86   : > { %1757 = vmatpush.msrb.mxu0 %v4198_v19  ;;  %1864 = vmatpush.msrb.mxu1 %v4205_v20  ;;  %v3758_v18 = vld [vmem:[%s4024_s18 + $0x298] sm:$0xff] }
  0x87   : > { %349 = vmatmul.f32.gmra.mxu0 %v269_v47  ;;  %1063 = vmatmul.f32.gmra.mxu2 %v3741_v48 }
  0x88   : > { %2468 = vmatpush.msrb.mxu2 %v4198_v19  ;;  %2575 = vmatpush.msrb.mxu3 %v4205_v20  ;;  %v287_v19 = vld [vmem:[%s4024_s18 + $0xc0] sm:$0xff] }
  0x89   : > { %456 = vmatmul.f32.gmra.mxu1 %v270_v49  ;;  %1758 = vmatpush.msrb.mxu0 %v4212_v21  ;;  %v3759_v20 = vld [vmem:[%s4024_s18 + $0x2a0] sm:$0xff] }
  0x8a   : > { %1170 = vmatmul.f32.gmra.mxu3 %v3742_v50  ;;  %1865 = vmatpush.msrb.mxu1 %v4219_v22 }
  0x8b   : > { %2469 = vmatpush.msrb.mxu2 %v4212_v21  ;;  %2576 = vmatpush.msrb.mxu3 %v4219_v22  ;;  %v288_v21 = vld [vmem:[%s4024_s18 + $0xc8] sm:$0xff] }
  0x8c   : > { %1759 = vmatpush.msrb.mxu0 %v4226_v23  ;;  %1866 = vmatpush.msrb.mxu1 %v4233_v24  ;;  %v3760_v22 = vld [vmem:[%s4024_s18 + $0x2a8] sm:$0xff] }
  0x8d   : > { %2470 = vmatpush.msrb.mxu2 %v4226_v23  ;;  %2577 = vmatpush.msrb.mxu3 %v4233_v24  ;;  %v289_v23 = vld [vmem:[%s4024_s18 + $0xd0] sm:$0xff] }
  0x8e   : > { %1760 = vmatpush.msrb.mxu0 %v4240_v25  ;;  %1867 = vmatpush.msrb.mxu1 %v4247_v26  ;;  %v3761_v24 = vld [vmem:[%s4024_s18 + $0x2b0] sm:$0xff] }
  0x8f   : > { %352 = vmatmul.f32.gmra.mxu0 %v271_v51  ;;  %1066 = vmatmul.f32.gmra.mxu2 %v3743_v52 }
  0x90   : > { %2471 = vmatpush.msrb.mxu2 %v4240_v25  ;;  %2578 = vmatpush.msrb.mxu3 %v4247_v26  ;;  %v290_v25 = vld [vmem:[%s4024_s18 + $0xd8] sm:$0xff] }
  0x91   : > { %459 = vmatmul.f32.gmra.mxu1 %v272_v53  ;;  %1761 = vmatpush.msrb.mxu0 %v4254_v27  ;;  %v3762_v26 = vld [vmem:[%s4024_s18 + $0x2b8] sm:$0xff]  ;;  %v297_v53 = vld [vmem:[%s4024_s18 + $0x110] sm:$0xff] }
  0x92   : > { %1173 = vmatmul.f32.gmra.mxu3 %v3744_v54  ;;  %1868 = vmatpush.msrb.mxu1 %v4261_v28  ;;  %v3769_v54 = vld [vmem:[%s4024_s18 + $0x2f0] sm:$0xff] }
  0x93   : > { %2472 = vmatpush.msrb.mxu2 %v4254_v27  ;;  %2579 = vmatpush.msrb.mxu3 %v4261_v28  ;;  %v291_v27 = vld [vmem:[%s4024_s18 + $0xe0] sm:$0xff] }
  0x94   : > { %1762 = vmatpush.msrb.mxu0 %v4268_v29  ;;  %1869 = vmatpush.msrb.mxu1 %v4275_v30  ;;  %v3763_v28 = vld [vmem:[%s4024_s18 + $0x2c0] sm:$0xff] }
  0x95   : > { %2473 = vmatpush.msrb.mxu2 %v4268_v29  ;;  %2580 = vmatpush.msrb.mxu3 %v4275_v30  ;;  %v292_v29 = vld [vmem:[%s4024_s18 + $0xe8] sm:$0xff] }
  0x96   : > { %1763 = vmatpush.msrb.mxu0 %v4282_v31  ;;  %1870 = vmatpush.msrb.mxu1 %v4289_v32  ;;  %v3764_v30 = vld [vmem:[%s4024_s18 + $0x2c8] sm:$0xff] }
  0x97   : > { %355 = vmatmul.f32.gmra.mxu0 %v273_v55  ;;  %1069 = vmatmul.f32.gmra.mxu2 %v3745_v56 }
  0x98   : > { %2474 = vmatpush.msrb.mxu2 %v4282_v31  ;;  %2581 = vmatpush.msrb.mxu3 %v4289_v32  ;;  %v293_v31 = vld [vmem:[%s4024_s18 + $0xf0] sm:$0xff] }
  0x99   : > { %462 = vmatmul.f32.gmra.mxu1 %v274_v57  ;;  %1764 = vmatpush.msrb.mxu0 %v4296_v33  ;;  %v3765_v32 = vld [vmem:[%s4024_s18 + $0x2d0] sm:$0xff] }
  0x9a   : > { %1176 = vmatmul.f32.gmra.mxu3 %v3746_v58  ;;  %1871 = vmatpush.msrb.mxu1 %v4307_v36 }
  0x9b   : > { %2475 = vmatpush.msrb.mxu2 %v4296_v33  ;;  %2582 = vmatpush.msrb.mxu3 %v4307_v36  ;;  %v294_v33 = vld [vmem:[%s4024_s18 + $0xf8] sm:$0xff] }
  0x9f   : > { %358 = vmatmul.f32.gmra.mxu0 %v275_v59  ;;  %1072 = vmatmul.f32.gmra.mxu2 %v3747_v60  ;;  %v298_v59 = vld [vmem:[%s4024_s18 + $0x118] sm:$0xff] }
  0xa1   : > { %465 = vmatmul.f32.gmra.mxu1 %v276_v61  ;;  %v3770_v61 = vld [vmem:[%s4024_s18 + $0x2f8] sm:$0xff] }
  0xa2   : > { %1179 = vmatmul.f32.gmra.mxu3 %v3748_v62 }
  0xa7   : > { %361 = vmatmul.f32.gmra.mxu0 %v277_v63  ;;  %1075 = vmatmul.f32.gmra.mxu2 %v3749_v0 }
  0xa9   : > { %468 = vmatmul.f32.gmra.mxu1 %v278_v1  ;;  %v798_v1 = vld [vmem:[#allocation4 + $0x8] sm:$0xff] }
  0xaa   : > { %1182 = vmatmul.f32.gmra.mxu3 %v3750_v2  ;;  %v888_v2 = vld [vmem:[#allocation5 + $0x8] sm:$0xff] }
  0xaf   : > { %364 = vmatmul.f32.gmra.mxu0 %v279_v3  ;;  %1078 = vmatmul.f32.gmra.mxu2 %v3751_v4 }
  0xb1   : > { %471 = vmatmul.f32.gmra.mxu1 %v280_v5 }
  0xb2   : > { %1185 = vmatmul.f32.gmra.mxu3 %v3752_v6 }
  0xb7   : > { %367 = vmatmul.f32.gmra.mxu0 %v281_v7  ;;  %1081 = vmatmul.f32.gmra.mxu2 %v3753_v8 }
  0xb9   : > { %474 = vmatmul.f32.gmra.mxu1 %v282_v9 }
  0xba   : > { %1188 = vmatmul.f32.gmra.mxu3 %v3754_v10 }
  0xbf   : > { %370 = vmatmul.f32.gmra.mxu0 %v283_v11  ;;  %1084 = vmatmul.f32.gmra.mxu2 %v3755_v12 }
  0xc1   : > { %477 = vmatmul.f32.gmra.mxu1 %v284_v13  ;;  %v299_v13 = vld [vmem:[%s4024_s18 + $0x120] sm:$0xff] }
  0xc2   : > { %1191 = vmatmul.f32.gmra.mxu3 %v3756_v14  ;;  %v3771_v14 = vld [vmem:[%s4024_s18 + $0x300] sm:$0xff] }
  0xc7   : > { %373 = vmatmul.f32.gmra.mxu0 %v285_v15  ;;  %1087 = vmatmul.f32.gmra.mxu2 %v3757_v16 }
  0xc9   : > { %480 = vmatmul.f32.gmra.mxu1 %v286_v17 }
  0xca   : > { %1194 = vmatmul.f32.gmra.mxu3 %v3758_v18 }
  0xcf   : > { %376 = vmatmul.f32.gmra.mxu0 %v287_v19  ;;  %1090 = vmatmul.f32.gmra.mxu2 %v3759_v20 }
  0xd1   : > { %483 = vmatmul.f32.gmra.mxu1 %v288_v21 }
  0xd2   : > { %1197 = vmatmul.f32.gmra.mxu3 %v3760_v22 }
  0xd7   : > { %379 = vmatmul.f32.gmra.mxu0 %v289_v23  ;;  %1093 = vmatmul.f32.gmra.mxu2 %v3761_v24 }
  0xd9   : > { %486 = vmatmul.f32.gmra.mxu1 %v290_v25 }
  0xda   : > { %1200 = vmatmul.f32.gmra.mxu3 %v3762_v26  ;;  %v300_v26 = vld [vmem:[%s4024_s18 + $0x128] sm:$0xff] }
  0xdf   : > { %382 = vmatmul.f32.gmra.mxu0 %v291_v27  ;;  %1096 = vmatmul.f32.gmra.mxu2 %v3763_v28 }
  0xe1   : > { %489 = vmatmul.f32.gmra.mxu1 %v292_v29 }
  0xe2   : > { %1203 = vmatmul.f32.gmra.mxu3 %v3764_v30  ;;  %v3772_v30 = vld [vmem:[%s4024_s18 + $0x308] sm:$0xff] }
  0xe7   : > { %385 = vmatmul.f32.gmra.mxu0 %v293_v31  ;;  %1099 = vmatmul.f32.gmra.mxu2 %v3765_v32 }
  0xe9   : > { %492 = vmatmul.f32.gmra.mxu1 %v294_v33  ;;  %v799_v33 = vld [vmem:[#allocation4 + $0x10] sm:$0xff] }
  0xea   : > { %1206 = vmatmul.f32.gmra.mxu3 %v3766_v34 }
  0xec   : > { %v341_v36 = vpop.f32.mrf.mxu0 }
  0xed   : > { %v342_v39 = vadd.f32 %v4442_v35, %v341_v36 }
  0xee   : > { %v448_v40 = vpop.f32.mrf.mxu1 }
  0xef   : > { %v449_v42 = vadd.f32 %v448_v40, %v342_v39  ;;  %388 = vmatmul.f32.gmra.mxu0 %v295_v37  ;;  %1102 = vmatmul.f32.gmra.mxu2 %v3767_v38  ;;  %v889_v38 = vld [vmem:[#allocation5 + $0x10] sm:$0xff] }
  0xf1   : > { %vm538_vm3 = vcmp.gt.f32.partialorder %v449_v42, 0.0  ;;  %v568_v44 = vmul.f32 0.2, %v449_v42  ;;  %495 = vmatmul.f32.gmra.mxu1 %v296_v41 }
  0xf2   : > { %1209 = vmatmul.f32.gmra.mxu3 %v3768_v43  ;;  %v1055_v47 = vpop.f32.mrf.mxu2 }
  0xf3   : > { %v598_v48 = vsel %vm538_vm3, %v449_v42, %v568_v44  ;;  %v1056_v49 = vadd.f32 %v4442_v35, %v1055_v47 }
  0xf4   : > { %v827_v50 = vmax.f32 %v797_v45, %v598_v48  ;;  %v917_v51 = vmin.f32 %v887_v46, %v598_v48  ;;  %v344_v52 = vpop.f32.mrf.mxu0  ;;  %v700_v63 = vmul.f32 %v598_v48, %v598_v48  ;;  %v630_v4 = vsel %vm629_vm4, %v598_v48, 0.0 }
  0xf5   : > { %v345_v55 = vadd.f32 %v4442_v35, %v344_v52  ;;  %v1162_v56 = vpop.f32.mrf.mxu3 }
  0xf6   : > { %857 = vst.msk [vmem:[#allocation4] sm:$0xff] %vm629_vm4, %v827_v50  ;;  %v1163_v57 = vadd.f32 %v1162_v56, %v1056_v49  ;;  %v451_v58 = vpop.f32.mrf.mxu1  ;;  %v730_v15 = vsel %vm629_vm4, %v700_v63, 0.0  ;;  %v301_v49 = vld [vmem:[%s4024_s18 + $0x130] sm:$0xff]  ;;  %v302_v63 = vld [vmem:[%s4024_s18 + $0x138] sm:$0xff] }
  0xf7   : > { %947 = vst.msk [vmem:[#allocation5] sm:$0xff] %vm629_vm4, %v917_v51  ;;  %v452_v60 = vadd.f32 %v451_v58, %v345_v55  ;;  %391 = vmatmul.f32.gmra.mxu0 %v297_v53  ;;  %1105 = vmatmul.f32.gmra.mxu2 %v3769_v54  ;;  %v3773_v50 = vld [vmem:[%s4024_s18 + $0x310] sm:$0xff] }
  0xf8   : > { %vm1252_vm5 = vcmp.gt.f32.partialorder %v1163_v57, 0.0  ;;  %v1282_v62 = vmul.f32 0.2, %v1163_v57 }
  0xf9   : > { %vm539_vm6 = vcmp.gt.f32.partialorder %v452_v60, 0.0  ;;  %v569_v0 = vmul.f32 0.2, %v452_v60  ;;  %498 = vmatmul.f32.gmra.mxu1 %v298_v59 }
  0xfa   : > { %1212 = vmatmul.f32.gmra.mxu3 %v3770_v61  ;;  %v1058_v3 = vpop.f32.mrf.mxu2  ;;  %v1312_v5 = vsel %vm1252_vm5, %v1163_v57, %v1282_v62 }
  0xfb   : > { %v599_v6 = vsel %vm539_vm6, %v452_v60, %v569_v0  ;;  %v1059_v7 = vadd.f32 %v4442_v35, %v1058_v3  ;;  %v1411_v20 = vmul.f32 %v1312_v5, %v1312_v5  ;;  %v1343_v34 = vsel %vm629_vm4, %v1312_v5, 0.0  ;;  %v3774_v3 = vld [vmem:[%s4024_s18 + $0x318] sm:$0xff] }
  0xfc   : > { %v631_v8 = vsel %vm629_vm4, %v599_v6, 0.0  ;;  %v701_v9 = vmul.f32 %v599_v6, %v599_v6  ;;  %v828_v10 = vmax.f32 %v798_v1, %v599_v6  ;;  %v918_v11 = vmin.f32 %v888_v2, %v599_v6  ;;  %v347_v12 = vpop.f32.mrf.mxu0  ;;  %v800_v6 = vld [vmem:[#allocation4 + $0x18] sm:$0xff] }
  0xfd   : > { %v1508_v16 = vld [vmem:[#allocation4] sm:$0xff]  ;;  %v632_v17 = vadd.f32 %v631_v8, %v630_v4  ;;  %v348_v18 = vadd.f32 %v4442_v35, %v347_v12  ;;  %v1165_v19 = vpop.f32.mrf.mxu3  ;;  %v1441_v36 = vsel %vm629_vm4, %v1411_v20, 0.0  ;;  %v890_v8 = vld [vmem:[#allocation5 + $0x18] sm:$0xff] }
  0xfe   : > { %v1538_v21 = vmax.f32 %v1508_v16, %v1312_v5  ;;  %v1598_v22 = vld [vmem:[#allocation5] sm:$0xff]  ;;  %v731_v23 = vsel %vm629_vm4, %v701_v9, 0.0  ;;  %858 = vst.msk [vmem:[#allocation4 + $0x8] sm:$0xff] %vm629_vm4, %v828_v10  ;;  %v1166_v24 = vadd.f32 %v1165_v19, %v1059_v7  ;;  %v454_v25 = vpop.f32.mrf.mxu1  ;;  %v303_v19 = vld [vmem:[%s4024_s18 + $0x140] sm:$0xff] }
  0xff   : > { %v1628_v27 = vmin.f32 %v1598_v22, %v1312_v5  ;;  %v732_v28 = vadd.f32 %v731_v23, %v730_v15  ;;  %948 = vst.msk [vmem:[#allocation5 + $0x8] sm:$0xff] %vm629_vm4, %v918_v11  ;;  %v455_v29 = vadd.f32 %v454_v25, %v348_v18  ;;  %394 = vmatmul.f32.gmra.mxu0 %v299_v13  ;;  %v3775_v20 = vld [vmem:[%s4024_s18 + $0x320] sm:$0xff] }
 0x100   : > { %1108 = vmatmul.f32.gmra.mxu2 %v3771_v14  ;;  %1568 = vst.msk [vmem:[#allocation4] sm:$0xff] %vm629_vm4, %v1538_v21  ;;  %vm1253_vm7 = vcmp.gt.f32.partialorder %v1166_v24, 0.0  ;;  %v1283_v31 = vmul.f32 0.2, %v1166_v24 }
 0x101   : > { %1658 = vst.msk [vmem:[#allocation5] sm:$0xff] %vm629_vm4, %v1628_v27  ;;  %vm540_vm8 = vcmp.gt.f32.partialorder %v455_v29, 0.0  ;;  %v570_v32 = vmul.f32 0.2, %v455_v29  ;;  %501 = vmatmul.f32.gmra.mxu1 %v300_v26 }
 0x102   : > { %v1313_v37 = vsel %vm1253_vm7, %v1166_v24, %v1283_v31  ;;  %1215 = vmatmul.f32.gmra.mxu3 %v3772_v30  ;;  %v1061_v39 = vpop.f32.mrf.mxu2 }
 0x103   : > { %v1344_v40 = vsel %vm629_vm4, %v1313_v37, 0.0  ;;  %v1412_v41 = vmul.f32 %v1313_v37, %v1313_v37  ;;  %v600_v42 = vsel %vm540_vm8, %v455_v29, %v570_v32  ;;  %v1062_v43 = vadd.f32 %v4442_v35, %v1061_v39 }
 0x104   : > { %v1345_v44 = vadd.f32 %v1344_v40, %v1343_v34  ;;  %v633_v45 = vsel %vm629_vm4, %v600_v42, 0.0  ;;  %v702_v46 = vmul.f32 %v600_v42, %v600_v42  ;;  %v829_v47 = vmax.f32 %v799_v33, %v600_v42  ;;  %v350_v48 = vpop.f32.mrf.mxu0  ;;  %v304_v33 = vld [vmem:[%s4024_s18 + $0x148] sm:$0xff] }
 0x105   : > { %v1442_v51 = vsel %vm629_vm4, %v1412_v41, 0.0  ;;  %v1509_v52 = vld [vmem:[#allocation4 + $0x8] sm:$0xff]  ;;  %v634_v53 = vadd.f32 %v633_v45, %v632_v17  ;;  %v919_v54 = vmin.f32 %v889_v38, %v600_v42  ;;  %v351_v55 = vadd.f32 %v4442_v35, %v350_v48  ;;  %v1168_v56 = vpop.f32.mrf.mxu3  ;;  %v801_v41 = vld [vmem:[#allocation4 + $0x20] sm:$0xff] }
 0x106   : > { %v1443_v57 = vadd.f32 %v1442_v51, %v1441_v36  ;;  %v1539_v58 = vmax.f32 %v1509_v52, %v1313_v37  ;;  %v1599_v59 = vld [vmem:[#allocation5 + $0x8] sm:$0xff]  ;;  %v733_v60 = vsel %vm629_vm4, %v702_v46, 0.0  ;;  %859 = vst.msk [vmem:[#allocation4 + $0x10] sm:$0xff] %vm629_vm4, %v829_v47  ;;  %v1169_v61 = vadd.f32 %v1168_v56, %v1062_v43  ;;  %v457_v62 = vpop.f32.mrf.mxu1  ;;  %v3776_v38 = vld [vmem:[%s4024_s18 + $0x328] sm:$0xff]  ;;  %v891_v43 = vld [vmem:[#allocation5 + $0x20] sm:$0xff] }
 0x107   : > { %v1629_v0 = vmin.f32 %v1599_v59, %v1313_v37  ;;  %v734_v1 = vadd.f32 %v733_v60, %v732_v28  ;;  %949 = vst.msk [vmem:[#allocation5 + $0x10] sm:$0xff] %vm629_vm4, %v919_v54  ;;  %v458_v2 = vadd.f32 %v457_v62, %v351_v55  ;;  %397 = vmatmul.f32.gmra.mxu0 %v301_v49  ;;  %v305_v54 = vld [vmem:[%s4024_s18 + $0x150] sm:$0xff] }
 0x108   : > { %1111 = vmatmul.f32.gmra.mxu2 %v3773_v50  ;;  %1569 = vst.msk [vmem:[#allocation4 + $0x8] sm:$0xff] %vm629_vm4, %v1539_v58  ;;  %vm1254_vm9 = vcmp.gt.f32.partialorder %v1169_v61, 0.0  ;;  %v1284_v4 = vmul.f32 0.2, %v1169_v61  ;;  %v3777_v55 = vld [vmem:[%s4024_s18 + $0x330] sm:$0xff] }
 0x109   : > { %1659 = vst.msk [vmem:[#allocation5 + $0x8] sm:$0xff] %vm629_vm4, %v1629_v0  ;;  %vm541_vm10 = vcmp.gt.f32.partialorder %v458_v2, 0.0  ;;  %v571_v5 = vmul.f32 0.2, %v458_v2  ;;  %504 = vmatmul.f32.gmra.mxu1 %v302_v63 }
 0x10a   : > { %v1314_v7 = vsel %vm1254_vm9, %v1169_v61, %v1284_v4  ;;  %1218 = vmatmul.f32.gmra.mxu3 %v3774_v3  ;;  %v1064_v9 = vpop.f32.mrf.mxu2  ;;  %v306_v4 = vld [vmem:[%s4024_s18 + $0x158] sm:$0xff] }
 0x10b   : > { %v1346_v10 = vsel %vm629_vm4, %v1314_v7, 0.0  ;;  %v1413_v11 = vmul.f32 %v1314_v7, %v1314_v7  ;;  %v601_v12 = vsel %vm541_vm10, %v458_v2, %v571_v5  ;;  %v1065_v13 = vadd.f32 %v4442_v35, %v1064_v9 }
 0x10c   : > { %v1347_v14 = vadd.f32 %v1346_v10, %v1345_v44  ;;  %v635_v15 = vsel %vm629_vm4, %v601_v12, 0.0  ;;  %v703_v16 = vmul.f32 %v601_v12, %v601_v12  ;;  %v830_v17 = vmax.f32 %v800_v6, %v601_v12  ;;  %v353_v18 = vpop.f32.mrf.mxu0 }
 0x10d   : > { %v1444_v21 = vsel %vm629_vm4, %v1413_v11, 0.0  ;;  %v1510_v22 = vld [vmem:[#allocation4 + $0x10] sm:$0xff]  ;;  %v636_v23 = vadd.f32 %v635_v15, %v634_v53  ;;  %v920_v24 = vmin.f32 %v890_v8, %v601_v12  ;;  %v354_v25 = vadd.f32 %v4442_v35, %v353_v18  ;;  %v1171_v26 = vpop.f32.mrf.mxu3  ;;  %v802_v11 = vld [vmem:[#allocation4 + $0x28] sm:$0xff] }
 0x10e   : > { %v1445_v27 = vadd.f32 %v1444_v21, %v1443_v57  ;;  %v1540_v28 = vmax.f32 %v1510_v22, %v1314_v7  ;;  %v1600_v29 = vld [vmem:[#allocation5 + $0x10] sm:$0xff]  ;;  %v735_v30 = vsel %vm629_vm4, %v703_v16, 0.0  ;;  %860 = vst.msk [vmem:[#allocation4 + $0x18] sm:$0xff] %vm629_vm4, %v830_v17  ;;  %v1172_v31 = vadd.f32 %v1171_v26, %v1065_v13  ;;  %v460_v32 = vpop.f32.mrf.mxu1  ;;  %v3778_v8 = vld [vmem:[%s4024_s18 + $0x338] sm:$0xff] }
 0x10f   : > { %v1630_v34 = vmin.f32 %v1600_v29, %v1314_v7  ;;  %v736_v36 = vadd.f32 %v735_v30, %v734_v1  ;;  %950 = vst.msk [vmem:[#allocation5 + $0x18] sm:$0xff] %vm629_vm4, %v920_v24  ;;  %v461_v37 = vadd.f32 %v460_v32, %v354_v25  ;;  %400 = vmatmul.f32.gmra.mxu0 %v303_v19  ;;  %v892_v13 = vld [vmem:[#allocation5 + $0x28] sm:$0xff] }
 0x110   : > { %1114 = vmatmul.f32.gmra.mxu2 %v3775_v20  ;;  %1570 = vst.msk [vmem:[#allocation4 + $0x10] sm:$0xff] %vm629_vm4, %v1540_v28  ;;  %vm1255_vm11 = vcmp.gt.f32.partialorder %v1172_v31, 0.0  ;;  %v1285_v39 = vmul.f32 0.2, %v1172_v31  ;;  %v307_v24 = vld [vmem:[%s4024_s18 + $0x160] sm:$0xff] }
 0x111   : > { %1660 = vst.msk [vmem:[#allocation5 + $0x10] sm:$0xff] %vm629_vm4, %v1630_v34  ;;  %vm542_vm12 = vcmp.gt.f32.partialorder %v461_v37, 0.0  ;;  %v572_v40 = vmul.f32 0.2, %v461_v37  ;;  %507 = vmatmul.f32.gmra.mxu1 %v304_v33  ;;  %v3779_v25 = vld [vmem:[%s4024_s18 + $0x340] sm:$0xff] }
 0x112   : > { %v1315_v42 = vsel %vm1255_vm11, %v1172_v31, %v1285_v39  ;;  %1221 = vmatmul.f32.gmra.mxu3 %v3776_v38  ;;  %v1067_v44 = vpop.f32.mrf.mxu2  ;;  %v308_v39 = vld [vmem:[%s4024_s18 + $0x168] sm:$0xff] }
 0x113   : > { %v1348_v45 = vsel %vm629_vm4, %v1315_v42, 0.0  ;;  %v1414_v46 = vmul.f32 %v1315_v42, %v1315_v42  ;;  %v602_v47 = vsel %vm542_vm12, %v461_v37, %v572_v40  ;;  %v1068_v48 = vadd.f32 %v4442_v35, %v1067_v44 }
 0x114   : > { %v1349_v49 = vadd.f32 %v1348_v45, %v1347_v14  ;;  %v637_v50 = vsel %vm629_vm4, %v602_v47, 0.0  ;;  %v704_v51 = vmul.f32 %v602_v47, %v602_v47  ;;  %v831_v52 = vmax.f32 %v801_v41, %v602_v47  ;;  %v356_v53 = vpop.f32.mrf.mxu0 }
 0x115   : > { %v1446_v56 = vsel %vm629_vm4, %v1414_v46, 0.0  ;;  %v1511_v57 = vld [vmem:[#allocation4 + $0x18] sm:$0xff]  ;;  %v638_v58 = vadd.f32 %v637_v50, %v636_v23  ;;  %v921_v59 = vmin.f32 %v891_v43, %v602_v47  ;;  %v357_v60 = vadd.f32 %v4442_v35, %v356_v53  ;;  %v1174_v61 = vpop.f32.mrf.mxu3  ;;  %v3780_v43 = vld [vmem:[%s4024_s18 + $0x348] sm:$0xff]  ;;  %v803_v46 = vld [vmem:[#allocation4 + $0x30] sm:$0xff] }
 0x116   : > { %v1447_v62 = vadd.f32 %v1446_v56, %v1445_v27  ;;  %v1541_v63 = vmax.f32 %v1511_v57, %v1315_v42  ;;  %v1601_v0 = vld [vmem:[#allocation5 + $0x18] sm:$0xff]  ;;  %v737_v1 = vsel %vm629_vm4, %v704_v51, 0.0  ;;  %861 = vst.msk [vmem:[#allocation4 + $0x20] sm:$0xff] %vm629_vm4, %v831_v52  ;;  %v1175_v2 = vadd.f32 %v1174_v61, %v1068_v48  ;;  %v463_v3 = vpop.f32.mrf.mxu1  ;;  %v893_v48 = vld [vmem:[#allocation5 + $0x30] sm:$0xff] }
 0x117   : > { %v1631_v5 = vmin.f32 %v1601_v0, %v1315_v42  ;;  %v738_v6 = vadd.f32 %v737_v1, %v736_v36  ;;  %951 = vst.msk [vmem:[#allocation5 + $0x20] sm:$0xff] %vm629_vm4, %v921_v59  ;;  %v464_v7 = vadd.f32 %v463_v3, %v357_v60  ;;  %403 = vmatmul.f32.gmra.mxu0 %v305_v54  ;;  %v309_v59 = vld [vmem:[%s4024_s18 + $0x170] sm:$0xff] }
 0x118   : > { %1117 = vmatmul.f32.gmra.mxu2 %v3777_v55  ;;  %1571 = vst.msk [vmem:[#allocation4 + $0x18] sm:$0xff] %vm629_vm4, %v1541_v63  ;;  %vm1256_vm13 = vcmp.gt.f32.partialorder %v1175_v2, 0.0  ;;  %v1286_v9 = vmul.f32 0.2, %v1175_v2  ;;  %v3781_v60 = vld [vmem:[%s4024_s18 + $0x350] sm:$0xff] }
 0x119   : > { %1661 = vst.msk [vmem:[#allocation5 + $0x18] sm:$0xff] %vm629_vm4, %v1631_v5  ;;  %vm543_vm14 = vcmp.gt.f32.partialorder %v464_v7, 0.0  ;;  %v573_v10 = vmul.f32 0.2, %v464_v7  ;;  %510 = vmatmul.f32.gmra.mxu1 %v306_v4 }
 0x11a   : > { %v1316_v12 = vsel %vm1256_vm13, %v1175_v2, %v1286_v9  ;;  %1224 = vmatmul.f32.gmra.mxu3 %v3778_v8  ;;  %v1070_v14 = vpop.f32.mrf.mxu2  ;;  %v310_v9 = vld [vmem:[%s4024_s18 + $0x178] sm:$0xff] }
 0x11b   : > { %v1350_v15 = vsel %vm629_vm4, %v1316_v12, 0.0  ;;  %v1415_v16 = vmul.f32 %v1316_v12, %v1316_v12  ;;  %v603_v17 = vsel %vm543_vm14, %v464_v7, %v573_v10  ;;  %v1071_v18 = vadd.f32 %v4442_v35, %v1070_v14 }
 0x11c   : > { %v1351_v19 = vadd.f32 %v1350_v15, %v1349_v49  ;;  %v639_v20 = vsel %vm629_vm4, %v603_v17, 0.0  ;;  %v705_v21 = vmul.f32 %v603_v17, %v603_v17  ;;  %v832_v22 = vmax.f32 %v802_v11, %v603_v17  ;;  %v359_v23 = vpop.f32.mrf.mxu0 }
 0x11d   : > { %v1448_v26 = vsel %vm629_vm4, %v1415_v16, 0.0  ;;  %v1512_v27 = vld [vmem:[#allocation4 + $0x20] sm:$0xff]  ;;  %v640_v28 = vadd.f32 %v639_v20, %v638_v58  ;;  %v922_v29 = vmin.f32 %v892_v13, %v603_v17  ;;  %v360_v30 = vadd.f32 %v4442_v35, %v359_v23  ;;  %v1177_v31 = vpop.f32.mrf.mxu3  ;;  %v3782_v13 = vld [vmem:[%s4024_s18 + $0x358] sm:$0xff] }
 0x11e   : > { %v1449_v32 = vadd.f32 %v1448_v26, %v1447_v62  ;;  %v1542_v33 = vmax.f32 %v1512_v27, %v1316_v12  ;;  %v1602_v34 = vld [vmem:[#allocation5 + $0x20] sm:$0xff]  ;;  %v739_v36 = vsel %vm629_vm4, %v705_v21, 0.0  ;;  %862 = vst.msk [vmem:[#allocation4 + $0x28] sm:$0xff] %vm629_vm4, %v832_v22  ;;  %v1178_v37 = vadd.f32 %v1177_v31, %v1071_v18  ;;  %v466_v38 = vpop.f32.mrf.mxu1  ;;  %v804_v16 = vld [vmem:[#allocation4 + $0x38] sm:$0xff]  ;;  %v894_v18 = vld [vmem:[#allocation5 + $0x38] sm:$0xff] }
 0x11f   : > { %v1632_v40 = vmin.f32 %v1602_v34, %v1316_v12  ;;  %v740_v41 = vadd.f32 %v739_v36, %v738_v6  ;;  %952 = vst.msk [vmem:[#allocation5 + $0x28] sm:$0xff] %vm629_vm4, %v922_v29  ;;  %v467_v42 = vadd.f32 %v466_v38, %v360_v30  ;;  %406 = vmatmul.f32.gmra.mxu0 %v307_v24  ;;  %v311_v29 = vld [vmem:[%s4024_s18 + $0x180] sm:$0xff] }
 0x120   : > { %1120 = vmatmul.f32.gmra.mxu2 %v3779_v25  ;;  %1572 = vst.msk [vmem:[#allocation4 + $0x20] sm:$0xff] %vm629_vm4, %v1542_v33  ;;  %vm1257_vm15 = vcmp.gt.f32.partialorder %v1178_v37, 0.0  ;;  %v1287_v44 = vmul.f32 0.2, %v1178_v37  ;;  %v3783_v30 = vld [vmem:[%s4024_s18 + $0x360] sm:$0xff] }
 0x121   : > { %1662 = vst.msk [vmem:[#allocation5 + $0x20] sm:$0xff] %vm629_vm4, %v1632_v40  ;;  %vm544_vm0 = vcmp.gt.f32.partialorder %v467_v42, 0.0  ;;  %v574_v45 = vmul.f32 0.2, %v467_v42  ;;  %513 = vmatmul.f32.gmra.mxu1 %v308_v39 }
 0x122   : > { %v1317_v47 = vsel %vm1257_vm15, %v1178_v37, %v1287_v44  ;;  %1227 = vmatmul.f32.gmra.mxu3 %v3780_v43  ;;  %v1073_v49 = vpop.f32.mrf.mxu2  ;;  %v312_v44 = vld [vmem:[%s4024_s18 + $0x188] sm:$0xff] }
 0x123   : > { %v1352_v50 = vsel %vm629_vm4, %v1317_v47, 0.0  ;;  %v1416_v51 = vmul.f32 %v1317_v47, %v1317_v47  ;;  %v604_v52 = vsel %vm544_vm0, %v467_v42, %v574_v45  ;;  %v1074_v53 = vadd.f32 %v4442_v35, %v1073_v49 }
 0x124   : > { %v1353_v54 = vadd.f32 %v1352_v50, %v1351_v19  ;;  %v641_v55 = vsel %vm629_vm4, %v604_v52, 0.0  ;;  %v706_v56 = vmul.f32 %v604_v52, %v604_v52  ;;  %v833_v57 = vmax.f32 %v803_v46, %v604_v52  ;;  %v362_v58 = vpop.f32.mrf.mxu0 }
 0x125   : > { %v1450_v61 = vsel %vm629_vm4, %v1416_v51, 0.0  ;;  %v1513_v62 = vld [vmem:[#allocation4 + $0x28] sm:$0xff]  ;;  %v642_v63 = vadd.f32 %v641_v55, %v640_v28  ;;  %v923_v0 = vmin.f32 %v893_v48, %v604_v52  ;;  %v363_v1 = vadd.f32 %v4442_v35, %v362_v58  ;;  %v1180_v2 = vpop.f32.mrf.mxu3  ;;  %v805_v51 = vld [vmem:[#allocation4 + $0x40] sm:$0xff] }
 0x126   : > { %v1451_v3 = vadd.f32 %v1450_v61, %v1449_v32  ;;  %v1543_v4 = vmax.f32 %v1513_v62, %v1317_v47  ;;  %v1603_v5 = vld [vmem:[#allocation5 + $0x28] sm:$0xff]  ;;  %v741_v6 = vsel %vm629_vm4, %v706_v56, 0.0  ;;  %863 = vst.msk [vmem:[#allocation4 + $0x30] sm:$0xff] %vm629_vm4, %v833_v57  ;;  %v1181_v7 = vadd.f32 %v1180_v2, %v1074_v53  ;;  %v469_v8 = vpop.f32.mrf.mxu1  ;;  %v3784_v48 = vld [vmem:[%s4024_s18 + $0x368] sm:$0xff]  ;;  %v895_v53 = vld [vmem:[#allocation5 + $0x40] sm:$0xff] }
 0x127   : > { %v1633_v10 = vmin.f32 %v1603_v5, %v1317_v47  ;;  %v742_v11 = vadd.f32 %v741_v6, %v740_v41  ;;  %953 = vst.msk [vmem:[#allocation5 + $0x30] sm:$0xff] %vm629_vm4, %v923_v0  ;;  %v470_v12 = vadd.f32 %v469_v8, %v363_v1  ;;  %409 = vmatmul.f32.gmra.mxu0 %v309_v59  ;;  %v313_v0 = vld [vmem:[%s4024_s18 + $0x190] sm:$0xff] }
 0x128   : > { %1123 = vmatmul.f32.gmra.mxu2 %v3781_v60  ;;  %1573 = vst.msk [vmem:[#allocation4 + $0x28] sm:$0xff] %vm629_vm4, %v1543_v4  ;;  %vm1258_vm1 = vcmp.gt.f32.partialorder %v1181_v7, 0.0  ;;  %v1288_v14 = vmul.f32 0.2, %v1181_v7  ;;  %v3785_v1 = vld [vmem:[%s4024_s18 + $0x370] sm:$0xff] }
 0x129   : > { %1663 = vst.msk [vmem:[#allocation5 + $0x28] sm:$0xff] %vm629_vm4, %v1633_v10  ;;  %vm545_vm2 = vcmp.gt.f32.partialorder %v470_v12, 0.0  ;;  %v575_v15 = vmul.f32 0.2, %v470_v12  ;;  %516 = vmatmul.f32.gmra.mxu1 %v310_v9 }
 0x12a   : > { %v1318_v17 = vsel %vm1258_vm1, %v1181_v7, %v1288_v14  ;;  %1230 = vmatmul.f32.gmra.mxu3 %v3782_v13  ;;  %v1076_v19 = vpop.f32.mrf.mxu2  ;;  %v314_v14 = vld [vmem:[%s4024_s18 + $0x198] sm:$0xff] }
 0x12b   : > { %v1354_v20 = vsel %vm629_vm4, %v1318_v17, 0.0  ;;  %v1417_v21 = vmul.f32 %v1318_v17, %v1318_v17  ;;  %v605_v22 = vsel %vm545_vm2, %v470_v12, %v575_v15  ;;  %v1077_v23 = vadd.f32 %v4442_v35, %v1076_v19 }
 0x12c   : > { %v1355_v24 = vadd.f32 %v1354_v20, %v1353_v54  ;;  %v643_v25 = vsel %vm629_vm4, %v605_v22, 0.0  ;;  %v707_v26 = vmul.f32 %v605_v22, %v605_v22  ;;  %v834_v27 = vmax.f32 %v804_v16, %v605_v22  ;;  %v365_v28 = vpop.f32.mrf.mxu0 }
 0x12d   : > { %v1452_v31 = vsel %vm629_vm4, %v1417_v21, 0.0  ;;  %v1514_v32 = vld [vmem:[#allocation4 + $0x30] sm:$0xff]  ;;  %v644_v33 = vadd.f32 %v643_v25, %v642_v63  ;;  %v924_v34 = vmin.f32 %v894_v18, %v605_v22  ;;  %v366_v36 = vadd.f32 %v4442_v35, %v365_v28  ;;  %v1183_v37 = vpop.f32.mrf.mxu3  ;;  %v806_v21 = vld [vmem:[#allocation4 + $0x48] sm:$0xff] }
 0x12e   : > { %v1453_v38 = vadd.f32 %v1452_v31, %v1451_v3  ;;  %v1544_v39 = vmax.f32 %v1514_v32, %v1318_v17  ;;  %v1604_v40 = vld [vmem:[#allocation5 + $0x30] sm:$0xff]  ;;  %v743_v41 = vsel %vm629_vm4, %v707_v26, 0.0  ;;  %864 = vst.msk [vmem:[#allocation4 + $0x38] sm:$0xff] %vm629_vm4, %v834_v27  ;;  %v1184_v42 = vadd.f32 %v1183_v37, %v1077_v23  ;;  %v472_v43 = vpop.f32.mrf.mxu1  ;;  %v3786_v18 = vld [vmem:[%s4024_s18 + $0x378] sm:$0xff] }
 0x12f   : > { %v1634_v45 = vmin.f32 %v1604_v40, %v1318_v17  ;;  %v744_v46 = vadd.f32 %v743_v41, %v742_v11  ;;  %954 = vst.msk [vmem:[#allocation5 + $0x38] sm:$0xff] %vm629_vm4, %v924_v34  ;;  %v473_v47 = vadd.f32 %v472_v43, %v366_v36  ;;  %412 = vmatmul.f32.gmra.mxu0 %v311_v29  ;;  %v896_v23 = vld [vmem:[#allocation5 + $0x48] sm:$0xff] }
 0x130   : > { %1126 = vmatmul.f32.gmra.mxu2 %v3783_v30  ;;  %1574 = vst.msk [vmem:[#allocation4 + $0x30] sm:$0xff] %vm629_vm4, %v1544_v39  ;;  %vm1259_vm3 = vcmp.gt.f32.partialorder %v1184_v42, 0.0  ;;  %v1289_v49 = vmul.f32 0.2, %v1184_v42  ;;  %v315_v34 = vld [vmem:[%s4024_s18 + $0x1a0] sm:$0xff] }
 0x131   : > { %1664 = vst.msk [vmem:[#allocation5 + $0x30] sm:$0xff] %vm629_vm4, %v1634_v45  ;;  %vm546_vm5 = vcmp.gt.f32.partialorder %v473_v47, 0.0  ;;  %v576_v50 = vmul.f32 0.2, %v473_v47  ;;  %519 = vmatmul.f32.gmra.mxu1 %v312_v44  ;;  %v3787_v36 = vld [vmem:[%s4024_s18 + $0x380] sm:$0xff] }
 0x132   : > { %v1319_v52 = vsel %vm1259_vm3, %v1184_v42, %v1289_v49  ;;  %1233 = vmatmul.f32.gmra.mxu3 %v3784_v48  ;;  %v1079_v54 = vpop.f32.mrf.mxu2  ;;  %v316_v49 = vld [vmem:[%s4024_s18 + $0x1a8] sm:$0xff] }
 0x133   : > { %v1356_v55 = vsel %vm629_vm4, %v1319_v52, 0.0  ;;  %v1418_v56 = vmul.f32 %v1319_v52, %v1319_v52  ;;  %v606_v57 = vsel %vm546_vm5, %v473_v47, %v576_v50  ;;  %v1080_v58 = vadd.f32 %v4442_v35, %v1079_v54 }
 0x134   : > { %v1357_v59 = vadd.f32 %v1356_v55, %v1355_v24  ;;  %v645_v60 = vsel %vm629_vm4, %v606_v57, 0.0  ;;  %v708_v61 = vmul.f32 %v606_v57, %v606_v57  ;;  %v835_v62 = vmax.f32 %v805_v51, %v606_v57  ;;  %v368_v63 = vpop.f32.mrf.mxu0 }
 0x135   : > { %v1454_v2 = vsel %vm629_vm4, %v1418_v56, 0.0  ;;  %v1515_v3 = vld [vmem:[#allocation4 + $0x38] sm:$0xff]  ;;  %v646_v4 = vadd.f32 %v645_v60, %v644_v33  ;;  %v925_v5 = vmin.f32 %v895_v53, %v606_v57  ;;  %v369_v6 = vadd.f32 %v4442_v35, %v368_v63  ;;  %v1186_v7 = vpop.f32.mrf.mxu3  ;;  %v3788_v53 = vld [vmem:[%s4024_s18 + $0x388] sm:$0xff]  ;;  %v807_v56 = vld [vmem:[#allocation4 + $0x50] sm:$0xff] }
 0x136   : > { %v1455_v8 = vadd.f32 %v1454_v2, %v1453_v38  ;;  %v1545_v9 = vmax.f32 %v1515_v3, %v1319_v52  ;;  %v1605_v10 = vld [vmem:[#allocation5 + $0x38] sm:$0xff]  ;;  %v745_v11 = vsel %vm629_vm4, %v708_v61, 0.0  ;;  %865 = vst.msk [vmem:[#allocation4 + $0x40] sm:$0xff] %vm629_vm4, %v835_v62  ;;  %v1187_v12 = vadd.f32 %v1186_v7, %v1080_v58  ;;  %v475_v13 = vpop.f32.mrf.mxu1  ;;  %v897_v58 = vld [vmem:[#allocation5 + $0x50] sm:$0xff] }
 0x137   : > { %v1635_v15 = vmin.f32 %v1605_v10, %v1319_v52  ;;  %v746_v16 = vadd.f32 %v745_v11, %v744_v46  ;;  %955 = vst.msk [vmem:[#allocation5 + $0x40] sm:$0xff] %vm629_vm4, %v925_v5  ;;  %v476_v17 = vadd.f32 %v475_v13, %v369_v6  ;;  %415 = vmatmul.f32.gmra.mxu0 %v313_v0  ;;  %v317_v5 = vld [vmem:[%s4024_s18 + $0x1b0] sm:$0xff] }
 0x138   : > { %1129 = vmatmul.f32.gmra.mxu2 %v3785_v1  ;;  %1575 = vst.msk [vmem:[#allocation4 + $0x38] sm:$0xff] %vm629_vm4, %v1545_v9  ;;  %vm1260_vm6 = vcmp.gt.f32.partialorder %v1187_v12, 0.0  ;;  %v1290_v19 = vmul.f32 0.2, %v1187_v12  ;;  %v3789_v6 = vld [vmem:[%s4024_s18 + $0x390] sm:$0xff] }
 0x139   : > { %1665 = vst.msk [vmem:[#allocation5 + $0x38] sm:$0xff] %vm629_vm4, %v1635_v15  ;;  %vm547_vm7 = vcmp.gt.f32.partialorder %v476_v17, 0.0  ;;  %v577_v20 = vmul.f32 0.2, %v476_v17  ;;  %522 = vmatmul.f32.gmra.mxu1 %v314_v14 }
 0x13a   : > { %v1320_v22 = vsel %vm1260_vm6, %v1187_v12, %v1290_v19  ;;  %1236 = vmatmul.f32.gmra.mxu3 %v3786_v18  ;;  %v1082_v24 = vpop.f32.mrf.mxu2  ;;  %v318_v19 = vld [vmem:[%s4024_s18 + $0x1b8] sm:$0xff] }
 0x13b   : > { %v1358_v25 = vsel %vm629_vm4, %v1320_v22, 0.0  ;;  %v1419_v26 = vmul.f32 %v1320_v22, %v1320_v22  ;;  %v607_v27 = vsel %vm547_vm7, %v476_v17, %v577_v20  ;;  %v1083_v28 = vadd.f32 %v4442_v35, %v1082_v24 }
 0x13c   : > { %v1359_v29 = vadd.f32 %v1358_v25, %v1357_v59  ;;  %v647_v30 = vsel %vm629_vm4, %v607_v27, 0.0  ;;  %v709_v31 = vmul.f32 %v607_v27, %v607_v27  ;;  %v836_v32 = vmax.f32 %v806_v21, %v607_v27  ;;  %v371_v33 = vpop.f32.mrf.mxu0 }
 0x13d   : > { %v1456_v37 = vsel %vm629_vm4, %v1419_v26, 0.0  ;;  %v1516_v38 = vld [vmem:[#allocation4 + $0x40] sm:$0xff]  ;;  %v648_v39 = vadd.f32 %v647_v30, %v646_v4  ;;  %v926_v40 = vmin.f32 %v896_v23, %v607_v27  ;;  %v372_v41 = vadd.f32 %v4442_v35, %v371_v33  ;;  %v1189_v42 = vpop.f32.mrf.mxu3  ;;  %v3790_v23 = vld [vmem:[%s4024_s18 + $0x398] sm:$0xff] }
 0x13e   : > { %v1457_v43 = vadd.f32 %v1456_v37, %v1455_v8  ;;  %v1546_v44 = vmax.f32 %v1516_v38, %v1320_v22  ;;  %v1606_v45 = vld [vmem:[#allocation5 + $0x40] sm:$0xff]  ;;  %v747_v46 = vsel %vm629_vm4, %v709_v31, 0.0  ;;  %866 = vst.msk [vmem:[#allocation4 + $0x48] sm:$0xff] %vm629_vm4, %v836_v32  ;;  %v1190_v47 = vadd.f32 %v1189_v42, %v1083_v28  ;;  %v478_v48 = vpop.f32.mrf.mxu1  ;;  %v808_v26 = vld [vmem:[#allocation4 + $0x58] sm:$0xff]  ;;  %v898_v28 = vld [vmem:[#allocation5 + $0x58] sm:$0xff] }
 0x13f   : > { %v1636_v50 = vmin.f32 %v1606_v45, %v1320_v22  ;;  %v748_v51 = vadd.f32 %v747_v46, %v746_v16  ;;  %956 = vst.msk [vmem:[#allocation5 + $0x48] sm:$0xff] %vm629_vm4, %v926_v40  ;;  %v479_v52 = vadd.f32 %v478_v48, %v372_v41  ;;  %418 = vmatmul.f32.gmra.mxu0 %v315_v34  ;;  %v319_v40 = vld [vmem:[%s4024_s18 + $0x1c0] sm:$0xff] }
 0x140   : > { %1132 = vmatmul.f32.gmra.mxu2 %v3787_v36  ;;  %1576 = vst.msk [vmem:[#allocation4 + $0x40] sm:$0xff] %vm629_vm4, %v1546_v44  ;;  %vm1261_vm8 = vcmp.gt.f32.partialorder %v1190_v47, 0.0  ;;  %v1291_v54 = vmul.f32 0.2, %v1190_v47  ;;  %v3791_v41 = vld [vmem:[%s4024_s18 + $0x3a0] sm:$0xff] }
 0x141   : > { %1666 = vst.msk [vmem:[#allocation5 + $0x40] sm:$0xff] %vm629_vm4, %v1636_v50  ;;  %vm548_vm9 = vcmp.gt.f32.partialorder %v479_v52, 0.0  ;;  %v578_v55 = vmul.f32 0.2, %v479_v52  ;;  %525 = vmatmul.f32.gmra.mxu1 %v316_v49 }
 0x142   : > { %v1321_v57 = vsel %vm1261_vm8, %v1190_v47, %v1291_v54  ;;  %1239 = vmatmul.f32.gmra.mxu3 %v3788_v53  ;;  %v1085_v59 = vpop.f32.mrf.mxu2  ;;  %v320_v54 = vld [vmem:[%s4024_s18 + $0x1c8] sm:$0xff] }
 0x143   : > { %v1360_v60 = vsel %vm629_vm4, %v1321_v57, 0.0  ;;  %v1420_v61 = vmul.f32 %v1321_v57, %v1321_v57  ;;  %v608_v62 = vsel %vm548_vm9, %v479_v52, %v578_v55  ;;  %v1086_v63 = vadd.f32 %v4442_v35, %v1085_v59 }
 0x144   : > { %v1361_v0 = vadd.f32 %v1360_v60, %v1359_v29  ;;  %v649_v1 = vsel %vm629_vm4, %v608_v62, 0.0  ;;  %v710_v2 = vmul.f32 %v608_v62, %v608_v62  ;;  %v837_v3 = vmax.f32 %v807_v56, %v608_v62  ;;  %v374_v4 = vpop.f32.mrf.mxu0  ;;  %v809_v60 = vld [vmem:[#allocation4 + $0x60] sm:$0xff] }
 0x145   : > { %v1458_v7 = vsel %vm629_vm4, %v1420_v61, 0.0  ;;  %v1517_v8 = vld [vmem:[#allocation4 + $0x48] sm:$0xff]  ;;  %v650_v9 = vadd.f32 %v649_v1, %v648_v39  ;;  %v927_v10 = vmin.f32 %v897_v58, %v608_v62  ;;  %v375_v11 = vadd.f32 %v4442_v35, %v374_v4  ;;  %v1192_v12 = vpop.f32.mrf.mxu3  ;;  %v899_v62 = vld [vmem:[#allocation5 + $0x60] sm:$0xff] }
 0x146   : > { %v1459_v13 = vadd.f32 %v1458_v7, %v1457_v43  ;;  %v1547_v14 = vmax.f32 %v1517_v8, %v1321_v57  ;;  %v1607_v15 = vld [vmem:[#allocation5 + $0x48] sm:$0xff]  ;;  %v749_v16 = vsel %vm629_vm4, %v710_v2, 0.0  ;;  %867 = vst.msk [vmem:[#allocation4 + $0x50] sm:$0xff] %vm629_vm4, %v837_v3  ;;  %v1193_v17 = vadd.f32 %v1192_v12, %v1086_v63  ;;  %v481_v18 = vpop.f32.mrf.mxu1 }
 0x147   : > { %v1637_v20 = vmin.f32 %v1607_v15, %v1321_v57  ;;  %v750_v21 = vadd.f32 %v749_v16, %v748_v51  ;;  %957 = vst.msk [vmem:[#allocation5 + $0x50] sm:$0xff] %vm629_vm4, %v927_v10  ;;  %v482_v22 = vadd.f32 %v481_v18, %v375_v11  ;;  %421 = vmatmul.f32.gmra.mxu0 %v317_v5  ;;  %v4617_v3 = vld [vmem:[%s5873_s2] ss:$0 sm:$0xff]  ;;  %v321_v10 = vld [vmem:[%s4024_s18 + $0x1d0] sm:$0x3] }
 0x148   : > { %1135 = vmatmul.f32.gmra.mxu2 %v3789_v6  ;;  %1577 = vst.msk [vmem:[#allocation4 + $0x48] sm:$0xff] %vm629_vm4, %v1547_v14  ;;  %vm1262_vm10 = vcmp.gt.f32.partialorder %v1193_v17, 0.0  ;;  %v1292_v24 = vmul.f32 0.2, %v1193_v17  ;;  %v3793_v11 = vld [vmem:[%s4024_s18 + $0x3b0] sm:$0x3] }
 0x149   : > { %1667 = vst.msk [vmem:[#allocation5 + $0x48] sm:$0xff] %vm629_vm4, %v1637_v20  ;;  %vm549_vm11 = vcmp.gt.f32.partialorder %v482_v22, 0.0  ;;  %v579_v25 = vmul.f32 0.2, %v482_v22  ;;  %528 = vmatmul.f32.gmra.mxu1 %v318_v19 }
 0x14a   : > { %v1322_v27 = vsel %vm1262_vm10, %v1193_v17, %v1292_v24  ;;  %1242 = vmatmul.f32.gmra.mxu3 %v3790_v23  ;;  %v1088_v29 = vpop.f32.mrf.mxu2  ;;  %v322_v24 = vld [vmem:[%s4024_s18 + $0x1d8] sm:$0x3] }
 0x14b   : > { %v1362_v30 = vsel %vm629_vm4, %v1322_v27, 0.0  ;;  %v1421_v31 = vmul.f32 %v1322_v27, %v1322_v27  ;;  %v609_v32 = vsel %vm549_vm11, %v482_v22, %v579_v25  ;;  %v1089_v33 = vadd.f32 %v4442_v35, %v1088_v29 }
 0x14c   : > { %v1363_v34 = vadd.f32 %v1362_v30, %v1361_v0  ;;  %v651_v36 = vsel %vm629_vm4, %v609_v32, 0.0  ;;  %v711_v37 = vmul.f32 %v609_v32, %v609_v32  ;;  %v838_v38 = vmax.f32 %v808_v26, %v609_v32  ;;  %v377_v39 = vpop.f32.mrf.mxu0 }
 0x14d   : > { %v1460_v42 = vsel %vm629_vm4, %v1421_v31, 0.0  ;;  %v1518_v43 = vld [vmem:[#allocation4 + $0x50] sm:$0xff]  ;;  %v652_v44 = vadd.f32 %v651_v36, %v650_v9  ;;  %v928_v45 = vmin.f32 %v898_v28, %v609_v32  ;;  %v378_v46 = vadd.f32 %v4442_v35, %v377_v39  ;;  %v1195_v47 = vpop.f32.mrf.mxu3  ;;  %v3792_v35 = vld [vmem:[%s4024_s18 + $0x3a8] sm:$0xff] }
 0x14e   : > { %v1461_v48 = vadd.f32 %v1460_v42, %v1459_v13  ;;  %v1548_v49 = vmax.f32 %v1518_v43, %v1322_v27  ;;  %v1608_v50 = vld [vmem:[#allocation5 + $0x50] sm:$0xff]  ;;  %v751_v51 = vsel %vm629_vm4, %v711_v37, 0.0  ;;  %868 = vst.msk [vmem:[#allocation4 + $0x58] sm:$0xff] %vm629_vm4, %v838_v38  ;;  %v1196_v52 = vadd.f32 %v1195_v47, %v1089_v33  ;;  %v484_v53 = vpop.f32.mrf.mxu1  ;;  %v3794_v28 = vld [vmem:[%s4024_s18 + $0x3b8] sm:$0x3]  ;;  %v810_v31 = vld [vmem:[#allocation4 + $0x68] sm:$0xff] }
 0x14f   : > { %v1638_v55 = vmin.f32 %v1608_v50, %v1322_v27  ;;  %v752_v56 = vadd.f32 %v751_v51, %v750_v21  ;;  %958 = vst.msk [vmem:[#allocation5 + $0x58] sm:$0xff] %vm629_vm4, %v928_v45  ;;  %v485_v57 = vadd.f32 %v484_v53, %v378_v46  ;;  %424 = vmatmul.f32.gmra.mxu0 %v319_v40  ;;  %v900_v33 = vld [vmem:[#allocation5 + $0x68] sm:$0xff] }
 0x150   : > { %1138 = vmatmul.f32.gmra.mxu2 %v3791_v41  ;;  %1578 = vst.msk [vmem:[#allocation4 + $0x50] sm:$0xff] %vm629_vm4, %v1548_v49  ;;  %vm1263_vm12 = vcmp.gt.f32.partialorder %v1196_v52, 0.0  ;;  %v1293_v58 = vmul.f32 0.2, %v1196_v52  ;;  %v3795_v45 = vld [vmem:[%s4024_s18 + $0x3c0] sm:$0xff] }
 0x151   : > { %1668 = vst.msk [vmem:[#allocation5 + $0x50] sm:$0xff] %vm629_vm4, %v1638_v55  ;;  %vm550_vm13 = vcmp.gt.f32.partialorder %v485_v57, 0.0  ;;  %v580_v59 = vmul.f32 0.2, %v485_v57  ;;  %531 = vmatmul.f32.gmra.mxu1 %v320_v54  ;;  %v3855_v46 = vld [vmem:[%s4024_s18 + $0x5a0] sm:$0xff] }
 0x152   : > { %v1323_v61 = vsel %vm1263_vm12, %v1196_v52, %v1293_v58  ;;  %1245 = vmatmul.f32.gmra.mxu3 %v3792_v35  ;;  %v1091_v63 = vpop.f32.mrf.mxu2  ;;  %v3796_v58 = vld [vmem:[%s4024_s18 + $0x3c8] sm:$0xff] }
 0x153   : > { %v1364_v0 = vsel %vm629_vm4, %v1323_v61, 0.0  ;;  %v1422_v1 = vmul.f32 %v1323_v61, %v1323_v61  ;;  %v610_v2 = vsel %vm550_vm13, %v485_v57, %v580_v59  ;;  %v1092_v4 = vadd.f32 %v4617_v3, %v1091_v63 }
 0x154   : > { %v1365_v5 = vadd.f32 %v1364_v0, %v1363_v34  ;;  %v653_v6 = vsel %vm629_vm4, %v610_v2, 0.0  ;;  %v712_v7 = vmul.f32 %v610_v2, %v610_v2  ;;  %v839_v8 = vmax.f32 %v809_v60, %v610_v2  ;;  %v380_v9 = vpop.f32.mrf.mxu0 }
 0x155   : > { %v1462_v12 = vsel %vm629_vm4, %v1422_v1, 0.0  ;;  %v1519_v13 = vld [vmem:[#allocation4 + $0x58] sm:$0xff]  ;;  %v654_v14 = vadd.f32 %v653_v6, %v652_v44  ;;  %v929_v15 = vmin.f32 %v899_v62, %v610_v2  ;;  %v381_v16 = vadd.f32 %v4617_v3, %v380_v9  ;;  %v1198_v17 = vpop.f32.mrf.mxu3  ;;  %v3856_v62 = vld [vmem:[%s4024_s18 + $0x5a8] sm:$0xff]  ;;  %v811_v1 = vld [vmem:[#allocation4 + $0x70] sm:$0xff] }
 0x156   : > { %v1463_v18 = vadd.f32 %v1462_v12, %v1461_v48  ;;  %v1549_v19 = vmax.f32 %v1519_v13, %v1323_v61  ;;  %v1609_v20 = vld [vmem:[#allocation5 + $0x58] sm:$0xff]  ;;  %v753_v21 = vsel %vm629_vm4, %v712_v7, 0.0  ;;  %869 = vst.msk [vmem:[#allocation4 + $0x60] sm:$0xff] %vm629_vm4, %v839_v8  ;;  %v1199_v22 = vadd.f32 %v1198_v17, %v1092_v4  ;;  %v487_v23 = vpop.f32.mrf.mxu1  ;;  %v901_v4 = vld [vmem:[#allocation5 + $0x70] sm:$0xff] }
 0x157   : > { %v1639_v25 = vmin.f32 %v1609_v20, %v1323_v61  ;;  %v754_v26 = vadd.f32 %v753_v21, %v752_v56  ;;  %959 = vst.msk [vmem:[#allocation5 + $0x60] sm:$0xff] %vm629_vm4, %v929_v15  ;;  %v488_v27 = vadd.f32 %v487_v23, %v381_v16  ;;  %427 = vmatmul.f32.gmra.mxu0 %v321_v10  ;;  %v3797_v15 = vld [vmem:[%s4024_s18 + $0x3d0] sm:$0xff] }
 0x158   : > { %1141 = vmatmul.f32.gmra.mxu2 %v3793_v11  ;;  %1579 = vst.msk [vmem:[#allocation4 + $0x58] sm:$0xff] %vm629_vm4, %v1549_v19  ;;  %vm1264_vm14 = vcmp.gt.f32.partialorder %v1199_v22, 0.0  ;;  %v1294_v29 = vmul.f32 0.2, %v1199_v22  ;;  %v3857_v16 = vld [vmem:[%s4024_s18 + $0x5b0] sm:$0xff] }
 0x159   : > { %1669 = vst.msk [vmem:[#allocation5 + $0x58] sm:$0xff] %vm629_vm4, %v1639_v25  ;;  %vm551_vm15 = vcmp.gt.f32.partialorder %v488_v27, 0.0  ;;  %v581_v30 = vmul.f32 0.2, %v488_v27  ;;  %534 = vmatmul.f32.gmra.mxu1 %v322_v24 }
 0x15a   : > { %v1324_v32 = vsel %vm1264_vm14, %v1199_v22, %v1294_v29  ;;  %1248 = vmatmul.f32.gmra.mxu3 %v3794_v28  ;;  %v1094_v34 = vpop.f32.mrf.mxu2  ;;  %v3798_v29 = vld [vmem:[%s4024_s18 + $0x3d8] sm:$0xff] }
 0x15b   : > { %v1366_v36 = vsel %vm629_vm4, %v1324_v32, 0.0  ;;  %v1423_v37 = vmul.f32 %v1324_v32, %v1324_v32  ;;  %v611_v38 = vsel %vm551_vm15, %v488_v27, %v581_v30  ;;  %v1095_v39 = vadd.f32 %v4617_v3, %v1094_v34 }
 0x15c   : > { %v1367_v40 = vadd.f32 %v1366_v36, %v1365_v5  ;;  %v655_v41 = vsel %vm629_vm4, %v611_v38, 0.0  ;;  %v713_v42 = vmul.f32 %v611_v38, %v611_v38  ;;  %v840_v43 = vmax.f32 %v810_v31, %v611_v38  ;;  %v383_v44 = vpop.f32.mrf.mxu0 }
 0x15d   : > { %v1464_v47 = vsel %vm629_vm4, %v1423_v37, 0.0  ;;  %v1520_v48 = vld [vmem:[#allocation4 + $0x60] sm:$0xff]  ;;  %v656_v49 = vadd.f32 %v655_v41, %v654_v14  ;;  %v930_v50 = vmin.f32 %v900_v33, %v611_v38  ;;  %v384_v51 = vadd.f32 %v4617_v3, %v383_v44  ;;  %v1201_v52 = vpop.f32.mrf.mxu3  ;;  %v3858_v33 = vld [vmem:[%s4024_s18 + $0x5b8] sm:$0xff] }
 0x15e   : > { %v1465_v53 = vadd.f32 %v1464_v47, %v1463_v18  ;;  %v1550_v54 = vmax.f32 %v1520_v48, %v1324_v32  ;;  %v1610_v55 = vld [vmem:[#allocation5 + $0x60] sm:$0xff]  ;;  %v755_v56 = vsel %vm629_vm4, %v713_v42, 0.0  ;;  %870 = vst.msk [vmem:[#allocation4 + $0x68] sm:$0xff] %vm629_vm4, %v840_v43  ;;  %v1202_v57 = vadd.f32 %v1201_v52, %v1095_v39  ;;  %v490_v35 = vpop.f32.mrf.mxu1  ;;  %v812_v37 = vld [vmem:[#allocation4 + $0x78] sm:$0xff]  ;;  %v902_v39 = vld [vmem:[#allocation5 + $0x78] sm:$0xff] }
 0x15f   : > { %v1640_v59 = vmin.f32 %v1610_v55, %v1324_v32  ;;  %v756_v60 = vadd.f32 %v755_v56, %v754_v26  ;;  %960 = vst.msk [vmem:[#allocation5 + $0x68] sm:$0xff] %vm629_vm4, %v930_v50  ;;  %v491_v61 = vadd.f32 %v490_v35, %v384_v51  ;;  %1765 = vmatmul.f32.vlgmr.msrb.gmra.mxu0 %v3795_v45  ;;  %v3799_v50 = vld [vmem:[%s4024_s18 + $0x3e0] sm:$0xff] }
 0x160   : > { %2476 = vmatmul.f32.vlgmr.msrb.gmra.mxu2 %v3855_v46  ;;  %1580 = vst.msk [vmem:[#allocation4 + $0x60] sm:$0xff] %vm629_vm4, %v1550_v54  ;;  %vm1265_vm0 = vcmp.gt.f32.partialorder %v1202_v57, 0.0  ;;  %v1295_v63 = vmul.f32 0.2, %v1202_v57  ;;  %v3859_v51 = vld [vmem:[%s4024_s18 + $0x5c0] sm:$0xff] }
 0x161   : > { %1670 = vst.msk [vmem:[#allocation5 + $0x60] sm:$0xff] %vm629_vm4, %v1640_v59  ;;  %vm552_vm1 = vcmp.gt.f32.partialorder %v491_v61, 0.0  ;;  %v582_v0 = vmul.f32 0.2, %v491_v61  ;;  %1872 = vmatmul.f32.vlgmr.msrb.gmra.mxu1 %v3796_v58 }
 0x162   : > { %v1325_v2 = vsel %vm1265_vm0, %v1202_v57, %v1295_v63  ;;  %2583 = vmatmul.f32.vlgmr.msrb.gmra.mxu3 %v3856_v62  ;;  %v1097_v5 = vpop.f32.mrf.mxu2  ;;  %v3800_v63 = vld [vmem:[%s4024_s18 + $0x3e8] sm:$0xff] }
 0x163   : > { %v1368_v6 = vsel %vm629_vm4, %v1325_v2, 0.0  ;;  %v1424_v7 = vmul.f32 %v1325_v2, %v1325_v2  ;;  %v612_v8 = vsel %vm552_vm1, %v491_v61, %v582_v0  ;;  %v1098_v9 = vadd.f32 %v4617_v3, %v1097_v5 }
 0x164   : > { %v1369_v10 = vadd.f32 %v1368_v6, %v1367_v40  ;;  %v657_v11 = vsel %vm629_vm4, %v612_v8, 0.0  ;;  %v714_v12 = vmul.f32 %v612_v8, %v612_v8  ;;  %v841_v13 = vmax.f32 %v811_v1, %v612_v8  ;;  %v386_v14 = vpop.f32.mrf.mxu0 }
 0x165   : > { %v1466_v17 = vsel %vm629_vm4, %v1424_v7, 0.0  ;;  %v1521_v18 = vld [vmem:[#allocation4 + $0x68] sm:$0xff]  ;;  %v658_v19 = vadd.f32 %v657_v11, %v656_v49  ;;  %v931_v20 = vmin.f32 %v901_v4, %v612_v8  ;;  %v387_v21 = vadd.f32 %v4617_v3, %v386_v14  ;;  %v1204_v22 = vpop.f32.mrf.mxu3  ;;  %v813_v7 = vld [vmem:[#allocation4 + $0x80] sm:$0xff] }
 0x166   : > { %v1467_v23 = vadd.f32 %v1466_v17, %v1465_v53  ;;  %v1551_v24 = vmax.f32 %v1521_v18, %v1325_v2  ;;  %v1611_v25 = vld [vmem:[#allocation5 + $0x68] sm:$0xff]  ;;  %v757_v26 = vsel %vm629_vm4, %v714_v12, 0.0  ;;  %871 = vst.msk [vmem:[#allocation4 + $0x70] sm:$0xff] %vm629_vm4, %v841_v13  ;;  %v1205_v27 = vadd.f32 %v1204_v22, %v1098_v9  ;;  %v493_v28 = vpop.f32.mrf.mxu1  ;;  %v3860_v4 = vld [vmem:[%s4024_s18 + $0x5c8] sm:$0xff]  ;;  %v903_v9 = vld [vmem:[#allocation5 + $0x80] sm:$0xff] }
 0x167   : > { %v1641_v30 = vmin.f32 %v1611_v25, %v1325_v2  ;;  %v758_v31 = vadd.f32 %v757_v26, %v756_v60  ;;  %961 = vst.msk [vmem:[#allocation5 + $0x70] sm:$0xff] %vm629_vm4, %v931_v20  ;;  %v494_v32 = vadd.f32 %v493_v28, %v387_v21  ;;  %1768 = vmatmul.f32.gmra.mxu0 %v3797_v15  ;;  %v3801_v20 = vld [vmem:[%s4024_s18 + $0x3f0] sm:$0xff] }
 0x168   : > { %2479 = vmatmul.f32.gmra.mxu2 %v3857_v16  ;;  %1581 = vst.msk [vmem:[#allocation4 + $0x68] sm:$0xff] %vm629_vm4, %v1551_v24  ;;  %vm1266_vm2 = vcmp.gt.f32.partialorder %v1205_v27, 0.0  ;;  %v1296_v34 = vmul.f32 0.2, %v1205_v27  ;;  %v3861_v21 = vld [vmem:[%s4024_s18 + $0x5d0] sm:$0xff] }
 0x169   : > { %1671 = vst.msk [vmem:[#allocation5 + $0x68] sm:$0xff] %vm629_vm4, %v1641_v30  ;;  %vm553_vm3 = vcmp.gt.f32.partialorder %v494_v32, 0.0  ;;  %v583_v36 = vmul.f32 0.2, %v494_v32  ;;  %1875 = vmatmul.f32.gmra.mxu1 %v3798_v29 }
 0x16a   : > { %v1326_v38 = vsel %vm1266_vm2, %v1205_v27, %v1296_v34  ;;  %2586 = vmatmul.f32.gmra.mxu3 %v3858_v33  ;;  %v1100_v40 = vpop.f32.mrf.mxu2  ;;  %v3802_v34 = vld [vmem:[%s4024_s18 + $0x3f8] sm:$0xff] }
 0x16b   : > { %v1370_v41 = vsel %vm629_vm4, %v1326_v38, 0.0  ;;  %v1425_v42 = vmul.f32 %v1326_v38, %v1326_v38  ;;  %v613_v43 = vsel %vm553_vm3, %v494_v32, %v583_v36  ;;  %v1101_v44 = vadd.f32 %v4617_v3, %v1100_v40 }
 0x16c   : > { %v1371_v45 = vadd.f32 %v1370_v41, %v1369_v10  ;;  %v659_v46 = vsel %vm629_vm4, %v613_v43, 0.0  ;;  %v715_v47 = vmul.f32 %v613_v43, %v613_v43  ;;  %v842_v48 = vmax.f32 %v812_v37, %v613_v43  ;;  %v389_v49 = vpop.f32.mrf.mxu0 }
 0x16d   : > { %v1468_v52 = vsel %vm629_vm4, %v1425_v42, 0.0  ;;  %v1522_v53 = vld [vmem:[#allocation4 + $0x70] sm:$0xff]  ;;  %v660_v54 = vadd.f32 %v659_v46, %v658_v19  ;;  %v932_v55 = vmin.f32 %v902_v39, %v613_v43  ;;  %v390_v56 = vadd.f32 %v4617_v3, %v389_v49  ;;  %v1207_v57 = vpop.f32.mrf.mxu3  ;;  %v814_v42 = vld [vmem:[#allocation4 + $0x88] sm:$0xff] }
 0x16e   : > { %v1469_v35 = vadd.f32 %v1468_v52, %v1467_v23  ;;  %v1552_v58 = vmax.f32 %v1522_v53, %v1326_v38  ;;  %v1612_v59 = vld [vmem:[#allocation5 + $0x70] sm:$0xff]  ;;  %v759_v60 = vsel %vm629_vm4, %v715_v47, 0.0  ;;  %872 = vst.msk [vmem:[#allocation4 + $0x78] sm:$0xff] %vm629_vm4, %v842_v48  ;;  %v1208_v61 = vadd.f32 %v1207_v57, %v1101_v44  ;;  %v496_v62 = vpop.f32.mrf.mxu1  ;;  %v3862_v39 = vld [vmem:[%s4024_s18 + $0x5d8] sm:$0xff] }
 0x16f   : > { %v1642_v0 = vmin.f32 %v1612_v59, %v1326_v38  ;;  %v760_v1 = vadd.f32 %v759_v60, %v758_v31  ;;  %962 = vst.msk [vmem:[#allocation5 + $0x78] sm:$0xff] %vm629_vm4, %v932_v55  ;;  %v497_v2 = vadd.f32 %v496_v62, %v390_v56  ;;  %1771 = vmatmul.f32.gmra.mxu0 %v3799_v50  ;;  %v904_v44 = vld [vmem:[#allocation5 + $0x88] sm:$0xff] }
 0x170   : > { %2482 = vmatmul.f32.gmra.mxu2 %v3859_v51  ;;  %1582 = vst.msk [vmem:[#allocation4 + $0x70] sm:$0xff] %vm629_vm4, %v1552_v58  ;;  %vm1267_vm5 = vcmp.gt.f32.partialorder %v1208_v61, 0.0  ;;  %v1297_v5 = vmul.f32 0.2, %v1208_v61  ;;  %v3803_v55 = vld [vmem:[%s4024_s18 + $0x400] sm:$0xff] }
 0x171   : > { %1672 = vst.msk [vmem:[#allocation5 + $0x70] sm:$0xff] %vm629_vm4, %v1642_v0  ;;  %vm554_vm6 = vcmp.gt.f32.partialorder %v497_v2, 0.0  ;;  %v584_v6 = vmul.f32 0.2, %v497_v2  ;;  %1878 = vmatmul.f32.gmra.mxu1 %v3800_v63  ;;  %v3863_v56 = vld [vmem:[%s4024_s18 + $0x5e0] sm:$0xff] }
 0x172   : > { %v1327_v8 = vsel %vm1267_vm5, %v1208_v61, %v1297_v5  ;;  %2589 = vmatmul.f32.gmra.mxu3 %v3860_v4  ;;  %v1103_v10 = vpop.f32.mrf.mxu2  ;;  %v3804_v5 = vld [vmem:[%s4024_s18 + $0x408] sm:$0xff] }
 0x173   : > { %v1372_v11 = vsel %vm629_vm4, %v1327_v8, 0.0  ;;  %v1426_v12 = vmul.f32 %v1327_v8, %v1327_v8  ;;  %v614_v13 = vsel %vm554_vm6, %v497_v2, %v584_v6  ;;  %v1104_v14 = vadd.f32 %v4617_v3, %v1103_v10 }
 0x174   : > { %v1373_v15 = vadd.f32 %v1372_v11, %v1371_v45  ;;  %v661_v16 = vsel %vm629_vm4, %v614_v13, 0.0  ;;  %v716_v17 = vmul.f32 %v614_v13, %v614_v13  ;;  %v843_v18 = vmax.f32 %v813_v7, %v614_v13  ;;  %v392_v19 = vpop.f32.mrf.mxu0 }
 0x175   : > { %v1470_v22 = vsel %vm629_vm4, %v1426_v12, 0.0  ;;  %v1523_v23 = vld [vmem:[#allocation4 + $0x78] sm:$0xff]  ;;  %v662_v24 = vadd.f32 %v661_v16, %v660_v54  ;;  %v933_v25 = vmin.f32 %v903_v9, %v614_v13  ;;  %v393_v26 = vadd.f32 %v4617_v3, %v392_v19  ;;  %v1210_v27 = vpop.f32.mrf.mxu3  ;;  %v3864_v9 = vld [vmem:[%s4024_s18 + $0x5e8] sm:$0xff]  ;;  %v815_v12 = vld [vmem:[#allocation4 + $0x90] sm:$0xff] }
 0x176   : > { %v1471_v28 = vadd.f32 %v1470_v22, %v1469_v35  ;;  %v1553_v29 = vmax.f32 %v1523_v23, %v1327_v8  ;;  %v1613_v30 = vld [vmem:[#allocation5 + $0x78] sm:$0xff]  ;;  %v761_v31 = vsel %vm629_vm4, %v716_v17, 0.0  ;;  %873 = vst.msk [vmem:[#allocation4 + $0x80] sm:$0xff] %vm629_vm4, %v843_v18  ;;  %v1211_v32 = vadd.f32 %v1210_v27, %v1104_v14  ;;  %v499_v33 = vpop.f32.mrf.mxu1  ;;  %v905_v14 = vld [vmem:[#allocation5 + $0x90] sm:$0xff] }
 0x177   : > { %v1643_v36 = vmin.f32 %v1613_v30, %v1327_v8  ;;  %v762_v37 = vadd.f32 %v761_v31, %v760_v1  ;;  %963 = vst.msk [vmem:[#allocation5 + $0x80] sm:$0xff] %vm629_vm4, %v933_v25  ;;  %v500_v38 = vadd.f32 %v499_v33, %v393_v26  ;;  %1774 = vmatmul.f32.gmra.mxu0 %v3801_v20  ;;  %v3805_v25 = vld [vmem:[%s4024_s18 + $0x410] sm:$0xff] }
 0x178   : > { %2485 = vmatmul.f32.gmra.mxu2 %v3861_v21  ;;  %1583 = vst.msk [vmem:[#allocation4 + $0x78] sm:$0xff] %vm629_vm4, %v1553_v29  ;;  %vm1268_vm7 = vcmp.gt.f32.partialorder %v1211_v32, 0.0  ;;  %v1298_v40 = vmul.f32 0.2, %v1211_v32  ;;  %v3865_v26 = vld [vmem:[%s4024_s18 + $0x5f0] sm:$0xff] }
 0x179   : > { %1673 = vst.msk [vmem:[#allocation5 + $0x78] sm:$0xff] %vm629_vm4, %v1643_v36  ;;  %vm555_vm8 = vcmp.gt.f32.partialorder %v500_v38, 0.0  ;;  %v585_v41 = vmul.f32 0.2, %v500_v38  ;;  %1881 = vmatmul.f32.gmra.mxu1 %v3802_v34 }
 0x17a   : > { %v1328_v43 = vsel %vm1268_vm7, %v1211_v32, %v1298_v40  ;;  %2592 = vmatmul.f32.gmra.mxu3 %v3862_v39  ;;  %v1106_v45 = vpop.f32.mrf.mxu2  ;;  %v3806_v40 = vld [vmem:[%s4024_s18 + $0x418] sm:$0xff] }
 0x17b   : > { %v1374_v46 = vsel %vm629_vm4, %v1328_v43, 0.0  ;;  %v1427_v47 = vmul.f32 %v1328_v43, %v1328_v43  ;;  %v615_v48 = vsel %vm555_vm8, %v500_v38, %v585_v41  ;;  %v1107_v49 = vadd.f32 %v4617_v3, %v1106_v45 }
 0x17c   : > { %v1375_v50 = vadd.f32 %v1374_v46, %v1373_v15  ;;  %v663_v51 = vsel %vm629_vm4, %v615_v48, 0.0  ;;  %v717_v52 = vmul.f32 %v615_v48, %v615_v48  ;;  %v844_v53 = vmax.f32 %v814_v42, %v615_v48  ;;  %v395_v54 = vpop.f32.mrf.mxu0 }
 0x17d   : > { %v1472_v57 = vsel %vm629_vm4, %v1427_v47, 0.0  ;;  %v1524_v35 = vld [vmem:[#allocation4 + $0x80] sm:$0xff]  ;;  %v664_v58 = vadd.f32 %v663_v51, %v662_v24  ;;  %v934_v59 = vmin.f32 %v904_v44, %v615_v48  ;;  %v396_v60 = vadd.f32 %v4617_v3, %v395_v54  ;;  %v1213_v61 = vpop.f32.mrf.mxu3  ;;  %v3866_v44 = vld [vmem:[%s4024_s18 + $0x5f8] sm:$0xff] }
 0x17e   : > { %v1473_v62 = vadd.f32 %v1472_v57, %v1471_v28  ;;  %v1554_v63 = vmax.f32 %v1524_v35, %v1328_v43  ;;  %v1614_v0 = vld [vmem:[#allocation5 + $0x80] sm:$0xff]  ;;  %v763_v1 = vsel %vm629_vm4, %v717_v52, 0.0  ;;  %874 = vst.msk [vmem:[#allocation4 + $0x88] sm:$0xff] %vm629_vm4, %v844_v53  ;;  %v1214_v2 = vadd.f32 %v1213_v61, %v1107_v49  ;;  %v502_v4 = vpop.f32.mrf.mxu1  ;;  %v816_v47 = vld [vmem:[#allocation4 + $0x98] sm:$0xff]  ;;  %v906_v49 = vld [vmem:[#allocation5 + $0x98] sm:$0xff] }
 0x17f   : > { %v1644_v6 = vmin.f32 %v1614_v0, %v1328_v43  ;;  %v764_v7 = vadd.f32 %v763_v1, %v762_v37  ;;  %964 = vst.msk [vmem:[#allocation5 + $0x88] sm:$0xff] %vm629_vm4, %v934_v59  ;;  %v503_v8 = vadd.f32 %v502_v4, %v396_v60  ;;  %1777 = vmatmul.f32.gmra.mxu0 %v3803_v55  ;;  %v3807_v35 = vld [vmem:[%s4024_s18 + $0x420] sm:$0xff] }
 0x180   : > { %2488 = vmatmul.f32.gmra.mxu2 %v3863_v56  ;;  %1584 = vst.msk [vmem:[#allocation4 + $0x80] sm:$0xff] %vm629_vm4, %v1554_v63  ;;  %vm1269_vm9 = vcmp.gt.f32.partialorder %v1214_v2, 0.0  ;;  %v1299_v10 = vmul.f32 0.2, %v1214_v2 }
 0x181   : > { %1674 = vst.msk [vmem:[#allocation5 + $0x80] sm:$0xff] %vm629_vm4, %v1644_v6  ;;  %vm556_vm10 = vcmp.gt.f32.partialorder %v503_v8, 0.0  ;;  %v586_v11 = vmul.f32 0.2, %v503_v8  ;;  %1884 = vmatmul.f32.gmra.mxu1 %v3804_v5  ;;  %v3808_v6 = vld [vmem:[%s4024_s18 + $0x428] sm:$0xff] }
 0x182   : > { %v1329_v13 = vsel %vm1269_vm9, %v1214_v2, %v1299_v10  ;;  %2595 = vmatmul.f32.gmra.mxu3 %v3864_v9  ;;  %v3868_v9 = vld [vmem:[%s4024_s18 + $0x608] sm:$0xff] }
 0x183   : > { %v1109_v15 = vpop.f32.mrf.mxu2  ;;  %v1376_v16 = vsel %vm629_vm4, %v1329_v13, 0.0  ;;  %v1428_v17 = vmul.f32 %v1329_v13, %v1329_v13  ;;  %v616_v18 = vsel %vm556_vm10, %v503_v8, %v586_v11  ;;  %v817_v10 = vld [vmem:[#allocation4 + $0xa0] sm:$0xff] }
 0x184   : > { %v1110_v19 = vadd.f32 %v4617_v3, %v1109_v15  ;;  %v1377_v20 = vadd.f32 %v1376_v16, %v1375_v50  ;;  %v665_v21 = vsel %vm629_vm4, %v616_v18, 0.0  ;;  %v718_v22 = vmul.f32 %v616_v18, %v616_v18  ;;  %v398_v24 = vpop.f32.mrf.mxu0 }
 0x185   : > { %v845_v23 = vmax.f32 %v815_v12, %v616_v18  ;;  %v1474_v27 = vsel %vm629_vm4, %v1428_v17, 0.0  ;;  %v1525_v28 = vld [vmem:[#allocation4 + $0x88] sm:$0xff]  ;;  %v4708_v29 = vadd.f32 %v665_v21, %v664_v58  ;;  %v935_v30 = vmin.f32 %v905_v14, %v616_v18  ;;  %v1216_v32 = vpop.f32.mrf.mxu3  ;;  %v3867_v58 = vld [vmem:[%s4024_s18 + $0x600] sm:$0xff] }
 0x186   : > { %v399_v31 = vadd.f32 %v4617_v3, %v398_v24  ;;  %v1475_v33 = vadd.f32 %v1474_v27, %v1473_v62  ;;  %v1555_v34 = vmax.f32 %v1525_v28, %v1329_v13  ;;  %v1615_v36 = vld [vmem:[#allocation5 + $0x88] sm:$0xff]  ;;  %v765_v37 = vsel %vm629_vm4, %v718_v22, 0.0  ;;  %v505_v39 = vpop.f32.mrf.mxu1 }
 0x187   : > { %875 = vst.msk [vmem:[#allocation4 + $0x90] sm:$0xff] %vm629_vm4, %v845_v23  ;;  %v1217_v38 = vadd.f32 %v1216_v32, %v1110_v19  ;;  %v1645_v41 = vmin.f32 %v1615_v36, %v1329_v13  ;;  %v4714_v42 = vadd.f32 %v765_v37, %v764_v7  ;;  %1780 = vmatmul.f32.gmra.mxu0 %v3805_v25  ;;  %v907_v13 = vld [vmem:[#allocation5 + $0xa0] sm:$0xff]  ;;  %v818_v36 = vld [vmem:[#allocation4 + $0xa8] sm:$0xff] }
 0x188   : > { %965 = vst.msk [vmem:[#allocation5 + $0x90] sm:$0xff] %vm629_vm4, %v935_v30  ;;  %v506_v43 = vadd.f32 %v505_v39, %v399_v31  ;;  %2491 = vmatmul.f32.gmra.mxu2 %v3865_v26  ;;  %v3809_v19 = vld [vmem:[%s4024_s18 + $0x430] sm:$0xff]  ;;  %v3810_v31 = vld [vmem:[%s4024_s18 + $0x438] sm:$0xff] }
 0x189   : > { %1585 = vst.msk [vmem:[#allocation4 + $0x88] sm:$0xff] %vm629_vm4, %v1555_v34  ;;  %vm1270_vm11 = vcmp.gt.f32.partialorder %v1217_v38, 0.0  ;;  %v1300_v45 = vmul.f32 0.2, %v1217_v38  ;;  %1887 = vmatmul.f32.gmra.mxu1 %v3806_v40  ;;  %v3870_v34 = vld [vmem:[%s4024_s18 + $0x618] sm:$0xff] }
 0x18a   : > { %1675 = vst.msk [vmem:[#allocation5 + $0x88] sm:$0xff] %vm629_vm4, %v1645_v41  ;;  %vm557_vm12 = vcmp.gt.f32.partialorder %v506_v43, 0.0  ;;  %v587_v46 = vmul.f32 0.2, %v506_v43  ;;  %2598 = vmatmul.f32.gmra.mxu3 %v3866_v44  ;;  %v908_v39 = vld [vmem:[#allocation5 + $0xa8] sm:$0xff] }
 0x18b   : > { %v1330_v48 = vsel %vm1270_vm11, %v1217_v38, %v1300_v45  ;;  %v1112_v50 = vpop.f32.mrf.mxu2 }
 0x18c   : > { %v1378_v51 = vsel %vm629_vm4, %v1330_v48, 0.0  ;;  %v1429_v52 = vmul.f32 %v1330_v48, %v1330_v48  ;;  %v4721_v53 = vsel %vm557_vm12, %v506_v43, %v587_v46  ;;  %v1113_v54 = vadd.f32 %v4617_v3, %v1112_v50  ;;  %v401_v57 = vpop.f32.mrf.mxu0  ;;  %v3811_v46 = vld [vmem:[%s4024_s18 + $0x440] sm:$0xff] }
 0x18d   : > { %v4724_v55 = vadd.f32 %v1378_v51, %v1377_v20  ;;  %v846_v56 = vmax.f32 %v816_v47, %v4721_v53  ;;  %v936_v61 = vmin.f32 %v906_v49, %v4721_v53  ;;  %v402_v62 = vadd.f32 %v4617_v3, %v401_v57  ;;  %v1219_v63 = vpop.f32.mrf.mxu3  ;;  %v3869_v20 = vld [vmem:[%s4024_s18 + $0x610] sm:$0xff]  ;;  %v3871_v47 = vld [vmem:[%s4024_s18 + $0x620] sm:$0xff] }
 0x18e   : > { %v1476_v59 = vsel %vm629_vm4, %v1429_v52, 0.0  ;;  %v1526_v60 = vld [vmem:[#allocation4 + $0x90] sm:$0xff]  ;;  %v1220_v4 = vadd.f32 %v1219_v63, %v1113_v54  ;;  %v508_v5 = vpop.f32.mrf.mxu1 }
 0x18f   : > { %v4732_v0 = vadd.f32 %v1476_v59, %v1475_v33  ;;  %v1556_v1 = vmax.f32 %v1526_v60, %v1330_v48  ;;  %v1616_v2 = vld [vmem:[#allocation5 + $0x90] sm:$0xff]  ;;  %876 = vst.msk [vmem:[#allocation4 + $0x98] sm:$0xff] %vm629_vm4, %v846_v56  ;;  %v509_v8 = vadd.f32 %v508_v5, %v402_v62  ;;  %1783 = vmatmul.f32.gmra.mxu0 %v3807_v35  ;;  %v819_v62 = vld [vmem:[#allocation4 + $0xb0] sm:$0xff] }
 0x190   : > { %v1646_v7 = vmin.f32 %v1616_v2, %v1330_v48  ;;  %966 = vst.msk [vmem:[#allocation5 + $0x98] sm:$0xff] %vm629_vm4, %v936_v61  ;;  %2494 = vmatmul.f32.gmra.mxu2 %v3867_v58  ;;  %v1301_v11 = vmul.f32 0.2, %v1220_v4  ;;  %vm1271_vm14 = vcmp.gt.f32.partialorder %v1220_v4, 0.0  ;;  %v3812_v58 = vld [vmem:[%s4024_s18 + $0x448] sm:$0xff] }
 0x191   : > { %1586 = vst.msk [vmem:[#allocation4 + $0x90] sm:$0xff] %vm629_vm4, %v1556_v1  ;;  %vm558_vm13 = vcmp.gt.f32.partialorder %v509_v8, 0.0  ;;  %v588_v12 = vmul.f32 0.2, %v509_v8  ;;  %1890 = vmatmul.f32.gmra.mxu1 %v3808_v6  ;;  %v3872_v61 = vld [vmem:[%s4024_s18 + $0x628] sm:$0xff] }
 0x192   : > { %1676 = vst.msk [vmem:[#allocation5 + $0x90] sm:$0xff] %vm629_vm4, %v1646_v7  ;;  %2601 = vmatmul.f32.gmra.mxu3 %v3868_v9  ;;  %v4746_v21 = vsel %vm1271_vm14, %v1220_v4, %v1301_v11  ;;  %v909_v2 = vld [vmem:[#allocation5 + $0xb0] sm:$0xff]  ;;  %v3813_v9 = vld [vmem:[%s4024_s18 + $0x450] sm:$0xff] }
 0x193   : > { %v1115_v14 = vpop.f32.mrf.mxu2  ;;  %v4740_v15 = vsel %vm558_vm13, %v509_v8, %v588_v12 }
 0x194   : > { %v1116_v16 = vadd.f32 %v4617_v3, %v1115_v14  ;;  %v847_v17 = vmax.f32 %v817_v10, %v4740_v15  ;;  %v404_v18 = vpop.f32.mrf.mxu0  ;;  %v937_v23 = vmin.f32 %v907_v13, %v4740_v15  ;;  %v3873_v10 = vld [vmem:[%s4024_s18 + $0x630] sm:$0xff] }
 0x195   : > { %v405_v24 = vadd.f32 %v4617_v3, %v404_v18  ;;  %v1222_v25 = vpop.f32.mrf.mxu3 }
 0x196   : > { %v1527_v22 = vld [vmem:[#allocation4 + $0x98] sm:$0xff]  ;;  %877 = vst.msk [vmem:[#allocation4 + $0xa0] sm:$0xff] %vm629_vm4, %v847_v17  ;;  %v1223_v28 = vadd.f32 %v1222_v25, %v1116_v16  ;;  %v511_v30 = vpop.f32.mrf.mxu1 }
 0x197   : > { %v1557_v26 = vmax.f32 %v1527_v22, %v4746_v21  ;;  %v1617_v27 = vld [vmem:[#allocation5 + $0x98] sm:$0xff]  ;;  %967 = vst.msk [vmem:[#allocation5 + $0xa0] sm:$0xff] %vm629_vm4, %v937_v23  ;;  %v512_v33 = vadd.f32 %v511_v30, %v405_v24  ;;  %1786 = vmatmul.f32.gmra.mxu0 %v3809_v19  ;;  %v3814_v22 = vld [vmem:[%s4024_s18 + $0x458] sm:$0xff] }
 0x198   : > { %v1647_v32 = vmin.f32 %v1617_v27, %v4746_v21  ;;  %2497 = vmatmul.f32.gmra.mxu2 %v3869_v20  ;;  %v1302_v37 = vmul.f32 0.2, %v1223_v28  ;;  %vm1272_vm0 = vcmp.gt.f32.partialorder %v1223_v28, 0.0  ;;  %v3874_v25 = vld [vmem:[%s4024_s18 + $0x638] sm:$0xff]  ;;  %v910_v30 = vld [vmem:[#allocation5 + $0xb8] sm:$0xff] }
 0x199   : > { %1587 = vst.msk [vmem:[#allocation4 + $0x98] sm:$0xff] %vm629_vm4, %v1557_v26  ;;  %vm559_vm15 = vcmp.gt.f32.partialorder %v512_v33, 0.0  ;;  %v589_v38 = vmul.f32 0.2, %v512_v33  ;;  %1893 = vmatmul.f32.gmra.mxu1 %v3810_v31  ;;  %v820_v26 = vld [vmem:[#allocation4 + $0xb8] sm:$0xff] }
 0x19a   : > { %1677 = vst.msk [vmem:[#allocation5 + $0x98] sm:$0xff] %vm629_vm4, %v1647_v32  ;;  %2604 = vmatmul.f32.gmra.mxu3 %v3870_v34  ;;  %v4764_v48 = vsel %vm1272_vm0, %v1223_v28, %v1302_v37  ;;  %v719_v34 = vmul.f32 %v4721_v53, %v4721_v53  ;;  %vm687_vm0 = vcmask 254976  }
 0x19b   : > { %v1118_v40 = vpop.f32.mrf.mxu2  ;;  %v4758_v41 = vsel %vm559_vm15, %v512_v33, %v589_v38  ;;  %v3815_v38 = vld [vmem:[%s4024_s18 + $0x460] sm:$0xff] }
 0x19c   : > { %v1119_v43 = vadd.f32 %v4617_v3, %v1118_v40  ;;  %v848_v44 = vmax.f32 %v818_v36, %v4758_v41  ;;  %v407_v45 = vpop.f32.mrf.mxu0  ;;  %v938_v50 = vmin.f32 %v908_v39, %v4758_v41  ;;  %v3875_v39 = vld [vmem:[%s4024_s18 + $0x640] sm:$0xff] }
 0x19d   : > { %v1528_v49 = vld [vmem:[#allocation4 + $0xa0] sm:$0xff]  ;;  %v408_v51 = vadd.f32 %v4617_v3, %v407_v45  ;;  %v1225_v52 = vpop.f32.mrf.mxu3 }
 0x19e   : > { %v1558_v54 = vmax.f32 %v1528_v49, %v4764_v48  ;;  %v1618_v56 = vld [vmem:[#allocation5 + $0xa0] sm:$0xff]  ;;  %878 = vst.msk [vmem:[#allocation4 + $0xa8] sm:$0xff] %vm629_vm4, %v848_v44  ;;  %v1226_v57 = vadd.f32 %v1225_v52, %v1119_v43  ;;  %v514_v35 = vpop.f32.mrf.mxu1  ;;  %v3816_v52 = vld [vmem:[%s4024_s18 + $0x468] sm:$0xff] }
 0x19f   : > { %v1648_v59 = vmin.f32 %v1618_v56, %v4764_v48  ;;  %968 = vst.msk [vmem:[#allocation5 + $0xa8] sm:$0xff] %vm629_vm4, %v938_v50  ;;  %v515_v60 = vadd.f32 %v514_v35, %v408_v51  ;;  %1789 = vmatmul.f32.gmra.mxu0 %v3811_v46  ;;  %v3876_v35 = vld [vmem:[%s4024_s18 + $0x648] sm:$0xff] }
 0x1a0   : > { %2500 = vmatmul.f32.gmra.mxu2 %v3871_v47  ;;  %1588 = vst.msk [vmem:[#allocation4 + $0xa0] sm:$0xff] %vm629_vm4, %v1558_v54  ;;  %v1303_v63 = vmul.f32 0.2, %v1226_v57  ;;  %vm1273_vm2 = vcmp.gt.f32.partialorder %v1226_v57, 0.0  ;;  %v667_v54 = vsel %vm629_vm4, %v4721_v53, 0.0 }
 0x1a1   : > { %1678 = vst.msk [vmem:[#allocation5 + $0xa0] sm:$0xff] %vm629_vm4, %v1648_v59  ;;  %vm560_vm1 = vcmp.gt.f32.partialorder %v515_v60, 0.0  ;;  %v590_v1 = vmul.f32 0.2, %v515_v60  ;;  %1896 = vmatmul.f32.gmra.mxu1 %v3812_v58  ;;  %v767_v58 = vsel %vm629_vm4, %v719_v34, 0.0  ;;  %v821_v59 = vld [vmem:[#allocation4 + $0xc0] sm:$0xff]  ;;  %v668_v53 = vadd.f32 %v667_v54, %v4708_v29 }
 0x1a2   : > { %2607 = vmatmul.f32.gmra.mxu3 %v3872_v61  ;;  %v4782_v11 = vsel %vm1273_vm2, %v1226_v57, %v1303_v63  ;;  %v1430_v63 = vmul.f32 %v4746_v21, %v4746_v21  ;;  %v671_v34 = vsel %vm629_vm4, %v4758_v41, 0.0 }
 0x1a3   : > { %v1121_v4 = vpop.f32.mrf.mxu2  ;;  %v4776_v5 = vsel %vm560_vm1, %v515_v60, %v590_v1  ;;  %v911_v1 = vld [vmem:[#allocation5 + $0xc0] sm:$0xff] }
 0x1a4   : > { %v1122_v6 = vadd.f32 %v4617_v3, %v1121_v4  ;;  %v849_v7 = vmax.f32 %v819_v62, %v4776_v5  ;;  %v410_v8 = vpop.f32.mrf.mxu0  ;;  %v939_v13 = vmin.f32 %v909_v2, %v4776_v5  ;;  %v1380_v62 = vsel %vm629_vm4, %v4746_v21, 0.0 }
 0x1a5   : > { %v1529_v12 = vld [vmem:[#allocation4 + $0xa8] sm:$0xff]  ;;  %v411_v14 = vadd.f32 %v4617_v3, %v410_v8  ;;  %v1228_v16 = vpop.f32.mrf.mxu3  ;;  %v669_v4 = vsel %vm629_vm4, %v4740_v15, 0.0  ;;  %v768_v8 = vadd.f32 %v767_v58, %v4714_v42  ;;  %v721_v21 = vmul.f32 %v4758_v41, %v4758_v41  ;;  %v3819_v58 = vld [vmem:[%s4024_s18 + $0x480] sm:$0xff] }
 0x1a6   : > { %v1559_v17 = vmax.f32 %v1529_v12, %v4782_v11  ;;  %v1619_v18 = vld [vmem:[#allocation5 + $0xa8] sm:$0xff]  ;;  %879 = vst.msk [vmem:[#allocation4 + $0xb0] sm:$0xff] %vm629_vm4, %v849_v7  ;;  %v1229_v19 = vadd.f32 %v1228_v16, %v1122_v6  ;;  %v517_v20 = vpop.f32.mrf.mxu1  ;;  %v720_v6 = vmul.f32 %v4740_v15, %v4740_v15  ;;  %v1381_v15 = vadd.f32 %v1380_v62, %v4724_v55 }
 0x1a7   : > { %v1649_v23 = vmin.f32 %v1619_v18, %v4782_v11  ;;  %969 = vst.msk [vmem:[#allocation5 + $0xb0] sm:$0xff] %vm629_vm4, %v939_v13  ;;  %v518_v24 = vadd.f32 %v517_v20, %v411_v14  ;;  %1792 = vmatmul.f32.gmra.mxu0 %v3813_v9  ;;  %v1431_v9 = vmul.f32 %v4764_v48, %v4764_v48  ;;  %v3817_v13 = vld [vmem:[%s4024_s18 + $0x470] sm:$0xff]  ;;  %v1478_v20 = vsel %vm629_vm4, %v1430_v63, 0.0 }
 0x1a8   : > { %2503 = vmatmul.f32.gmra.mxu2 %v3873_v10  ;;  %1589 = vst.msk [vmem:[#allocation4 + $0xa8] sm:$0xff] %vm629_vm4, %v1559_v17  ;;  %v1304_v27 = vmul.f32 0.2, %v1229_v19  ;;  %vm1274_vm5 = vcmp.gt.f32.partialorder %v1229_v19, 0.0  ;;  %v3877_v14 = vld [vmem:[%s4024_s18 + $0x650] sm:$0xff]  ;;  %v722_v41 = vmul.f32 %v4776_v5, %v4776_v5 }
 0x1a9   : > { %1679 = vst.msk [vmem:[#allocation5 + $0xa8] sm:$0xff] %vm629_vm4, %v1649_v23  ;;  %vm561_vm3 = vcmp.gt.f32.partialorder %v518_v24, 0.0  ;;  %v591_v28 = vmul.f32 0.2, %v518_v24  ;;  %1899 = vmatmul.f32.gmra.mxu1 %v3814_v22  ;;  %v670_v22 = vadd.f32 %v669_v4, %v668_v53 }
 0x1aa   : > { %2610 = vmatmul.f32.gmra.mxu3 %v3874_v25  ;;  %v4802_v40 = vsel %vm1274_vm5, %v1229_v19, %v1304_v27  ;;  %v769_v27 = vsel %vm629_vm4, %v720_v6, 0.0 }
 0x1ab   : > { %v1124_v31 = vpop.f32.mrf.mxu2  ;;  %v4794_v32 = vsel %vm561_vm3, %v518_v24, %v591_v28 }
 0x1ac   : > { %v1125_v33 = vadd.f32 %v4617_v3, %v1124_v31  ;;  %v850_v36 = vmax.f32 %v820_v26, %v4794_v32  ;;  %v413_v37 = vpop.f32.mrf.mxu0  ;;  %v940_v44 = vmin.f32 %v910_v30, %v4794_v32  ;;  %v3818_v26 = vld [vmem:[%s4024_s18 + $0x478] sm:$0xff]  ;;  %v1382_v31 = vsel %vm629_vm4, %v4764_v48, 0.0 }
 0x1ad   : > { %v1530_v43 = vld [vmem:[#allocation4 + $0xb0] sm:$0xff]  ;;  %v414_v45 = vadd.f32 %v4617_v3, %v413_v37  ;;  %v1231_v46 = vpop.f32.mrf.mxu3  ;;  %v822_v37 = vld [vmem:[#allocation4 + $0xc8] sm:$0xff]  ;;  %v1432_v48 = vmul.f32 %v4782_v11, %v4782_v11 }
 0x1ae   : > { %v1560_v47 = vmax.f32 %v1530_v43, %v4802_v40  ;;  %v1620_v49 = vld [vmem:[#allocation5 + $0xb0] sm:$0xff]  ;;  %880 = vst.msk [vmem:[#allocation4 + $0xb8] sm:$0xff] %vm629_vm4, %v850_v36  ;;  %v1232_v50 = vadd.f32 %v1231_v46, %v1125_v33  ;;  %v520_v51 = vpop.f32.mrf.mxu1  ;;  %v3878_v30 = vld [vmem:[%s4024_s18 + $0x658] sm:$0xff]  ;;  %v1480_v33 = vsel %vm629_vm4, %v1431_v9, 0.0  ;;  %v771_v36 = vsel %vm629_vm4, %v721_v21, 0.0 }
 0x1af   : > { %v1650_v56 = vmin.f32 %v1620_v49, %v4802_v40  ;;  %970 = vst.msk [vmem:[#allocation5 + $0xb8] sm:$0xff] %vm629_vm4, %v940_v44  ;;  %v521_v57 = vadd.f32 %v520_v51, %v414_v45  ;;  %1795 = vmatmul.f32.gmra.mxu0 %v3815_v38  ;;  %v1479_v38 = vadd.f32 %v1478_v20, %v4732_v0  ;;  %v912_v45 = vld [vmem:[#allocation5 + $0xc8] sm:$0xff] }
 0x1b0   : > { %2506 = vmatmul.f32.gmra.mxu2 %v3875_v39  ;;  %1590 = vst.msk [vmem:[#allocation4 + $0xb0] sm:$0xff] %vm629_vm4, %v1560_v47  ;;  %v1305_v60 = vmul.f32 0.2, %v1232_v50  ;;  %vm1275_vm7 = vcmp.gt.f32.partialorder %v1232_v50, 0.0  ;;  %v770_v44 = vadd.f32 %v769_v27, %v768_v8  ;;  %v1383_v0 = vadd.f32 %v1382_v31, %v1381_v15  ;;  %v3820_v8 = vld [vmem:[%s4024_s18 + $0x488] sm:$0xff] }
 0x1b1   : > { %1680 = vst.msk [vmem:[#allocation5 + $0xb0] sm:$0xff] %vm629_vm4, %v1650_v56  ;;  %vm562_vm6 = vcmp.gt.f32.partialorder %v521_v57, 0.0  ;;  %v592_v61 = vmul.f32 0.2, %v521_v57  ;;  %1902 = vmatmul.f32.gmra.mxu1 %v3816_v52  ;;  %v672_v47 = vadd.f32 %v671_v34, %v670_v22  ;;  %v1481_v52 = vadd.f32 %v1480_v33, %v1479_v38  ;;  %v3821_v34 = vld [vmem:[%s4024_s18 + $0x490] sm:$0xff] }
 0x1b2   : > { %2613 = vmatmul.f32.gmra.mxu3 %v3876_v35  ;;  %v4839_v16 = vsel %vm1275_vm7, %v1232_v50, %v1305_v60  ;;  %v4869_v50 = vld [vmem:[%s5873_s2] ss:$0 sm:$0xff]  ;;  %v772_v54 = vadd.f32 %v771_v36, %v770_v44  ;;  %v1384_v56 = vsel %vm629_vm4, %v4782_v11, 0.0  ;;  %v673_v60 = vsel %vm629_vm4, %v4776_v5, 0.0  ;;  %v3881_v36 = vld [vmem:[%s4024_s18 + $0x670] sm:$0xff] }
 0x1b3   : > { %v1127_v2 = vpop.f32.mrf.mxu2  ;;  %v4826_v7 = vsel %vm562_vm6, %v521_v57, %v592_v61  ;;  %v1482_v11 = vsel %vm629_vm4, %v1432_v48, 0.0  ;;  %v1433_v9 = vmul.f32 %v4802_v40, %v4802_v40  ;;  %v675_v15 = vsel %vm629_vm4, %v4794_v32, 0.0 }
 0x1b4   : > { %v1128_v29 = vadd.f32 %v4617_v3, %v1127_v2  ;;  %v851_v10 = vmax.f32 %v821_v59, %v4826_v7  ;;  %v416_v12 = vpop.f32.mrf.mxu0  ;;  %v941_v42 = vmin.f32 %v911_v1, %v4826_v7  ;;  %v3879_v59 = vld [vmem:[%s4024_s18 + $0x660] sm:$0xff]  ;;  %v773_v2 = vsel %vm629_vm4, %v722_v41, 0.0 }
 0x1b5   : > { %v1531_v17 = vld [vmem:[#allocation4 + $0xb8] sm:$0xff]  ;;  %v417_v18 = vadd.f32 %v4617_v3, %v416_v12  ;;  %v1234_v19 = vpop.f32.mrf.mxu3  ;;  %v3880_v12 = vld [vmem:[%s4024_s18 + $0x668] sm:$0xff]  ;;  %v1483_v22 = vadd.f32 %v1482_v11, %v1481_v52  ;;  %vm697_vm6 = vcmask 253952  }
 0x1b6   : > { %v1561_v23 = vmax.f32 %v1531_v17, %v4839_v16  ;;  %v1621_v24 = vld [vmem:[#allocation5 + $0xb8] sm:$0xff]  ;;  %881 = vst.msk [vmem:[#allocation4 + $0xc0] sm:$0xff] %vm629_vm4, %v851_v10  ;;  %v1235_v25 = vadd.f32 %v1234_v19, %v1128_v29  ;;  %v523_v55 = vpop.f32.mrf.mxu1  ;;  %v723_v17 = vmul.f32 %v4794_v32, %v4794_v32 }
 0x1b7   : > { %v1651_v28 = vmin.f32 %v1621_v24, %v4839_v16  ;;  %971 = vst.msk [vmem:[#allocation5 + $0xc0] sm:$0xff] %vm629_vm4, %v941_v42  ;;  %v524_v3 = vadd.f32 %v523_v55, %v417_v18  ;;  %1798 = vmatmul.f32.gmra.mxu0 %v3817_v13  ;;  %v1385_v13 = vadd.f32 %v1384_v56, %v1383_v0  ;;  %v823_v42 = vld [vmem:[#allocation4 + $0xd0] sm:$0xff]  ;;  %v913_v24 = vld [vmem:[#allocation5 + $0xd0] sm:$0xff]  ;;  %v1484_v55 = vsel %vm629_vm4, %v1433_v9, 0.0 }
 0x1b8   : > { %2509 = vmatmul.f32.gmra.mxu2 %v3877_v14  ;;  %1591 = vst.msk [vmem:[#allocation4 + $0xb8] sm:$0xff] %vm629_vm4, %v1561_v23  ;;  %v1306_v39 = vmul.f32 0.2, %v1235_v25  ;;  %vm1276_vm9 = vcmp.gt.f32.partialorder %v1235_v25, 0.0  ;;  %v1386_v14 = vsel %vm629_vm4, %v4802_v40, 0.0  ;;  %v674_v18 = vadd.f32 %v673_v60, %v672_v47  ;;  %v824_v60 = vld [vmem:[#allocation4 + $0xd8] sm:$0xff] }
 0x1b9   : > { %1681 = vst.msk [vmem:[#allocation5 + $0xb8] sm:$0xff] %vm629_vm4, %v1651_v28  ;;  %vm563_vm8 = vcmp.gt.f32.partialorder %v524_v3, 0.0  ;;  %v593_v43 = vmul.f32 0.2, %v524_v3  ;;  %1905 = vmatmul.f32.gmra.mxu1 %v3818_v26  ;;  %v774_v23 = vadd.f32 %v773_v2, %v772_v54  ;;  %v1434_v40 = vmul.f32 %v4839_v16, %v4839_v16 }
 0x1ba   : > { %2616 = vmatmul.f32.gmra.mxu3 %v3878_v30  ;;  %v4880_v61 = vsel %vm1276_vm9, %v1235_v25, %v1306_v39  ;;  %v1387_v25 = vadd.f32 %v1386_v14, %v1385_v13  ;;  %v676_v28 = vadd.f32 %v675_v15, %v674_v18  ;;  %v724_v30 = vmul.f32 %v4826_v7, %v4826_v7  ;;  %v3823_v14 = vld [vmem:[%s4024_s18 + $0x4a0] sm:$0xff] }
 0x1bb   : > { %v1130_v46 = vpop.f32.mrf.mxu2  ;;  %v4864_v49 = vsel %vm563_vm8, %v524_v3, %v593_v43  ;;  %v775_v3 = vsel %vm629_vm4, %v723_v17, 0.0  ;;  %v1486_v41 = vsel %vm629_vm4, %v1434_v40, 0.0  ;;  %v1435_v52 = vmul.f32 %v4880_v61, %v4880_v61  ;;  %v3883_v15 = vld [vmem:[%s4024_s18 + $0x680] sm:$0xff] }
 0x1bc   : > { %v1131_v51 = vadd.f32 %v4869_v50, %v1130_v46  ;;  %v852_v57 = vmax.f32 %v822_v37, %v4864_v49  ;;  %v419_v35 = vpop.f32.mrf.mxu0  ;;  %v942_v62 = vmin.f32 %v912_v45, %v4864_v49  ;;  %v1388_v37 = vsel %vm629_vm4, %v4839_v16, 0.0 }
 0x1bd   : > { %v1532_v53 = vld [vmem:[#allocation4 + $0xc0] sm:$0xff]  ;;  %v420_v63 = vadd.f32 %v4869_v50, %v419_v35  ;;  %v1237_v1 = vpop.f32.mrf.mxu3  ;;  %v677_v45 = vsel %vm629_vm4, %v4826_v7, 0.0  ;;  %v1485_v7 = vadd.f32 %v1484_v55, %v1483_v22  ;;  %v776_v35 = vadd.f32 %v775_v3, %v774_v23 }
 0x1be   : > { %v1562_v4 = vmax.f32 %v1532_v53, %v4880_v61  ;;  %v1622_v6 = vld [vmem:[#allocation5 + $0xc0] sm:$0xff]  ;;  %882 = vst.msk [vmem:[#allocation4 + $0xc8] sm:$0xff] %vm629_vm4, %v852_v57  ;;  %v1238_v5 = vadd.f32 %v1237_v1, %v1131_v51  ;;  %v526_v29 = vpop.f32.mrf.mxu1  ;;  %v678_v53 = vadd.f32 %v677_v45, %v676_v28  ;;  %v1390_v11 = vsel %vm629_vm4, %v4880_v61, 0.0  ;;  %v3824_v55 = vld [vmem:[%s4024_s18 + $0x4a8] sm:$0xff] }
 0x1bf   : > { %v1652_v21 = vmin.f32 %v1622_v6, %v4880_v61  ;;  %972 = vst.msk [vmem:[#allocation5 + $0xc8] sm:$0xff] %vm629_vm4, %v942_v62  ;;  %v527_v10 = vadd.f32 %v526_v29, %v420_v63  ;;  %1801 = vmatmul.f32.gmra.mxu0 %v3819_v58  ;;  %v3822_v51 = vld [vmem:[%s4024_s18 + $0x498] sm:$0xff]  ;;  %v1389_v58 = vadd.f32 %v1388_v37, %v1387_v25  ;;  %v679_v2 = vsel %vm629_vm4, %v4864_v49, 0.0 }
 0x1c0   : > { %2512 = vmatmul.f32.gmra.mxu2 %v3879_v59  ;;  %1592 = vst.msk [vmem:[#allocation4 + $0xc0] sm:$0xff] %vm629_vm4, %v1562_v4  ;;  %v1307_v19 = vmul.f32 0.2, %v1238_v5  ;;  %vm1277_vm11 = vcmp.gt.f32.partialorder %v1238_v5, 0.0  ;;  %v3882_v57 = vld [vmem:[%s4024_s18 + $0x678] sm:$0xff]  ;;  %v777_v59 = vsel %vm629_vm4, %v724_v30, 0.0  ;;  %v1487_v1 = vadd.f32 %v1486_v41, %v1485_v7 }
 0x1c1   : > { %1682 = vst.msk [vmem:[#allocation5 + $0xc0] sm:$0xff] %vm629_vm4, %v1652_v21  ;;  %vm564_vm10 = vcmp.gt.f32.partialorder %v527_v10, 0.0  ;;  %v594_v20 = vmul.f32 0.2, %v527_v10  ;;  %1908 = vmatmul.f32.gmra.mxu1 %v3820_v8  ;;  %v914_v4 = vld [vmem:[#allocation5 + $0xd8] sm:$0xff]  ;;  %v725_v29 = vmul.f32 %v4864_v49, %v4864_v49  ;;  %v778_v21 = vadd.f32 %v777_v59, %v776_v35  ;;  %v915_v45 = vld [vmem:[#allocation5 + $0xe0] sm:$0xff] }
 0x1c2   : > { %2619 = vmatmul.f32.gmra.mxu3 %v3880_v12  ;;  %v4917_v38 = vsel %vm1277_vm11, %v1238_v5, %v1307_v19  ;;  %v1488_v5 = vsel %vm629_vm4, %v1435_v52, 0.0  ;;  %v1391_v17 = vadd.f32 %v1390_v11, %v1389_v58  ;;  %v680_v23 = vadd.f32 %v679_v2, %v678_v53  ;;  %v3825_v7 = vld [vmem:[%s4024_s18 + $0x4b0] sm:$0xff] }
 0x1c3   : > { %v1133_v32 = vpop.f32.mrf.mxu2  ;;  %v4905_v26 = vsel %vm564_vm10, %v527_v10, %v594_v20  ;;  %v1436_v61 = vmul.f32 %v4917_v38, %v4917_v38  ;;  %v1489_v22 = vadd.f32 %v1488_v5, %v1487_v1  ;;  %v1392_v28 = vsel %vm629_vm4, %v4917_v38, 0.0  ;;  %v3885_v35 = vld [vmem:[%s4024_s18 + $0x690] sm:$0xff] }
 0x1c4   : > { %v1134_v27 = vadd.f32 %v4869_v50, %v1133_v32  ;;  %v853_v31 = vmax.f32 %v823_v42, %v4905_v26  ;;  %v422_v33 = vpop.f32.mrf.mxu0  ;;  %v943_v43 = vmin.f32 %v913_v24, %v4905_v26  ;;  %v726_v10 = vmul.f32 %v4905_v26, %v4905_v26 }
 0x1c5   : > { %v1533_v39 = vld [vmem:[#allocation4 + $0xc8] sm:$0xff]  ;;  %v423_v44 = vadd.f32 %v4869_v50, %v422_v33  ;;  %v1240_v48 = vpop.f32.mrf.mxu3  ;;  %v1490_v33 = vsel %vm629_vm4, %v1436_v61, 0.0  ;;  %v3886_v61 = vld [vmem:[%s4024_s18 + $0x698] sm:$0xff] }
 0x1c6   : > { %v1563_v46 = vmax.f32 %v1533_v39, %v4917_v38  ;;  %v1623_v0 = vld [vmem:[#allocation5 + $0xc8] sm:$0xff]  ;;  %883 = vst.msk [vmem:[#allocation4 + $0xd0] sm:$0xff] %vm629_vm4, %v853_v31  ;;  %v1241_v16 = vadd.f32 %v1240_v48, %v1134_v27  ;;  %v529_v47 = vpop.f32.mrf.mxu1  ;;  %v779_v27 = vsel %vm629_vm4, %v725_v29, 0.0  ;;  %v3884_v31 = vld [vmem:[%s4024_s18 + $0x688] sm:$0xff]  ;;  %v1393_v48 = vadd.f32 %v1392_v28, %v1391_v17 }
 0x1c7   : > { %v1653_v54 = vmin.f32 %v1623_v0, %v4917_v38  ;;  %973 = vst.msk [vmem:[#allocation5 + $0xd0] sm:$0xff] %vm629_vm4, %v943_v43  ;;  %v530_v56 = vadd.f32 %v529_v47, %v423_v44  ;;  %1804 = vmatmul.f32.gmra.mxu0 %v3821_v34  ;;  %v681_v34 = vsel %vm629_vm4, %v4905_v26, 0.0  ;;  %v825_v43 = vld [vmem:[#allocation4 + $0xe0] sm:$0xff]  ;;  %v780_v44 = vadd.f32 %v779_v27, %v778_v21  ;;  %v3826_v29 = vld [vmem:[%s4024_s18 + $0x4b8] sm:$0xff] }
 0x1c8   : > { %2515 = vmatmul.f32.gmra.mxu2 %v3881_v36  ;;  %1593 = vst.msk [vmem:[#allocation4 + $0xc8] sm:$0xff] %vm629_vm4, %v1563_v46  ;;  %v1308_v62 = vmul.f32 0.2, %v1241_v16  ;;  %vm1278_vm13 = vcmp.gt.f32.partialorder %v1241_v16, 0.0  ;;  %v781_v36 = vsel %vm629_vm4, %v726_v10, 0.0  ;;  %v1491_v46 = vadd.f32 %v1490_v33, %v1489_v22 }
 0x1c9   : > { %1683 = vst.msk [vmem:[#allocation5 + $0xc8] sm:$0xff] %vm629_vm4, %v1653_v54  ;;  %vm565_vm12 = vcmp.gt.f32.partialorder %v530_v56, 0.0  ;;  %v595_v63 = vmul.f32 0.2, %v530_v56  ;;  %1911 = vmatmul.f32.gmra.mxu1 %v3822_v51  ;;  %v682_v0 = vadd.f32 %v681_v34, %v680_v23  ;;  %v782_v51 = vadd.f32 %v781_v36, %v780_v44  ;;  %v916_v22 = vld [vmem:[#allocation5 + $0xe8] sm:$0x3] }
 0x1ca   : > { %2622 = vmatmul.f32.gmra.mxu3 %v3882_v57  ;;  %v1338_v42 = vsel %vm1278_vm13, %v1241_v16, %v1308_v62 }
 0x1cb   : > { %v1136_v6 = vpop.f32.mrf.mxu2  ;;  %v625_v8 = vsel %vm565_vm12, %v530_v56, %v595_v63  ;;  %v1437_v39 = vmul.f32 %v1338_v42, %v1338_v42  ;;  %v1394_v52 = vsel %vm629_vm4, %v1338_v42, 0.0 }
 0x1cc   : > { %v1137_v9 = vadd.f32 %v4869_v50, %v1136_v6  ;;  %v854_v12 = vmax.f32 %v824_v60, %v625_v8  ;;  %v425_v13 = vpop.f32.mrf.mxu0  ;;  %v944_v49 = vmin.f32 %v914_v4, %v625_v8  ;;  %v727_v41 = vmul.f32 %v625_v8, %v625_v8 }
 0x1cd   : > { %v1534_v18 = vld [vmem:[#allocation4 + $0xd0] sm:$0xff]  ;;  %v426_v19 = vadd.f32 %v4869_v50, %v425_v13  ;;  %v1243_v20 = vpop.f32.mrf.mxu3  ;;  %v1492_v58 = vsel %vm629_vm4, %v1437_v39, 0.0  ;;  %v683_v59 = vsel %vm629_vm4, %v625_v8, 0.0  ;;  %v1395_v10 = vadd.f32 %v1394_v52, %v1393_v48 }
 0x1ce   : > { %v1564_v40 = vmax.f32 %v1534_v18, %v1338_v42  ;;  %v1624_v24 = vld [vmem:[#allocation5 + $0xd0] sm:$0xff]  ;;  %884 = vst.msk [vmem:[#allocation4 + $0xd8] sm:$0xff] %vm629_vm4, %v854_v12  ;;  %v1244_v32 = vadd.f32 %v1243_v20, %v1137_v9  ;;  %v532_v25 = vpop.f32.mrf.mxu1  ;;  %v783_v1 = vsel %vm629_vm4, %v727_v41, 0.0 }
 0x1cf   : > { %v1654_v3 = vmin.f32 %v1624_v24, %v1338_v42  ;;  %974 = vst.msk [vmem:[#allocation5 + $0xd8] sm:$0xff] %vm629_vm4, %v944_v49  ;;  %v533_v30 = vadd.f32 %v532_v25, %v426_v19  ;;  %1807 = vmatmul.f32.gmra.mxu0 %v3823_v14  ;;  %v1493_v14 = vadd.f32 %v1492_v58, %v1491_v46  ;;  %v826_v42 = vld [vmem:[#allocation4 + $0xe8] sm:$0x3] }
 0x1d0   : > { %2518 = vmatmul.f32.gmra.mxu2 %v3883_v15  ;;  %1594 = vst.msk [vmem:[#allocation4 + $0xd0] sm:$0xff] %vm629_vm4, %v1564_v40  ;;  %v1309_v37 = vmul.f32 0.2, %v1244_v32  ;;  %vm1279_vm14 = vcmp.gt.f32.partialorder %v1244_v32, 0.0  ;;  %v684_v15 = vadd.f32 %v683_v59, %v682_v0  ;;  %v784_v18 = vadd.f32 %v783_v1, %v782_v51  ;;  %v3828_v0 = vld [vmem:[%s4024_s18 + $0x4c8] sm:$0xff] }
 0x1d1   : > { %1684 = vst.msk [vmem:[#allocation5 + $0xd0] sm:$0xff] %vm629_vm4, %v1654_v3  ;;  %vm566_vm15 = vcmp.gt.f32.partialorder %v533_v30, 0.0  ;;  %v596_v38 = vmul.f32 0.2, %v533_v30  ;;  %1914 = vmatmul.f32.gmra.mxu1 %v3824_v55 }
 0x1d2   : > { %2625 = vmatmul.f32.gmra.mxu3 %v3884_v31  ;;  %v1339_v54 = vsel %vm1279_vm14, %v1244_v32, %v1309_v37  ;;  %v3827_v31 = vld [vmem:[%s4024_s18 + $0x4c0] sm:$0xff] }
 0x1d3   : > { %v1139_v26 = vpop.f32.mrf.mxu2  ;;  %v626_v16 = vsel %vm566_vm15, %v533_v30, %v596_v38  ;;  %v1438_v9 = vmul.f32 %v1339_v54, %v1339_v54  ;;  %v1396_v49 = vsel %vm629_vm4, %v1339_v54, 0.0 }
 0x1d4   : > { %v1140_v47 = vadd.f32 %v4869_v50, %v1139_v26  ;;  %v855_v56 = vmax.f32 %v825_v43, %v626_v16  ;;  %v428_v57 = vpop.f32.mrf.mxu0  ;;  %v945_v53 = vmin.f32 %v915_v45, %v626_v16  ;;  %v728_v4 = vmul.f32 %v626_v16, %v626_v16  ;;  %v3887_v43 = vld [vmem:[%s4024_s18 + $0x6a0] sm:$0xff] }
 0x1d5   : > { %v1535_v60 = vld [vmem:[#allocation4 + $0xd8] sm:$0xff]  ;;  %v429_v62 = vadd.f32 %v4869_v50, %v428_v57  ;;  %v1246_v63 = vpop.f32.mrf.mxu3  ;;  %v685_v12 = vsel %vm629_vm4, %v626_v16, 0.0  ;;  %v1494_v40 = vsel %vm629_vm4, %v1438_v9, 0.0 }
 0x1d6   : > { %v1565_v11 = vmax.f32 %v1535_v60, %v1339_v54  ;;  %v1625_v2 = vld [vmem:[#allocation5 + $0xd8] sm:$0xff]  ;;  %885 = vst.msk [vmem:[#allocation4 + $0xe0] sm:$0xff] %vm629_vm4, %v855_v56  ;;  %v1247_v6 = vadd.f32 %v1246_v63, %v1140_v47  ;;  %v535_v5 = vpop.f32.mrf.mxu1  ;;  %v785_v19 = vsel %vm629_vm4, %v728_v4, 0.0  ;;  %v686_v24 = vadd.f32 %v685_v12, %v684_v15 }
 0x1d7   : > { %v1655_v21 = vmin.f32 %v1625_v2, %v1339_v54  ;;  %975 = vst.msk [vmem:[#allocation5 + $0xe0] sm:$0xff] %vm629_vm4, %v945_v53  ;;  %v536_v8 = vadd.f32 %v535_v5, %v429_v62  ;;  %1810 = vmatmul.f32.gmra.mxu0 %v3825_v7  ;;  %v786_v33 = vadd.f32 %v785_v19, %v784_v18  ;;  %v3888_v54 = vld [vmem:[%s4024_s18 + $0x6a8] sm:$0xff]  ;;  %v3889_v15 = vld [vmem:[%s4024_s18 + $0x6b0] sm:$0xff] }
 0x1d8   : > { %2521 = vmatmul.f32.gmra.mxu2 %v3885_v35  ;;  %1595 = vst.msk [vmem:[#allocation4 + $0xd8] sm:$0xff] %vm629_vm4, %v1565_v11  ;;  %vm1280_vm1 = vcmp.gt.f32.partialorder %v1247_v6, 0.0  ;;  %v1310_v13 = vmul.f32 0.2, %v1247_v6  ;;  %v1397_v56 = vadd.f32 %v1396_v49, %v1395_v10  ;;  %v1495_v60 = vadd.f32 %v1494_v40, %v1493_v14  ;;  %v2219_v19 = vld [vmem:[#allocation4] sm:$0xff] }
 0x1d9   : > { %1685 = vst.msk [vmem:[#allocation5 + $0xd8] sm:$0xff] %vm629_vm4, %v1655_v21  ;;  %vm567_vm2 = vcmp.gt.f32.partialorder %v536_v8, 0.0  ;;  %v597_v17 = vmul.f32 0.2, %v536_v8  ;;  %1917 = vmatmul.f32.gmra.mxu1 %v3826_v29  ;;  %v3829_v21 = vld [vmem:[%s4024_s18 + $0x4d0] sm:$0xff] }
 0x1da   : > { %v1340_v20 = vsel %vm1280_vm1, %v1247_v6, %v1310_v13  ;;  %2628 = vmatmul.f32.gmra.mxu3 %v3886_v61 }
 0x1db   : > { %v1142_v23 = vpop.f32.mrf.mxu2  ;;  %v627_v32 = vsel %vm567_vm2, %v536_v8, %v597_v17  ;;  %v1439_v55 = vmul.f32 %v1340_v20, %v1340_v20  ;;  %v1398_v44 = vsel %vm629_vm4, %v1340_v20, 0.0 }
 0x1dc   : > { %v1143_v25 = vadd.f32 %v4869_v50, %v1142_v23  ;;  %v688_v27 = vsel %vm687_vm0, %v627_v32, 0.0  ;;  %v729_v28 = vmul.f32 %v627_v32, %v627_v32  ;;  %v856_v3 = vmax.f32 %v826_v42, %v627_v32  ;;  %v1766_v30 = vpop.f32.mrf.mxu0 }
 0x1dd   : > { %v1536_v34 = vld [vmem:[#allocation4 + $0xe0] sm:$0xff]  ;;  %v689_v36 = vadd.f32 %v688_v27, %v686_v24  ;;  %v946_v37 = vmin.f32 %v916_v22, %v627_v32  ;;  %v1249_v39 = vpop.f32.mrf.mxu3  ;;  %v1767_v38 = vadd.f32 %v4869_v50, %v1766_v30  ;;  %v1496_v57 = vsel %vm629_vm4, %v1439_v55, 0.0  ;;  %v3830_v22 = vld [vmem:[%s4024_s18 + $0x4d8] sm:$0xff]  ;;  %v628_v27 = vld [vmem:[#allocation2] sm:$0x1] }
 0x1de   : > { %v1566_v48 = vmax.f32 %v1536_v34, %v1340_v20  ;;  %v1626_v41 = vld [vmem:[#allocation5 + $0xe0] sm:$0xff]  ;;  %v787_v45 = vsel %vm687_vm0, %v729_v28, 0.0  ;;  %886 = vst.msk [vmem:[#allocation4 + $0xe8] sm:$0x3] %vm687_vm0, %v856_v3  ;;  %v1250_v26 = vadd.f32 %v1249_v39, %v1143_v25  ;;  %v1873_v46 = vpop.f32.mrf.mxu1  ;;  %v1399_v53 = vadd.f32 %v1398_v44, %v1397_v56 }
 0x1df   : > { %v1656_v16 = vmin.f32 %v1626_v41, %v1340_v20  ;;  %v690_v47 = vrot.slane %v689_v36, 4  ;;  %v788_v51 = vadd.f32 %v787_v45, %v786_v33  ;;  %976 = vst.msk [vmem:[#allocation5 + $0xe8] sm:$0x3] %vm687_vm0, %v946_v37  ;;  %v1874_v52 = vadd.f32 %v1873_v46, %v1767_v38  ;;  %1813 = vmatmul.f32.gmra.mxu0 %v3827_v31  ;;  %v2309_v25 = vld [vmem:[#allocation5] sm:$0xff]  ;;  %v699_v37 = vld [vmem:[#allocation3] sm:$0x1] }
 0x1e0   : > { %1596 = vst.msk [vmem:[#allocation4 + $0xe0] sm:$0xff] %vm629_vm4, %v1566_v48  ;;  %vm1281_vm3 = vcmp.gt.f32.partialorder %v1250_v26, 0.0  ;;  %v1311_v7 = vmul.f32 0.2, %v1250_v26  ;;  %2524 = vmatmul.f32.gmra.mxu2 %v3887_v43  ;;  %v1497_v6 = vadd.f32 %v1496_v57, %v1495_v60  ;;  %v3890_v55 = vld [vmem:[%s4024_s18 + $0x6b8] sm:$0xff] }
 0x1e1   : > { %1686 = vst.msk [vmem:[#allocation5 + $0xe0] sm:$0xff] %vm629_vm4, %v1656_v16  ;;  %v691_v35 = vadd.f32 %v690_v47, %v689_v36  ;;  %v789_v58 = vrot.slane %v788_v51, 4  ;;  %vm1963_vm5 = vcmp.gt.f32.partialorder %v1874_v52, 0.0  ;;  %v1993_v59 = vmul.f32 0.2, %v1874_v52  ;;  %1920 = vmatmul.f32.gmra.mxu1 %v3828_v0 }
 0x1e2   : > { %v1341_v62 = vsel %vm1281_vm3, %v1250_v26, %v1311_v7  ;;  %2631 = vmatmul.f32.gmra.mxu3 %v3888_v54 }
 0x1e3   : > { %v2477_v63 = vpop.f32.mrf.mxu2  ;;  %v692_v1 = vrot.slane %v691_v35, 2  ;;  %v790_v11 = vadd.f32 %v789_v58, %v788_v51  ;;  %v1400_v2 = vsel %vm687_vm0, %v1341_v62, 0.0  ;;  %v1440_v4 = vmul.f32 %v1341_v62, %v1341_v62  ;;  %v3831_v51 = vld [vmem:[%s4024_s18 + $0x4e0] sm:$0xff] }
 0x1e4   : > { %v1401_v5 = vadd.f32 %v1400_v2, %v1399_v53  ;;  %v2023_v29 = vsel %vm1963_vm5, %v1874_v52, %v1993_v59  ;;  %v1769_v9 = vpop.f32.mrf.mxu0  ;;  %v2478_v13 = vadd.f32 %v4869_v50, %v2477_v63  ;;  %v3832_v63 = vld [vmem:[%s4024_s18 + $0x4e8] sm:$0xff] }
 0x1e5   : > { %v693_v8 = vadd.f32 %v692_v1, %v691_v35  ;;  %v791_v61 = vrot.slane %v790_v11, 2  ;;  %v1498_v10 = vsel %vm687_vm0, %v1440_v4, 0.0  ;;  %v1537_v12 = vld [vmem:[#allocation4 + $0xe8] sm:$0x3]  ;;  %v2584_v14 = vpop.f32.mrf.mxu3  ;;  %v2249_v32 = vmax.f32 %v2219_v19, %v2023_v29  ;;  %v3891_v35 = vld [vmem:[%s4024_s18 + $0x6c0] sm:$0xff] }
 0x1e6   : > { %v1402_v17 = vrot.slane %v1401_v5, 4  ;;  %v1499_v42 = vadd.f32 %v1498_v10, %v1497_v6  ;;  %v1567_v18 = vmax.f32 %v1537_v12, %v1341_v62  ;;  %v1627_v49 = vld [vmem:[#allocation5 + $0xe8] sm:$0x3]  ;;  %v1876_v20 = vpop.f32.mrf.mxu1  ;;  %v2339_v30 = vmin.f32 %v2309_v25, %v2023_v29  ;;  %v3892_v4 = vld [vmem:[%s4024_s18 + $0x6c8] sm:$0xff] }
 0x1e7   : > { %v694_v23 = vrot.slane %v693_v8, 1  ;;  %v792_v40 = vadd.f32 %v791_v61, %v790_v11  ;;  %v1657_v24 = vmin.f32 %v1627_v49, %v1341_v62  ;;  %1816 = vmatmul.f32.gmra.mxu0 %v3829_v21  ;;  %v1770_v34 = vadd.f32 %v4869_v50, %v1769_v9  ;;  %2279 = vst.msk [vmem:[#allocation4] sm:$0xff] %vm629_vm4, %v2249_v32 }
 0x1e8   : > { %v1403_v28 = vadd.f32 %v1402_v17, %v1401_v5  ;;  %v1500_v3 = vrot.slane %v1499_v42, 4  ;;  %1597 = vst.msk [vmem:[#allocation4 + $0xe8] sm:$0x3] %vm687_vm0, %v1567_v18  ;;  %2527 = vmatmul.f32.gmra.mxu2 %v3889_v15  ;;  %v2585_v36 = vadd.f32 %v2584_v14, %v2478_v13  ;;  %v2122_v43 = vmul.f32 %v2023_v29, %v2023_v29  ;;  %v2220_v17 = vld [vmem:[#allocation4 + $0x8] sm:$0xff] }
 0x1e9   : > { %v695_v31 = vadd.f32 %v694_v23, %v693_v8  ;;  %v793_v33 = vrot.slane %v792_v40, 1  ;;  %1687 = vst.msk [vmem:[#allocation5 + $0xe8] sm:$0x3] %vm687_vm0, %v1657_v24  ;;  %1923 = vmatmul.f32.gmra.mxu1 %v3830_v22  ;;  %v1877_v0 = vadd.f32 %v1876_v20, %v1770_v34  ;;  %v2054_v54 = vsel %vm629_vm4, %v2023_v29, 0.0  ;;  %v3833_v23 = vld [vmem:[%s4024_s18 + $0x4f0] sm:$0xff] }
 0x1ea   : > { %v1404_v39 = vrot.slane %v1403_v28, 2  ;;  %v1501_v38 = vadd.f32 %v1500_v3, %v1499_v42  ;;  %2634 = vmatmul.f32.gmra.mxu3 %v3890_v55  ;;  %2369 = vst.msk [vmem:[#allocation5] sm:$0xff] %vm629_vm4, %v2339_v30  ;;  %vm2674_vm7 = vcmp.gt.f32.partialorder %v2585_v36, 0.0  ;;  %v2704_v45 = vmul.f32 0.2, %v2585_v36  ;;  %v2310_v42 = vld [vmem:[#allocation5 + $0x8] sm:$0xff] }
 0x1eb   : > { %v2480_v44 = vpop.f32.mrf.mxu2  ;;  %v696_v48 = vadd.f32 %v695_v31, %v628_v27  ;;  %v794_v41 = vadd.f32 %v793_v33, %v792_v40  ;;  %v2152_v60 = vsel %vm629_vm4, %v2122_v43, 0.0  ;;  %vm1964_vm8 = vcmp.gt.f32.partialorder %v1877_v0, 0.0  ;;  %v2221_v33 = vld [vmem:[#allocation4 + $0x10] sm:$0xff] }
 0x1ec   : > { %v1405_v26 = vadd.f32 %v1404_v39, %v1403_v28  ;;  %v1502_v46 = vrot.slane %v1501_v38, 2  ;;  %v2481_v16 = vadd.f32 %v4869_v50, %v2480_v44  ;;  %v1772_v47 = vpop.f32.mrf.mxu0  ;;  %v2734_v56 = vsel %vm2674_vm7, %v2585_v36, %v2704_v45 }
 0x1ed   : > { %698 = vst.msk [vmem:[#allocation2] sm:$0x1] %vm697_vm6, %v696_v48  ;;  %v795_v52 = vadd.f32 %v794_v41, %v699_v37  ;;  %v1773_v57 = vadd.f32 %v4869_v50, %v1772_v47  ;;  %v2587_v7 = vpop.f32.mrf.mxu3  ;;  %v2833_v53 = vmul.f32 %v2734_v56, %v2734_v56  ;;  %v1994_v1 = vmul.f32 0.2, %v1877_v0  ;;  %v3893_v48 = vld [vmem:[%s4024_s18 + $0x6d0] sm:$0xff]  ;;  %v3834_v41 = vld [vmem:[%s4024_s18 + $0x4f8] sm:$0xff] }
 0x1ee   : > { %v1406_v58 = vrot.slane %v1405_v26, 1  ;;  %v1503_v59 = vadd.f32 %v1502_v46, %v1501_v38  ;;  %v1879_v62 = vpop.f32.mrf.mxu1  ;;  %v2588_v11 = vadd.f32 %v2587_v7, %v2481_v16  ;;  %v2765_v29 = vsel %vm629_vm4, %v2734_v56, 0.0  ;;  %v2930_v21 = vld [vmem:[#allocation4] sm:$0xff]  ;;  %v3894_v47 = vld [vmem:[%s4024_s18 + $0x6d8] sm:$0xff] }
 0x1ef   : > { %796 = vst.msk [vmem:[#allocation3] sm:$0x1] %vm697_vm6, %v795_v52  ;;  %v1880_v2 = vadd.f32 %v1879_v62, %v1773_v57  ;;  %1819 = vmatmul.f32.gmra.mxu0 %v3831_v51  ;;  %v2863_v9 = vsel %vm629_vm4, %v2833_v53, 0.0  ;;  %v2024_v8 = vsel %vm1964_vm8, %v1877_v0, %v1994_v1  ;;  %v2960_v12 = vmax.f32 %v2930_v21, %v2734_v56  ;;  %v2311_v16 = vld [vmem:[#allocation5 + $0x10] sm:$0xff] }
 0x1f0   : > { %v1407_v6 = vadd.f32 %v1406_v58, %v1405_v26  ;;  %v1504_v5 = vrot.slane %v1503_v59, 1  ;;  %2530 = vmatmul.f32.gmra.mxu2 %v3891_v35  ;;  %vm2675_vm9 = vcmp.gt.f32.partialorder %v2588_v11, 0.0  ;;  %v2705_v61 = vmul.f32 0.2, %v2588_v11 }
 0x1f1   : > { %vm1965_vm10 = vcmp.gt.f32.partialorder %v1880_v2, 0.0  ;;  %1926 = vmatmul.f32.gmra.mxu1 %v3832_v63  ;;  %v3020_v13 = vld [vmem:[#allocation5] sm:$0xff]  ;;  %v2055_v14 = vsel %vm629_vm4, %v2024_v8, 0.0  ;;  %v2123_v15 = vmul.f32 %v2024_v8, %v2024_v8  ;;  %v2250_v20 = vmax.f32 %v2220_v17, %v2024_v8  ;;  %2990 = vst.msk [vmem:[#allocation4] sm:$0xff] %vm629_vm4, %v2960_v12  ;;  %v3836_v17 = vld [vmem:[%s4024_s18 + $0x508] sm:$0xff] }
 0x1f2   : > { %v1505_v10 = vadd.f32 %v1504_v5, %v1503_v59  ;;  %2637 = vmatmul.f32.gmra.mxu3 %v3892_v4  ;;  %v3050_v49 = vmin.f32 %v3020_v13, %v2734_v56  ;;  %v2056_v19 = vadd.f32 %v2055_v14, %v2054_v54  ;;  %v2340_v22 = vmin.f32 %v2310_v42, %v2024_v8  ;;  %v2312_v13 = vld [vmem:[#allocation5 + $0x18] sm:$0xff] }
 0x1f3   : > { %v2483_v18 = vpop.f32.mrf.mxu2  ;;  %v2153_v24 = vsel %vm629_vm4, %v2123_v15, 0.0  ;;  %v5026_v32 = vsel %vm2675_vm9, %v2588_v11, %v2705_v61  ;;  %v1995_v25 = vmul.f32 0.2, %v1880_v2  ;;  %2280 = vst.msk [vmem:[#allocation4 + $0x8] sm:$0xff] %vm629_vm4, %v2250_v20  ;;  %v3895_v15 = vld [vmem:[%s4024_s18 + $0x6e0] sm:$0xff] }
 0x1f4   : > { %v1342_v40 = vld [vmem:[#allocation2] sm:$0x1]  ;;  %v2484_v55 = vadd.f32 %v4869_v50, %v2483_v18  ;;  %v1775_v27 = vpop.f32.mrf.mxu0  ;;  %3080 = vst.msk [vmem:[#allocation5] sm:$0xff] %vm629_vm4, %v3050_v49  ;;  %v2154_v3 = vadd.f32 %v2153_v24, %v2152_v60  ;;  %v2766_v30 = vsel %vm629_vm4, %v5026_v32, 0.0  ;;  %v2834_v31 = vmul.f32 %v5026_v32, %v5026_v32 }
 0x1f5   : > { %v1408_v28 = vadd.f32 %v1407_v6, %v1342_v40  ;;  %v2590_v34 = vpop.f32.mrf.mxu3  ;;  %v2767_v37 = vadd.f32 %v2766_v30, %v2765_v29  ;;  %v2025_v39 = vsel %vm1965_vm10, %v1880_v2, %v1995_v25  ;;  %v1776_v38 = vadd.f32 %v4869_v50, %v1775_v27  ;;  %2370 = vst.msk [vmem:[#allocation5 + $0x8] sm:$0xff] %vm629_vm4, %v2340_v22  ;;  %v3835_v2 = vld [vmem:[%s4024_s18 + $0x500] sm:$0xff]  ;;  %v3896_v22 = vld [vmem:[%s4024_s18 + $0x6e8] sm:$0xff] }
 0x1f6   : > { %v1410_v36 = vld [vmem:[#allocation3] sm:$0x1]  ;;  %v2591_v43 = vadd.f32 %v2590_v34, %v2484_v55  ;;  %v1882_v44 = vpop.f32.mrf.mxu1  ;;  %v2864_v26 = vsel %vm629_vm4, %v2834_v31, 0.0  ;;  %v2057_v46 = vsel %vm629_vm4, %v2025_v39, 0.0  ;;  %v2124_v0 = vmul.f32 %v2025_v39, %v2025_v39 }
 0x1f7   : > { %1409 = vst.msk [vmem:[#allocation2] sm:$0x1] %vm697_vm6, %v1408_v28  ;;  %v1506_v45 = vadd.f32 %v1505_v10, %v1410_v36  ;;  %1822 = vmatmul.f32.gmra.mxu0 %v3833_v23  ;;  %v2865_v51 = vadd.f32 %v2864_v26, %v2863_v9  ;;  %v2058_v52 = vadd.f32 %v2057_v46, %v2056_v19  ;;  %v2222_v29 = vld [vmem:[#allocation4 + $0x18] sm:$0xff] }
 0x1f8   : > { %v2251_v54 = vmax.f32 %v2221_v33, %v2025_v39  ;;  %v2341_v56 = vmin.f32 %v2311_v16, %v2025_v39  ;;  %v2155_v57 = vsel %vm629_vm4, %v2124_v0, 0.0  ;;  %vm2676_vm11 = vcmp.gt.f32.partialorder %v2591_v43, 0.0  ;;  %2533 = vmatmul.f32.gmra.mxu2 %v3893_v48  ;;  %v3837_v39 = vld [vmem:[%s4024_s18 + $0x510] sm:$0xff]  ;;  %v2223_v48 = vld [vmem:[#allocation4 + $0x20] sm:$0xff] }
 0x1f9   : > { %1507 = vst.msk [vmem:[#allocation3] sm:$0x1] %vm697_vm6, %v1506_v45  ;;  %v2706_v7 = vmul.f32 0.2, %v2591_v43  ;;  %v1883_v35 = vadd.f32 %v1882_v44, %v1776_v38  ;;  %1929 = vmatmul.f32.gmra.mxu1 %v3834_v41  ;;  %v2156_v58 = vadd.f32 %v2155_v57, %v2154_v3 }
 0x1fa   : > { %2281 = vst.msk [vmem:[#allocation4 + $0x10] sm:$0xff] %vm629_vm4, %v2251_v54  ;;  %2640 = vmatmul.f32.gmra.mxu3 %v3894_v47  ;;  %v2931_v4 = vld [vmem:[#allocation4 + $0x8] sm:$0xff]  ;;  %v2313_v47 = vld [vmem:[#allocation5 + $0x20] sm:$0xff] }
 0x1fb   : > { %v2486_v59 = vpop.f32.mrf.mxu2  ;;  %2371 = vst.msk [vmem:[#allocation5 + $0x10] sm:$0xff] %vm629_vm4, %v2341_v56  ;;  %v2736_v60 = vsel %vm2676_vm11, %v2591_v43, %v2706_v7  ;;  %vm1966_vm12 = vcmp.gt.f32.partialorder %v1883_v35, 0.0  ;;  %v1996_v53 = vmul.f32 0.2, %v1883_v35  ;;  %v2961_v8 = vmax.f32 %v2931_v4, %v5026_v32  ;;  %v3838_v54 = vld [vmem:[%s4024_s18 + $0x518] sm:$0xff] }
 0x1fc   : > { %v2768_v62 = vsel %vm629_vm4, %v2736_v60, 0.0  ;;  %v2835_v63 = vmul.f32 %v2736_v60, %v2736_v60  ;;  %v2487_v1 = vadd.f32 %v4869_v50, %v2486_v59  ;;  %v1778_v11 = vpop.f32.mrf.mxu0  ;;  %v3021_v42 = vld [vmem:[#allocation5 + $0x8] sm:$0xff] }
 0x1fd   : > { %v2769_v6 = vadd.f32 %v2768_v62, %v2767_v37  ;;  %v2026_v5 = vsel %vm1966_vm12, %v1883_v35, %v1996_v53  ;;  %v1779_v9 = vadd.f32 %v4869_v50, %v1778_v11  ;;  %v2593_v21 = vpop.f32.mrf.mxu3  ;;  %2991 = vst.msk [vmem:[#allocation4 + $0x8] sm:$0xff] %vm629_vm4, %v2961_v8  ;;  %v3051_v23 = vmin.f32 %v3021_v42, %v5026_v32 }
 0x1fe   : > { %v2866_v61 = vsel %vm629_vm4, %v2835_v63, 0.0  ;;  %v2059_v10 = vsel %vm629_vm4, %v2026_v5, 0.0  ;;  %v2125_v12 = vmul.f32 %v2026_v5, %v2026_v5  ;;  %v1885_v14 = vpop.f32.mrf.mxu1  ;;  %v2252_v19 = vmax.f32 %v2222_v29, %v2026_v5 }
 0x1ff   : > { %v2867_v18 = vadd.f32 %v2866_v61, %v2865_v51  ;;  %v2060_v49 = vadd.f32 %v2059_v10, %v2058_v52  ;;  %v2342_v20 = vmin.f32 %v2312_v13, %v2026_v5  ;;  %1825 = vmatmul.f32.gmra.mxu0 %v3835_v2  ;;  %v2594_v24 = vadd.f32 %v2593_v21, %v2487_v1  ;;  %v3897_v52 = vld [vmem:[%s4024_s18 + $0x6f0] sm:$0xff]  ;;  %v3839_v13 = vld [vmem:[%s4024_s18 + $0x520] sm:$0xff] }
 0x200   : > { %v2157_v40 = vsel %vm629_vm4, %v2125_v12, 0.0  ;;  %v1886_v25 = vadd.f32 %v1885_v14, %v1779_v9  ;;  %2282 = vst.msk [vmem:[#allocation4 + $0x18] sm:$0xff] %vm629_vm4, %v2252_v19  ;;  %2536 = vmatmul.f32.gmra.mxu2 %v3895_v15  ;;  %v2224_v10 = vld [vmem:[#allocation4 + $0x28] sm:$0xff] }
 0x201   : > { %v2932_v55 = vld [vmem:[#allocation4 + $0x10] sm:$0xff]  ;;  %v2158_v27 = vadd.f32 %v2157_v40, %v2156_v58  ;;  %1932 = vmatmul.f32.gmra.mxu1 %v3836_v17  ;;  %3081 = vst.msk [vmem:[#allocation5 + $0x8] sm:$0xff] %vm629_vm4, %v3051_v23  ;;  %vm2677_vm13 = vcmp.gt.f32.partialorder %v2594_v24, 0.0  ;;  %v2707_v30 = vmul.f32 0.2, %v2594_v24 }
 0x202   : > { %v2962_v28 = vmax.f32 %v2932_v55, %v2736_v60  ;;  %v3022_v3 = vld [vmem:[#allocation5 + $0x10] sm:$0xff]  ;;  %vm1967_vm14 = vcmp.gt.f32.partialorder %v1886_v25, 0.0  ;;  %2643 = vmatmul.f32.gmra.mxu3 %v3896_v22  ;;  %2372 = vst.msk [vmem:[#allocation5 + $0x18] sm:$0xff] %vm629_vm4, %v2342_v20  ;;  %v1997_v33 = vmul.f32 0.2, %v1886_v25  ;;  %v3898_v58 = vld [vmem:[%s4024_s18 + $0x6f8] sm:$0xff] }
 0x203   : > { %v2489_v32 = vpop.f32.mrf.mxu2  ;;  %v3052_v31 = vmin.f32 %v3022_v3, %v2736_v60  ;;  %v2737_v36 = vsel %vm2677_vm13, %v2594_v24, %v2707_v30  ;;  %v5088_v22 = vld [vmem:[%s5873_s2] ss:$0 sm:$0xff]  ;;  %v3900_v30 = vld [vmem:[%s4024_s18 + $0x708] sm:$0xff] }
 0x204   : > { %v2490_v34 = vadd.f32 %v4869_v50, %v2489_v32  ;;  %2992 = vst.msk [vmem:[#allocation4 + $0x10] sm:$0xff] %vm629_vm4, %v2962_v28  ;;  %v1781_v37 = vpop.f32.mrf.mxu0  ;;  %v2770_v38 = vsel %vm629_vm4, %v2737_v36, 0.0  ;;  %v2836_v43 = vmul.f32 %v2737_v36, %v2737_v36  ;;  %v2027_v44 = vsel %vm1967_vm14, %v1886_v25, %v1997_v33  ;;  %v3899_v24 = vld [vmem:[%s4024_s18 + $0x700] sm:$0xff]  ;;  %v3840_v25 = vld [vmem:[%s4024_s18 + $0x528] sm:$0xff] }
 0x205   : > { %3082 = vst.msk [vmem:[#allocation5 + $0x10] sm:$0xff] %vm629_vm4, %v3052_v31  ;;  %v1782_v41 = vadd.f32 %v4869_v50, %v1781_v37  ;;  %v2596_v45 = vpop.f32.mrf.mxu3  ;;  %v2771_v26 = vadd.f32 %v2770_v38, %v2769_v6  ;;  %v2061_v46 = vsel %vm629_vm4, %v2027_v44, 0.0  ;;  %v2126_v0 = vmul.f32 %v2027_v44, %v2027_v44 }
 0x206   : > { %v2253_v16 = vmax.f32 %v2223_v48, %v2027_v44  ;;  %v1888_v51 = vpop.f32.mrf.mxu1  ;;  %v2868_v56 = vsel %vm629_vm4, %v2836_v43, 0.0  ;;  %v2062_v57 = vadd.f32 %v2061_v46, %v2060_v49  ;;  %v2343_v7 = vmin.f32 %v2313_v47, %v2027_v44 }
 0x207   : > { %v2597_v35 = vadd.f32 %v2596_v45, %v2490_v34  ;;  %1828 = vmatmul.f32.gmra.mxu0 %v3837_v39  ;;  %v2869_v59 = vadd.f32 %v2868_v56, %v2867_v18  ;;  %v2933_v60 = vld [vmem:[#allocation4 + $0x18] sm:$0xff]  ;;  %v2159_v53 = vsel %vm629_vm4, %v2126_v0, 0.0  ;;  %v1889_v62 = vadd.f32 %v1888_v51, %v1782_v41  ;;  %v3841_v0 = vld [vmem:[%s4024_s18 + $0x530] sm:$0xff] }
 0x208   : > { %2283 = vst.msk [vmem:[#allocation4 + $0x20] sm:$0xff] %vm629_vm4, %v2253_v16  ;;  %v2963_v63 = vmax.f32 %v2933_v60, %v2737_v36  ;;  %v2160_v1 = vadd.f32 %v2159_v53, %v2158_v27  ;;  %2539 = vmatmul.f32.gmra.mxu2 %v3897_v52  ;;  %v2314_v18 = vld [vmem:[#allocation5 + $0x28] sm:$0xff]  ;;  %v3901_v53 = vld [vmem:[%s4024_s18 + $0x710] sm:$0xff] }
 0x209   : > { %2373 = vst.msk [vmem:[#allocation5 + $0x20] sm:$0xff] %vm629_vm4, %v2343_v7  ;;  %vm2678_vm15 = vcmp.gt.f32.partialorder %v2597_v35, 0.0  ;;  %v2708_v11 = vmul.f32 0.2, %v2597_v35  ;;  %1935 = vmatmul.f32.gmra.mxu1 %v3838_v54  ;;  %v3023_v2 = vld [vmem:[#allocation5 + $0x18] sm:$0xff]  ;;  %vm1968_vm1 = vcmp.gt.f32.partialorder %v1889_v62, 0.0 }
 0x20a   : > { %v1998_v4 = vmul.f32 0.2, %v1889_v62  ;;  %2646 = vmatmul.f32.gmra.mxu3 %v3898_v58  ;;  %2993 = vst.msk [vmem:[#allocation4 + $0x18] sm:$0xff] %vm629_vm4, %v2963_v63  ;;  %v3053_v5 = vmin.f32 %v3023_v2, %v2737_v36  ;;  %v2315_v54 = vld [vmem:[#allocation5 + $0x30] sm:$0xff] }
 0x20b   : > { %v2492_v6 = vpop.f32.mrf.mxu2  ;;  %v2738_v29 = vsel %vm2678_vm15, %v2597_v35, %v2708_v11 }
 0x20c   : > { %v2493_v9 = vadd.f32 %v4869_v50, %v2492_v6  ;;  %v2772_v21 = vsel %vm629_vm4, %v2738_v29, 0.0  ;;  %v2837_v8 = vmul.f32 %v2738_v29, %v2738_v29  ;;  %v2028_v61 = vsel %vm1968_vm1, %v1889_v62, %v1998_v4  ;;  %v1784_v12 = vpop.f32.mrf.mxu0  ;;  %3083 = vst.msk [vmem:[#allocation5 + $0x18] sm:$0xff] %vm629_vm4, %v3053_v5  ;;  %v3842_v62 = vld [vmem:[%s4024_s18 + $0x538] sm:$0xff] }
 0x20d   : > { %v2773_v14 = vadd.f32 %v2772_v21, %v2771_v26  ;;  %v2063_v15 = vsel %vm629_vm4, %v2028_v61, 0.0  ;;  %v2127_v17 = vmul.f32 %v2028_v61, %v2028_v61  ;;  %v2254_v42 = vmax.f32 %v2224_v10, %v2028_v61  ;;  %v2599_v49 = vpop.f32.mrf.mxu3  ;;  %v2225_v26 = vld [vmem:[#allocation4 + $0x30] sm:$0xff] }
 0x20e   : > { %v2870_v50 = vsel %vm629_vm4, %v2837_v8, 0.0  ;;  %v2064_v19 = vadd.f32 %v2063_v15, %v2062_v57  ;;  %v2344_v20 = vmin.f32 %v2314_v18, %v2028_v61  ;;  %v1785_v23 = vadd.f32 %v5088_v22, %v1784_v12  ;;  %v1891_v40 = vpop.f32.mrf.mxu1  ;;  %v3902_v6 = vld [vmem:[%s4024_s18 + $0x718] sm:$0xff]  ;;  %v3843_v18 = vld [vmem:[%s4024_s18 + $0x540] sm:$0xff] }
 0x20f   : > { %v2871_v55 = vadd.f32 %v2870_v50, %v2869_v59  ;;  %v2934_v27 = vld [vmem:[#allocation4 + $0x20] sm:$0xff]  ;;  %v2161_v28 = vsel %vm629_vm4, %v2127_v17, 0.0  ;;  %2284 = vst.msk [vmem:[#allocation4 + $0x28] sm:$0xff] %vm629_vm4, %v2254_v42  ;;  %v2600_v3 = vadd.f32 %v2599_v49, %v2493_v9  ;;  %1831 = vmatmul.f32.gmra.mxu0 %v3839_v13  ;;  %v2226_v17 = vld [vmem:[#allocation4 + $0x38] sm:$0xff] }
 0x210   : > { %v2964_v32 = vmax.f32 %v2934_v27, %v2738_v29  ;;  %v3024_v31 = vld [vmem:[#allocation5 + $0x20] sm:$0xff]  ;;  %v2162_v33 = vadd.f32 %v2161_v28, %v2160_v1  ;;  %2374 = vst.msk [vmem:[#allocation5 + $0x28] sm:$0xff] %vm629_vm4, %v2344_v20  ;;  %v1892_v34 = vadd.f32 %v1891_v40, %v1785_v23  ;;  %2542 = vmatmul.f32.gmra.mxu2 %v3899_v24  ;;  %v2316_v23 = vld [vmem:[#allocation5 + $0x38] sm:$0xff] }
 0x211   : > { %v3054_v36 = vmin.f32 %v3024_v31, %v2738_v29  ;;  %vm2679_vm2 = vcmp.gt.f32.partialorder %v2600_v3, 0.0  ;;  %v2709_v37 = vmul.f32 0.2, %v2600_v3  ;;  %1938 = vmatmul.f32.gmra.mxu1 %v3840_v25 }
 0x212   : > { %2994 = vst.msk [vmem:[#allocation4 + $0x20] sm:$0xff] %vm629_vm4, %v2964_v32  ;;  %vm1969_vm3 = vcmp.gt.f32.partialorder %v1892_v34, 0.0  ;;  %v1999_v39 = vmul.f32 0.2, %v1892_v34  ;;  %2649 = vmatmul.f32.gmra.mxu3 %v3900_v30  ;;  %v3903_v30 = vld [vmem:[%s4024_s18 + $0x720] sm:$0xff]  ;;  %v3844_v32 = vld [vmem:[%s4024_s18 + $0x548] sm:$0xff] }
 0x213   : > { %v2495_v38 = vpop.f32.mrf.mxu2  ;;  %3084 = vst.msk [vmem:[#allocation5 + $0x20] sm:$0xff] %vm629_vm4, %v3054_v36  ;;  %v2739_v43 = vsel %vm2679_vm2, %v2600_v3, %v2709_v37 }
 0x214   : > { %v2496_v44 = vadd.f32 %v5088_v22, %v2495_v38  ;;  %v2774_v48 = vsel %vm629_vm4, %v2739_v43, 0.0  ;;  %v2838_v41 = vmul.f32 %v2739_v43, %v2739_v43  ;;  %v2029_v45 = vsel %vm1969_vm3, %v1892_v34, %v1999_v39  ;;  %v1787_v46 = vpop.f32.mrf.mxu0  ;;  %v3904_v39 = vld [vmem:[%s4024_s18 + $0x728] sm:$0xff] }
 0x215   : > { %v2775_v16 = vadd.f32 %v2774_v48, %v2773_v14  ;;  %v2065_v47 = vsel %vm629_vm4, %v2029_v45, 0.0  ;;  %v2128_v51 = vmul.f32 %v2029_v45, %v2029_v45  ;;  %v2255_v52 = vmax.f32 %v2225_v26, %v2029_v45  ;;  %v2602_v56 = vpop.f32.mrf.mxu3 }
 0x216   : > { %v2872_v57 = vsel %vm629_vm4, %v2838_v41, 0.0  ;;  %v2935_v7 = vld [vmem:[#allocation4 + $0x28] sm:$0xff]  ;;  %v2066_v35 = vadd.f32 %v2065_v47, %v2064_v19  ;;  %v2345_v58 = vmin.f32 %v2315_v54, %v2029_v45  ;;  %v1788_v59 = vadd.f32 %v5088_v22, %v1787_v46  ;;  %v1894_v60 = vpop.f32.mrf.mxu1 }
 0x217   : > { %v2873_v63 = vadd.f32 %v2872_v57, %v2871_v55  ;;  %v2965_v1 = vmax.f32 %v2935_v7, %v2739_v43  ;;  %v3025_v11 = vld [vmem:[#allocation5 + $0x28] sm:$0xff]  ;;  %v2163_v2 = vsel %vm629_vm4, %v2128_v51, 0.0  ;;  %2285 = vst.msk [vmem:[#allocation4 + $0x30] sm:$0xff] %vm629_vm4, %v2255_v52  ;;  %v2603_v4 = vadd.f32 %v2602_v56, %v2496_v44  ;;  %1834 = vmatmul.f32.gmra.mxu0 %v3841_v0  ;;  %v2227_v51 = vld [vmem:[#allocation4 + $0x40] sm:$0xff]  ;;  %v3845_v54 = vld [vmem:[%s4024_s18 + $0x550] sm:$0xff] }
 0x218   : > { %v3055_v5 = vmin.f32 %v3025_v11, %v2739_v43  ;;  %v2164_v29 = vadd.f32 %v2163_v2, %v2162_v33  ;;  %2375 = vst.msk [vmem:[#allocation5 + $0x30] sm:$0xff] %vm629_vm4, %v2345_v58  ;;  %v1895_v9 = vadd.f32 %v1894_v60, %v1788_v59  ;;  %2545 = vmatmul.f32.gmra.mxu2 %v3901_v53  ;;  %v2317_v58 = vld [vmem:[#allocation5 + $0x40] sm:$0xff] }
 0x219   : > { %2995 = vst.msk [vmem:[#allocation4 + $0x28] sm:$0xff] %vm629_vm4, %v2965_v1  ;;  %vm2680_vm5 = vcmp.gt.f32.partialorder %v2603_v4, 0.0  ;;  %v2710_v21 = vmul.f32 0.2, %v2603_v4  ;;  %1941 = vmatmul.f32.gmra.mxu1 %v3842_v62  ;;  %v3905_v2 = vld [vmem:[%s4024_s18 + $0x730] sm:$0xff] }
 0x21a   : > { %3085 = vst.msk [vmem:[#allocation5 + $0x28] sm:$0xff] %vm629_vm4, %v3055_v5  ;;  %vm1970_vm7 = vcmp.gt.f32.partialorder %v1895_v9, 0.0  ;;  %v2000_v8 = vmul.f32 0.2, %v1895_v9  ;;  %2652 = vmatmul.f32.gmra.mxu3 %v3902_v6 }
 0x21b   : > { %v2498_v61 = vpop.f32.mrf.mxu2  ;;  %v2740_v10 = vsel %vm2680_vm5, %v2603_v4, %v2710_v21  ;;  %v3846_v4 = vld [vmem:[%s4024_s18 + $0x558] sm:$0xff] }
 0x21c   : > { %v2499_v12 = vadd.f32 %v5088_v22, %v2498_v61  ;;  %v2776_v13 = vsel %vm629_vm4, %v2740_v10, 0.0  ;;  %v2839_v14 = vmul.f32 %v2740_v10, %v2740_v10  ;;  %v2030_v15 = vsel %vm1970_vm7, %v1895_v9, %v2000_v8  ;;  %v1790_v42 = vpop.f32.mrf.mxu0  ;;  %v3906_v8 = vld [vmem:[%s4024_s18 + $0x738] sm:$0xff] }
 0x21d   : > { %v2777_v49 = vadd.f32 %v2776_v13, %v2775_v16  ;;  %v2067_v50 = vsel %vm629_vm4, %v2030_v15, 0.0  ;;  %v2129_v19 = vmul.f32 %v2030_v15, %v2030_v15  ;;  %v2256_v20 = vmax.f32 %v2226_v17, %v2030_v15  ;;  %v2605_v40 = vpop.f32.mrf.mxu3 }
 0x21e   : > { %v2874_v24 = vsel %vm629_vm4, %v2839_v14, 0.0  ;;  %v2936_v25 = vld [vmem:[#allocation4 + $0x30] sm:$0xff]  ;;  %v2068_v55 = vadd.f32 %v2067_v50, %v2066_v35  ;;  %v2346_v27 = vmin.f32 %v2316_v23, %v2030_v15  ;;  %v1791_v28 = vadd.f32 %v5088_v22, %v1790_v42  ;;  %v1897_v3 = vpop.f32.mrf.mxu1  ;;  %v3847_v23 = vld [vmem:[%s4024_s18 + $0x560] sm:$0xff] }
 0x21f   : > { %v2875_v31 = vadd.f32 %v2874_v24, %v2873_v63  ;;  %v2966_v33 = vmax.f32 %v2936_v25, %v2740_v10  ;;  %v3026_v34 = vld [vmem:[#allocation5 + $0x30] sm:$0xff]  ;;  %v2165_v36 = vsel %vm629_vm4, %v2129_v19, 0.0  ;;  %2286 = vst.msk [vmem:[#allocation4 + $0x38] sm:$0xff] %vm629_vm4, %v2256_v20  ;;  %v2606_v37 = vadd.f32 %v2605_v40, %v2499_v12  ;;  %1837 = vmatmul.f32.gmra.mxu0 %v3843_v18  ;;  %v2228_v19 = vld [vmem:[#allocation4 + $0x48] sm:$0xff] }
 0x220   : > { %v3056_v38 = vmin.f32 %v3026_v34, %v2740_v10  ;;  %v2166_v43 = vadd.f32 %v2165_v36, %v2164_v29  ;;  %2376 = vst.msk [vmem:[#allocation5 + $0x38] sm:$0xff] %vm629_vm4, %v2346_v27  ;;  %v1898_v44 = vadd.f32 %v1897_v3, %v1791_v28  ;;  %2548 = vmatmul.f32.gmra.mxu2 %v3903_v30  ;;  %v2318_v27 = vld [vmem:[#allocation5 + $0x48] sm:$0xff] }
 0x221   : > { %2996 = vst.msk [vmem:[#allocation4 + $0x30] sm:$0xff] %vm629_vm4, %v2966_v33  ;;  %vm2681_vm8 = vcmp.gt.f32.partialorder %v2606_v37, 0.0  ;;  %v2711_v48 = vmul.f32 0.2, %v2606_v37  ;;  %1944 = vmatmul.f32.gmra.mxu1 %v3844_v32  ;;  %v3907_v36 = vld [vmem:[%s4024_s18 + $0x740] sm:$0xff] }
 0x222   : > { %3086 = vst.msk [vmem:[#allocation5 + $0x30] sm:$0xff] %vm629_vm4, %v3056_v38  ;;  %vm1971_vm9 = vcmp.gt.f32.partialorder %v1898_v44, 0.0  ;;  %v2001_v41 = vmul.f32 0.2, %v1898_v44  ;;  %2655 = vmatmul.f32.gmra.mxu3 %v3904_v39 }
 0x223   : > { %v2501_v45 = vpop.f32.mrf.mxu2  ;;  %v2741_v26 = vsel %vm2681_vm8, %v2606_v37, %v2711_v48  ;;  %v3848_v37 = vld [vmem:[%s4024_s18 + $0x568] sm:$0xff] }
 0x224   : > { %v2502_v46 = vadd.f32 %v5088_v22, %v2501_v45  ;;  %v2778_v0 = vsel %vm629_vm4, %v2741_v26, 0.0  ;;  %v2840_v16 = vmul.f32 %v2741_v26, %v2741_v26  ;;  %v2031_v47 = vsel %vm1971_vm9, %v1898_v44, %v2001_v41  ;;  %v1793_v52 = vpop.f32.mrf.mxu0  ;;  %v3908_v41 = vld [vmem:[%s4024_s18 + $0x748] sm:$0xff] }
 0x225   : > { %v2779_v56 = vadd.f32 %v2778_v0, %v2777_v49  ;;  %v2069_v57 = vsel %vm629_vm4, %v2031_v47, 0.0  ;;  %v2130_v7 = vmul.f32 %v2031_v47, %v2031_v47  ;;  %v2257_v35 = vmax.f32 %v2227_v51, %v2031_v47  ;;  %v2608_v59 = vpop.f32.mrf.mxu3 }
 0x226   : > { %v2876_v60 = vsel %vm629_vm4, %v2840_v16, 0.0  ;;  %v2937_v53 = vld [vmem:[#allocation4 + $0x38] sm:$0xff]  ;;  %v2070_v62 = vadd.f32 %v2069_v57, %v2068_v55  ;;  %v2347_v63 = vmin.f32 %v2317_v58, %v2031_v47  ;;  %v1794_v1 = vadd.f32 %v5088_v22, %v1793_v52  ;;  %v1900_v11 = vpop.f32.mrf.mxu1  ;;  %v3849_v58 = vld [vmem:[%s4024_s18 + $0x570] sm:$0xff] }
 0x227   : > { %v2877_v6 = vadd.f32 %v2876_v60, %v2875_v31  ;;  %v2967_v5 = vmax.f32 %v2937_v53, %v2741_v26  ;;  %v3027_v29 = vld [vmem:[#allocation5 + $0x38] sm:$0xff]  ;;  %v2167_v9 = vsel %vm629_vm4, %v2130_v7, 0.0  ;;  %2287 = vst.msk [vmem:[#allocation4 + $0x40] sm:$0xff] %vm629_vm4, %v2257_v35  ;;  %v2609_v21 = vadd.f32 %v2608_v59, %v2502_v46  ;;  %1840 = vmatmul.f32.gmra.mxu0 %v3845_v54  ;;  %v2229_v7 = vld [vmem:[#allocation4 + $0x50] sm:$0xff] }
 0x228   : > { %v3057_v61 = vmin.f32 %v3027_v29, %v2741_v26  ;;  %v2168_v10 = vadd.f32 %v2167_v9, %v2166_v43  ;;  %2377 = vst.msk [vmem:[#allocation5 + $0x40] sm:$0xff] %vm629_vm4, %v2347_v63  ;;  %v1901_v12 = vadd.f32 %v1900_v11, %v1794_v1  ;;  %2551 = vmatmul.f32.gmra.mxu2 %v3905_v2  ;;  %v2319_v63 = vld [vmem:[#allocation5 + $0x50] sm:$0xff]  ;;  %v3909_v9 = vld [vmem:[%s4024_s18 + $0x750] sm:$0xff] }
 0x229   : > { %2997 = vst.msk [vmem:[#allocation4 + $0x38] sm:$0xff] %vm629_vm4, %v2967_v5  ;;  %vm2682_vm10 = vcmp.gt.f32.partialorder %v2609_v21, 0.0  ;;  %v2712_v13 = vmul.f32 0.2, %v2609_v21  ;;  %1947 = vmatmul.f32.gmra.mxu1 %v3846_v4 }
 0x22a   : > { %3087 = vst.msk [vmem:[#allocation5 + $0x38] sm:$0xff] %vm629_vm4, %v3057_v61  ;;  %vm1972_vm11 = vcmp.gt.f32.partialorder %v1901_v12, 0.0  ;;  %v2002_v14 = vmul.f32 0.2, %v1901_v12  ;;  %2658 = vmatmul.f32.gmra.mxu3 %v3906_v8 }
 0x22b   : > { %v2504_v15 = vpop.f32.mrf.mxu2  ;;  %v2742_v17 = vsel %vm2682_vm10, %v2609_v21, %v2712_v13  ;;  %v3850_v21 = vld [vmem:[%s4024_s18 + $0x578] sm:$0xff] }
 0x22c   : > { %v2505_v42 = vadd.f32 %v5088_v22, %v2504_v15  ;;  %v2780_v18 = vsel %vm629_vm4, %v2742_v17, 0.0  ;;  %v2841_v49 = vmul.f32 %v2742_v17, %v2742_v17  ;;  %v2032_v50 = vsel %vm1972_vm11, %v1901_v12, %v2002_v14  ;;  %v1796_v20 = vpop.f32.mrf.mxu0  ;;  %v3910_v14 = vld [vmem:[%s4024_s18 + $0x758] sm:$0xff] }
 0x22d   : > { %v2781_v40 = vadd.f32 %v2780_v18, %v2779_v56  ;;  %v2071_v24 = vsel %vm629_vm4, %v2032_v50, 0.0  ;;  %v2131_v25 = vmul.f32 %v2032_v50, %v2032_v50  ;;  %v2258_v55 = vmax.f32 %v2228_v19, %v2032_v50  ;;  %v2611_v28 = vpop.f32.mrf.mxu3 }
 0x22e   : > { %v2878_v3 = vsel %vm629_vm4, %v2841_v49, 0.0  ;;  %v2938_v30 = vld [vmem:[#allocation4 + $0x40] sm:$0xff]  ;;  %v2072_v32 = vadd.f32 %v2071_v24, %v2070_v62  ;;  %v2348_v31 = vmin.f32 %v2318_v27, %v2032_v50  ;;  %v1797_v33 = vadd.f32 %v5088_v22, %v1796_v20  ;;  %v1903_v34 = vpop.f32.mrf.mxu1 }
 0x22f   : > { %v2879_v39 = vadd.f32 %v2878_v3, %v2877_v6  ;;  %v2968_v38 = vmax.f32 %v2938_v30, %v2742_v17  ;;  %v3028_v43 = vld [vmem:[#allocation5 + $0x40] sm:$0xff]  ;;  %v2169_v44 = vsel %vm629_vm4, %v2131_v25, 0.0  ;;  %2288 = vst.msk [vmem:[#allocation4 + $0x48] sm:$0xff] %vm629_vm4, %v2258_v55  ;;  %v2612_v48 = vadd.f32 %v2611_v28, %v2505_v42  ;;  %1843 = vmatmul.f32.gmra.mxu0 %v3847_v23  ;;  %v2230_v25 = vld [vmem:[#allocation4 + $0x58] sm:$0xff] }
 0x230   : > { %v3058_v45 = vmin.f32 %v3028_v43, %v2742_v17  ;;  %v2170_v26 = vadd.f32 %v2169_v44, %v2168_v10  ;;  %2378 = vst.msk [vmem:[#allocation5 + $0x48] sm:$0xff] %vm629_vm4, %v2348_v31  ;;  %v1904_v46 = vadd.f32 %v1903_v34, %v1797_v33  ;;  %2554 = vmatmul.f32.gmra.mxu2 %v3907_v36  ;;  %v3851_v27 = vld [vmem:[%s4024_s18 + $0x580] sm:$0xff]  ;;  %v2320_v31 = vld [vmem:[#allocation5 + $0x58] sm:$0xff] }
 0x231   : > { %2998 = vst.msk [vmem:[#allocation4 + $0x40] sm:$0xff] %vm629_vm4, %v2968_v38  ;;  %vm2683_vm12 = vcmp.gt.f32.partialorder %v2612_v48, 0.0  ;;  %v2713_v0 = vmul.f32 0.2, %v2612_v48  ;;  %1950 = vmatmul.f32.gmra.mxu1 %v3848_v37  ;;  %v3911_v44 = vld [vmem:[%s4024_s18 + $0x760] sm:$0xff] }
 0x232   : > { %3088 = vst.msk [vmem:[#allocation5 + $0x40] sm:$0xff] %vm629_vm4, %v3058_v45  ;;  %vm1973_vm13 = vcmp.gt.f32.partialorder %v1904_v46, 0.0  ;;  %v2003_v16 = vmul.f32 0.2, %v1904_v46  ;;  %2661 = vmatmul.f32.gmra.mxu3 %v3908_v41 }
 0x233   : > { %v2507_v47 = vpop.f32.mrf.mxu2  ;;  %v2743_v51 = vsel %vm2683_vm12, %v2612_v48, %v2713_v0  ;;  %v3852_v48 = vld [vmem:[%s4024_s18 + $0x588] sm:$0xff] }
 0x234   : > { %v2508_v52 = vadd.f32 %v5088_v22, %v2507_v47  ;;  %v2782_v54 = vsel %vm629_vm4, %v2743_v51, 0.0  ;;  %v2842_v56 = vmul.f32 %v2743_v51, %v2743_v51  ;;  %v2033_v57 = vsel %vm1973_vm13, %v1904_v46, %v2003_v16  ;;  %v1799_v35 = vpop.f32.mrf.mxu0  ;;  %v3912_v16 = vld [vmem:[%s4024_s18 + $0x768] sm:$0xff] }
 0x235   : > { %v2783_v59 = vadd.f32 %v2782_v54, %v2781_v40  ;;  %v2073_v60 = vsel %vm629_vm4, %v2033_v57, 0.0  ;;  %v2132_v53 = vmul.f32 %v2033_v57, %v2033_v57  ;;  %v2259_v62 = vmax.f32 %v2229_v7, %v2033_v57  ;;  %v2614_v1 = vpop.f32.mrf.mxu3 }
 0x236   : > { %v2880_v11 = vsel %vm629_vm4, %v2842_v56, 0.0  ;;  %v2939_v2 = vld [vmem:[#allocation4 + $0x48] sm:$0xff]  ;;  %v2074_v4 = vadd.f32 %v2073_v60, %v2072_v32  ;;  %v2349_v6 = vmin.f32 %v2319_v63, %v2033_v57  ;;  %v1800_v5 = vadd.f32 %v5088_v22, %v1799_v35  ;;  %v1906_v29 = vpop.f32.mrf.mxu1 }
 0x237   : > { %v2881_v8 = vadd.f32 %v2880_v11, %v2879_v39  ;;  %v2969_v61 = vmax.f32 %v2939_v2, %v2743_v51  ;;  %v3029_v10 = vld [vmem:[#allocation5 + $0x48] sm:$0xff]  ;;  %v2171_v12 = vsel %vm629_vm4, %v2132_v53, 0.0  ;;  %2289 = vst.msk [vmem:[#allocation4 + $0x50] sm:$0xff] %vm629_vm4, %v2259_v62  ;;  %v2615_v13 = vadd.f32 %v2614_v1, %v2508_v52  ;;  %1846 = vmatmul.f32.gmra.mxu0 %v3849_v58  ;;  %v2231_v53 = vld [vmem:[#allocation4 + $0x60] sm:$0xff]  ;;  %v3853_v63 = vld [vmem:[%s4024_s18 + $0x590] sm:$0x3] }
 0x238   : > { %v3059_v15 = vmin.f32 %v3029_v10, %v2743_v51  ;;  %v2172_v17 = vadd.f32 %v2171_v12, %v2170_v26  ;;  %2379 = vst.msk [vmem:[#allocation5 + $0x50] sm:$0xff] %vm629_vm4, %v2349_v6  ;;  %v1907_v42 = vadd.f32 %v1906_v29, %v1800_v5  ;;  %2557 = vmatmul.f32.gmra.mxu2 %v3909_v9  ;;  %v2321_v6 = vld [vmem:[#allocation5 + $0x60] sm:$0xff]  ;;  %v3913_v12 = vld [vmem:[%s4024_s18 + $0x770] sm:$0x3] }
 0x239   : > { %2999 = vst.msk [vmem:[#allocation4 + $0x48] sm:$0xff] %vm629_vm4, %v2969_v61  ;;  %vm2684_vm14 = vcmp.gt.f32.partialorder %v2615_v13, 0.0  ;;  %v2714_v18 = vmul.f32 0.2, %v2615_v13  ;;  %1953 = vmatmul.f32.gmra.mxu1 %v3850_v21 }
 0x23a   : > { %3089 = vst.msk [vmem:[#allocation5 + $0x48] sm:$0xff] %vm629_vm4, %v3059_v15  ;;  %vm1974_vm15 = vcmp.gt.f32.partialorder %v1907_v42, 0.0  ;;  %v2004_v49 = vmul.f32 0.2, %v1907_v42  ;;  %2664 = vmatmul.f32.gmra.mxu3 %v3910_v14 }
 0x23b   : > { %v2510_v50 = vpop.f32.mrf.mxu2  ;;  %v2744_v19 = vsel %vm2684_vm14, %v2615_v13, %v2714_v18  ;;  %v3854_v13 = vld [vmem:[%s4024_s18 + $0x598] sm:$0x3] }
 0x23c   : > { %v2511_v20 = vadd.f32 %v5088_v22, %v2510_v50  ;;  %v2784_v23 = vsel %vm629_vm4, %v2744_v19, 0.0  ;;  %v2843_v40 = vmul.f32 %v2744_v19, %v2744_v19  ;;  %v2034_v24 = vsel %vm1974_vm15, %v1907_v42, %v2004_v49  ;;  %v1802_v55 = vpop.f32.mrf.mxu0  ;;  %v3914_v49 = vld [vmem:[%s4024_s18 + $0x778] sm:$0x3] }
 0x23d   : > { %v2785_v28 = vadd.f32 %v2784_v23, %v2783_v59  ;;  %v2075_v3 = vsel %vm629_vm4, %v2034_v24, 0.0  ;;  %v2133_v30 = vmul.f32 %v2034_v24, %v2034_v24  ;;  %v2260_v32 = vmax.f32 %v2230_v25, %v2034_v24  ;;  %v2617_v33 = vpop.f32.mrf.mxu3 }
 0x23e   : > { %v2882_v34 = vsel %vm629_vm4, %v2843_v40, 0.0  ;;  %v2940_v36 = vld [vmem:[#allocation4 + $0x50] sm:$0xff]  ;;  %v2076_v37 = vadd.f32 %v2075_v3, %v2074_v4  ;;  %v2350_v39 = vmin.f32 %v2320_v31, %v2034_v24  ;;  %v1803_v38 = vadd.f32 %v5088_v22, %v1802_v55  ;;  %v1909_v43 = vpop.f32.mrf.mxu1 }
 0x23f   : > { %v2883_v41 = vadd.f32 %v2882_v34, %v2881_v8  ;;  %v2970_v45 = vmax.f32 %v2940_v36, %v2744_v19  ;;  %v3030_v26 = vld [vmem:[#allocation5 + $0x50] sm:$0xff]  ;;  %v2173_v46 = vsel %vm629_vm4, %v2133_v30, 0.0  ;;  %2290 = vst.msk [vmem:[#allocation4 + $0x58] sm:$0xff] %vm629_vm4, %v2260_v32  ;;  %v2618_v0 = vadd.f32 %v2617_v33, %v2511_v20  ;;  %1849 = vmatmul.f32.gmra.mxu0 %v3851_v27  ;;  %v2232_v30 = vld [vmem:[#allocation4 + $0x68] sm:$0xff] }
 0x240   : > { %v3060_v47 = vmin.f32 %v3030_v26, %v2744_v19  ;;  %v2174_v51 = vadd.f32 %v2173_v46, %v2172_v17  ;;  %2380 = vst.msk [vmem:[#allocation5 + $0x58] sm:$0xff] %vm629_vm4, %v2350_v39  ;;  %v1910_v52 = vadd.f32 %v1909_v43, %v1803_v38  ;;  %2560 = vmatmul.f32.gmra.mxu2 %v3911_v44 }
 0x241   : > { %3000 = vst.msk [vmem:[#allocation4 + $0x50] sm:$0xff] %vm629_vm4, %v2970_v45  ;;  %vm2685_vm1 = vcmp.gt.f32.partialorder %v2618_v0, 0.0  ;;  %v2715_v54 = vmul.f32 0.2, %v2618_v0  ;;  %1956 = vmatmul.f32.gmra.mxu1 %v3852_v48 }
 0x242   : > { %3090 = vst.msk [vmem:[#allocation5 + $0x50] sm:$0xff] %vm629_vm4, %v3060_v47  ;;  %vm1975_vm2 = vcmp.gt.f32.partialorder %v1910_v52, 0.0  ;;  %v2005_v56 = vmul.f32 0.2, %v1910_v52  ;;  %2667 = vmatmul.f32.gmra.mxu3 %v3912_v16 }
 0x243   : > { %v2513_v57 = vpop.f32.mrf.mxu2  ;;  %v2745_v7 = vsel %vm2685_vm1, %v2618_v0, %v2715_v54 }
 0x244   : > { %v2514_v35 = vadd.f32 %v5088_v22, %v2513_v57  ;;  %v2786_v58 = vsel %vm629_vm4, %v2745_v7, 0.0  ;;  %v2844_v59 = vmul.f32 %v2745_v7, %v2745_v7  ;;  %v2035_v60 = vsel %vm1975_vm2, %v1910_v52, %v2005_v56  ;;  %v1805_v62 = vpop.f32.mrf.mxu0 }
 0x245   : > { %v2787_v1 = vadd.f32 %v2786_v58, %v2785_v28  ;;  %v2077_v11 = vsel %vm629_vm4, %v2035_v60, 0.0  ;;  %v2134_v2 = vmul.f32 %v2035_v60, %v2035_v60  ;;  %v2261_v4 = vmax.f32 %v2231_v53, %v2035_v60  ;;  %v2620_v5 = vpop.f32.mrf.mxu3 }
 0x246   : > { %v2884_v29 = vsel %vm629_vm4, %v2844_v59, 0.0  ;;  %v2941_v9 = vld [vmem:[#allocation4 + $0x58] sm:$0xff]  ;;  %v2078_v21 = vadd.f32 %v2077_v11, %v2076_v37  ;;  %v2351_v8 = vmin.f32 %v2321_v6, %v2035_v60  ;;  %v1806_v61 = vadd.f32 %v5088_v22, %v1805_v62  ;;  %v1912_v10 = vpop.f32.mrf.mxu1  ;;  %v2233_v62 = vld [vmem:[#allocation4 + $0x70] sm:$0xff]  ;;  %v2323_v6 = vld [vmem:[#allocation5 + $0x70] sm:$0xff] }
 0x247   : > { %v2885_v14 = vadd.f32 %v2884_v29, %v2883_v41  ;;  %v2971_v15 = vmax.f32 %v2941_v9, %v2745_v7  ;;  %v3031_v17 = vld [vmem:[#allocation5 + $0x58] sm:$0xff]  ;;  %v2175_v42 = vsel %vm629_vm4, %v2134_v2, 0.0  ;;  %2291 = vst.msk [vmem:[#allocation4 + $0x60] sm:$0xff] %vm629_vm4, %v2261_v4  ;;  %v2621_v18 = vadd.f32 %v2620_v5, %v2514_v35  ;;  %1852 = vmatmul.f32.gmra.mxu0 %v3853_v63  ;;  %v2322_v37 = vld [vmem:[#allocation5 + $0x68] sm:$0xff] }
 0x248   : > { %v3061_v50 = vmin.f32 %v3031_v17, %v2745_v7  ;;  %v2176_v19 = vadd.f32 %v2175_v42, %v2174_v51  ;;  %2381 = vst.msk [vmem:[#allocation5 + $0x60] sm:$0xff] %vm629_vm4, %v2351_v8  ;;  %v1913_v20 = vadd.f32 %v1912_v10, %v1806_v61  ;;  %2563 = vmatmul.f32.gmra.mxu2 %v3913_v12 }
 0x249   : > { %3001 = vst.msk [vmem:[#allocation4 + $0x58] sm:$0xff] %vm629_vm4, %v2971_v15  ;;  %vm2686_vm3 = vcmp.gt.f32.partialorder %v2621_v18, 0.0  ;;  %v2716_v23 = vmul.f32 0.2, %v2621_v18  ;;  %1959 = vmatmul.f32.gmra.mxu1 %v3854_v13 }
 0x24a   : > { %3091 = vst.msk [vmem:[#allocation5 + $0x58] sm:$0xff] %vm629_vm4, %v3061_v50  ;;  %vm1976_vm5 = vcmp.gt.f32.partialorder %v1913_v20, 0.0  ;;  %v2006_v40 = vmul.f32 0.2, %v1913_v20  ;;  %2670 = vmatmul.f32.gmra.mxu3 %v3914_v49 }
 0x24b   : > { %v2516_v24 = vpop.f32.mrf.mxu2  ;;  %v2746_v25 = vsel %vm2686_vm3, %v2621_v18, %v2716_v23 }
 0x24c   : > { %v2517_v55 = vadd.f32 %v5088_v22, %v2516_v24  ;;  %v2788_v27 = vsel %vm629_vm4, %v2746_v25, 0.0  ;;  %v2845_v28 = vmul.f32 %v2746_v25, %v2746_v25  ;;  %v2036_v3 = vsel %vm1976_vm5, %v1913_v20, %v2006_v40  ;;  %v1808_v32 = vpop.f32.mrf.mxu0 }
 0x24d   : > { %v2789_v31 = vadd.f32 %v2788_v27, %v2787_v1  ;;  %v2079_v33 = vsel %vm629_vm4, %v2036_v3, 0.0  ;;  %v2135_v34 = vmul.f32 %v2036_v3, %v2036_v3  ;;  %v2262_v36 = vmax.f32 %v2232_v30, %v2036_v3  ;;  %v2623_v39 = vpop.f32.mrf.mxu3  ;;  %v2234_v27 = vld [vmem:[#allocation4 + $0x78] sm:$0xff] }
 0x24e   : > { %v2886_v38 = vsel %vm629_vm4, %v2845_v28, 0.0  ;;  %v2942_v43 = vld [vmem:[#allocation4 + $0x60] sm:$0xff]  ;;  %v2080_v44 = vadd.f32 %v2079_v33, %v2078_v21  ;;  %v2352_v48 = vmin.f32 %v2322_v37, %v2036_v3  ;;  %v1809_v41 = vadd.f32 %v5088_v22, %v1808_v32  ;;  %v1915_v45 = vpop.f32.mrf.mxu1  ;;  %v2324_v33 = vld [vmem:[#allocation5 + $0x78] sm:$0xff] }
 0x24f   : > { %v2887_v26 = vadd.f32 %v2886_v38, %v2885_v14  ;;  %v2972_v46 = vmax.f32 %v2942_v43, %v2746_v25  ;;  %v3032_v0 = vld [vmem:[#allocation5 + $0x60] sm:$0xff]  ;;  %v2177_v16 = vsel %vm629_vm4, %v2135_v34, 0.0  ;;  %2292 = vst.msk [vmem:[#allocation4 + $0x68] sm:$0xff] %vm629_vm4, %v2262_v36  ;;  %v2624_v47 = vadd.f32 %v2623_v39, %v2517_v55 }
 0x250   : > { %v3062_v51 = vmin.f32 %v3032_v0, %v2746_v25  ;;  %v2178_v52 = vadd.f32 %v2177_v16, %v2176_v19  ;;  %2382 = vst.msk [vmem:[#allocation5 + $0x68] sm:$0xff] %vm629_vm4, %v2352_v48  ;;  %v1916_v54 = vadd.f32 %v1915_v45, %v1809_v41 }
 0x251   : > { %3002 = vst.msk [vmem:[#allocation4 + $0x60] sm:$0xff] %vm629_vm4, %v2972_v46  ;;  %vm2687_vm7 = vcmp.gt.f32.partialorder %v2624_v47, 0.0  ;;  %v2717_v56 = vmul.f32 0.2, %v2624_v47 }
 0x252   : > { %3092 = vst.msk [vmem:[#allocation5 + $0x60] sm:$0xff] %vm629_vm4, %v3062_v51  ;;  %vm1977_vm8 = vcmp.gt.f32.partialorder %v1916_v54, 0.0  ;;  %v2007_v57 = vmul.f32 0.2, %v1916_v54 }
 0x253   : > { %v2519_v7 = vpop.f32.mrf.mxu2  ;;  %v2747_v35 = vsel %vm2687_vm7, %v2624_v47, %v2717_v56 }
 0x254   : > { %v2520_v58 = vadd.f32 %v5088_v22, %v2519_v7  ;;  %v2790_v59 = vsel %vm629_vm4, %v2747_v35, 0.0  ;;  %v2846_v60 = vmul.f32 %v2747_v35, %v2747_v35  ;;  %v2037_v53 = vsel %vm1977_vm8, %v1916_v54, %v2007_v57  ;;  %v1811_v63 = vpop.f32.mrf.mxu0 }
 0x255   : > { %v2791_v1 = vadd.f32 %v2790_v59, %v2789_v31  ;;  %v2081_v11 = vsel %vm629_vm4, %v2037_v53, 0.0  ;;  %v2136_v2 = vmul.f32 %v2037_v53, %v2037_v53  ;;  %v2263_v4 = vmax.f32 %v2233_v62, %v2037_v53  ;;  %v2626_v5 = vpop.f32.mrf.mxu3 }
 0x256   : > { %v2888_v29 = vsel %vm629_vm4, %v2846_v60, 0.0  ;;  %v2943_v9 = vld [vmem:[#allocation4 + $0x68] sm:$0xff]  ;;  %v2082_v21 = vadd.f32 %v2081_v11, %v2080_v44  ;;  %v2353_v8 = vmin.f32 %v2323_v6, %v2037_v53  ;;  %v1812_v61 = vadd.f32 %v5088_v22, %v1811_v63  ;;  %v1918_v10 = vpop.f32.mrf.mxu1  ;;  %v2325_v11 = vld [vmem:[#allocation5 + $0x80] sm:$0xff] }
 0x257   : > { %v2889_v12 = vadd.f32 %v2888_v29, %v2887_v26  ;;  %v2973_v13 = vmax.f32 %v2943_v9, %v2747_v35  ;;  %v3033_v14 = vld [vmem:[#allocation5 + $0x68] sm:$0xff]  ;;  %v2179_v15 = vsel %vm629_vm4, %v2136_v2, 0.0  ;;  %2293 = vst.msk [vmem:[#allocation4 + $0x70] sm:$0xff] %vm629_vm4, %v2263_v4  ;;  %v2627_v17 = vadd.f32 %v2626_v5, %v2520_v58  ;;  %v2235_v58 = vld [vmem:[#allocation4 + $0x80] sm:$0xff] }
 0x258   : > { %v3063_v42 = vmin.f32 %v3033_v14, %v2747_v35  ;;  %v2180_v18 = vadd.f32 %v2179_v15, %v2178_v52  ;;  %2383 = vst.msk [vmem:[#allocation5 + $0x70] sm:$0xff] %vm629_vm4, %v2353_v8  ;;  %v1919_v49 = vadd.f32 %v1918_v10, %v1812_v61 }
 0x259   : > { %3003 = vst.msk [vmem:[#allocation4 + $0x68] sm:$0xff] %vm629_vm4, %v2973_v13  ;;  %vm2688_vm9 = vcmp.gt.f32.partialorder %v2627_v17, 0.0  ;;  %v2718_v50 = vmul.f32 0.2, %v2627_v17 }
 0x25a   : > { %3093 = vst.msk [vmem:[#allocation5 + $0x68] sm:$0xff] %vm629_vm4, %v3063_v42  ;;  %vm1978_vm10 = vcmp.gt.f32.partialorder %v1919_v49, 0.0  ;;  %v2008_v19 = vmul.f32 0.2, %v1919_v49 }
 0x25b   : > { %v2522_v20 = vpop.f32.mrf.mxu2  ;;  %v2748_v23 = vsel %vm2688_vm9, %v2627_v17, %v2718_v50 }
 0x25c   : > { %v2523_v40 = vadd.f32 %v5088_v22, %v2522_v20  ;;  %v2792_v24 = vsel %vm629_vm4, %v2748_v23, 0.0  ;;  %v2847_v25 = vmul.f32 %v2748_v23, %v2748_v23  ;;  %v2038_v55 = vsel %vm1978_vm10, %v1919_v49, %v2008_v19  ;;  %v1814_v28 = vpop.f32.mrf.mxu0 }
 0x25d   : > { %v2793_v3 = vadd.f32 %v2792_v24, %v2791_v1  ;;  %v2083_v30 = vsel %vm629_vm4, %v2038_v55, 0.0  ;;  %v2137_v32 = vmul.f32 %v2038_v55, %v2038_v55  ;;  %v2264_v31 = vmax.f32 %v2234_v27, %v2038_v55  ;;  %v2629_v34 = vpop.f32.mrf.mxu3 }
 0x25e   : > { %v2890_v36 = vsel %vm629_vm4, %v2847_v25, 0.0  ;;  %v2944_v37 = vld [vmem:[#allocation4 + $0x70] sm:$0xff]  ;;  %v2084_v39 = vadd.f32 %v2083_v30, %v2082_v21  ;;  %v2354_v38 = vmin.f32 %v2324_v33, %v2038_v55  ;;  %v1815_v43 = vadd.f32 %v5088_v22, %v1814_v28  ;;  %v1921_v44 = vpop.f32.mrf.mxu1  ;;  %v2326_v30 = vld [vmem:[#allocation5 + $0x88] sm:$0xff] }
 0x25f   : > { %v2891_v48 = vadd.f32 %v2890_v36, %v2889_v12  ;;  %v2974_v41 = vmax.f32 %v2944_v37, %v2748_v23  ;;  %v3034_v45 = vld [vmem:[#allocation5 + $0x70] sm:$0xff]  ;;  %v2181_v26 = vsel %vm629_vm4, %v2137_v32, 0.0  ;;  %2294 = vst.msk [vmem:[#allocation4 + $0x78] sm:$0xff] %vm629_vm4, %v2264_v31  ;;  %v2630_v46 = vadd.f32 %v2629_v34, %v2523_v40  ;;  %v2236_v40 = vld [vmem:[#allocation4 + $0x88] sm:$0xff] }
 0x260   : > { %v3064_v0 = vmin.f32 %v3034_v45, %v2748_v23  ;;  %v2182_v16 = vadd.f32 %v2181_v26, %v2180_v18  ;;  %2384 = vst.msk [vmem:[#allocation5 + $0x78] sm:$0xff] %vm629_vm4, %v2354_v38  ;;  %v1922_v47 = vadd.f32 %v1921_v44, %v1815_v43 }
 0x261   : > { %3004 = vst.msk [vmem:[#allocation4 + $0x70] sm:$0xff] %vm629_vm4, %v2974_v41  ;;  %vm2689_vm11 = vcmp.gt.f32.partialorder %v2630_v46, 0.0  ;;  %v2719_v51 = vmul.f32 0.2, %v2630_v46 }
 0x262   : > { %3094 = vst.msk [vmem:[#allocation5 + $0x70] sm:$0xff] %vm629_vm4, %v3064_v0  ;;  %vm1979_vm12 = vcmp.gt.f32.partialorder %v1922_v47, 0.0  ;;  %v2009_v52 = vmul.f32 0.2, %v1922_v47 }
 0x263   : > { %v2749_v54 = vsel %vm2689_vm11, %v2630_v46, %v2719_v51  ;;  %v2525_v56 = vpop.f32.mrf.mxu2 }
 0x264   : > { %v2794_v57 = vsel %vm629_vm4, %v2749_v54, 0.0  ;;  %v2848_v7 = vmul.f32 %v2749_v54, %v2749_v54  ;;  %v2039_v35 = vsel %vm1979_vm12, %v1922_v47, %v2009_v52  ;;  %v2526_v59 = vadd.f32 %v5088_v22, %v2525_v56  ;;  %v1817_v60 = vpop.f32.mrf.mxu0  ;;  %v2237_v56 = vld [vmem:[#allocation4 + $0x90] sm:$0xff] }
 0x265   : > { %v2795_v53 = vadd.f32 %v2794_v57, %v2793_v3  ;;  %v2085_v62 = vsel %vm629_vm4, %v2039_v35, 0.0  ;;  %v2138_v63 = vmul.f32 %v2039_v35, %v2039_v35  ;;  %v2265_v1 = vmax.f32 %v2235_v58, %v2039_v35  ;;  %v2632_v2 = vpop.f32.mrf.mxu3  ;;  %v5251_v57 = vld [vmem:[%s5873_s2] ss:$0 sm:$0xff] }
 0x266   : > { %v2892_v4 = vsel %vm629_vm4, %v2848_v7, 0.0  ;;  %v2945_v6 = vld [vmem:[#allocation4 + $0x78] sm:$0xff]  ;;  %v2086_v5 = vadd.f32 %v2085_v62, %v2084_v39  ;;  %v2355_v29 = vmin.f32 %v2325_v11, %v2039_v35  ;;  %v1818_v9 = vadd.f32 %v5088_v22, %v1817_v60  ;;  %v1924_v21 = vpop.f32.mrf.mxu1  ;;  %v2327_v62 = vld [vmem:[#allocation5 + $0x90] sm:$0xff] }
 0x267   : > { %v2893_v8 = vadd.f32 %v2892_v4, %v2891_v48  ;;  %v2975_v61 = vmax.f32 %v2945_v6, %v2749_v54  ;;  %v3035_v10 = vld [vmem:[#allocation5 + $0x78] sm:$0xff]  ;;  %v2183_v12 = vsel %vm629_vm4, %v2138_v63, 0.0  ;;  %2295 = vst.msk [vmem:[#allocation4 + $0x80] sm:$0xff] %vm629_vm4, %v2265_v1  ;;  %v2633_v13 = vadd.f32 %v2632_v2, %v2526_v59 }
 0x268   : > { %v3065_v14 = vmin.f32 %v3035_v10, %v2749_v54  ;;  %v2184_v15 = vadd.f32 %v2183_v12, %v2182_v16  ;;  %2385 = vst.msk [vmem:[#allocation5 + $0x80] sm:$0xff] %vm629_vm4, %v2355_v29  ;;  %v1925_v17 = vadd.f32 %v1924_v21, %v1818_v9 }
 0x269   : > { %3005 = vst.msk [vmem:[#allocation4 + $0x78] sm:$0xff] %vm629_vm4, %v2975_v61  ;;  %vm2690_vm13 = vcmp.gt.f32.partialorder %v2633_v13, 0.0  ;;  %v2720_v42 = vmul.f32 0.2, %v2633_v13 }
 0x26a   : > { %3095 = vst.msk [vmem:[#allocation5 + $0x78] sm:$0xff] %vm629_vm4, %v3065_v14  ;;  %vm1980_vm14 = vcmp.gt.f32.partialorder %v1925_v17, 0.0  ;;  %v2010_v18 = vmul.f32 0.2, %v1925_v17 }
 0x26b   : > { %v2750_v49 = vsel %vm2690_vm13, %v2633_v13, %v2720_v42  ;;  %v2528_v50 = vpop.f32.mrf.mxu2 }
 0x26c   : > { %v2796_v19 = vsel %vm629_vm4, %v2750_v49, 0.0  ;;  %v2849_v20 = vmul.f32 %v2750_v49, %v2750_v49  ;;  %v2040_v23 = vsel %vm1980_vm14, %v1925_v17, %v2010_v18  ;;  %v2529_v24 = vadd.f32 %v5088_v22, %v2528_v50  ;;  %v1820_v25 = vpop.f32.mrf.mxu0  ;;  %v2238_v50 = vld [vmem:[#allocation4 + $0x98] sm:$0xff] }
 0x26d   : > { %v2797_v55 = vadd.f32 %v2796_v19, %v2795_v53  ;;  %v2087_v27 = vsel %vm629_vm4, %v2040_v23, 0.0  ;;  %v2139_v28 = vmul.f32 %v2040_v23, %v2040_v23  ;;  %v2266_v3 = vmax.f32 %v2236_v40, %v2040_v23  ;;  %v2635_v32 = vpop.f32.mrf.mxu3 }
 0x26e   : > { %v2894_v31 = vsel %vm629_vm4, %v2849_v20, 0.0  ;;  %v2946_v33 = vld [vmem:[#allocation4 + $0x80] sm:$0xff]  ;;  %v2088_v34 = vadd.f32 %v2087_v27, %v2086_v5  ;;  %v2356_v36 = vmin.f32 %v2326_v30, %v2040_v23  ;;  %v1821_v37 = vadd.f32 %v5088_v22, %v1820_v25  ;;  %v1927_v39 = vpop.f32.mrf.mxu1 }
 0x26f   : > { %v2895_v38 = vadd.f32 %v2894_v31, %v2893_v8  ;;  %v2976_v43 = vmax.f32 %v2946_v33, %v2750_v49  ;;  %v3036_v44 = vld [vmem:[#allocation5 + $0x80] sm:$0xff]  ;;  %v2185_v48 = vsel %vm629_vm4, %v2139_v28, 0.0  ;;  %2296 = vst.msk [vmem:[#allocation4 + $0x88] sm:$0xff] %vm629_vm4, %v2266_v3  ;;  %v2636_v41 = vadd.f32 %v2635_v32, %v2529_v24  ;;  %v2328_v24 = vld [vmem:[#allocation5 + $0x98] sm:$0xff] }
 0x270   : > { %v3066_v45 = vmin.f32 %v3036_v44, %v2750_v49  ;;  %v2186_v26 = vadd.f32 %v2185_v48, %v2184_v15  ;;  %2386 = vst.msk [vmem:[#allocation5 + $0x88] sm:$0xff] %vm629_vm4, %v2356_v36  ;;  %v1928_v46 = vadd.f32 %v1927_v39, %v1821_v37 }
 0x271   : > { %3006 = vst.msk [vmem:[#allocation4 + $0x80] sm:$0xff] %vm629_vm4, %v2976_v43  ;;  %vm2691_vm15 = vcmp.gt.f32.partialorder %v2636_v41, 0.0  ;;  %v2721_v0 = vmul.f32 0.2, %v2636_v41 }
 0x272   : > { %3096 = vst.msk [vmem:[#allocation5 + $0x80] sm:$0xff] %vm629_vm4, %v3066_v45  ;;  %vm1981_vm1 = vcmp.gt.f32.partialorder %v1928_v46, 0.0  ;;  %v2011_v22 = vmul.f32 0.2, %v1928_v46  ;;  %v2239_v45 = vld [vmem:[#allocation4 + $0xa0] sm:$0xff] }
 0x273   : > { %v2751_v16 = vsel %vm2691_vm15, %v2636_v41, %v2721_v0  ;;  %v2531_v47 = vpop.f32.mrf.mxu2 }
 0x274   : > { %v2798_v51 = vsel %vm629_vm4, %v2751_v16, 0.0  ;;  %v2850_v52 = vmul.f32 %v2751_v16, %v2751_v16  ;;  %v2041_v54 = vsel %vm1981_vm1, %v1928_v46, %v2011_v22  ;;  %v2532_v7 = vadd.f32 %v5251_v57, %v2531_v47  ;;  %v1823_v35 = vpop.f32.mrf.mxu0  ;;  %v2329_v47 = vld [vmem:[#allocation5 + $0xa0] sm:$0xff] }
 0x275   : > { %v2799_v58 = vadd.f32 %v2798_v51, %v2797_v55  ;;  %v2089_v59 = vsel %vm629_vm4, %v2041_v54, 0.0  ;;  %v2140_v60 = vmul.f32 %v2041_v54, %v2041_v54  ;;  %v2267_v53 = vmax.f32 %v2237_v56, %v2041_v54  ;;  %v2638_v63 = vpop.f32.mrf.mxu3 }
 0x276   : > { %v2896_v1 = vsel %vm629_vm4, %v2850_v52, 0.0  ;;  %v2947_v11 = vld [vmem:[#allocation4 + $0x88] sm:$0xff]  ;;  %v5256_v2 = vadd.f32 %v2089_v59, %v2088_v34  ;;  %v2357_v4 = vmin.f32 %v2327_v62, %v2041_v54  ;;  %v1824_v6 = vadd.f32 %v5251_v57, %v1823_v35  ;;  %v1930_v5 = vpop.f32.mrf.mxu1 }
 0x277   : > { %v2897_v29 = vadd.f32 %v2896_v1, %v2895_v38  ;;  %v2977_v9 = vmax.f32 %v2947_v11, %v2751_v16  ;;  %v3037_v21 = vld [vmem:[#allocation5 + $0x88] sm:$0xff]  ;;  %v2187_v8 = vsel %vm629_vm4, %v2140_v60, 0.0  ;;  %2297 = vst.msk [vmem:[#allocation4 + $0x90] sm:$0xff] %vm629_vm4, %v2267_v53  ;;  %v2639_v61 = vadd.f32 %v2638_v63, %v2532_v7 }
 0x278   : > { %v3067_v10 = vmin.f32 %v3037_v21, %v2751_v16  ;;  %v5261_v12 = vadd.f32 %v2187_v8, %v2186_v26  ;;  %2387 = vst.msk [vmem:[#allocation5 + $0x90] sm:$0xff] %vm629_vm4, %v2357_v4  ;;  %v1931_v13 = vadd.f32 %v1930_v5, %v1824_v6  ;;  %v2240_v5 = vld [vmem:[#allocation4 + $0xa8] sm:$0xff] }
 0x279   : > { %3007 = vst.msk [vmem:[#allocation4 + $0x88] sm:$0xff] %vm629_vm4, %v2977_v9  ;;  %vm2692_vm2 = vcmp.gt.f32.partialorder %v2639_v61, 0.0  ;;  %v2722_v14 = vmul.f32 0.2, %v2639_v61 }
 0x27a   : > { %3097 = vst.msk [vmem:[#allocation5 + $0x88] sm:$0xff] %vm629_vm4, %v3067_v10  ;;  %vm1982_vm3 = vcmp.gt.f32.partialorder %v1931_v13, 0.0  ;;  %v2012_v15 = vmul.f32 0.2, %v1931_v13 }
 0x27b   : > { %v2752_v17 = vsel %vm2692_vm2, %v2639_v61, %v2722_v14  ;;  %v2534_v19 = vpop.f32.mrf.mxu2  ;;  %v2330_v61 = vld [vmem:[#allocation5 + $0xa8] sm:$0xff] }
 0x27c   : > { %v2800_v42 = vsel %vm629_vm4, %v2752_v17, 0.0  ;;  %v2851_v18 = vmul.f32 %v2752_v17, %v2752_v17  ;;  %v5267_v49 = vsel %vm1982_vm3, %v1931_v13, %v2012_v15  ;;  %v1826_v20 = vpop.f32.mrf.mxu0  ;;  %v2535_v3 = vadd.f32 %v5251_v57, %v2534_v19 }
 0x27d   : > { %v5269_v23 = vadd.f32 %v2800_v42, %v2799_v58  ;;  %v2268_v40 = vmax.f32 %v2238_v50, %v5267_v49  ;;  %v2641_v25 = vpop.f32.mrf.mxu3  ;;  %v2358_v28 = vmin.f32 %v2328_v24, %v5267_v49  ;;  %v1827_v34 = vadd.f32 %v5251_v57, %v1826_v20 }
 0x27e   : > { %v2898_v55 = vsel %vm629_vm4, %v2851_v18, 0.0  ;;  %v2948_v27 = vld [vmem:[#allocation4 + $0x90] sm:$0xff]  ;;  %v1933_v30 = vpop.f32.mrf.mxu1  ;;  %v2642_v37 = vadd.f32 %v2641_v25, %v2535_v3 }
 0x27f   : > { %v5275_v32 = vadd.f32 %v2898_v55, %v2897_v29  ;;  %v2978_v31 = vmax.f32 %v2948_v27, %v2752_v17  ;;  %v3038_v33 = vld [vmem:[#allocation5 + $0x90] sm:$0xff]  ;;  %2298 = vst.msk [vmem:[#allocation4 + $0x98] sm:$0xff] %vm629_vm4, %v2268_v40  ;;  %v1934_v39 = vadd.f32 %v1933_v30, %v1827_v34  ;;  %v2241_v27 = vld [vmem:[#allocation4 + $0xb0] sm:$0xff] }
 0x280   : > { %v3068_v36 = vmin.f32 %v3038_v33, %v2752_v17  ;;  %2388 = vst.msk [vmem:[#allocation5 + $0x98] sm:$0xff] %vm629_vm4, %v2358_v28  ;;  %v2723_v38 = vmul.f32 0.2, %v2642_v37  ;;  %vm2693_vm5 = vcmp.gt.f32.partialorder %v2642_v37, 0.0  ;;  %v2331_v30 = vld [vmem:[#allocation5 + $0xb0] sm:$0xff] }
 0x281   : > { %3008 = vst.msk [vmem:[#allocation4 + $0x90] sm:$0xff] %vm629_vm4, %v2978_v31  ;;  %vm1983_vm7 = vcmp.gt.f32.partialorder %v1934_v39, 0.0  ;;  %v2013_v43 = vmul.f32 0.2, %v1934_v39 }
 0x282   : > { %3098 = vst.msk [vmem:[#allocation5 + $0x90] sm:$0xff] %vm629_vm4, %v3068_v36  ;;  %v5285_v0 = vsel %vm2693_vm5, %v2642_v37, %v2723_v38 }
 0x283   : > { %v2537_v44 = vpop.f32.mrf.mxu2  ;;  %v5282_v41 = vsel %vm1983_vm7, %v1934_v39, %v2013_v43 }
 0x284   : > { %v1829_v48 = vpop.f32.mrf.mxu0  ;;  %v2538_v26 = vadd.f32 %v5251_v57, %v2537_v44  ;;  %v2269_v16 = vmax.f32 %v2239_v45, %v5282_v41  ;;  %v2359_v56 = vmin.f32 %v2329_v47, %v5282_v41 }
 0x285   : > { %v2644_v46 = vpop.f32.mrf.mxu3  ;;  %v1830_v35 = vadd.f32 %v5251_v57, %v1829_v48 }
 0x286   : > { %v2949_v22 = vld [vmem:[#allocation4 + $0x98] sm:$0xff]  ;;  %v1936_v51 = vpop.f32.mrf.mxu1  ;;  %2299 = vst.msk [vmem:[#allocation4 + $0xa0] sm:$0xff] %vm629_vm4, %v2269_v16  ;;  %v2645_v58 = vadd.f32 %v2644_v46, %v2538_v26 }
 0x287   : > { %v2979_v52 = vmax.f32 %v2949_v22, %v5285_v0  ;;  %v3039_v54 = vld [vmem:[#allocation5 + $0x98] sm:$0xff]  ;;  %v1937_v59 = vadd.f32 %v1936_v51, %v1830_v35  ;;  %2389 = vst.msk [vmem:[#allocation5 + $0xa0] sm:$0xff] %vm629_vm4, %v2359_v56  ;;  %v2242_v22 = vld [vmem:[#allocation4 + $0xb8] sm:$0xff] }
 0x288   : > { %v3069_v7 = vmin.f32 %v3039_v54, %v5285_v0  ;;  %v2724_v60 = vmul.f32 0.2, %v2645_v58  ;;  %vm2694_vm8 = vcmp.gt.f32.partialorder %v2645_v58, 0.0 }
 0x289   : > { %3009 = vst.msk [vmem:[#allocation4 + $0x98] sm:$0xff] %vm629_vm4, %v2979_v52  ;;  %vm1984_vm9 = vcmp.gt.f32.partialorder %v1937_v59, 0.0  ;;  %v2014_v53 = vmul.f32 0.2, %v1937_v59  ;;  %v2332_v52 = vld [vmem:[#allocation5 + $0xb8] sm:$0xff] }
 0x28a   : > { %3099 = vst.msk [vmem:[#allocation5 + $0x98] sm:$0xff] %vm629_vm4, %v3069_v7  ;;  %v5300_v9 = vsel %vm2694_vm8, %v2645_v58, %v2724_v60 }
 0x28b   : > { %v2540_v62 = vpop.f32.mrf.mxu2  ;;  %v5298_v6 = vsel %vm1984_vm9, %v1937_v59, %v2014_v53 }
 0x28c   : > { %v1832_v63 = vpop.f32.mrf.mxu0  ;;  %v2541_v1 = vadd.f32 %v5251_v57, %v2540_v62  ;;  %v2270_v8 = vmax.f32 %v2240_v5, %v5298_v6  ;;  %v2360_v13 = vmin.f32 %v2330_v61, %v5298_v6 }
 0x28d   : > { %v1833_v11 = vadd.f32 %v5251_v57, %v1832_v63  ;;  %v2647_v4 = vpop.f32.mrf.mxu3  ;;  %v2950_v21 = vld [vmem:[#allocation4 + $0xa0] sm:$0xff]  ;;  %v2141_v63 = vmul.f32 %v5267_v49, %v5267_v49 }
 0x28e   : > { %v1939_v29 = vpop.f32.mrf.mxu1  ;;  %v2980_v10 = vmax.f32 %v2950_v21, %v5300_v9  ;;  %2300 = vst.msk [vmem:[#allocation4 + $0xa8] sm:$0xff] %vm629_vm4, %v2270_v8  ;;  %v2648_v14 = vadd.f32 %v2647_v4, %v2541_v1  ;;  %v3040_v17 = vld [vmem:[#allocation5 + $0xa0] sm:$0xff]  ;;  %v2852_v21 = vmul.f32 %v5285_v0, %v5285_v0  ;;  %v2142_v8 = vmul.f32 %v5282_v41, %v5282_v41 }
 0x28f   : > { %v1940_v15 = vadd.f32 %v1939_v29, %v1833_v11  ;;  %v3070_v42 = vmin.f32 %v3040_v17, %v5300_v9  ;;  %2390 = vst.msk [vmem:[#allocation5 + $0xa8] sm:$0xff] %vm629_vm4, %v2360_v13  ;;  %v2189_v17 = vsel %vm629_vm4, %v2141_v63, 0.0 }
 0x290   : > { %3010 = vst.msk [vmem:[#allocation4 + $0xa0] sm:$0xff] %vm629_vm4, %v2980_v10  ;;  %v2725_v18 = vmul.f32 0.2, %v2648_v14  ;;  %vm2695_vm11 = vcmp.gt.f32.partialorder %v2648_v14, 0.0  ;;  %v2243_v10 = vld [vmem:[#allocation4 + $0xc0] sm:$0xff] }
 0x291   : > { %vm1985_vm10 = vcmp.gt.f32.partialorder %v1940_v15, 0.0  ;;  %v2015_v50 = vmul.f32 0.2, %v1940_v15  ;;  %3100 = vst.msk [vmem:[#allocation5 + $0xa0] sm:$0xff] %vm629_vm4, %v3070_v42 }
 0x292   : > { %v5315_v31 = vsel %vm2695_vm11, %v2648_v14, %v2725_v18  ;;  %v2333_v18 = vld [vmem:[#allocation5 + $0xc0] sm:$0xff] }
 0x293   : > { %v2543_v19 = vpop.f32.mrf.mxu2  ;;  %v5312_v55 = vsel %vm1985_vm10, %v1940_v15, %v2015_v50  ;;  %v2091_v15 = vsel %vm629_vm4, %v5267_v49, 0.0 }
 0x294   : > { %v1835_v20 = vpop.f32.mrf.mxu0  ;;  %v2544_v40 = vadd.f32 %v5251_v57, %v2543_v19  ;;  %v2271_v3 = vmax.f32 %v2241_v27, %v5312_v55  ;;  %v2361_v34 = vmin.f32 %v2331_v30, %v5312_v55  ;;  %v2802_v19 = vsel %vm629_vm4, %v5285_v0, 0.0 }
 0x295   : > { %v1836_v24 = vadd.f32 %v5251_v57, %v1835_v20  ;;  %v2650_v25 = vpop.f32.mrf.mxu3  ;;  %v2951_v33 = vld [vmem:[#allocation4 + $0xa8] sm:$0xff]  ;;  %v2093_v27 = vsel %vm629_vm4, %v5282_v41, 0.0  ;;  %v2900_v30 = vsel %vm629_vm4, %v2852_v21, 0.0  ;;  %v2191_v0 = vsel %vm629_vm4, %v2142_v8, 0.0 }
 0x296   : > { %v1942_v28 = vpop.f32.mrf.mxu1  ;;  %v2651_v36 = vadd.f32 %v2650_v25, %v2544_v40  ;;  %v2981_v37 = vmax.f32 %v2951_v33, %v5315_v31  ;;  %2301 = vst.msk [vmem:[#allocation4 + $0xb0] sm:$0xff] %vm629_vm4, %v2271_v3  ;;  %v3041_v38 = vld [vmem:[#allocation5 + $0xa8] sm:$0xff]  ;;  %v2803_v41 = vadd.f32 %v2802_v19, %v5269_v23  ;;  %v2097_v21 = vsel %vm629_vm4, %v5312_v55, 0.0 }
 0x297   : > { %v1943_v39 = vadd.f32 %v1942_v28, %v1836_v24  ;;  %2391 = vst.msk [vmem:[#allocation5 + $0xb0] sm:$0xff] %vm629_vm4, %v2361_v34  ;;  %v3071_v43 = vmin.f32 %v3041_v38, %v5315_v31  ;;  %v2143_v38 = vmul.f32 %v5298_v6, %v5298_v6 }
 0x298   : > { %3011 = vst.msk [vmem:[#allocation4 + $0xa8] sm:$0xff] %vm629_vm4, %v2981_v37  ;;  %v2726_v48 = vmul.f32 0.2, %v2651_v36  ;;  %vm2696_vm13 = vcmp.gt.f32.partialorder %v2651_v36, 0.0  ;;  %v2190_v37 = vadd.f32 %v2189_v17, %v5261_v12 }
 0x299   : > { %vm1986_vm12 = vcmp.gt.f32.partialorder %v1943_v39, 0.0  ;;  %v2016_v44 = vmul.f32 0.2, %v1943_v39  ;;  %3101 = vst.msk [vmem:[#allocation5 + $0xa8] sm:$0xff] %vm629_vm4, %v3071_v43 }
 0x29a   : > { %v5330_v35 = vsel %vm2696_vm13, %v2651_v36, %v2726_v48  ;;  %v2092_v36 = vadd.f32 %v2091_v15, %v5256_v2  ;;  %v2901_v48 = vadd.f32 %v2900_v30, %v5275_v32  ;;  %v2095_v32 = vsel %vm629_vm4, %v5298_v6, 0.0 }
 0x29b   : > { %v2546_v45 = vpop.f32.mrf.mxu2  ;;  %v5324_v46 = vsel %vm1986_vm12, %v1943_v39, %v2016_v44  ;;  %v2853_v39 = vmul.f32 %v5300_v9, %v5300_v9  ;;  %v2806_v6 = vsel %vm629_vm4, %v5315_v31, 0.0  ;;  %v2855_v19 = vmul.f32 %v5330_v35, %v5330_v35 }
 0x29c   : > { %v1838_v26 = vpop.f32.mrf.mxu0  ;;  %v2547_v16 = vadd.f32 %v5251_v57, %v2546_v45  ;;  %v2272_v51 = vmax.f32 %v2242_v22, %v5324_v46  ;;  %v2362_v56 = vmin.f32 %v2332_v52, %v5324_v46  ;;  %v2094_v2 = vadd.f32 %v2093_v27, %v2092_v36 }
 0x29d   : > { %v2653_v47 = vpop.f32.mrf.mxu3  ;;  %v1839_v7 = vadd.f32 %v5251_v57, %v1838_v26  ;;  %v2952_v58 = vld [vmem:[#allocation4 + $0xb0] sm:$0xff]  ;;  %v2192_v45 = vadd.f32 %v2191_v0, %v2190_v37  ;;  %v2804_v26 = vsel %vm629_vm4, %v5300_v9, 0.0  ;;  %v2854_v22 = vmul.f32 %v5315_v31, %v5315_v31  ;;  %v2334_v9 = vld [vmem:[#allocation5 + $0xc8] sm:$0xff]  ;;  %v2335_v37 = vld [vmem:[#allocation5 + $0xd0] sm:$0xff] }
 0x29e   : > { %v1945_v54 = vpop.f32.mrf.mxu1  ;;  %2302 = vst.msk [vmem:[#allocation4 + $0xb8] sm:$0xff] %vm629_vm4, %v2272_v51  ;;  %v2654_v59 = vadd.f32 %v2653_v47, %v2547_v16  ;;  %v2982_v60 = vmax.f32 %v2952_v58, %v5330_v35  ;;  %v3042_v53 = vld [vmem:[#allocation5 + $0xb0] sm:$0xff]  ;;  %v2244_v47 = vld [vmem:[#allocation4 + $0xc8] sm:$0xff]  ;;  %v2145_v27 = vmul.f32 %v5324_v46, %v5324_v46 }
 0x29f   : > { %2392 = vst.msk [vmem:[#allocation5 + $0xb8] sm:$0xff] %vm629_vm4, %v2362_v56  ;;  %v1946_v62 = vadd.f32 %v1945_v54, %v1839_v7  ;;  %v3072_v1 = vmin.f32 %v3042_v53, %v5330_v35  ;;  %v2902_v54 = vsel %vm629_vm4, %v2853_v39, 0.0  ;;  %v2144_v56 = vmul.f32 %v5312_v55, %v5312_v55 }
 0x2a0   : > { %3012 = vst.msk [vmem:[#allocation4 + $0xb0] sm:$0xff] %vm629_vm4, %v2982_v60  ;;  %v2727_v11 = vmul.f32 0.2, %v2654_v59  ;;  %vm2697_vm15 = vcmp.gt.f32.partialorder %v2654_v59, 0.0 }
 0x2a1   : > { %vm1987_vm14 = vcmp.gt.f32.partialorder %v1946_v62, 0.0  ;;  %v2017_v4 = vmul.f32 0.2, %v1946_v62  ;;  %3102 = vst.msk [vmem:[#allocation5 + $0xb0] sm:$0xff] %vm629_vm4, %v3072_v1  ;;  %v2805_v1 = vadd.f32 %v2804_v26, %v2803_v41  ;;  %v2195_v31 = vsel %vm629_vm4, %v2144_v56, 0.0 }
 0x2a2   : > { %v5353_v20 = vsel %vm2697_vm15, %v2654_v59, %v2727_v11  ;;  %v2193_v59 = vsel %vm629_vm4, %v2143_v38, 0.0  ;;  %v2099_v41 = vsel %vm629_vm4, %v5324_v46, 0.0  ;;  %v2197_v26 = vsel %vm629_vm4, %v2145_v27, 0.0 }
 0x2a3   : > { %v2549_v5 = vpop.f32.mrf.mxu2  ;;  %v5344_v61 = vsel %vm1987_vm14, %v1946_v62, %v2017_v4  ;;  %v2194_v15 = vadd.f32 %v2193_v59, %v2192_v45  ;;  %v2807_v17 = vadd.f32 %v2806_v6, %v2805_v1  ;;  %v2810_v46 = vsel %vm629_vm4, %v5353_v20, 0.0  ;;  %v2246_v6 = vld [vmem:[#allocation4 + $0xd8] sm:$0xff] }
 0x2a4   : > { %v1841_v29 = vpop.f32.mrf.mxu0  ;;  %v2550_v13 = vadd.f32 %v5251_v57, %v2549_v5  ;;  %v2273_v42 = vmax.f32 %v2243_v10, %v5344_v61  ;;  %v2363_v24 = vmin.f32 %v2333_v18, %v5344_v61 }
 0x2a5   : > { %v2656_v14 = vpop.f32.mrf.mxu3  ;;  %v2953_v40 = vld [vmem:[#allocation4 + $0xb8] sm:$0xff]  ;;  %v1842_v25 = vadd.f32 %v5251_v57, %v1841_v29  ;;  %v2904_v29 = vsel %vm629_vm4, %v2854_v22, 0.0  ;;  %v2196_v0 = vadd.f32 %v2195_v31, %v2194_v15 }
 0x2a6   : > { %v1948_v50 = vpop.f32.mrf.mxu1  ;;  %v2983_v49 = vmax.f32 %v2953_v40, %v5353_v20  ;;  %v3043_v28 = vld [vmem:[#allocation5 + $0xb8] sm:$0xff]  ;;  %2303 = vst.msk [vmem:[#allocation4 + $0xc0] sm:$0xff] %vm629_vm4, %v2273_v42  ;;  %v2657_v3 = vadd.f32 %v2656_v14, %v2550_v13  ;;  %v2903_v13 = vadd.f32 %v2902_v54, %v2901_v48  ;;  %v2096_v14 = vadd.f32 %v2095_v32, %v2094_v2 }
 0x2a7   : > { %v3073_v33 = vmin.f32 %v3043_v28, %v5353_v20  ;;  %2393 = vst.msk [vmem:[#allocation5 + $0xc0] sm:$0xff] %vm629_vm4, %v2363_v24  ;;  %v1949_v34 = vadd.f32 %v1948_v50, %v1842_v25  ;;  %v2808_v25 = vsel %vm629_vm4, %v5330_v35, 0.0  ;;  %v2245_v28 = vld [vmem:[#allocation4 + $0xd0] sm:$0xff]  ;;  %v2906_v2 = vsel %vm629_vm4, %v2855_v19, 0.0 }
 0x2a8   : > { %3013 = vst.msk [vmem:[#allocation4 + $0xb8] sm:$0xff] %vm629_vm4, %v2983_v49  ;;  %v2728_v43 = vmul.f32 0.2, %v2657_v3  ;;  %vm2698_vm2 = vcmp.gt.f32.partialorder %v2657_v3, 0.0  ;;  %v2905_v50 = vadd.f32 %v2904_v29, %v2903_v13  ;;  %v2098_v55 = vadd.f32 %v2097_v21, %v2096_v14 }
 0x2a9   : > { %3103 = vst.msk [vmem:[#allocation5 + $0xb8] sm:$0xff] %vm629_vm4, %v3073_v33  ;;  %vm1988_vm1 = vcmp.gt.f32.partialorder %v1949_v34, 0.0  ;;  %v2018_v44 = vmul.f32 0.2, %v1949_v34  ;;  %v2856_v33 = vmul.f32 %v5353_v20, %v5353_v20  ;;  %v2809_v48 = vadd.f32 %v2808_v25, %v2807_v17 }
 0x2aa   : > { %v5390_v60 = vsel %vm2698_vm2, %v2657_v3, %v2728_v43  ;;  %v2101_v54 = vsel %vm629_vm4, %v5344_v61, 0.0  ;;  %v2907_v56 = vadd.f32 %v2906_v2, %v2905_v50 }
 0x2ab   : > { %v2552_v12 = vpop.f32.mrf.mxu2  ;;  %v5379_v16 = vsel %vm1988_vm1, %v1949_v34, %v2018_v44  ;;  %v2146_v34 = vmul.f32 %v5344_v61, %v5344_v61  ;;  %v2857_v59 = vmul.f32 %v5390_v60, %v5390_v60  ;;  %v2812_v14 = vsel %vm629_vm4, %v5390_v60, 0.0 }
 0x2ac   : > { %v1844_v23 = vpop.f32.mrf.mxu0  ;;  %v2553_v51 = vadd.f32 %v5251_v57, %v2552_v12  ;;  %v2274_v7 = vmax.f32 %v2244_v47, %v5379_v16  ;;  %v2364_v62 = vmin.f32 %v2334_v9, %v5379_v16  ;;  %v2198_v9 = vadd.f32 %v2197_v26, %v2196_v0 }
 0x2ad   : > { %v2659_v52 = vpop.f32.mrf.mxu3  ;;  %v2954_v53 = vld [vmem:[#allocation4 + $0xc0] sm:$0xff]  ;;  %v1845_v63 = vadd.f32 %v5251_v57, %v1844_v23  ;;  %v2199_v32 = vsel %vm629_vm4, %v2146_v34, 0.0  ;;  %v2147_v61 = vmul.f32 %v5379_v16, %v5379_v16  ;;  %v2103_v50 = vsel %vm629_vm4, %v5379_v16, 0.0 }
 0x2ae   : > { %v1951_v58 = vpop.f32.mrf.mxu1  ;;  %v2984_v11 = vmax.f32 %v2954_v53, %v5390_v60  ;;  %v3044_v4 = vld [vmem:[#allocation5 + $0xc0] sm:$0xff]  ;;  %2304 = vst.msk [vmem:[#allocation4 + $0xc8] sm:$0xff] %vm629_vm4, %v2274_v7  ;;  %v2660_v5 = vadd.f32 %v2659_v52, %v2553_v51  ;;  %v2100_v51 = vadd.f32 %v2099_v41, %v2098_v55  ;;  %v2908_v52 = vsel %vm629_vm4, %v2856_v33, 0.0 }
 0x2af   : > { %v3074_v8 = vmin.f32 %v3044_v4, %v5390_v60  ;;  %2394 = vst.msk [vmem:[#allocation5 + $0xc8] sm:$0xff] %vm629_vm4, %v2364_v62  ;;  %v1952_v10 = vadd.f32 %v1951_v58, %v1845_v63  ;;  %v2811_v58 = vadd.f32 %v2810_v46, %v2809_v48  ;;  %v2200_v29 = vadd.f32 %v2199_v32, %v2198_v9  ;;  %v2247_v48 = vld [vmem:[#allocation4 + $0xe0] sm:$0xff]  ;;  %v2337_v46 = vld [vmem:[#allocation5 + $0xe0] sm:$0xff] }
 0x2b0   : > { %3014 = vst.msk [vmem:[#allocation4 + $0xc0] sm:$0xff] %vm629_vm4, %v2984_v11  ;;  %v2729_v42 = vmul.f32 0.2, %v2660_v5  ;;  %vm2699_vm5 = vcmp.gt.f32.partialorder %v2660_v5, 0.0  ;;  %v2102_v63 = vadd.f32 %v2101_v54, %v2100_v51 }
 0x2b1   : > { %3104 = vst.msk [vmem:[#allocation5 + $0xc0] sm:$0xff] %vm629_vm4, %v3074_v8  ;;  %vm1989_vm3 = vcmp.gt.f32.partialorder %v1952_v10, 0.0  ;;  %v2019_v18 = vmul.f32 0.2, %v1952_v10 }
 0x2b2   : > { %v2759_v39 = vsel %vm2699_vm5, %v2660_v5, %v2729_v42  ;;  %v2909_v5 = vadd.f32 %v2908_v52, %v2907_v56  ;;  %v2104_v0 = vadd.f32 %v2103_v50, %v2102_v63 }
 0x2b3   : > { %v2555_v40 = vpop.f32.mrf.mxu2  ;;  %v5412_v49 = vsel %vm1989_vm3, %v1952_v10, %v2019_v18  ;;  %v2858_v21 = vmul.f32 %v2759_v39, %v2759_v39  ;;  %v2336_v10 = vld [vmem:[#allocation5 + $0xd8] sm:$0xff]  ;;  %v2910_v18 = vsel %vm629_vm4, %v2857_v59, 0.0  ;;  %v2814_v60 = vsel %vm629_vm4, %v2759_v39, 0.0 }
 0x2b4   : > { %v1847_v24 = vpop.f32.mrf.mxu0  ;;  %v2556_v3 = vadd.f32 %v5251_v57, %v2555_v40  ;;  %v2275_v36 = vmax.f32 %v2245_v28, %v5412_v49  ;;  %v2365_v43 = vmin.f32 %v2335_v37, %v5412_v49  ;;  %v2813_v28 = vadd.f32 %v2812_v14, %v2811_v58 }
 0x2b5   : > { %v2662_v30 = vpop.f32.mrf.mxu3  ;;  %v2955_v38 = vld [vmem:[#allocation4 + $0xc8] sm:$0xff]  ;;  %v1848_v44 = vadd.f32 %v5251_v57, %v1847_v24  ;;  %v2201_v24 = vsel %vm629_vm4, %v2147_v61, 0.0  ;;  %v2148_v16 = vmul.f32 %v5412_v49, %v5412_v49 }
 0x2b6   : > { %v1954_v35 = vpop.f32.mrf.mxu1  ;;  %v2985_v45 = vmax.f32 %v2955_v38, %v2759_v39  ;;  %v3045_v12 = vld [vmem:[#allocation5 + $0xc8] sm:$0xff]  ;;  %2305 = vst.msk [vmem:[#allocation4 + $0xd0] sm:$0xff] %vm629_vm4, %v2275_v36  ;;  %v2663_v23 = vadd.f32 %v2662_v30, %v2556_v3  ;;  %v2912_v3 = vsel %vm629_vm4, %v2858_v21, 0.0  ;;  %v2105_v30 = vsel %vm629_vm4, %v5412_v49, 0.0 }
 0x2b7   : > { %v3075_v22 = vmin.f32 %v3045_v12, %v2759_v39  ;;  %2395 = vst.msk [vmem:[#allocation5 + $0xd0] sm:$0xff] %vm629_vm4, %v2365_v43  ;;  %v1955_v47 = vadd.f32 %v1954_v35, %v1848_v44  ;;  %v2911_v36 = vadd.f32 %v2910_v18, %v2909_v5  ;;  %v2202_v37 = vadd.f32 %v2201_v24, %v2200_v29  ;;  %v2338_v24 = vld [vmem:[#allocation5 + $0xe8] sm:$0x3] }
 0x2b8   : > { %3015 = vst.msk [vmem:[#allocation4 + $0xc8] sm:$0xff] %vm629_vm4, %v2985_v45  ;;  %v2730_v7 = vmul.f32 0.2, %v2663_v23  ;;  %vm2700_vm8 = vcmp.gt.f32.partialorder %v2663_v23, 0.0  ;;  %v2815_v35 = vadd.f32 %v2814_v60, %v2813_v28  ;;  %v2106_v38 = vadd.f32 %v2105_v30, %v2104_v0 }
 0x2b9   : > { %3105 = vst.msk [vmem:[#allocation5 + $0xc8] sm:$0xff] %vm629_vm4, %v3075_v22  ;;  %vm1990_vm7 = vcmp.gt.f32.partialorder %v1955_v47, 0.0  ;;  %v2020_v20 = vmul.f32 0.2, %v1955_v47  ;;  %v5461_v45 = vadd.f32 %v2912_v3, %v2911_v36  ;;  %v2203_v12 = vsel %vm629_vm4, %v2148_v16, 0.0 }
 0x2ba   : > { %v2760_v15 = vsel %vm2700_vm8, %v2663_v23, %v2730_v7  ;;  %v2204_v59 = vadd.f32 %v2203_v12, %v2202_v37 }
 0x2bb   : > { %v2558_v53 = vpop.f32.mrf.mxu2  ;;  %v2050_v1 = vsel %vm1990_vm7, %v1955_v47, %v2020_v20  ;;  %v2816_v23 = vsel %vm629_vm4, %v2760_v15, 0.0  ;;  %v2859_v56 = vmul.f32 %v2760_v15, %v2760_v15 }
 0x2bc   : > { %v1850_v62 = vpop.f32.mrf.mxu0  ;;  %v2559_v11 = vadd.f32 %v5251_v57, %v2558_v53  ;;  %v2276_v8 = vmax.f32 %v2246_v6, %v2050_v1  ;;  %v2366_v17 = vmin.f32 %v2336_v10, %v2050_v1  ;;  %v2149_v43 = vmul.f32 %v2050_v1, %v2050_v1 }
 0x2bd   : > { %v2665_v4 = vpop.f32.mrf.mxu3  ;;  %v2956_v31 = vld [vmem:[#allocation4 + $0xd0] sm:$0xff]  ;;  %v1851_v42 = vadd.f32 %v5251_v57, %v1850_v62  ;;  %v2107_v7 = vsel %vm629_vm4, %v2050_v1, 0.0  ;;  %v2817_v61 = vadd.f32 %v2816_v23, %v2815_v35  ;;  %v2914_v29 = vsel %vm629_vm4, %v2859_v56, 0.0 }
 0x2be   : > { %v1957_v13 = vpop.f32.mrf.mxu1  ;;  %v2986_v55 = vmax.f32 %v2956_v31, %v2760_v15  ;;  %v3046_v19 = vld [vmem:[#allocation5 + $0xd0] sm:$0xff]  ;;  %2306 = vst.msk [vmem:[#allocation4 + $0xd8] sm:$0xff] %vm629_vm4, %v2276_v8  ;;  %v2666_v40 = vadd.f32 %v2665_v4, %v2559_v11  ;;  %v2205_v53 = vsel %vm629_vm4, %v2149_v43, 0.0  ;;  %v2108_v1 = vadd.f32 %v2107_v7, %v2106_v38 }
 0x2bf   : > { %v3076_v25 = vmin.f32 %v3046_v19, %v2760_v15  ;;  %2396 = vst.msk [vmem:[#allocation5 + $0xd8] sm:$0xff] %vm629_vm4, %v2366_v17  ;;  %v1958_v27 = vadd.f32 %v1957_v13, %v1851_v42  ;;  %v2206_v21 = vadd.f32 %v2205_v53, %v2204_v59  ;;  %v2248_v17 = vld [vmem:[#allocation4 + $0xe8] sm:$0x3]  ;;  %v2915_v35 = vadd.f32 %v2914_v29, %v5461_v45  ;;  %v2121_v29 = vld [vmem:[#allocation3] sm:$0x1] }
 0x2c0   : > { %3016 = vst.msk [vmem:[#allocation4 + $0xd0] sm:$0xff] %vm629_vm4, %v2986_v55  ;;  %v2731_v33 = vmul.f32 0.2, %v2666_v40  ;;  %vm2701_vm10 = vcmp.gt.f32.partialorder %v2666_v40, 0.0 }
 0x2c1   : > { %3106 = vst.msk [vmem:[#allocation5 + $0xd0] sm:$0xff] %vm629_vm4, %v3076_v25  ;;  %vm1991_vm9 = vcmp.gt.f32.partialorder %v1958_v27, 0.0  ;;  %v2021_v34 = vmul.f32 0.2, %v1958_v27 }
 0x2c2   : > { %v2761_v47 = vsel %vm2701_vm10, %v2666_v40, %v2731_v33 }
 0x2c3   : > { %v2561_v41 = vpop.f32.mrf.mxu2  ;;  %v2051_v44 = vsel %vm1991_vm9, %v1958_v27, %v2021_v34  ;;  %v2860_v8 = vmul.f32 %v2761_v47, %v2761_v47  ;;  %v2818_v14 = vsel %vm629_vm4, %v2761_v47, 0.0 }
 0x2c4   : > { %v1853_v39 = vpop.f32.mrf.mxu0  ;;  %v2562_v49 = vadd.f32 %v5251_v57, %v2561_v41  ;;  %v2277_v26 = vmax.f32 %v2247_v48, %v2051_v44  ;;  %v2150_v52 = vmul.f32 %v2051_v44, %v2051_v44  ;;  %v2367_v54 = vmin.f32 %v2337_v46, %v2051_v44 }
 0x2c5   : > { %v2668_v2 = vpop.f32.mrf.mxu3  ;;  %v2957_v51 = vld [vmem:[#allocation4 + $0xd8] sm:$0xff]  ;;  %v1854_v32 = vadd.f32 %v5251_v57, %v1853_v39  ;;  %v2109_v6 = vsel %vm629_vm4, %v2051_v44, 0.0  ;;  %v2916_v30 = vsel %vm629_vm4, %v2860_v8, 0.0  ;;  %v2819_v41 = vadd.f32 %v2818_v14, %v2817_v61 }
 0x2c6   : > { %v1960_v22 = vpop.f32.mrf.mxu1  ;;  %v2987_v20 = vmax.f32 %v2957_v51, %v2761_v47  ;;  %v3047_v9 = vld [vmem:[#allocation5 + $0xd8] sm:$0xff]  ;;  %2307 = vst.msk [vmem:[#allocation4 + $0xe0] sm:$0xff] %vm629_vm4, %v2277_v26  ;;  %v2669_v58 = vadd.f32 %v2668_v2, %v2562_v49  ;;  %v2207_v4 = vsel %vm629_vm4, %v2150_v52, 0.0  ;;  %v2110_v15 = vadd.f32 %v2109_v6, %v2108_v1  ;;  %v2053_v6 = vld [vmem:[#allocation2] sm:$0x1] }
 0x2c7   : > { %v3077_v62 = vmin.f32 %v3047_v9, %v2761_v47  ;;  %2397 = vst.msk [vmem:[#allocation5 + $0xe0] sm:$0xff] %vm629_vm4, %v2367_v54  ;;  %v1961_v63 = vadd.f32 %v1960_v22, %v1854_v32  ;;  %v2208_v50 = vadd.f32 %v2207_v4, %v2206_v21  ;;  %v2917_v48 = vadd.f32 %v2916_v30, %v2915_v35 }
 0x2c8   : > { %3017 = vst.msk [vmem:[#allocation4 + $0xd8] sm:$0xff] %vm629_vm4, %v2987_v20  ;;  %vm2702_vm11 = vcmp.gt.f32.partialorder %v2669_v58, 0.0  ;;  %v2732_v11 = vmul.f32 0.2, %v2669_v58 }
 0x2c9   : > { %3107 = vst.msk [vmem:[#allocation5 + $0xd8] sm:$0xff] %vm629_vm4, %v3077_v62  ;;  %vm1992_vm12 = vcmp.gt.f32.partialorder %v1961_v63, 0.0  ;;  %v2022_v5 = vmul.f32 0.2, %v1961_v63 }
 0x2ca   : > { %v2762_v10 = vsel %vm2702_vm11, %v2669_v58, %v2732_v11 }
 0x2cb   : > { %v2564_v13 = vpop.f32.mrf.mxu2  ;;  %v2052_v31 = vsel %vm1992_vm12, %v1961_v63, %v2022_v5  ;;  %v2861_v60 = vmul.f32 %v2762_v10, %v2762_v10  ;;  %v2820_v16 = vsel %vm629_vm4, %v2762_v10, 0.0 }
 0x2cc   : > { %v2565_v42 = vadd.f32 %v5251_v57, %v2564_v13  ;;  %v2111_v55 = vsel %vm687_vm0, %v2052_v31, 0.0  ;;  %v2151_v19 = vmul.f32 %v2052_v31, %v2052_v31  ;;  %v2278_v40 = vmax.f32 %v2248_v17, %v2052_v31 }
 0x2cd   : > { %v2671_v18 = vpop.f32.mrf.mxu3  ;;  %v2958_v25 = vld [vmem:[#allocation4 + $0xe0] sm:$0xff]  ;;  %v2112_v27 = vadd.f32 %v2111_v55, %v2110_v15  ;;  %v2368_v28 = vmin.f32 %v2338_v24, %v2052_v31  ;;  %v2918_v38 = vsel %vm629_vm4, %v2861_v60, 0.0  ;;  %v2821_v49 = vadd.f32 %v2820_v16, %v2819_v41 }
 0x2ce   : > { %v2672_v3 = vadd.f32 %v2671_v18, %v2565_v42  ;;  %v2988_v0 = vmax.f32 %v2958_v25, %v2762_v10  ;;  %v3048_v33 = vld [vmem:[#allocation5 + $0xe0] sm:$0xff]  ;;  %v2209_v57 = vsel %vm687_vm0, %v2151_v19, 0.0  ;;  %2308 = vst.msk [vmem:[#allocation4 + $0xe8] sm:$0x3] %vm687_vm0, %v2278_v40  ;;  %v2919_v22 = vadd.f32 %v2918_v38, %v2917_v48 }
 0x2cf   : > { %v3078_v34 = vmin.f32 %v3048_v33, %v2762_v10  ;;  %v2113_v36 = vrot.slane %v2112_v27, 4  ;;  %v2210_v37 = vadd.f32 %v2209_v57, %v2208_v50  ;;  %2398 = vst.msk [vmem:[#allocation5 + $0xe8] sm:$0x3] %vm687_vm0, %v2368_v28 }
 0x2d0   : > { %vm2703_vm13 = vcmp.gt.f32.partialorder %v2672_v3, 0.0  ;;  %3018 = vst.msk [vmem:[#allocation4 + $0xe0] sm:$0xff] %vm629_vm4, %v2988_v0  ;;  %v2733_v39 = vmul.f32 0.2, %v2672_v3 }
 0x2d1   : > { %3108 = vst.msk [vmem:[#allocation5 + $0xe0] sm:$0xff] %vm629_vm4, %v3078_v34  ;;  %v2114_v43 = vadd.f32 %v2113_v36, %v2112_v27  ;;  %v2211_v44 = vrot.slane %v2210_v37, 4 }
 0x2d2   : > { %v2763_v2 = vsel %vm2703_vm13, %v2672_v3, %v2733_v39 }
 0x2d3   : > { %v2115_v12 = vrot.slane %v2114_v43, 2  ;;  %v2212_v23 = vadd.f32 %v2211_v44, %v2210_v37  ;;  %v2822_v26 = vsel %vm687_vm0, %v2763_v2, 0.0  ;;  %v2862_v46 = vmul.f32 %v2763_v2, %v2763_v2 }
 0x2d4   : > { %v2823_v45 = vadd.f32 %v2822_v26, %v2821_v49 }
 0x2d5   : > { %v2116_v47 = vadd.f32 %v2115_v12, %v2114_v43  ;;  %v2213_v51 = vrot.slane %v2212_v23, 2  ;;  %v2920_v52 = vsel %vm687_vm0, %v2862_v46, 0.0  ;;  %v2959_v54 = vld [vmem:[#allocation4 + $0xe8] sm:$0x3] }
 0x2d6   : > { %v2824_v32 = vrot.slane %v2823_v45, 4  ;;  %v2921_v56 = vadd.f32 %v2920_v52, %v2919_v22  ;;  %v2989_v7 = vmax.f32 %v2959_v54, %v2763_v2  ;;  %v3049_v20 = vld [vmem:[#allocation5 + $0xe8] sm:$0x3] }
 0x2d7   : > { %v2117_v9 = vrot.slane %v2116_v47, 1  ;;  %v2214_v58 = vadd.f32 %v2213_v51, %v2212_v23  ;;  %v3079_v59 = vmin.f32 %v3049_v20, %v2763_v2 }
 0x2d8   : > { %v2825_v53 = vadd.f32 %v2824_v32, %v2823_v45  ;;  %v2922_v62 = vrot.slane %v2921_v56, 4  ;;  %3019 = vst.msk [vmem:[#allocation4 + $0xe8] sm:$0x3] %vm687_vm0, %v2989_v7 }
 0x2d9   : > { %v2118_v63 = vadd.f32 %v2117_v9, %v2116_v47  ;;  %v2215_v61 = vrot.slane %v2214_v58, 1  ;;  %3109 = vst.msk [vmem:[#allocation5 + $0xe8] sm:$0x3] %vm687_vm0, %v3079_v59 }
 0x2da   : > { %v2826_v11 = vrot.slane %v2825_v53, 2  ;;  %v2923_v1 = vadd.f32 %v2922_v62, %v2921_v56 }
 0x2db   : > { %v2119_v4 = vadd.f32 %v2118_v63, %v2053_v6  ;;  %v2216_v5 = vadd.f32 %v2215_v61, %v2214_v58 }
 0x2dc   : > { %v2827_v21 = vadd.f32 %v2826_v11, %v2825_v53  ;;  %v2924_v8 = vrot.slane %v2923_v1, 2 }
 0x2dd   : > { %2120 = vst.msk [vmem:[#allocation2] sm:$0x1] %vm697_vm6, %v2119_v4  ;;  %v2217_v10 = vadd.f32 %v2216_v5, %v2121_v29 }
 0x2de   : > { %v2925_v13 = vadd.f32 %v2924_v8, %v2923_v1  ;;  %v2828_v14 = vrot.slane %v2827_v21, 1 }
 0x2df   : > { %2218 = vst.msk [vmem:[#allocation3] sm:$0x1] %vm697_vm6, %v2217_v10 }
 0x2e0   : > { %v2926_v15 = vrot.slane %v2925_v13, 1  ;;  %v2829_v31 = vadd.f32 %v2828_v14, %v2827_v21 }
 0x2e2   : > { %v2927_v18 = vadd.f32 %v2926_v15, %v2925_v13 }
 0x2e4   : > { %v2764_v17 = vld [vmem:[#allocation2] sm:$0x1] }
 0x2e5   : > { %v2830_v42 = vadd.f32 %v2829_v31, %v2764_v17  ;;  %3113 = sbr.rel (%p3915_p5) target bundleno = 874 (0x36a), region = 40 }
 0x2e6   : > { %v2832_v50 = vld [vmem:[#allocation3] sm:$0x1] }
 0x2e7   : > { %2831 = vst.msk [vmem:[#allocation2] sm:$0x1] %vm697_vm6, %v2830_v42  ;;  %v2928_v55 = vadd.f32 %v2927_v18, %v2832_v50 }
 0x2e9   : > { %2929 = vst.msk [vmem:[#allocation3] sm:$0x1] %vm697_vm6, %v2928_v55 }
 0x2ea   : > { %v3988_v19 = vmov 3744.0   ;;  %v3127_v38 = vld [vmem:[%s5873_s2 + $0x1] sm:$0x1]  ;;  %v3140_v49 = vld [vmem:[%s5873_s2 + $0x2] sm:$0x1]  ;;  %v3145_v23 = vld [vmem:[#allocation4 + $0x8] sm:$0xff] }
 0x2eb   : > { %3973 = vrcp.f32 %v3988_v19  ;;  %v3144_v12 = vld [vmem:[#allocation4] sm:$0xff]  ;;  %v3146_v26 = vld [vmem:[#allocation4 + $0x10] sm:$0xff]  ;;  %v3147_v46 = vld [vmem:[#allocation4 + $0x18] sm:$0xff]  ;;  %v3989_v51 = vmov 0   ;;  %vm3302_vm7 = vcmask 1042432   ;;  %vm3314_vm8 = vcmask 1046528  }
 0x2ec   : > { %v3174_v22 = vld [vmem:[#allocation5] sm:$0xff]  ;;  %v3175_v45 = vld [vmem:[#allocation5 + $0x8] sm:$0xff]  ;;  %v3176_v47 = vld [vmem:[#allocation5 + $0x10] sm:$0xff]  ;;  %vm5875_vm9 = vcmask 257024   ;;  %vm3349_vm10 = vcmask 261125   ;;  %vm3373_vm11 = vcmask 261122  }
 0x2ed   : > { %v3177_v32 = vld [vmem:[#allocation5 + $0x18] sm:$0xff]  ;;  %v3148_v20 = vld [vmem:[#allocation4 + $0x20] sm:$0xff]  ;;  %v3178_v9 = vld [vmem:[#allocation5 + $0x20] sm:$0xff]  ;;  %vm3375_vm12 = vcmask 259072   ;;  %vm3401_vm13 = vcmask 261127  }
 0x2ee   : > { %v3114_v27 = vld [vmem:[#allocation2] sm:$0x1]  ;;  %v3149_v58 = vld [vmem:[#allocation4 + $0x28] sm:$0xff]  ;;  %v3150_v59 = vld [vmem:[#allocation4 + $0x30] sm:$0xff] }
 0x2ef   : > { %v3179_v53 = vld [vmem:[#allocation5 + $0x28] sm:$0xff]  ;;  %v3180_v61 = vld [vmem:[#allocation5 + $0x30] sm:$0xff]  ;;  %v3181_v11 = vld [vmem:[#allocation5 + $0x38] sm:$0xff] }
 0x2f0   : > { %v3123_v3 = vld [vmem:[#allocation3] sm:$0x1]  ;;  %v3152_v42 = vld [vmem:[#allocation4 + $0x40] sm:$0xff]  ;;  %v3182_v18 = vld [vmem:[#allocation5 + $0x40] sm:$0xff] }
 0x2f1   : > { %v3974_v40 = vpop.eup %3973  ;;  %v3151_v6 = vld [vmem:[#allocation4 + $0x38] sm:$0xff] }
 0x2f2   : > { %v3116_v24 = vmul.f32 3744.0, %v3974_v40  ;;  %vm3120_vm14 = vweird.f32 %v3974_v40 }
 0x2f4   : > { %v3117_v60 = vsub.f32 1.0, %v3116_v24 }
 0x2f6   : > { %v3118_v25 = vmul.f32 %v3974_v40, %v3117_v60 }
 0x2f8   : > { %v3119_v28 = vadd.f32 %v3974_v40, %v3118_v25 }
 0x2fa   : > { %v3121_v30 = vsel %vm3120_vm14, %v3974_v40, %v3119_v28  ;;  %vm5876_vm14 = vcmask 256000  }
 0x2fb   : > { %v3122_v16 = vmul.f32 %v3121_v30, %v3114_v27  ;;  %v3124_v0 = vmul.f32 %v3123_v3, %v3121_v30 }
 0x2fd   : > { %v3125_v33 = vmul.f32 %v3122_v16, %v3122_v16 }
 0x2ff   : > { %v3126_v57 = vsub.f32 %v3124_v0, %v3125_v33 }
 0x301   : > { %v3128_v34 = vadd.f32 0.8, %v3126_v57 }
 0x303   : > { %3975 = vrsqrt.f32 %v3128_v34  ;;  %vm3135_vm15 = vweird.f32 %v3128_v34 }
 0x309   : > { %v3976_v36 = vpop.eup %3975 }
 0x30a   : > { %v3130_v37 = vmul.f32 %v3976_v36, %v3128_v34  ;;  %vm3136_vm1 = vweird.f32 %v3976_v36 }
 0x30b   : > { %vm3137_vm2 = vmor %vm3135_vm15, %vm3136_vm1  ;;  %vm3428_vm15 = vcmask 261124   ;;  %vm3453_vm1 = vcmask 258048  }
 0x30c   : > { %v3131_v35 = vmul.f32 %v3976_v36, %v3130_v37 }
 0x30e   : > { %v3132_v41 = vmul.f32 0.5, %v3131_v35 }
 0x310   : > { %v3133_v39 = vsub.f32 1.5, %v3132_v41 }
 0x312   : > { %v3134_v43 = vmul.f32 %v3976_v36, %v3133_v39 }
 0x314   : > { %v3138_v44 = vsel %vm3137_vm2, %v3976_v36, %v3134_v43  ;;  %vm3451_vm2 = vcmask 261121  }
 0x315   : > { %v3139_v48 = vmul.f32 %v3138_v44, %v3127_v38 }
 0x317   : > { %v3141_v2 = vmul.f32 %v3139_v48, %v3122_v16  ;;  %vm3143_vm3 = vcmp.ge.f32.partialorder %v3139_v48, 0.0  ;;  %v5502_v7 = vperm.slane %v3139_v48, 0 }
 0x318   : > { %v3204_v52 = vsel %vm3143_vm3, 1, %v3989_v51  ;;  %vm3479_vm3 = vcmask 261126  }
 0x319   : > { %v3142_v54 = vsub.f32 %v3140_v49, %v3141_v2  ;;  %v3205_v56 = vperm.slane %v3204_v52, 0 }
 0x31b   : > { %vm5504_vm5 = vcmp.eq.s32.totalorder %v3205_v56, 1  ;;  %v5508_v63 = vperm.slane %v3142_v54, 0 }
 0x31c   : > { %v3207_v1 = vsel %vm5504_vm5, %v3144_v12, %v3174_v22  ;;  %v3208_v4 = vsel %vm5504_vm5, %v3145_v23, %v3175_v45  ;;  %v3209_v5 = vsel %vm5504_vm5, %v3146_v26, %v3176_v47  ;;  %v3210_v29 = vsel %vm5504_vm5, %v3147_v46, %v3177_v32 }
 0x31d   : > { %v3238_v21 = vmul.f32 %v5502_v7, %v3207_v1  ;;  %v3239_v8 = vmul.f32 %v5502_v7, %v3208_v4  ;;  %v3240_v10 = vmul.f32 %v5502_v7, %v3209_v5  ;;  %v3241_v13 = vmul.f32 %v5502_v7, %v3210_v29 }
 0x31e   : > { %v3211_v14 = vsel %vm5504_vm5, %v3148_v20, %v3178_v9  ;;  %v3212_v15 = vsel %vm5504_vm5, %v3149_v58, %v3179_v53  ;;  %v3213_v31 = vsel %vm5504_vm5, %v3150_v59, %v3180_v61  ;;  %v3214_v17 = vsel %vm5504_vm5, %v3151_v6, %v3181_v11  ;;  %v3153_v9 = vld [vmem:[#allocation4 + $0x48] sm:$0xff]  ;;  %v3183_v58 = vld [vmem:[#allocation5 + $0x48] sm:$0xff] }
 0x31f   : > { %v3269_v50 = vadd.f32 %v5508_v63, %v3238_v21  ;;  %v3270_v55 = vadd.f32 %v5508_v63, %v3239_v8  ;;  %v3271_v19 = vadd.f32 %v5508_v63, %v3240_v10  ;;  %v3272_v40 = vadd.f32 %v5508_v63, %v3241_v13  ;;  %v3154_v13 = vld [vmem:[#allocation4 + $0x50] sm:$0xff] }
 0x320   : > { %v3242_v24 = vmul.f32 %v5502_v7, %v3211_v14  ;;  %v3243_v60 = vmul.f32 %v5502_v7, %v3212_v15  ;;  %v3244_v25 = vmul.f32 %v5502_v7, %v3213_v31  ;;  %v3245_v27 = vmul.f32 %v5502_v7, %v3214_v17  ;;  %v3184_v14 = vld [vmem:[#allocation5 + $0x50] sm:$0xff] }
 0x321   : > { %v3303_v28 = vrot.slane %v3270_v55, 5  ;;  %v3304_v3 = vrot.slane %v3271_v19, 5  ;;  %v3306_v30 = vrot.slane %v3272_v40, 5  ;;  %v3215_v16 = vsel %vm5504_vm5, %v3152_v42, %v3182_v18  ;;  %v3155_v18 = vld [vmem:[#allocation4 + $0x58] sm:$0xff] }
 0x322   : > { %v5541_v0 = vadd.f32 %v5508_v63, %v3242_v24  ;;  %v3274_v33 = vadd.f32 %v5508_v63, %v3243_v60  ;;  %v3275_v57 = vadd.f32 %v5508_v63, %v3244_v25  ;;  %v5546_v34 = vadd.f32 %v5508_v63, %v3245_v27 }
 0x323   : > { %v3305_v36 = vsel %vm3302_vm7, %v3303_v28, %v3304_v3  ;;  %v3307_v37 = vsel %vm3302_vm7, %v3304_v3, %v3306_v30  ;;  %v3331_v35 = vmax.f32 %v3270_v55, %v3306_v30  ;;  %v3246_v41 = vmul.f32 %v5502_v7, %v3215_v16 }
 0x324   : > { %v3310_v39 = vmax.f32 %v3269_v50, %v3305_v36  ;;  %v3311_v38 = vmax.f32 %v3270_v55, %v3307_v37  ;;  %v3326_v43 = vrot.slane %v5541_v0, 5  ;;  %v3355_v44 = vrot.slane %v3274_v33, 5  ;;  %v3185_v50 = vld [vmem:[#allocation5 + $0x58] sm:$0xff]  ;;  %v3186_v36 = vld [vmem:[#allocation5 + $0x60] sm:$0xff] }
 0x325   : > { %v3337_v48 = vrot.slane %v3331_v35, 1  ;;  %v3357_v49 = vrot.slane %v3275_v57, 5  ;;  %v3379_v2 = vrot.slane %v5546_v34, 5  ;;  %v5554_v12 = vadd.f32 %v5508_v63, %v3246_v41 }
 0x326   : > { %v3315_v23 = vrot.slane %v3310_v39, 1  ;;  %v3316_v26 = vrot.slane %v3311_v38, 1  ;;  %v3327_v46 = vsel %vm3302_vm7, %v3306_v30, %v3326_v43  ;;  %v3333_v22 = vmax.f32 %v3272_v40, %v3326_v43 }
 0x327   : > { %v3332_v45 = vmax.f32 %v3271_v19, %v3327_v46  ;;  %v3356_v47 = vsel %vm3302_vm7, %v3326_v43, %v3355_v44  ;;  %v3358_v51 = vsel %vm3302_vm7, %v3355_v44, %v3357_v49  ;;  %v3380_v52 = vsel %vm3302_vm7, %v3357_v49, %v3379_v2  ;;  %v3158_v44 = vld [vmem:[#allocation4 + $0x70] sm:$0xff] }
 0x328   : > { %v3317_v54 = vsel %vm3314_vm8, %v3315_v23, %v3316_v26  ;;  %v3321_v32 = vmax.f32 %v3311_v38, %v3316_v26  ;;  %v3340_v56 = vrot.slane %v3333_v22, 1  ;;  %v3361_v20 = vmax.f32 %v3272_v40, %v3356_v47 }
 0x329   : > { %v3320_v59 = vmax.f32 %v3310_v39, %v3317_v54  ;;  %v3338_v53 = vrot.slane %v3332_v45, 1  ;;  %v3362_v61 = vmax.f32 %v5541_v0, %v3358_v51  ;;  %v3386_v6 = vmax.f32 %v5541_v0, %v3357_v49  ;;  %v3188_v49 = vld [vmem:[#allocation5 + $0x70] sm:$0xff] }
 0x32a   : > { %3324 = vst.msk [vmem:[%s5874_s3 + $0x8] sm:$0xf] %vm5875_vm9, %v3321_v32  ;;  %v3347_v11 = vmax.f32 %v3333_v22, %v3340_v56  ;;  %v3365_v1 = vrot.slane %v3361_v20, 1  ;;  %v3387_v4 = vmax.f32 %v3274_v33, %v3380_v52  ;;  %v3381_v5 = vrot.slane %v5554_v12, 5  ;;  %v3156_v33 = vld [vmem:[#allocation4 + $0x60] sm:$0xff] }
 0x32b   : > { %3322 = vst.msk [vmem:[%s5874_s3] sm:$0xff] %vm629_vm4, %v3320_v59  ;;  %v3339_v29 = vsel %vm3314_vm8, %v3337_v48, %v3338_v53  ;;  %v3341_v21 = vsel %vm3314_vm8, %v3338_v53, %v3340_v56  ;;  %v3366_v8 = vrot.slane %v3362_v61, 1  ;;  %v3216_v10 = vsel %vm5504_vm5, %v3153_v9, %v3183_v58  ;;  %v3187_v48 = vld [vmem:[#allocation5 + $0x68] sm:$0xff] }
 0x32c   : > { %v3345_v15 = vmax.f32 %v3331_v35, %v3339_v29  ;;  %v3346_v31 = vmax.f32 %v3332_v45, %v3341_v21  ;;  %3918 = vst.msk [vmem:[%s5874_s3 + $0x1b] sm:$0x1] %vm697_vm6, %v3347_v11  ;;  %v3391_v17 = vrot.slane %v3387_v4, 1  ;;  %v3382_v42 = vsel %vm3302_vm7, %v3379_v2, %v3381_v5  ;;  %v3157_v35 = vld [vmem:[#allocation4 + $0x68] sm:$0xff] }
 0x32d   : > { %v3367_v55 = vsel %vm3314_vm8, %v3365_v1, %v3366_v8  ;;  %v3371_v19 = vmax.f32 %v3362_v61, %v3366_v8  ;;  %v3388_v40 = vmax.f32 %v3275_v57, %v3382_v42  ;;  %v3247_v24 = vmul.f32 %v5502_v7, %v3216_v10 }
 0x32e   : > { %3916 = vst.msk [vmem:[%s5874_s3 + $0xb] sm:$0xe0] %vm3349_vm10, %v3345_v15  ;;  %v3370_v60 = vmax.f32 %v3361_v20, %v3367_v55  ;;  %v3397_v25 = vmax.f32 %v3386_v6, %v3391_v17  ;;  %v5587_v27 = vmax.f32 %v3275_v57, %v3381_v5  ;;  %v3217_v28 = vsel %vm5504_vm5, %v3154_v13, %v3184_v14  ;;  %v3160_v15 = vld [vmem:[#allocation4 + $0x80] sm:$0xff] }
 0x32f   : > { %3917 = vst.msk [vmem:[%s5874_s3 + $0x13] sm:$0xff] %vm629_vm4, %v3346_v31  ;;  %v3392_v3 = vrot.slane %v3388_v40, 1  ;;  %v3278_v30 = vadd.f32 %v5508_v63, %v3247_v24  ;;  %v3218_v16 = vsel %vm5504_vm5, %v3155_v18, %v3185_v50  ;;  %v3248_v0 = vmul.f32 %v5502_v7, %v3217_v28  ;;  %v3161_v31 = vld [vmem:[#allocation4 + $0x88] sm:$0xff]  ;;  %v3191_v24 = vld [vmem:[#allocation5 + $0x88] sm:$0xff] }
 0x330   : > { %3919 = vst.msk [vmem:[%s5874_s3 + $0x1e] sm:$0xfc] %vm3373_vm11, %v3370_v60  ;;  %v3418_v57 = vrot.slane %v5587_v27, 1  ;;  %v3249_v37 = vmul.f32 %v5502_v7, %v3218_v16  ;;  %v3219_v26 = vsel %vm5504_vm5, %v3156_v33, %v3186_v36  ;;  %v3220_v54 = vsel %vm5504_vm5, %v3157_v35, %v3187_v48  ;;  %v3192_v35 = vld [vmem:[#allocation5 + $0x90] sm:$0xff] }
 0x331   : > { %3920 = vst.msk [vmem:[%s5874_s3 + $0x26] sm:$0x3f] %vm3375_vm12, %v3371_v19  ;;  %v3393_v41 = vsel %vm3314_vm8, %v3391_v17, %v3392_v3  ;;  %v3399_v39 = vmax.f32 %v3388_v40, %v3392_v3  ;;  %v3407_v38 = vrot.slane %v3278_v30, 5  ;;  %v3279_v43 = vadd.f32 %v5508_v63, %v3248_v0  ;;  %v3190_v17 = vld [vmem:[#allocation5 + $0x80] sm:$0xff]  ;;  %v3159_v19 = vld [vmem:[#allocation4 + $0x78] sm:$0xff]  ;;  %v3189_v40 = vld [vmem:[#allocation5 + $0x78] sm:$0xff] }
 0x332   : > { %3921 = vst.msk [vmem:[%s5874_s3 + $0x29] sm:$0x80] %vm3401_vm13, %v3397_v25  ;;  %v3398_v2 = vmax.f32 %v3387_v4, %v3393_v41  ;;  %v3280_v23 = vadd.f32 %v5508_v63, %v3249_v37  ;;  %v3250_v47 = vmul.f32 %v5502_v7, %v3219_v26  ;;  %v3221_v32 = vsel %vm5504_vm5, %v3158_v44, %v3188_v49  ;;  %v3163_v37 = vld [vmem:[#allocation4 + $0x98] sm:$0xff]  ;;  %v3193_v44 = vld [vmem:[#allocation5 + $0x98] sm:$0xff]  ;;  %v3164_v48 = vld [vmem:[#allocation4 + $0xa0] sm:$0xff] }
 0x333   : > { %3923 = vst.msk [vmem:[%s5874_s3 + $0x39] sm:$0x7] %vm5876_vm14, %v3399_v39  ;;  %v3408_v46 = vsel %vm3302_vm7, %v3381_v5, %v3407_v38  ;;  %v3414_v22 = vmax.f32 %v5554_v12, %v3407_v38  ;;  %v3433_v45 = vrot.slane %v3279_v43, 5  ;;  %v3251_v58 = vmul.f32 %v5502_v7, %v3220_v54  ;;  %v3194_v49 = vld [vmem:[#allocation5 + $0xa0] sm:$0xff] }
 0x334   : > { %3922 = vst.msk [vmem:[%s5874_s3 + $0x31] sm:$0xff] %vm629_vm4, %v3398_v2  ;;  %v3413_v51 = vmax.f32 %v5546_v34, %v3408_v46  ;;  %v3435_v52 = vrot.slane %v3280_v23, 5  ;;  %v3281_v9 = vadd.f32 %v5508_v63, %v3250_v47  ;;  %v3252_v1 = vmul.f32 %v5502_v7, %v3221_v32 }
 0x335   : > { %v3421_v56 = vrot.slane %v3414_v22, 1  ;;  %v3434_v20 = vsel %vm3302_vm7, %v3407_v38, %v3433_v45  ;;  %v3282_v4 = vadd.f32 %v5508_v63, %v3251_v58  ;;  %vm3502_vm9 = vcmask 261123  }
 0x336   : > { %v3419_v59 = vrot.slane %v3413_v51, 1  ;;  %v3436_v53 = vsel %vm3302_vm7, %v3433_v45, %v3435_v52  ;;  %v3439_v61 = vmax.f32 %v5554_v12, %v3434_v20  ;;  %v3461_v34 = vmax.f32 %v3278_v30, %v3435_v52  ;;  %v3165_v20 = vld [vmem:[#allocation4 + $0xa8] sm:$0xff] }
 0x337   : > { %v3440_v6 = vmax.f32 %v3278_v30, %v3436_v53  ;;  %v3456_v11 = vrot.slane %v3281_v9, 5  ;;  %v5646_v50 = vadd.f32 %v5508_v63, %v3252_v1  ;;  %v3485_v55 = vrot.slane %v3282_v4, 5 }
 0x338   : > { %v3420_v5 = vsel %vm3314_vm8, %v3418_v57, %v3419_v59  ;;  %v3422_v29 = vsel %vm3314_vm8, %v3419_v59, %v3421_v56  ;;  %v3443_v21 = vrot.slane %v3439_v61, 1  ;;  %v3467_v8 = vrot.slane %v3461_v34, 1  ;;  %v3162_v57 = vld [vmem:[#allocation4 + $0x90] sm:$0xff] }
 0x339   : > { %v3425_v10 = vmax.f32 %v5587_v27, %v3420_v5  ;;  %v3426_v13 = vmax.f32 %v3413_v51, %v3422_v29  ;;  %v3444_v14 = vrot.slane %v3440_v6, 1  ;;  %v3457_v12 = vsel %vm3302_vm7, %v3435_v52, %v3456_v11 }
 0x33a   : > { %v3462_v42 = vmax.f32 %v3279_v43, %v3457_v12  ;;  %v3463_v18 = vmax.f32 %v3280_v23, %v3456_v11  ;;  %vm3504_vm14 = vcmask 260096   ;;  %v3486_v30 = vrot.slane %v5646_v50, 5 }
 0x33b   : > { %3924 = vst.msk [vmem:[%s5874_s3 + $0x3c] sm:$0xf0] %vm3428_vm15, %v3425_v10  ;;  %v3445_v60 = vsel %vm3314_vm8, %v3443_v21, %v3444_v14  ;;  %v3449_v25 = vmax.f32 %v3440_v6, %v3444_v14  ;;  %v3490_v16 = vmax.f32 %v3280_v23, %v3485_v55  ;;  %v3222_v0 = vsel %vm5504_vm5, %v3159_v19, %v3189_v40  ;;  %v3196_v6 = vld [vmem:[#allocation5 + $0xb0] sm:$0xff] }
 0x33c   : > { %3925 = vst.msk [vmem:[%s5874_s3 + $0x44] sm:$0xff] %vm629_vm4, %v3426_v13  ;;  %v3448_v27 = vmax.f32 %v3439_v61, %v3445_v60  ;;  %v3468_v28 = vrot.slane %v3462_v42, 1  ;;  %v3470_v3 = vrot.slane %v3463_v18, 1  ;;  %v3223_v33 = vsel %vm5504_vm5, %v3160_v15, %v3190_v17  ;;  %v3195_v61 = vld [vmem:[#allocation5 + $0xa8] sm:$0xff] }
 0x33d   : > { %3927 = vst.msk [vmem:[%s5874_s3 + $0x57] sm:$0x1f] %vm3453_vm1, %v3449_v25  ;;  %v3224_v36 = vsel %vm5504_vm5, %v3161_v31, %v3191_v24  ;;  %v3487_v43 = vsel %vm3302_vm7, %v3485_v55, %v3486_v30  ;;  %v3494_v46 = vrot.slane %v3490_v16, 1  ;;  %v3253_v22 = vmul.f32 %v5502_v7, %v3222_v0 }
 0x33e   : > { %3926 = vst.msk [vmem:[%s5874_s3 + $0x4f] sm:$0xfe] %vm3451_vm2, %v3448_v27  ;;  %v3469_v41 = vsel %vm3314_vm8, %v3467_v8, %v3468_v28  ;;  %v3471_v39 = vsel %vm3314_vm8, %v3468_v28, %v3470_v3  ;;  %v3477_v38 = vmax.f32 %v3463_v18, %v3470_v3  ;;  %v3491_v26 = vmax.f32 %v3281_v9, %v3487_v43 }
 0x33f   : > { %v3475_v2 = vmax.f32 %v3461_v34, %v3469_v41  ;;  %v3476_v23 = vmax.f32 %v3462_v42, %v3471_v39  ;;  %v3254_v45 = vmul.f32 %v5502_v7, %v3223_v33  ;;  %v3255_v47 = vmul.f32 %v5502_v7, %v3224_v36  ;;  %v3166_v34 = vld [vmem:[#allocation4 + $0xb0] sm:$0xff] }
 0x340   : > { %3930 = vst.msk [vmem:[%s5874_s3 + $0x6a] sm:$0x3] %vm687_vm0, %v3477_v38  ;;  %v3225_v51 = vsel %vm5504_vm5, %v3162_v57, %v3192_v35  ;;  %v3495_v52 = vrot.slane %v3491_v26, 1  ;;  %v3226_v54 = vsel %vm5504_vm5, %v3163_v37, %v3193_v44  ;;  %v3227_v56 = vsel %vm5504_vm5, %v3164_v48, %v3194_v49  ;;  %v3167_v37 = vld [vmem:[#allocation4 + $0xb8] sm:$0xff]  ;;  %v3197_v35 = vld [vmem:[#allocation5 + $0xb8] sm:$0xff]  ;;  %v3168_v44 = vld [vmem:[#allocation4 + $0xc0] sm:$0xff] }
 0x341   : > { %3928 = vst.msk [vmem:[%s5874_s3 + $0x5a] sm:$0xc0] %vm3479_vm3, %v3475_v2  ;;  %v3256_v32 = vmul.f32 %v5502_v7, %v3225_v51  ;;  %v3284_v9 = vadd.f32 %v5508_v63, %v3253_v22  ;;  %v3285_v58 = vadd.f32 %v5508_v63, %v3254_v45  ;;  %v5700_v59 = vadd.f32 %v5508_v63, %v3255_v47 }
 0x342   : > { %3929 = vst.msk [vmem:[%s5874_s3 + $0x62] sm:$0xff] %vm629_vm4, %v3476_v23  ;;  %v3257_v53 = vmul.f32 %v5502_v7, %v3226_v54  ;;  %v3496_v11 = vsel %vm3314_vm8, %v3494_v46, %v3495_v52  ;;  %v3500_v1 = vmax.f32 %v3491_v26, %v3495_v52  ;;  %v3258_v5 = vmul.f32 %v5502_v7, %v3227_v56  ;;  %v3198_v26 = vld [vmem:[#allocation5 + $0xc0] sm:$0xff]  ;;  %v3169_v46 = vld [vmem:[#allocation4 + $0xc8] sm:$0xff]  ;;  %v3199_v52 = vld [vmem:[#allocation5 + $0xc8] sm:$0xff] }
 0x343   : > { %v3287_v4 = vadd.f32 %v5508_v63, %v3256_v32  ;;  %v3499_v29 = vmax.f32 %v3490_v16, %v3496_v11  ;;  %v3508_v21 = vrot.slane %v3285_v58, 5  ;;  %v3509_v8 = vrot.slane %v5700_v59, 5  ;;  %v3170_v54 = vld [vmem:[#allocation4 + $0xd0] sm:$0xff]  ;;  %v3200_v32 = vld [vmem:[#allocation5 + $0xd0] sm:$0xff]  ;;  %v3201_v11 = vld [vmem:[#allocation5 + $0xd8] sm:$0xff] }
 0x344   : > { %v3288_v10 = vadd.f32 %v5508_v63, %v3257_v53  ;;  %3932 = vst.msk [vmem:[%s5874_s3 + $0x75] sm:$0x7f] %vm3504_vm14, %v3500_v1  ;;  %v5713_v14 = vadd.f32 %v5508_v63, %v3258_v5  ;;  %v3228_v12 = vsel %vm5504_vm5, %v3165_v20, %v3195_v61  ;;  %v3229_v15 = vsel %vm5504_vm5, %v3166_v34, %v3196_v6  ;;  %v3171_v6 = vld [vmem:[#allocation4 + $0xd8] sm:$0xff] }
 0x345   : > { %v3537_v13 = vrot.slane %v3287_v4, 5  ;;  %3931 = vst.msk [vmem:[%s5874_s3 + $0x6d] sm:$0xf8] %vm3502_vm9, %v3499_v29  ;;  %v3510_v31 = vsel %vm3302_vm7, %v3508_v21, %v3509_v8  ;;  %v3514_v17 = vmax.f32 %v5646_v50, %v3508_v21  ;;  %v3516_v42 = vmax.f32 %v3285_v58, %v3509_v8 }
 0x346   : > { %v3539_v18 = vrot.slane %v3288_v10, 5  ;;  %v3515_v55 = vmax.f32 %v3284_v9, %v3510_v31  ;;  %v3559_v40 = vrot.slane %v5713_v14, 5  ;;  %v3259_v24 = vmul.f32 %v5502_v7, %v3228_v12 }
 0x347   : > { %v3538_v19 = vsel %vm3302_vm7, %v3509_v8, %v3537_v13  ;;  %v3520_v60 = vrot.slane %v3514_v17, 1  ;;  %v3523_v25 = vrot.slane %v3516_v42, 1  ;;  %v3260_v43 = vmul.f32 %v5502_v7, %v3229_v15 }
 0x348   : > { %v3540_v27 = vsel %vm3302_vm7, %v3537_v13, %v3539_v18  ;;  %v3543_v28 = vmax.f32 %v3285_v58, %v3538_v19  ;;  %v3521_v3 = vrot.slane %v3515_v55, 1  ;;  %v3560_v16 = vsel %vm3302_vm7, %v3539_v18, %v3559_v40 }
 0x349   : > { %v3544_v30 = vmax.f32 %v5700_v59, %v3540_v27  ;;  %v3566_v50 = vmax.f32 %v5700_v59, %v3539_v18  ;;  %v3530_v0 = vmax.f32 %v3516_v42, %v3523_v25  ;;  %v5732_v36 = vmax.f32 %v3287_v4, %v3560_v16  ;;  %v3172_v42 = vld [vmem:[#allocation4 + $0xe0] sm:$0xff]  ;;  %v3202_v18 = vld [vmem:[#allocation5 + $0xe0] sm:$0xff] }
 0x34a   : > { %v3547_v33 = vrot.slane %v3543_v28, 1  ;;  %v5735_v57 = vadd.f32 %v5508_v63, %v3259_v24  ;;  %v3522_v41 = vsel %vm3314_vm8, %v3520_v60, %v3521_v3  ;;  %v3524_v39 = vsel %vm3314_vm8, %v3521_v3, %v3523_v25 }
 0x34b   : > { %v3548_v38 = vrot.slane %v3544_v30, 1  ;;  %v3528_v48 = vmax.f32 %v3514_v17, %v3522_v41  ;;  %v3529_v49 = vmax.f32 %v3515_v55, %v3524_v39  ;;  %3935 = vst.msk [vmem:[%s5874_s3 + $0x8b] sm:$0x1] %vm697_vm6, %v3530_v0  ;;  %v3571_v2 = vrot.slane %v5732_v36, 1 }
 0x34c   : > { %v3561_v23 = vrot.slane %v5735_v57, 5  ;;  %v3291_v47 = vadd.f32 %v5508_v63, %v3260_v43  ;;  %v3230_v51 = vsel %vm5504_vm5, %v3167_v37, %v3197_v35  ;;  %v3231_v61 = vsel %vm5504_vm5, %v3168_v44, %v3198_v26  ;;  %v3173_v37 = vld [vmem:[#allocation4 + $0xe8] sm:$0x3]  ;;  %v3203_v35 = vld [vmem:[#allocation5 + $0xe8] sm:$0x3] }
 0x34d   : > { %v3549_v22 = vsel %vm3314_vm8, %v3547_v33, %v3548_v38  ;;  %v3553_v45 = vmax.f32 %v3544_v30, %v3548_v38  ;;  %3933 = vst.msk [vmem:[%s5874_s3 + $0x7b] sm:$0xe0] %vm3349_vm10, %v3528_v48  ;;  %v3577_v20 = vmax.f32 %v3566_v50, %v3571_v2  ;;  %v3261_v34 = vmul.f32 %v5502_v7, %v3230_v51 }
 0x34e   : > { %v3552_v56 = vmax.f32 %v3543_v28, %v3549_v22  ;;  %v3562_v9 = vsel %vm3302_vm7, %v3559_v40, %v3561_v23  ;;  %v3590_v58 = vmax.f32 %v3288_v10, %v3561_v23  ;;  %3934 = vst.msk [vmem:[%s5874_s3 + $0x83] sm:$0xff] %vm629_vm4, %v3529_v49  ;;  %v3585_v53 = vrot.slane %v3291_v47, 5 }
 0x34f   : > { %v3568_v59 = vmax.f32 %v3288_v10, %v3562_v9  ;;  %v3262_v4 = vmul.f32 %v5502_v7, %v3231_v61  ;;  %v3232_v5 = vsel %vm5504_vm5, %v3169_v46, %v3199_v52  ;;  %v3233_v29 = vsel %vm5504_vm5, %v3170_v54, %v3200_v32  ;;  %3937 = vst.msk [vmem:[%s5874_s3 + $0x96] sm:$0x3f] %vm3375_vm12, %v3553_v45 }
 0x350   : > { %3936 = vst.msk [vmem:[%s5874_s3 + $0x8e] sm:$0xfc] %vm3373_vm11, %v3552_v56  ;;  %v3596_v1 = vrot.slane %v3590_v58, 1  ;;  %v3586_v8 = vsel %vm3302_vm7, %v3561_v23, %v3585_v53  ;;  %v3592_v10 = vmax.f32 %v5735_v57, %v3585_v53  ;;  %v3292_v13 = vadd.f32 %v5508_v63, %v3261_v34 }
 0x351   : > { %v3572_v21 = vrot.slane %v3568_v59, 1  ;;  %3938 = vst.msk [vmem:[%s5874_s3 + $0x99] sm:$0x80] %vm3401_vm13, %v3577_v20  ;;  %v3591_v12 = vmax.f32 %v5713_v14, %v3586_v8  ;;  %v3293_v15 = vadd.f32 %v5508_v63, %v3262_v4  ;;  %v3263_v31 = vmul.f32 %v5502_v7, %v3232_v5 }
 0x352   : > { %v3234_v17 = vsel %vm5504_vm5, %v3171_v6, %v3201_v11  ;;  %v3599_v40 = vrot.slane %v3592_v10, 1  ;;  %v3610_v24 = vrot.slane %v3292_v13, 5  ;;  %vm5879_vm6 = vcmask 256000  }
 0x353   : > { %v3573_v55 = vsel %vm3314_vm8, %v3571_v2, %v3572_v21  ;;  %v3579_v19 = vmax.f32 %v3568_v59, %v3572_v21  ;;  %v3597_v25 = vrot.slane %v3591_v12, 1  ;;  %v3612_v27 = vrot.slane %v3293_v15, 5 }
 0x354   : > { %v3578_v60 = vmax.f32 %v5732_v36, %v3573_v55  ;;  %v3294_v14 = vadd.f32 %v5508_v63, %v3263_v31  ;;  %v3611_v28 = vsel %vm3302_vm7, %v3585_v53, %v3610_v24  ;;  %v3264_v3 = vmul.f32 %v5502_v7, %v3233_v29 }
 0x355   : > { %3940 = vst.msk [vmem:[%s5874_s3 + $0xa9] sm:$0x7] %vm5879_vm6, %v3579_v19  ;;  %v3265_v30 = vmul.f32 %v5502_v7, %v3234_v17  ;;  %v3235_v16 = vsel %vm5504_vm5, %v3172_v42, %v3202_v18  ;;  %v3598_v50 = vsel %vm3314_vm8, %v3596_v1, %v3597_v25  ;;  %v3600_v0 = vsel %vm3314_vm8, %v3597_v25, %v3599_v40 }
 0x356   : > { %3939 = vst.msk [vmem:[%s5874_s3 + $0xa1] sm:$0xff] %vm629_vm4, %v3578_v60  ;;  %v3613_v33 = vsel %vm3302_vm7, %v3610_v24, %v3612_v27  ;;  %v3616_v36 = vmax.f32 %v5735_v57, %v3611_v28  ;;  %v3603_v41 = vmax.f32 %v3590_v58, %v3598_v50  ;;  %v3604_v39 = vmax.f32 %v3591_v12, %v3600_v0 }
 0x357   : > { %v3617_v38 = vmax.f32 %v3291_v47, %v3613_v33  ;;  %v3631_v43 = vrot.slane %v3294_v14, 5  ;;  %v3636_v48 = vmax.f32 %v3291_v47, %v3612_v27  ;;  %v3295_v49 = vadd.f32 %v5508_v63, %v3264_v3 }
 0x358   : > { %v3620_v44 = vrot.slane %v3616_v36, 1  ;;  %v3296_v2 = vadd.f32 %v5508_v63, %v3265_v30  ;;  %3941 = vst.msk [vmem:[%s5874_s3 + $0xac] sm:$0xf0] %vm3428_vm15, %v3603_v41  ;;  %v3236_v46 = vsel %vm5504_vm5, %v3173_v37, %v3203_v35  ;;  %v3266_v56 = vmul.f32 %v5502_v7, %v3235_v16 }
 0x359   : > { %v3621_v23 = vrot.slane %v3617_v38, 1  ;;  %v3632_v57 = vsel %vm3302_vm7, %v3612_v27, %v3631_v43  ;;  %v3638_v26 = vmax.f32 %v3293_v15, %v3631_v43  ;;  %3942 = vst.msk [vmem:[%s5874_s3 + $0xb4] sm:$0xff] %vm629_vm4, %v3604_v39  ;;  %v3642_v45 = vrot.slane %v3636_v48, 1 }
 0x35a   : > { %v3637_v22 = vmax.f32 %v3292_v13, %v3632_v57  ;;  %v3659_v47 = vrot.slane %v3295_v49, 5  ;;  %v3660_v51 = vrot.slane %v3296_v2, 5  ;;  %v3267_v61 = vmul.f32 %v5502_v7, %v3236_v46 }
 0x35b   : > { %v3622_v52 = vsel %vm3314_vm8, %v3620_v44, %v3621_v23  ;;  %v3626_v54 = vmax.f32 %v3617_v38, %v3621_v23  ;;  %v3645_v32 = vrot.slane %v3638_v26, 1  ;;  %v3297_v34 = vadd.f32 %v5508_v63, %v3266_v56 }
 0x35c   : > { %v3625_v20 = vmax.f32 %v3616_v36, %v3622_v52  ;;  %v3643_v9 = vrot.slane %v3637_v22, 1  ;;  %v3661_v62 = vsel %vm3302_vm7, %v3659_v47, %v3660_v51  ;;  %v3664_v58 = vmax.f32 %v3293_v15, %v3659_v47 }
 0x35d   : > { %3944 = vst.msk [vmem:[%s5874_s3 + $0xc7] sm:$0x1f] %vm3453_vm1, %v3626_v54  ;;  %v3652_v59 = vmax.f32 %v3638_v26, %v3645_v32  ;;  %v3665_v53 = vmax.f32 %v3294_v14, %v3661_v62  ;;  %v3298_v29 = vadd.f32 %v5508_v63, %v3267_v61  ;;  %v3680_v21 = vrot.slane %v3297_v34, 5 }
 0x35e   : > { %3943 = vst.msk [vmem:[%s5874_s3 + $0xbf] sm:$0xfe] %vm3451_vm2, %v3625_v20  ;;  %v3644_v6 = vsel %vm3314_vm8, %v3642_v45, %v3643_v9  ;;  %v3646_v11 = vsel %vm3314_vm8, %v3643_v9, %v3645_v32  ;;  %v3668_v1 = vrot.slane %v3664_v58, 1 }
 0x35f   : > { %v3650_v4 = vmax.f32 %v3636_v48, %v3644_v6  ;;  %v3651_v5 = vmax.f32 %v3637_v22, %v3646_v11  ;;  %3947 = vst.msk [vmem:[%s5874_s3 + $0xda] sm:$0x3] %vm687_vm0, %v3652_v59  ;;  %v3669_v7 = vrot.slane %v3665_v53, 1  ;;  %v3682_v13 = vrot.slane %v3298_v29, 5 }
 0x360   : > { %v3681_v15 = vsel %vm3302_vm7, %v3660_v51, %v3680_v21  ;;  %vm5880_vm0 = vcmask 257024  }
 0x361   : > { %3945 = vst.msk [vmem:[%s5874_s3 + $0xca] sm:$0xc0] %vm3479_vm3, %v3650_v4  ;;  %v3670_v8 = vsel %vm3314_vm8, %v3668_v1, %v3669_v7  ;;  %v3674_v10 = vmax.f32 %v3665_v53, %v3669_v7  ;;  %v3683_v63 = vsel %vm3302_vm7, %v3680_v21, %v3682_v13  ;;  %v3686_v31 = vmax.f32 %v3295_v49, %v3681_v15 }
 0x362   : > { %3946 = vst.msk [vmem:[%s5874_s3 + $0xd2] sm:$0xff] %vm629_vm4, %v3651_v5  ;;  %v3673_v12 = vmax.f32 %v3664_v58, %v3670_v8  ;;  %v3687_v17 = vmax.f32 %v3296_v2, %v3683_v63 }
 0x363   : > { %3949 = vst.msk [vmem:[%s5874_s3 + $0xe5] sm:$0x7f] %vm3504_vm14, %v3674_v10  ;;  %v3690_v42 = vrot.slane %v3686_v31, 1 }
 0x364   : > { %3948 = vst.msk [vmem:[%s5874_s3 + $0xdd] sm:$0xf8] %vm3502_vm9, %v3673_v12  ;;  %v3691_v18 = vrot.slane %v3687_v17, 1 }
 0x366   : > { %v3692_v55 = vsel %vm3314_vm8, %v3690_v42, %v3691_v18  ;;  %v3696_v19 = vmax.f32 %v3687_v17, %v3691_v18 }
 0x367   : > { %v3695_v40 = vmax.f32 %v3686_v31, %v3692_v55 }
 0x368   : > { %3951 = vst.msk [vmem:[%s5874_s3 + $0xf8] sm:$0xf] %vm5880_vm0, %v3696_v19 }
 0x369   : > { %3950 = vst.msk [vmem:[%s5874_s3 + $0xf0] sm:$0xff] %vm629_vm4, %v3695_v40 }
 0x36a PF: > { %s13_s12 = sadd.s32 1, %s3983_s12  }
 0x36b   : > { %p10_p6 = scmp.ge.s32.totalorder %s13_s12, 6  }
 0x36d   :  { %12 = sbr.rel (!%p10_p6) target bundleno = 1 (0x1), region = 84 }

// kernel: policy_net_forward.3
= control target key start
LH: loop header
LB: loop body
LE: loop exit
PB: predicated region body
PF: predicated region fallthrough
CT: control target
= control target key end

     0   :  { %s1369_s0 = inlined_call_operand.vmem [shape: f32[48,512], index: 0, kind: input, shape index: {}]   ;;  %s1370_s1 = inlined_call_operand.vmem [shape: f32[512,64], index: 1, kind: input, shape index: {}]   ;;  %s1371_s2 = inlined_call_operand.vmem [shape: f32[5,64,64], index: 2, kind: input, shape index: {}]   ;;  %s1372_s3 = inlined_call_operand.vmem [shape: f32[7,64], index: 3, kind: input, shape index: {}]   ;;  %s1373_s4 = inlined_call_operand.vmem [shape: f32[65,6], index: 4, kind: input, shape index: {}]   ;;  %s1374_s5 = inlined_call_operand.hbm [shape: f32[2,6], index: 5, kind: output, shape index: {}]  }
   0x1   :  { %v92_v0 = vld [vmem:[%s1370_s1 + $0x178] sm:$0xff]  ;;  %v91_v2 = vld [vmem:[%s1370_s1 + $0x170] sm:$0xff]  ;;  %v90_v6 = vld [vmem:[%s1370_s1 + $0x168] sm:$0xff] }
   0x2   :  { %v60_v1 = vld [vmem:[%s1370_s1 + $0x78] sm:$0xff]  ;;  %181 = vmatpush.msra.mxu2 %v92_v0  ;;  %v59_v4 = vld [vmem:[%s1370_s1 + $0x70] sm:$0xff]  ;;  %v58_v8 = vld [vmem:[%s1370_s1 + $0x68] sm:$0xff] }
   0x3   :  { %111 = vmatpush.msra.mxu0 %v60_v1  ;;  %v108_v3 = vld [vmem:[%s1370_s1 + $0x1f8] sm:$0xff]  ;;  %v107_v7 = vld [vmem:[%s1370_s1 + $0x1f0] sm:$0xff]  ;;  %v106_v10 = vld [vmem:[%s1370_s1 + $0x1e8] sm:$0xff] }
   0x4   :  { %v76_v5 = vld [vmem:[%s1370_s1 + $0xf8] sm:$0xff]  ;;  %216 = vmatpush.msra.mxu3 %v108_v3  ;;  %182 = vmatpush.msra.mxu2 %v91_v2  ;;  %v75_v9 = vld [vmem:[%s1370_s1 + $0xf0] sm:$0xff]  ;;  %v89_v11 = vld [vmem:[%s1370_s1 + $0x160] sm:$0xff] }
   0x5   :  { %146 = vmatpush.msra.mxu1 %v76_v5  ;;  %112 = vmatpush.msra.mxu0 %v59_v4  ;;  %v57_v12 = vld [vmem:[%s1370_s1 + $0x60] sm:$0xff]  ;;  %v74_v13 = vld [vmem:[%s1370_s1 + $0xe8] sm:$0xff]  ;;  %v88_v16 = vld [vmem:[%s1370_s1 + $0x158] sm:$0xff] }
   0x6   :  { %217 = vmatpush.msra.mxu3 %v107_v7  ;;  %183 = vmatpush.msra.mxu2 %v90_v6  ;;  %v105_v14 = vld [vmem:[%s1370_s1 + $0x1e0] sm:$0xff]  ;;  %v56_v17 = vld [vmem:[%s1370_s1 + $0x58] sm:$0xff]  ;;  %v87_v20 = vld [vmem:[%s1370_s1 + $0x150] sm:$0xff] }
   0x7   :  { %147 = vmatpush.msra.mxu1 %v75_v9  ;;  %113 = vmatpush.msra.mxu0 %v58_v8  ;;  %v73_v15 = vld [vmem:[%s1370_s1 + $0xe0] sm:$0xff]  ;;  %v104_v18 = vld [vmem:[%s1370_s1 + $0x1d8] sm:$0xff]  ;;  %v55_v21 = vld [vmem:[%s1370_s1 + $0x50] sm:$0xff] }
   0x8   :  { %218 = vmatpush.msra.mxu3 %v106_v10  ;;  %184 = vmatpush.msra.mxu2 %v89_v11  ;;  %v72_v19 = vld [vmem:[%s1370_s1 + $0xd8] sm:$0xff]  ;;  %v103_v22 = vld [vmem:[%s1370_s1 + $0x1d0] sm:$0xff]  ;;  %v86_v24 = vld [vmem:[%s1370_s1 + $0x148] sm:$0xff] }
   0x9   :  { %148 = vmatpush.msra.mxu1 %v74_v13  ;;  %114 = vmatpush.msra.mxu0 %v57_v12  ;;  %v71_v23 = vld [vmem:[%s1370_s1 + $0xd0] sm:$0xff]  ;;  %v54_v25 = vld [vmem:[%s1370_s1 + $0x48] sm:$0xff]  ;;  %v85_v28 = vld [vmem:[%s1370_s1 + $0x140] sm:$0xff] }
   0xa   :  { %219 = vmatpush.msra.mxu3 %v105_v14  ;;  %185 = vmatpush.msra.mxu2 %v88_v16  ;;  %v102_v26 = vld [vmem:[%s1370_s1 + $0x1c8] sm:$0xff]  ;;  %v53_v29 = vld [vmem:[%s1370_s1 + $0x40] sm:$0xff]  ;;  %v84_v32 = vld [vmem:[%s1370_s1 + $0x138] sm:$0xff] }
   0xb   :  { %149 = vmatpush.msra.mxu1 %v73_v15  ;;  %115 = vmatpush.msra.mxu0 %v56_v17  ;;  %v70_v27 = vld [vmem:[%s1370_s1 + $0xc8] sm:$0xff]  ;;  %v101_v30 = vld [vmem:[%s1370_s1 + $0x1c0] sm:$0xff]  ;;  %v52_v33 = vld [vmem:[%s1370_s1 + $0x38] sm:$0xff] }
   0xc   :  { %220 = vmatpush.msra.mxu3 %v104_v18  ;;  %186 = vmatpush.msra.mxu2 %v87_v20  ;;  %v69_v31 = vld [vmem:[%s1370_s1 + $0xc0] sm:$0xff]  ;;  %v100_v34 = vld [vmem:[%s1370_s1 + $0x1b8] sm:$0xff]  ;;  %v83_v36 = vld [vmem:[%s1370_s1 + $0x130] sm:$0xff] }
   0xd   :  { %150 = vmatpush.msra.mxu1 %v72_v19  ;;  %116 = vmatpush.msra.mxu0 %v55_v21  ;;  %v68_v35 = vld [vmem:[%s1370_s1 + $0xb8] sm:$0xff]  ;;  %v51_v37 = vld [vmem:[%s1370_s1 + $0x30] sm:$0xff]  ;;  %v82_v40 = vld [vmem:[%s1370_s1 + $0x128] sm:$0xff] }
   0xe   :  { %221 = vmatpush.msra.mxu3 %v103_v22  ;;  %187 = vmatpush.msra.mxu2 %v86_v24  ;;  %v99_v38 = vld [vmem:[%s1370_s1 + $0x1b0] sm:$0xff]  ;;  %v50_v41 = vld [vmem:[%s1370_s1 + $0x28] sm:$0xff]  ;;  %v81_v44 = vld [vmem:[%s1370_s1 + $0x120] sm:$0xff] }
   0xf   :  { %151 = vmatpush.msra.mxu1 %v71_v23  ;;  %117 = vmatpush.msra.mxu0 %v54_v25  ;;  %v67_v39 = vld [vmem:[%s1370_s1 + $0xb0] sm:$0xff]  ;;  %v98_v42 = vld [vmem:[%s1370_s1 + $0x1a8] sm:$0xff]  ;;  %v49_v45 = vld [vmem:[%s1370_s1 + $0x20] sm:$0xff] }
  0x10   :  { %222 = vmatpush.msra.mxu3 %v102_v26  ;;  %188 = vmatpush.msra.mxu2 %v85_v28  ;;  %v66_v43 = vld [vmem:[%s1370_s1 + $0xa8] sm:$0xff]  ;;  %v97_v46 = vld [vmem:[%s1370_s1 + $0x1a0] sm:$0xff]  ;;  %v80_v48 = vld [vmem:[%s1370_s1 + $0x118] sm:$0xff] }
  0x11   :  { %152 = vmatpush.msra.mxu1 %v70_v27  ;;  %118 = vmatpush.msra.mxu0 %v53_v29  ;;  %v65_v47 = vld [vmem:[%s1370_s1 + $0xa0] sm:$0xff]  ;;  %v48_v49 = vld [vmem:[%s1370_s1 + $0x18] sm:$0xff]  ;;  %v79_v52 = vld [vmem:[%s1370_s1 + $0x110] sm:$0xff] }
  0x12   :  { %223 = vmatpush.msra.mxu3 %v101_v30  ;;  %189 = vmatpush.msra.mxu2 %v84_v32  ;;  %v96_v50 = vld [vmem:[%s1370_s1 + $0x198] sm:$0xff]  ;;  %v47_v53 = vld [vmem:[%s1370_s1 + $0x10] sm:$0xff]  ;;  %v78_v54 = vld [vmem:[%s1370_s1 + $0x108] sm:$0xff] }
  0x13   :  { %153 = vmatpush.msra.mxu1 %v69_v31  ;;  %119 = vmatpush.msra.mxu0 %v52_v33  ;;  %v64_v51 = vld [vmem:[%s1370_s1 + $0x98] sm:$0xff]  ;;  %v95_v55 = vld [vmem:[%s1370_s1 + $0x190] sm:$0xff]  ;;  %v46_v56 = vld [vmem:[%s1370_s1 + $0x8] sm:$0xff] }
  0x14   :  { %224 = vmatpush.msra.mxu3 %v100_v34  ;;  %190 = vmatpush.msra.mxu2 %v83_v36  ;;  %v63_v57 = vld [vmem:[%s1370_s1 + $0x90] sm:$0xff]  ;;  %v77_v58 = vld [vmem:[%s1370_s1 + $0x100] sm:$0xff]  ;;  %v94_v59 = vld [vmem:[%s1370_s1 + $0x188] sm:$0xff] }
  0x15   :  { %154 = vmatpush.msra.mxu1 %v68_v35  ;;  %120 = vmatpush.msra.mxu0 %v51_v37  ;;  %v45_v60 = vld [vmem:[%s1370_s1] sm:$0xff]  ;;  %v62_v61 = vld [vmem:[%s1370_s1 + $0x88] sm:$0xff]  ;;  %v23_v62 = vld [vmem:[%s1369_s0 + $0x10] sm:$0xff] }
  0x16   :  { %225 = vmatpush.msra.mxu3 %v99_v38  ;;  %191 = vmatpush.msra.mxu2 %v82_v40  ;;  %v93_v63 = vld [vmem:[%s1370_s1 + $0x180] sm:$0xff] }
  0x17   :  { %155 = vmatpush.msra.mxu1 %v67_v39  ;;  %121 = vmatpush.msra.mxu0 %v50_v41 }
  0x18   :  { %226 = vmatpush.msra.mxu3 %v98_v42  ;;  %192 = vmatpush.msra.mxu2 %v81_v44 }
  0x19   :  { %156 = vmatpush.msra.mxu1 %v66_v43  ;;  %122 = vmatpush.msra.mxu0 %v49_v45 }
  0x1a   :  { %227 = vmatpush.msra.mxu3 %v97_v46  ;;  %193 = vmatpush.msra.mxu2 %v80_v48 }
  0x1b   :  { %157 = vmatpush.msra.mxu1 %v65_v47  ;;  %123 = vmatpush.msra.mxu0 %v48_v49 }
  0x1c   :  { %228 = vmatpush.msra.mxu3 %v96_v50  ;;  %194 = vmatpush.msra.mxu2 %v79_v52 }
  0x1d   :  { %158 = vmatpush.msra.mxu1 %v64_v51  ;;  %124 = vmatpush.msra.mxu0 %v47_v53 }
  0x1e   :  { %229 = vmatpush.msra.mxu3 %v95_v55  ;;  %195 = vmatpush.msra.mxu2 %v78_v54 }
  0x1f   :  { %159 = vmatpush.msra.mxu1 %v63_v57  ;;  %125 = vmatpush.msra.mxu0 %v46_v56 }
  0x20   :  { %10 = vsyncpa [#allocation3], 0  ;;  %230 = vmatpush.msra.mxu3 %v94_v59  ;;  %v21_v0 = vld [vmem:[%s1369_s0] sm:$0xff]  ;;  %v24_v1 = vld [vmem:[%s1369_s0 + $0x18] sm:$0xff]  ;;  %196 = vmatpush.msra.mxu2 %v77_v58  ;;  %vm269_vm4 = vcmask 523264   ;;  %vm369_vm11 = vcmask 1043456  }
  0x21   :  { %160 = vmatpush.msra.mxu1 %v62_v61  ;;  %126 = vmatpush.msra.mxu0 %v45_v60  ;;  %v61_v2 = vld [vmem:[%s1370_s1 + $0x80] sm:$0xff]  ;;  %v22_v3 = vld [vmem:[%s1369_s0 + $0x8] sm:$0xff]  ;;  %v27_v4 = vld [vmem:[%s1369_s0 + $0x30] sm:$0xff]  ;;  %vm357_vm12 = vcmask 1041408   ;;  %vm386_vm13 = vcmask 521218   ;;  %vm378_vm14 = vcmask 519168  }
  0x22   :  { %197 = vmatmul.f32.vlgmr.msra.gmra.mxu2 %v23_v62  ;;  %231 = vmatpush.msra.mxu3 %v93_v63  ;;  %v25_v5 = vld [vmem:[%s1369_s0 + $0x20] sm:$0xff]  ;;  %v28_v6 = vld [vmem:[%s1369_s0 + $0x38] sm:$0xff]  ;;  %v26_v7 = vld [vmem:[%s1369_s0 + $0x28] sm:$0xff]  ;;  %vm429_vm15 = vcmask 1040384   ;;  %s723_s21 = sshll.u32 %s1374_s5, 4  ;;  %s724_s21 = int_to_ptr.hbm [resolvable:$true] %s723_s21 }
  0x23   :  { %127 = vmatmul.f32.vlgmr.msra.gmra.mxu0 %v21_v0  ;;  %232 = vmatmul.f32.vlgmr.msra.gmra.mxu3 %v24_v1  ;;  %v31_v8 = vld [vmem:[%s1369_s0 + $0x50] sm:$0xff]  ;;  %v29_v9 = vld [vmem:[%s1369_s0 + $0x40] sm:$0xff]  ;;  %v32_v10 = vld [vmem:[%s1369_s0 + $0x58] sm:$0xff] }
  0x24   :  { %161 = vmatpush.msra.mxu1 %v61_v2  ;;  %v30_v11 = vld [vmem:[%s1369_s0 + $0x48] sm:$0xff]  ;;  %v35_v12 = vld [vmem:[%s1369_s0 + $0x70] sm:$0xff]  ;;  %v33_v13 = vld [vmem:[%s1369_s0 + $0x60] sm:$0xff] }
  0x25   :  { %162 = vmatmul.f32.vlgmr.msra.gmra.mxu1 %v22_v3  ;;  %v36_v14 = vld [vmem:[%s1369_s0 + $0x78] sm:$0xff]  ;;  %v34_v15 = vld [vmem:[%s1369_s0 + $0x68] sm:$0xff]  ;;  %v39_v16 = vld [vmem:[%s1369_s0 + $0x90] sm:$0xff] }
  0x26   :  { %v37_v17 = vld [vmem:[%s1369_s0 + $0x80] sm:$0xff]  ;;  %v40_v18 = vld [vmem:[%s1369_s0 + $0x98] sm:$0xff]  ;;  %v38_v19 = vld [vmem:[%s1369_s0 + $0x88] sm:$0xff] }
  0x27   :  { %v43_v20 = vld [vmem:[%s1369_s0 + $0xb0] sm:$0xff]  ;;  %v41_v21 = vld [vmem:[%s1369_s0 + $0xa0] sm:$0xff]  ;;  %v44_v22 = vld [vmem:[%s1369_s0 + $0xb8] sm:$0xff] }
  0x28   :  { %v42_v23 = vld [vmem:[%s1369_s0 + $0xa8] sm:$0xff]  ;;  %v773_v32 = vld [vmem:[%s1372_s3] ss:$0 sm:$0xff] }
  0x2a   :  { %200 = vmatmul.f32.gmra.mxu2 %v27_v4 }
  0x2b   :  { %130 = vmatmul.f32.gmra.mxu0 %v25_v5  ;;  %235 = vmatmul.f32.gmra.mxu3 %v28_v6 }
  0x2d   :  { %165 = vmatmul.f32.gmra.mxu1 %v26_v7 }
  0x32   :  { %203 = vmatmul.f32.gmra.mxu2 %v31_v8 }
  0x33   :  { %133 = vmatmul.f32.gmra.mxu0 %v29_v9  ;;  %238 = vmatmul.f32.gmra.mxu3 %v32_v10  ;;  %v817_v9 = vmov 48.0  }
  0x34   :  { %779 = vrcp.f32 %v817_v9 }
  0x35   :  { %168 = vmatmul.f32.gmra.mxu1 %v30_v11 }
  0x3a   :  { %206 = vmatmul.f32.gmra.mxu2 %v35_v12 }
  0x3b   :  { %136 = vmatmul.f32.gmra.mxu0 %v33_v13  ;;  %241 = vmatmul.f32.gmra.mxu3 %v36_v14 }
  0x3d   :  { %171 = vmatmul.f32.gmra.mxu1 %v34_v15 }
  0x42   :  { %209 = vmatmul.f32.gmra.mxu2 %v39_v16 }
  0x43   :  { %139 = vmatmul.f32.gmra.mxu0 %v37_v17  ;;  %244 = vmatmul.f32.gmra.mxu3 %v40_v18 }
  0x45   :  { %174 = vmatmul.f32.gmra.mxu1 %v38_v19 }
  0x4a   :  { %212 = vmatmul.f32.gmra.mxu2 %v43_v20 }
  0x4b   :  { %142 = vmatmul.f32.gmra.mxu0 %v41_v21  ;;  %247 = vmatmul.f32.gmra.mxu3 %v44_v22 }
  0x4d   :  { %177 = vmatmul.f32.gmra.mxu1 %v42_v23 }
  0xa0   :  { %v128_v24 = vpop.f32.mrf.mxu0 }
  0xa1   :  { %v129_v36 = vadd.f32 %v773_v32, %v128_v24 }
  0xa2   :  { %v163_v25 = vpop.f32.mrf.mxu1 }
  0xa3   :  { %v164_v41 = vadd.f32 %v163_v25, %v129_v36  ;;  %v780_v25 = vpop.eup %779 }
  0xa4   :  { %vm292_vm7 = vweird.f32 %v780_v25 }
  0xa5   :  { %v198_v26 = vpop.f32.mrf.mxu2 }
  0xa6   :  { %v233_v27 = vpop.f32.mrf.mxu3  ;;  %v199_v48 = vadd.f32 %v198_v26, %v164_v41 }
  0xa8   :  { %v131_v28 = vpop.f32.mrf.mxu0  ;;  %v234_v54 = vadd.f32 %v233_v27, %v199_v48 }
  0xa9   :  { %v132_v34 = vadd.f32 %v773_v32, %v131_v28 }
  0xaa   :  { %v166_v29 = vpop.f32.mrf.mxu1  ;;  %v257_v62 = vmul.f32 0.2, %v234_v54  ;;  %vm251_vm1 = vcmp.gt.f32.partialorder %v234_v54, 0.0 }
  0xab   :  { %v167_v39 = vadd.f32 %v166_v29, %v132_v34 }
  0xac   :  { %v1119_v5 = vsel %vm251_vm1, %v234_v54, %v257_v62 }
  0xad   :  { %v201_v30 = vpop.f32.mrf.mxu2  ;;  %v295_v15 = vmul.f32 %v1119_v5, %v1119_v5  ;;  %v270_v20 = vsel %vm269_vm4, %v1119_v5, 0.0 }
  0xae   :  { %v236_v31 = vpop.f32.mrf.mxu3  ;;  %v202_v45 = vadd.f32 %v201_v30, %v167_v39 }
  0xaf   :  { %v301_v29 = vsel %vm269_vm4, %v295_v15, 0.0  ;;  %v448_v15 = vld [vmem:[%s1371_s2 + $0x38] sm:$0xff] }
  0xb0   :  { %v134_v33 = vpop.f32.mrf.mxu0  ;;  %v237_v51 = vadd.f32 %v236_v31, %v202_v45  ;;  %492 = vmatpush.msrb.mxu1 %v448_v15 }
  0xb1   :  { %v135_v37 = vadd.f32 %v773_v32, %v134_v33 }
  0xb2   :  { %v169_v35 = vpop.f32.mrf.mxu1  ;;  %v258_v58 = vmul.f32 0.2, %v237_v51  ;;  %vm252_vm0 = vcmp.gt.f32.partialorder %v237_v51, 0.0 }
  0xb3   :  { %v170_v42 = vadd.f32 %v169_v35, %v135_v37 }
  0xb4   :  { %v1117_v1 = vsel %vm252_vm0, %v237_v51, %v258_v58 }
  0xb5   :  { %v204_v38 = vpop.f32.mrf.mxu2  ;;  %v296_v10 = vmul.f32 %v1117_v1, %v1117_v1  ;;  %v271_v16 = vsel %vm269_vm4, %v1117_v1, 0.0 }
  0xb6   :  { %v239_v40 = vpop.f32.mrf.mxu3  ;;  %v205_v49 = vadd.f32 %v204_v38, %v170_v42  ;;  %v272_v26 = vadd.f32 %v271_v16, %v270_v20  ;;  %v288_v38 = vmul.f32 48.0, %v780_v25  ;;  %v748_v16 = vld [vmem:[%s1371_s2 + $0xb0] sm:$0xff]  ;;  %v747_v20 = vld [vmem:[%s1371_s2 + $0xa8] sm:$0xff] }
  0xb7   :  { %v302_v21 = vsel %vm269_vm4, %v296_v10, 0.0 }
  0xb8   :  { %v137_v43 = vpop.f32.mrf.mxu0  ;;  %v240_v55 = vadd.f32 %v239_v40, %v205_v49  ;;  %v303_v33 = vadd.f32 %v302_v21, %v301_v29  ;;  %v737_v21 = vld [vmem:[%s1371_s2 + $0x68] sm:$0xff] }
  0xb9   :  { %v138_v44 = vadd.f32 %v773_v32, %v137_v43 }
  0xba   :  { %v172_v46 = vpop.f32.mrf.mxu1  ;;  %v259_v63 = vmul.f32 0.2, %v240_v55  ;;  %vm253_vm2 = vcmp.gt.f32.partialorder %v240_v55, 0.0 }
  0xbb   :  { %v173_v47 = vadd.f32 %v172_v46, %v138_v44 }
  0xbc   :  { %v1121_v6 = vsel %vm253_vm2, %v240_v55, %v259_v63 }
  0xbd   :  { %v207_v50 = vpop.f32.mrf.mxu2  ;;  %v297_v17 = vmul.f32 %v1121_v6, %v1121_v6  ;;  %v273_v22 = vsel %vm269_vm4, %v1121_v6, 0.0 }
  0xbe   :  { %v208_v52 = vadd.f32 %v207_v50, %v173_v47  ;;  %v242_v53 = vpop.f32.mrf.mxu3  ;;  %v274_v34 = vadd.f32 %v273_v22, %v272_v26  ;;  %v289_v47 = vsub.f32 1.0, %v288_v38  ;;  %v446_v22 = vld [vmem:[%s1371_s2 + $0x28] sm:$0xff] }
  0xbf   :  { %v304_v30 = vsel %vm269_vm4, %v297_v17, 0.0  ;;  %v738_v17 = vld [vmem:[%s1371_s2 + $0x70] sm:$0xff]  ;;  %v442_v38 = vld [vmem:[%s1371_s2 + $0x8] sm:$0xff] }
  0xc0   :  { %v140_v56 = vpop.f32.mrf.mxu0  ;;  %v243_v59 = vadd.f32 %v242_v53, %v208_v52  ;;  %v305_v39 = vadd.f32 %v304_v30, %v303_v33  ;;  %v290_v54 = vmul.f32 %v780_v25, %v289_v47  ;;  %v444_v30 = vld [vmem:[%s1371_s2 + $0x18] sm:$0xff] }
  0xc1   :  { %v141_v57 = vadd.f32 %v773_v32, %v140_v56 }
  0xc2   :  { %v175_v60 = vpop.f32.mrf.mxu1  ;;  %v260_v2 = vmul.f32 0.2, %v243_v59  ;;  %vm254_vm3 = vcmp.gt.f32.partialorder %v243_v59, 0.0 }
  0xc3   :  { %v176_v61 = vadd.f32 %v175_v60, %v141_v57 }
  0xc4   :  { %v1125_v12 = vsel %vm254_vm3, %v243_v59, %v260_v2  ;;  %v291_v59 = vadd.f32 %v780_v25, %v290_v54 }
  0xc5   :  { %v210_v0 = vpop.f32.mrf.mxu2  ;;  %v298_v23 = vmul.f32 %v1125_v12, %v1125_v12  ;;  %v275_v31 = vsel %vm269_vm4, %v1125_v12, 0.0 }
  0xc6   :  { %v211_v3 = vadd.f32 %v210_v0, %v176_v61  ;;  %v245_v4 = vpop.f32.mrf.mxu3  ;;  %v276_v40 = vadd.f32 %v275_v31, %v274_v34  ;;  %v293_v0 = vsel %vm292_vm7, %v780_v25, %v291_v59  ;;  %v445_v25 = vld [vmem:[%s1371_s2 + $0x20] sm:$0xff]  ;;  %v744_v31 = vld [vmem:[%s1371_s2 + $0x90] sm:$0xff] }
  0xc7   :  { %v306_v36 = vsel %vm269_vm4, %v298_v23, 0.0  ;;  %v746_v23 = vld [vmem:[%s1371_s2 + $0xa0] sm:$0xff]  ;;  %v443_v34 = vld [vmem:[%s1371_s2 + $0x10] sm:$0xff] }
  0xc8   :  { %v246_v7 = vadd.f32 %v245_v4, %v211_v3  ;;  %v143_v8 = vpop.f32.mrf.mxu0  ;;  %v307_v43 = vadd.f32 %v306_v36, %v305_v39  ;;  %v733_v36 = vld [vmem:[%s1371_s2 + $0x48] sm:$0xff]  ;;  %v742_v39 = vld [vmem:[%s1371_s2 + $0x80] sm:$0xff] }
  0xc9   :  { %v144_v11 = vadd.f32 %v773_v32, %v143_v8 }
  0xca   :  { %vm255_vm5 = vcmp.gt.f32.partialorder %v246_v7, 0.0  ;;  %v261_v13 = vmul.f32 0.2, %v246_v7  ;;  %v178_v14 = vpop.f32.mrf.mxu1 }
  0xcb   :  { %v179_v18 = vadd.f32 %v178_v14, %v144_v11  ;;  %v739_v14 = vld [vmem:[%s1371_s2 + $0x78] sm:$0xff] }
  0xcc   :  { %v1133_v19 = vsel %vm255_vm5, %v246_v7, %v261_v13  ;;  %v749_v13 = vld [vmem:[%s1371_s2 + $0xb8] sm:$0xff]  ;;  %469 = vmatpush.msrb.mxu0 %v739_v14 }
  0xcd   :  { %v213_v24 = vpop.f32.mrf.mxu2  ;;  %v299_v32 = vmul.f32 %v1133_v19, %v1133_v19  ;;  %v277_v37 = vsel %vm269_vm4, %v1133_v19, 0.0  ;;  %524 = vmatpush.msrb.mxu2 %v749_v13 }
  0xce   :  { %v214_v27 = vadd.f32 %v213_v24, %v179_v18  ;;  %v248_v28 = vpop.f32.mrf.mxu3  ;;  %v278_v44 = vadd.f32 %v277_v37, %v276_v40  ;;  %v447_v18 = vld [vmem:[%s1371_s2 + $0x30] sm:$0xff]  ;;  %470 = vmatpush.msrb.mxu0 %v738_v17  ;;  %v736_v24 = vld [vmem:[%s1371_s2 + $0x60] sm:$0xff] }
  0xcf   :  { %v308_v42 = vsel %vm269_vm4, %v299_v32, 0.0  ;;  %525 = vmatpush.msrb.mxu2 %v748_v16  ;;  %493 = vmatpush.msrb.mxu1 %v447_v18  ;;  %v734_v32 = vld [vmem:[%s1371_s2 + $0x50] sm:$0xff]  ;;  %v732_v40 = vld [vmem:[%s1371_s2 + $0x40] sm:$0xff] }
  0xd0   :  { %v249_v35 = vadd.f32 %v248_v28, %v214_v27  ;;  %v309_v49 = vadd.f32 %v308_v42, %v307_v43  ;;  %471 = vmatpush.msrb.mxu0 %v737_v21  ;;  %v745_v27 = vld [vmem:[%s1371_s2 + $0x98] sm:$0xff]  ;;  %v441_v42 = vld [vmem:[%s1371_s2] sm:$0xff] }
  0xd1   :  { %526 = vmatpush.msrb.mxu2 %v747_v20  ;;  %494 = vmatpush.msrb.mxu1 %v446_v22  ;;  %v735_v28 = vld [vmem:[%s1371_s2 + $0x58] sm:$0xff]  ;;  %v327_v43 = vld [vmem:[%s1372_s3 + $0x1] sm:$0x1] }
  0xd2   :  { %vm256_vm6 = vcmp.gt.f32.partialorder %v249_v35, 0.0  ;;  %v262_v41 = vmul.f32 0.2, %v249_v35  ;;  %472 = vmatpush.msrb.mxu0 %v736_v24 }
  0xd3   :  { %527 = vmatpush.msrb.mxu2 %v746_v23  ;;  %495 = vmatpush.msrb.mxu1 %v445_v25 }
  0xd4   :  { %v1152_v45 = vsel %vm256_vm6, %v249_v35, %v262_v41  ;;  %473 = vmatpush.msrb.mxu0 %v735_v28  ;;  %v743_v35 = vld [vmem:[%s1371_s2 + $0x88] sm:$0xff]  ;;  %vm690_vm6 = vcmask 41984  }
  0xd5   :  { %v279_v46 = vsel %vm269_vm4, %v1152_v45, 0.0  ;;  %v300_v48 = vmul.f32 %v1152_v45, %v1152_v45  ;;  %528 = vmatpush.msrb.mxu2 %v745_v27  ;;  %496 = vmatpush.msrb.mxu1 %v444_v30 }
  0xd6   :  { %v280_v50 = vadd.f32 %v279_v46, %v278_v44  ;;  %474 = vmatpush.msrb.mxu0 %v734_v32 }
  0xd7   :  { %v310_v51 = vsel %vm269_vm4, %v300_v48, 0.0  ;;  %529 = vmatpush.msrb.mxu2 %v744_v31  ;;  %497 = vmatpush.msrb.mxu1 %v443_v34 }
  0xd8   :  { %v281_v52 = vrot.slane %v280_v50, 4  ;;  %v311_v53 = vadd.f32 %v310_v51, %v309_v49  ;;  %475 = vmatpush.msrb.mxu0 %v733_v36 }
  0xd9   :  { %530 = vmatpush.msrb.mxu2 %v743_v35  ;;  %498 = vmatpush.msrb.mxu1 %v442_v38 }
  0xda   :  { %v282_v55 = vadd.f32 %v281_v52, %v280_v50  ;;  %v312_v56 = vrot.slane %v311_v53, 4  ;;  %476 = vmatpush.msrb.mxu0 %v732_v40  ;;  %v774_v52 = vld [vmem:[%s1372_s3 + $0x2] ss:$0 sm:$0xff] }
  0xdb   :  { %531 = vmatpush.msrb.mxu2 %v742_v39  ;;  %499 = vmatpush.msrb.mxu1 %v441_v42 }
  0xdc   :  { %v283_v57 = vrot.slane %v282_v55, 2  ;;  %v313_v58 = vadd.f32 %v312_v56, %v311_v53 }
  0xde   :  { %v284_v60 = vadd.f32 %v283_v57, %v282_v55  ;;  %v314_v61 = vrot.slane %v313_v58, 2 }
  0xe0   :  { %v285_v62 = vrot.slane %v284_v60, 1  ;;  %v315_v63 = vadd.f32 %v314_v61, %v313_v58 }
  0xe2   :  { %v286_v2 = vadd.f32 %v285_v62, %v284_v60  ;;  %v316_v3 = vrot.slane %v315_v63, 1 }
  0xe4   :  { %v1159_v4 = vmul.f32 %v293_v0, %v286_v2  ;;  %v317_v7 = vadd.f32 %v316_v3, %v315_v63 }
  0xe6   :  { %v318_v8 = vmul.f32 %v317_v7, %v293_v0  ;;  %v319_v9 = vmul.f32 %v1159_v4, %v1159_v4  ;;  %v324_v48 = vsub.f32 %v1125_v12, %v1159_v4  ;;  %v325_v49 = vsub.f32 %v1133_v19, %v1159_v4 }
  0xe7   :  { %v326_v50 = vsub.f32 %v1152_v45, %v1159_v4  ;;  %v321_v53 = vsub.f32 %v1119_v5, %v1159_v4  ;;  %v322_v54 = vsub.f32 %v1117_v1, %v1159_v4  ;;  %v323_v12 = vsub.f32 %v1121_v6, %v1159_v4 }
  0xe8   :  { %v320_v10 = vsub.f32 %v318_v8, %v319_v9 }
  0xea   :  { %v328_v11 = vadd.f32 0.8, %v320_v10 }
  0xec   :  { %781 = vrsqrt.f32 %v328_v11  ;;  %vm335_vm9 = vweird.f32 %v328_v11 }
  0xf2   :  { %v782_v26 = vpop.eup %781 }
  0xf3   :  { %v330_v29 = vmul.f32 %v782_v26, %v328_v11  ;;  %vm336_vm8 = vweird.f32 %v782_v26 }
  0xf4   :  { %vm337_vm10 = vmor %vm335_vm9, %vm336_vm8 }
  0xf5   :  { %v331_v33 = vmul.f32 %v782_v26, %v330_v29 }
  0xf7   :  { %v332_v37 = vmul.f32 0.5, %v331_v33 }
  0xf9   :  { %v333_v41 = vsub.f32 1.5, %v332_v37 }
  0xfb   :  { %v334_v44 = vmul.f32 %v782_v26, %v333_v41 }
  0xfd   :  { %v338_v46 = vsel %vm337_vm10, %v782_v26, %v334_v44 }
  0xfe   :  { %v339_v47 = vmul.f32 %v338_v46, %v327_v43 }
 0x100   :  { %v340_v51 = vperm.slane %v339_v47, 0 }
 0x102   :  { %v344_v55 = vmul.f32 %v340_v51, %v324_v48  ;;  %v345_v56 = vmul.f32 %v340_v51, %v325_v49  ;;  %v346_v19 = vmul.f32 %v340_v51, %v326_v50  ;;  %v341_v57 = vmul.f32 %v340_v51, %v321_v53 }
 0x103   :  { %v342_v58 = vmul.f32 %v340_v51, %v322_v54  ;;  %v343_v45 = vmul.f32 %v340_v51, %v323_v12 }
 0x104   :  { %v352_v59 = vadd.f32 %v774_v52, %v344_v55  ;;  %v353_v60 = vadd.f32 %v774_v52, %v345_v56  ;;  %v354_v61 = vadd.f32 %v774_v52, %v346_v19  ;;  %v349_v62 = vadd.f32 %v774_v52, %v341_v57 }
 0x105   :  { %v350_v63 = vadd.f32 %v774_v52, %v342_v58  ;;  %v351_v0 = vadd.f32 %v774_v52, %v343_v45 }
 0x106   :  { %v397_v5 = vrot.slane %v353_v60, 6  ;;  %v403_v2 = vrot.slane %v353_v60, 4  ;;  %v407_v3 = vrot.slane %v354_v61, 4  ;;  %v358_v1 = vrot.slane %v349_v62, 6 }
 0x107   :  { %v359_v7 = vrot.slane %v350_v63, 6  ;;  %v365_v6 = vrot.slane %v350_v63, 4  ;;  %v370_v4 = vrot.slane %v351_v0, 4  ;;  %v396_v10 = vrot.slane %v352_v59, 6 }
 0x108   :  { %v402_v8 = vmax.f32 %v352_v59, %v397_v5  ;;  %v408_v9 = vsel %vm369_vm11, %v403_v2, %v407_v3  ;;  %v411_v16 = vrot.slane %v354_v61, 2  ;;  %v374_v21 = vrot.slane %v351_v0, 2  ;;  %v775_v3 = vld [vmem:[%s1372_s3 + $0x3] ss:$0 sm:$0xff] }
 0x109   :  { %v360_v11 = vsel %vm357_vm12, %v358_v1, %v359_v7  ;;  %v364_v13 = vmax.f32 %v349_v62, %v359_v7  ;;  %v371_v14 = vsel %vm369_vm11, %v365_v6, %v370_v4  ;;  %v398_v18 = vsel %vm357_vm12, %v396_v10, %v397_v5 }
 0x10a   :  { %v410_v15 = vmax.f32 %v402_v8, %v408_v9  ;;  %v362_v17 = vmax.f32 %v349_v62, %v360_v11  ;;  %v400_v22 = vmax.f32 %v352_v59, %v398_v18  ;;  %v818_v62 = vmov 4.0  }
 0x10b   :  { %v373_v20 = vmax.f32 %v364_v13, %v371_v14  ;;  %783 = vrcp.f32 %v818_v62 }
 0x10c   :  { %v414_v23 = vmax.f32 %v410_v15, %v411_v16  ;;  %v367_v24 = vmax.f32 %v362_v17, %v365_v6  ;;  %v405_v26 = vmax.f32 %v400_v22, %v403_v2  ;;  %v758_v17 = vld [vmem:[%s1371_s2 + $0xf8] sm:$0xff]  ;;  %v757_v22 = vld [vmem:[%s1371_s2 + $0xf0] sm:$0xff] }
 0x10d   :  { %v377_v25 = vmax.f32 %v373_v20, %v374_v21  ;;  %641 = vmatpush.msra.mxu0 %v758_v17  ;;  %v778_v17 = vld [vmem:[%s1373_s4 + $0x40] ss:$0 sm:$0xff] }
 0x10e   :  { %v422_v27 = vsel %vm386_vm13, %v414_v23, -inf  ;;  %v376_v28 = vmax.f32 %v367_v24, %v374_v21  ;;  %v413_v31 = vmax.f32 %v405_v26, %v411_v16  ;;  %v766_v21 = vld [vmem:[%s1371_s2 + $0x138] sm:$0xff]  ;;  %v765_v26 = vld [vmem:[%s1371_s2 + $0x130] sm:$0xff] }
 0x10f   :  { %v387_v29 = vsel %vm386_vm13, %v377_v25, -inf  ;;  %v423_v30 = vrot.slane %v422_v27, 4  ;;  %619 = vmatpush.msrb.mxu3 %v766_v21  ;;  %642 = vmatpush.msra.mxu0 %v757_v22 }
 0x110   :  { %v388_v32 = vrot.slane %v387_v29, 4  ;;  %v379_v33 = vsel %vm378_vm14, %v376_v28, -inf  ;;  %v415_v36 = vsel %vm378_vm14, %v413_v31, -inf  ;;  %v755_v31 = vld [vmem:[%s1371_s2 + $0xe0] sm:$0xff] }
 0x111   :  { %v424_v34 = vmax.f32 %v422_v27, %v423_v30  ;;  %v380_v35 = vrot.slane %v379_v33, 4  ;;  %v416_v38 = vrot.slane %v415_v36, 4  ;;  %v784_v5 = vpop.eup %783  ;;  %v756_v27 = vld [vmem:[%s1371_s2 + $0xe8] sm:$0xff]  ;;  %620 = vmatpush.msrb.mxu3 %v765_v26 }
 0x112   :  { %v389_v37 = vmax.f32 %v387_v29, %v388_v32  ;;  %v551_v6 = vmul.f32 4.0, %v784_v5  ;;  %vm555_vm1 = vweird.f32 %v784_v5  ;;  %643 = vmatpush.msra.mxu0 %v756_v27  ;;  %v764_v30 = vld [vmem:[%s1371_s2 + $0x128] sm:$0xff] }
 0x113   :  { %v425_v39 = vrot.slane %v424_v34, 2  ;;  %v381_v40 = vmax.f32 %v379_v33, %v380_v35  ;;  %v417_v42 = vmax.f32 %v415_v36, %v416_v38  ;;  %621 = vmatpush.msrb.mxu3 %v764_v30  ;;  %v763_v35 = vld [vmem:[%s1371_s2 + $0x120] sm:$0xff]  ;;  %v754_v36 = vld [vmem:[%s1371_s2 + $0xd8] sm:$0xff] }
 0x114   :  { %v390_v41 = vrot.slane %v389_v37, 2  ;;  %v552_v9 = vsub.f32 1.0, %v551_v6  ;;  %644 = vmatpush.msra.mxu0 %v755_v31  ;;  %v660_v6 = vld [vmem:[%s1373_s4 + $0x18] sm:$0xff] }
 0x115   :  { %v426_v43 = vmax.f32 %v424_v34, %v425_v39  ;;  %v382_v44 = vrot.slane %v381_v40, 2  ;;  %v418_v47 = vrot.slane %v417_v42, 2  ;;  %622 = vmatpush.msrb.mxu3 %v763_v35  ;;  %v762_v39 = vld [vmem:[%s1371_s2 + $0x118] sm:$0xff] }
 0x116   :  { %v391_v46 = vmax.f32 %v389_v37, %v390_v41  ;;  %v553_v15 = vmul.f32 %v784_v5, %v552_v9  ;;  %645 = vmatpush.msra.mxu0 %v754_v36  ;;  %v753_v41 = vld [vmem:[%s1371_s2 + $0xd0] sm:$0xff]  ;;  %v657_v9 = vld [vmem:[%s1373_s4] sm:$0xff] }
 0x117   :  { %v427_v48 = vrot.slane %v426_v43, 1  ;;  %v383_v49 = vmax.f32 %v381_v40, %v382_v44  ;;  %v419_v51 = vmax.f32 %v417_v42, %v418_v47  ;;  %v761_v40 = vld [vmem:[%s1371_s2 + $0x110] sm:$0xff]  ;;  %v752_v42 = vld [vmem:[%s1371_s2 + $0xc8] sm:$0xff]  ;;  %623 = vmatpush.msrb.mxu3 %v762_v39  ;;  %v751_v47 = vld [vmem:[%s1371_s2 + $0xc0] sm:$0xff] }
 0x118   :  { %v392_v50 = vrot.slane %v391_v46, 1  ;;  %v554_v25 = vadd.f32 %v784_v5, %v553_v15  ;;  %646 = vmatpush.msra.mxu0 %v753_v41 }
 0x119   :  { %v428_v52 = vmax.f32 %v426_v43, %v427_v48  ;;  %v384_v53 = vrot.slane %v383_v49, 1  ;;  %v420_v12 = vrot.slane %v419_v51, 1  ;;  %624 = vmatpush.msrb.mxu3 %v761_v40 }
 0x11a   :  { %v393_v54 = vmax.f32 %v391_v46, %v392_v50  ;;  %v556_v34 = vsel %vm555_vm1, %v784_v5, %v554_v25  ;;  %v760_v46 = vld [vmem:[%s1371_s2 + $0x108] sm:$0xff]  ;;  %647 = vmatpush.msra.mxu0 %v752_v42  ;;  %v759_v50 = vld [vmem:[%s1371_s2 + $0x100] sm:$0xff] }
 0x11b   :  { %v385_v55 = vmax.f32 %v383_v49, %v384_v53  ;;  %v421_v19 = vmax.f32 %v419_v51, %v420_v12  ;;  %625 = vmatpush.msrb.mxu3 %v760_v46 }
 0x11c   :  { %v431_v56 = vsel %vm429_vm15, %v393_v54, %v428_v52  ;;  %648 = vmatpush.msra.mxu0 %v751_v47 }
 0x11d   :  { %v437_v57 = vrot.slane %v431_v56, 6  ;;  %v440_v58 = vsel %vm357_vm12, %v431_v56, 0.0  ;;  %v430_v45 = vsel %vm429_vm15, %v385_v55, %v421_v19  ;;  %626 = vmatpush.msrb.mxu3 %v759_v50  ;;  %v570_v19 = vld [vmem:[%s1372_s3 + $0x4] sm:$0x1] }
 0x11e   :  { %750 = vmatmul.msk.f32.vlgmr.msrb.gmra.mxu2 %vm269_vm4, %v440_v58  ;;  %v433_v60 = vrot.slane %v430_v45, 6 }
 0x11f   :  { %v439_v59 = vsel %vm357_vm12, %v430_v45, %v437_v57 }
 0x120   :  { %740 = vmatmul.msk.f32.vlgmr.msrb.gmra.mxu0 %vm269_vm4, %v439_v59  ;;  %v435_v61 = vsel %vm357_vm12, 0.0, %v433_v60 }
 0x121   :  { %741 = vmatmul.msk.f32.vlgmr.msrb.gmra.mxu1 %vm269_vm4, %v435_v61  ;;  %v776_v61 = vld [vmem:[%s1372_s3 + $0x5] ss:$0 sm:$0xff] }
 0x19d   :  { %v478_v63 = vpop.f32.mrf.mxu0 }
 0x19e   :  { %v501_v0 = vpop.f32.mrf.mxu1 }
 0x19f   :  { %v502_v2 = vadd.f32 %v501_v0, %v478_v63 }
 0x1a1   :  { %v533_v1 = vpop.f32.mrf.mxu2 }
 0x1a2   :  { %v536_v7 = vadd.f32 %v533_v1, %v502_v2  ;;  %v664_v2 = vld [vmem:[%s1373_s4 + $0x38] sm:$0xff]  ;;  %v662_v1 = vld [vmem:[%s1373_s4 + $0x28] sm:$0xff] }
 0x1a3   :  { %678 = vmatpush.msra.mxu1 %v664_v2 }
 0x1a4   :  { %v539_v4 = vadd.f32 %v775_v3, %v536_v7  ;;  %v663_v3 = vld [vmem:[%s1373_s4 + $0x30] sm:$0xff]  ;;  %v661_v7 = vld [vmem:[%s1373_s4 + $0x20] sm:$0xff] }
 0x1a5   :  { %679 = vmatpush.msra.mxu1 %v663_v3 }
 0x1a6   :  { %vm540_vm0 = vcmp.gt.f32.partialorder %v539_v4, 0.0  ;;  %v541_v8 = vmul.f32 0.2, %v539_v4 }
 0x1a7   :  { %680 = vmatpush.msra.mxu1 %v662_v1 }
 0x1a8   :  { %v1268_v10 = vsel %vm540_vm0, %v539_v4, %v541_v8  ;;  %v659_v4 = vld [vmem:[%s1373_s4 + $0x10] sm:$0xff]  ;;  %v658_v8 = vld [vmem:[%s1373_s4 + $0x8] sm:$0xff] }
 0x1a9   :  { %v543_v11 = vsel %vm378_vm14, %v1268_v10, 0.0  ;;  %v558_v13 = vmul.f32 %v1268_v10, %v1268_v10  ;;  %681 = vmatpush.msra.mxu1 %v661_v7 }
 0x1aa   :  { %v544_v14 = vrot.slane %v543_v11, 4 }
 0x1ab   :  { %v559_v16 = vsel %vm378_vm14, %v558_v13, 0.0  ;;  %682 = vmatpush.msra.mxu1 %v660_v6 }
 0x1ac   :  { %v545_v18 = vadd.f32 %v544_v14, %v543_v11  ;;  %v560_v20 = vrot.slane %v559_v16, 4 }
 0x1ad   :  { %683 = vmatpush.msra.mxu1 %v659_v4 }
 0x1ae   :  { %v546_v23 = vrot.slane %v545_v18, 2  ;;  %v561_v24 = vadd.f32 %v560_v20, %v559_v16 }
 0x1af   :  { %684 = vmatpush.msra.mxu1 %v658_v8 }
 0x1b0   :  { %v547_v28 = vadd.f32 %v546_v23, %v545_v18  ;;  %v562_v29 = vrot.slane %v561_v24, 2 }
 0x1b1   :  { %685 = vmatpush.msra.mxu1 %v657_v9 }
 0x1b2   :  { %v548_v32 = vrot.slane %v547_v28, 1  ;;  %v563_v33 = vadd.f32 %v562_v29, %v561_v24 }
 0x1b4   :  { %v549_v37 = vadd.f32 %v548_v32, %v547_v28  ;;  %v564_v38 = vrot.slane %v563_v33, 1 }
 0x1b6   :  { %v557_v43 = vmul.f32 %v556_v34, %v549_v37  ;;  %v565_v44 = vadd.f32 %v564_v38, %v563_v33 }
 0x1b8   :  { %v566_v48 = vmul.f32 %v565_v44, %v556_v34  ;;  %v567_v49 = vmul.f32 %v557_v43, %v557_v43  ;;  %v569_v59 = vsub.f32 %v1268_v10, %v557_v43  ;;  %v777_v10 = vld [vmem:[%s1372_s3 + $0x6] ss:$0 sm:$0xff]  ;;  %s819_s3 = smov [#allocation2]  }
 0x1b9   :  { %s721_s4 = sshll.u32 %s819_s3, 4  ;;  %s722_s4 = int_to_ptr.vmem [resolvable:$true] %s721_s4 }
 0x1ba   :  { %v568_v51 = vsub.f32 %v566_v48, %v567_v49 }
 0x1bc   :  { %v571_v52 = vadd.f32 0.8, %v568_v51 }
 0x1be   :  { %785 = vrsqrt.f32 %v571_v52  ;;  %vm578_vm3 = vweird.f32 %v571_v52 }
 0x1c4   :  { %v786_v53 = vpop.eup %785 }
 0x1c5   :  { %v573_v54 = vmul.f32 %v786_v53, %v571_v52  ;;  %vm579_vm2 = vweird.f32 %v786_v53 }
 0x1c6   :  { %vm580_vm5 = vmor %vm578_vm3, %vm579_vm2 }
 0x1c7   :  { %v574_v12 = vmul.f32 %v786_v53, %v573_v54 }
 0x1c9   :  { %v575_v55 = vmul.f32 0.5, %v574_v12 }
 0x1cb   :  { %v576_v56 = vsub.f32 1.5, %v575_v55 }
 0x1cd   :  { %v577_v57 = vmul.f32 %v786_v53, %v576_v56 }
 0x1cf   :  { %v581_v58 = vsel %vm580_vm5, %v786_v53, %v577_v57 }
 0x1d0   :  { %v582_v45 = vmul.f32 %v581_v58, %v570_v19 }
 0x1d2   :  { %v583_v60 = vperm.slane %v582_v45, 0 }
 0x1d4   :  { %v584_v62 = vmul.f32 %v583_v60, %v569_v59 }
 0x1d6   :  { %v587_v63 = vadd.f32 %v776_v61, %v584_v62 }
 0x1d8   :  { %v588_v0 = vmax.f32 %v587_v63, 0.0 }
 0x1da   :  { %768 = vmatmul.msk.f32.vlgmr.msra.gmra.mxu0 %vm269_vm4, %v588_v0  ;;  %v608_v5 = vrot.slane %v588_v0, 2 }
 0x1dc   :  { %767 = vmatmul.msk.f32.vlgmr.msrb.gmra.mxu3 %vm269_vm4, %v608_v5 }
 0x257   :  { %v650_v11 = vpop.f32.mrf.mxu0 }
 0x25f   :  { %v628_v13 = vpop.f32.mrf.mxu3 }
 0x260   :  { %v651_v14 = vadd.f32 %v650_v11, %v628_v13 }
 0x262   :  { %v655_v15 = vadd.f32 %v777_v10, %v651_v14 }
 0x264   :  { %v656_v16 = vmax.f32 %v655_v15, 0.0 }
 0x266   :  { %769 = vmatmul.msk.f32.vlgmr.msra.gmra.mxu1 %vm269_vm4, %v656_v16 }
 0x2e3   :  { %v687_v18 = vpop.f32.mrf.mxu1 }
 0x2e4   :  { %v688_v20 = vadd.f32 %v778_v17, %v687_v18 }
 0x2e6   :  { %v691_v21 = vsel %vm690_vm6, %v688_v20, -inf }
 0x2e7   :  { %692 = vmax.xlane.f32.xlu0 %v691_v21 }
 0x35a   :  { %v693_v22 = vpop.xlane.xlu0 %692 }
 0x35b   :  { %v694_v23 = vsub.f32 %v688_v20, %v693_v22 }
 0x35d   :  { %v695_v24 = vmul.f32 1.442695, %v694_v23 }
 0x35f   :  { %787 = vpow2.f32 %v695_v24 }
 0x365   :  { %v788_v25 = vpop.eup %787 }
 0x366   :  { %v697_v26 = vsel %vm690_vm6, %v788_v25, 0.0 }
 0x367   :  { %698 = vadd.xlane.f32.xlu0 %v697_v26 }
 0x3da   :  { %v699_v27 = vpop.xlane.xlu0 %698 }
 0x3db   :  { %789 = vrcp.f32 %v699_v27  ;;  %v711_v31 = vand.u32 2147483648, %v699_v27  ;;  %v709_v33 = vand.u32 2147483647, %v699_v27  ;;  %vm705_vm7 = vweird.f32 %v699_v27 }
 0x3dd   :  { %v712_v35 = vor.u32 1.1754944e-38, %v711_v31  ;;  %vm710_vm9 = vcmp.eq.f32.partialorder %v709_v33, 8.507059e+37 }
 0x3e1   :  { %v790_v28 = vpop.eup %789 }
 0x3e2   :  { %v701_v29 = vmul.f32 %v790_v28, %v699_v27  ;;  %vm706_vm4 = vweird.f32 %v790_v28 }
 0x3e3   :  { %vm707_vm8 = vmor %vm705_vm7, %vm706_vm4 }
 0x3e4   :  { %v702_v30 = vsub.f32 1.0, %v701_v29 }
 0x3e6   :  { %v703_v32 = vmul.f32 %v790_v28, %v702_v30 }
 0x3e8   :  { %v704_v34 = vadd.f32 %v790_v28, %v703_v32 }
 0x3ea   :  { %v708_v36 = vsel %vm707_vm8, %v790_v28, %v704_v34 }
 0x3eb   :  { %v713_v37 = vsel %vm710_vm9, %v712_v35, %v708_v36 }
 0x3ec   :  { %v714_v38 = vmul.f32 %v788_v25, %v713_v37 }
 0x3ee   :  { %715 = vst.msk [vmem:[#allocation2] sm:$0x3] %vm690_vm6, %v714_v38 }
 0x3ef   :  { %726 = dma.vmem_to_hbm [thread:$0]  %s722_s4, 32, %s724_s21, [#allocation3]  }
 0x3f0   :  { %815 = dma.done.wait [#allocation3], 32  }
 0x3f1   :  { %816 = vsyncadd [#allocation3], 4294967264 }
 0x3f2   :  { %731 = vsyncpa [#allocation3], 1 }

</bundles_post_ra>
